<compile_context>
chip_gen: v5e
topology: v5e:2x2
jax: 0.10.0
libtpu: 0.0.40
codegen_flags: <defaults>
</compile_context>

<pallas_src>
import functools

import jax
import jax.numpy as jnp
from jax.experimental import pallas as pl
from jax.experimental.pallas import tpu as pltpu

BN_EPS = 1e-5
LANE = 128
VMEM_LIMIT = 32 * 1024 * 1024


def _round_up(x, m):
    return ((x + m - 1) // m) * m


def _pick_tk(k_p):
    for cand in (512, 256, 128):
        if k_p % cand == 0:
            return cand
    return k_p  # unreachable: k_p is always a multiple of 128


# ---------------------------------------------------------------------------
# Pallas kernels
# ---------------------------------------------------------------------------
def _matmul_bn_kernel(x_ref, w_ref, s_ref, b_ref, o_ref, acc_ref, *, relu):
    k = pl.program_id(2)

    @pl.when(k == 0)
    def _():
        acc_ref[...] = jnp.zeros_like(acc_ref)

    acc_ref[...] += jnp.dot(
        x_ref[...], w_ref[...], preferred_element_type=jnp.float32
    )

    @pl.when(k == pl.num_programs(2) - 1)
    def _():
        y = acc_ref[...] * s_ref[...] + b_ref[...]
        if relu:
            y = jnp.maximum(y, 0.0)
        o_ref[...] = y.astype(o_ref.dtype)


def _matmul_bn_res_kernel(x_ref, w_ref, s_ref, b_ref, r_ref, o_ref, acc_ref, *, relu):
    k = pl.program_id(2)

    @pl.when(k == 0)
    def _():
        acc_ref[...] = jnp.zeros_like(acc_ref)

    acc_ref[...] += jnp.dot(
        x_ref[...], w_ref[...], preferred_element_type=jnp.float32
    )

    @pl.when(k == pl.num_programs(2) - 1)
    def _():
        y = acc_ref[...] * s_ref[...] + b_ref[...] + r_ref[...].astype(jnp.float32)
        if relu:
            y = jnp.maximum(y, 0.0)
        o_ref[...] = y.astype(o_ref.dtype)


def _pool_fc_kernel(x_ref, w_ref, b_ref, o_ref, acc_ref, *, inv_hw):
    t = pl.program_id(0)

    @pl.when(t == 0)
    def _():
        acc_ref[...] = jnp.zeros_like(acc_ref)

    acc_ref[...] += jnp.sum(x_ref[...].astype(jnp.float32), axis=1)

    @pl.when(t == pl.num_programs(0) - 1)
    def _():
        pooled = acc_ref[...] * inv_hw
        o_ref[...] = (
            jnp.dot(pooled, w_ref[...], preferred_element_type=jnp.float32)
            + b_ref[...]
        )


# ---------------------------------------------------------------------------
# Gridded fused conv-as-matmul + BN (+ residual) (+ ReLU)
# ---------------------------------------------------------------------------
def _fused_conv_matmul(x_cols, w_mat, scale, bias, residual=None, relu=True,
                       out_dtype=jnp.bfloat16):
    m, k_p = x_cols.shape
    _, cout_p = w_mat.shape

    tm = 256 if m >= 256 else _round_up(m, 8)
    m_p = _round_up(m, tm)
    tn = LANE
    tk = _pick_tk(k_p)

    x_cols = x_cols.astype(jnp.bfloat16)
    if m_p != m:
        x_cols = jnp.pad(x_cols, ((0, m_p - m), (0, 0)))

    args = [x_cols, w_mat, scale, bias]
    in_specs = [
        pl.BlockSpec((tm, tk), lambda i, j, k: (i, k)),
        pl.BlockSpec((tk, tn), lambda i, j, k: (k, j)),   # independent of M axis
        pl.BlockSpec((1, tn), lambda i, j, k: (0, j)),
        pl.BlockSpec((1, tn), lambda i, j, k: (0, j)),
    ]
    if residual is not None:
        r = residual.astype(jnp.bfloat16)
        if m_p != m:
            r = jnp.pad(r, ((0, m_p - m), (0, 0)))
        args.append(r)
        in_specs.append(pl.BlockSpec((tm, tn), lambda i, j, k: (i, j)))
        kernel = functools.partial(_matmul_bn_res_kernel, relu=relu)
    else:
        kernel = functools.partial(_matmul_bn_kernel, relu=relu)

    grid = (m_p // tm, cout_p // tn, k_p // tk)
    bytes_accessed = 2 * (m_p * k_p + k_p * cout_p + m_p * cout_p)
    if residual is not None:
        bytes_accessed += 2 * m_p * cout_p

    out = pl.pallas_call(
        kernel,
        out_shape=jax.ShapeDtypeStruct((m_p, cout_p), out_dtype),
        grid_spec=pltpu.PrefetchScalarGridSpec(
            num_scalar_prefetch=0,
            grid=grid,
            in_specs=in_specs,
            out_specs=pl.BlockSpec((tm, tn), lambda i, j, k: (i, j)),
            scratch_shapes=[pltpu.VMEM((tm, tn), jnp.float32)],
        ),
        compiler_params=pltpu.CompilerParams(
            dimension_semantics=("parallel", "parallel", "arbitrary"),
            vmem_limit_bytes=VMEM_LIMIT,
        ),
        cost_estimate=pl.CostEstimate(
            flops=2 * m_p * k_p * cout_p,
            transcendentals=0,
            bytes_accessed=bytes_accessed,
        ),
    )(*args)
    return out[:m] if m_p != m else out


# ---------------------------------------------------------------------------
# Glue: im2col + conv wrapper (bf16 activations)
# ---------------------------------------------------------------------------
def _im2col(x, kh, kw, stride, pad):
    n, h, w, c = x.shape
    xp = jnp.pad(x, ((0, 0), (pad, pad), (pad, pad), (0, 0)))
    hout = (h + 2 * pad - kh) // stride + 1
    wout = (w + 2 * pad - kw) // stride + 1
    cols = []
    for i in range(kh):
        for j in range(kw):
            cols.append(
                xp[:, i: i + (hout - 1) * stride + 1: stride,
                      j: j + (wout - 1) * stride + 1: stride, :]
            )
    cols = jnp.stack(cols, axis=3)  # (N, Hout, Wout, kh*kw, C)
    return cols.reshape(n * hout * wout, kh * kw * c), hout, wout


def conv_bn_act(x, cp, stride, residual=None, relu=True):
    """x: (N,H,W,Cin_p) bf16 NHWC; cp: prepared conv params."""
    n = x.shape[0]
    kh, kw, cin_p, cout_p = cp["w4"].shape
    pad = (kh - 1) // 2
    cols, hout, wout = _im2col(x, kh, kw, stride, pad)
    k = kh * kw * cin_p
    k_p = _round_up(k, LANE)
    w_mat = cp["w4"].reshape(k, cout_p)
    if k_p != k:
        cols = jnp.pad(cols, ((0, 0), (0, k_p - k)))
        w_mat = jnp.pad(w_mat, ((0, k_p - k), (0, 0)))
    res_flat = residual.reshape(-1, cout_p) if residual is not None else None
    out = _fused_conv_matmul(cols, w_mat, cp["scale"], cp["bias"],
                             residual=res_flat, relu=relu)
    return out.reshape(n, hout, wout, cout_p)


def basic_block(x, blk, stride):
    identity = x
    out = conv_bn_act(x, blk["conv1"], stride, relu=True)
    if "ds" in blk:
        identity = conv_bn_act(x, blk["ds"], stride, relu=False)
    out = conv_bn_act(out, blk["conv2"], 1, residual=identity, relu=True)
    return out


def _pool_fc(x, fc_w, fc_b, num_classes):
    n, h, w, c = x.shape
    hw = h * w
    x_flat = x.reshape(n, hw, c)
    if hw <= 8:
        hw_p, thw = hw, hw
    else:
        hw_p = _round_up(hw, 8)
        if hw_p != hw:
            x_flat = jnp.pad(x_flat, ((0, 0), (0, hw_p - hw), (0, 0)))
        thw = next(t for t in (128, 64, 32, 16, 8) if hw_p % t == 0)
    ncp = fc_w.shape[1]
    logits = pl.pallas_call(
        functools.partial(_pool_fc_kernel, inv_hw=1.0 / hw),
        out_shape=jax.ShapeDtypeStruct((n, ncp), jnp.float32),
        grid_spec=pltpu.PrefetchScalarGridSpec(
            num_scalar_prefetch=0,
            grid=(hw_p // thw,),
            in_specs=[
                pl.BlockSpec((n, thw, c), lambda t: (0, t, 0)),
                pl.BlockSpec((c, ncp), lambda t: (0, 0)),
                pl.BlockSpec((1, ncp), lambda t: (0, 0)),
            ],
            out_specs=pl.BlockSpec((n, ncp), lambda t: (0, 0)),
            scratch_shapes=[pltpu.VMEM((n, c), jnp.float32)],
        ),
        compiler_params=pltpu.CompilerParams(
            dimension_semantics=("arbitrary",),
            vmem_limit_bytes=VMEM_LIMIT,
        ),
    )(x_flat, fc_w, fc_b)
    return logits[:, :num_classes]


def resnet_forward(params, x_nchw, num_classes=10):
    # PyTorch input is NCHW; convert once to NHWC bf16 for the TPU layout.
    x = jnp.transpose(x_nchw.astype(jnp.float32), (0, 2, 3, 1)).astype(jnp.bfloat16)
    x = conv_bn_act(x, params["conv1"], 1, relu=True)
    for layer_blocks, stride in zip(params["layers"], (1, 2, 2, 2)):
        for bi, blk in enumerate(layer_blocks):
            x = basic_block(x, blk, stride if bi == 0 else 1)
    return _pool_fc(x, params["fc_w"], params["fc_b"], num_classes)


# ---------------------------------------------------------------------------
# One-time parameter preparation: BN folding, OIHW->HWIO, lane padding, bf16.
# ---------------------------------------------------------------------------
def _fold_bn(bn):
    scale = bn["gamma"] / jnp.sqrt(bn["var"] + BN_EPS)
    bias = bn["beta"] - bn["mean"] * scale
    return scale, bias


def _prep_conv(conv_w, bn, cin_act):
    cout, cin, kh, kw = conv_w.shape
    cout_p = _round_up(cout, LANE)
    w = jnp.pad(conv_w, ((0, cout_p - cout), (0, cin_act - cin), (0, 0), (0, 0)))
    w4 = jnp.transpose(w, (2, 3, 1, 0)).astype(jnp.bfloat16)  # (kh,kw,cin_act,cout_p)
    scale, bias = _fold_bn(bn)
    scale = jnp.pad(scale, (0, cout_p - cout)).reshape(1, cout_p).astype(jnp.float32)
    bias = jnp.pad(bias, (0, cout_p - cout)).reshape(1, cout_p).astype(jnp.float32)
    return {"w4": w4, "scale": scale, "bias": bias}


def prepare_params(raw):
    prepared = {"conv1": _prep_conv(raw["conv1_w"], raw["bn1"],
                                    raw["conv1_w"].shape[1])}
    in_c_p = prepared["conv1"]["w4"].shape[-1]
    layers = []
    for layer_blocks in raw["layers"]:
        blocks = []
        for bp in layer_blocks:
            blk = {"conv1": _prep_conv(bp["conv1_w"], bp["bn1"], in_c_p)}
            mid_c_p = blk["conv1"]["w4"].shape[-1]
            blk["conv2"] = _prep_conv(bp["conv2_w"], bp["bn2"], mid_c_p)
            if "ds_conv_w" in bp:
                blk["ds"] = _prep_conv(bp["ds_conv_w"], bp["ds_bn"], in_c_p)
            in_c_p = blk["conv2"]["w4"].shape[-1]
            blocks.append(blk)
        layers.append(blocks)
    prepared["layers"] = layers

    num_classes, feat = raw["fc_w"].shape
    ncp = _round_up(num_classes, LANE)
    fc_w = jnp.pad(raw["fc_w"].T, ((0, 0), (0, ncp - num_classes))).astype(jnp.float32)
    fc_b = jnp.pad(raw["fc_b"], (0, ncp - num_classes)).reshape(1, ncp).astype(jnp.float32)
    prepared["fc_w"] = fc_w
    prepared["fc_b"] = fc_b
    return prepared


# ---------------------------------------------------------------------------
# Deterministic synthetic parameters (shapes per ResNet.__init__, BasicBlock)
# ---------------------------------------------------------------------------
def _init_bn(key, c):
    k1, k2, k3, k4 = jax.random.split(key, 4)
    return dict(
        gamma=1.0 + 0.1 * jax.random.normal(k1, (c,), jnp.float32),
        beta=0.1 * jax.random.normal(k2, (c,), jnp.float32),
        mean=0.1 * jax.random.normal(k3, (c,), jnp.float32),
        var=1.0 + 0.1 * jax.random.uniform(k4, (c,), jnp.float32),
    )


def _init_conv(key, cout, cin, kh, kw):
    return 0.05 * jax.random.normal(key, (cout, cin, kh, kw), jnp.float32)


def init_params(key, layers=(1, 1, 1, 1), num_classes=10):
    keys = iter(jax.random.split(key, 256))
    nk = lambda: next(keys)
    p = {"conv1_w": _init_conv(nk(), 64, 3, 3, 3), "bn1": _init_bn(nk(), 64)}
    in_c = 64
    layer_params = []
    for out_c, nblocks, stride in zip((64, 128, 256, 512), layers, (1, 2, 2, 2)):
        blocks = []
        for bi in range(nblocks):
            s = stride if bi == 0 else 1
            bp = {
                "conv1_w": _init_conv(nk(), out_c, in_c, 3, 3),
                "bn1": _init_bn(nk(), out_c),
                "conv2_w": _init_conv(nk(), out_c, out_c, 3, 3),
                "bn2": _init_bn(nk(), out_c),
            }
            if s != 1 or in_c != out_c:
                bp["ds_conv_w"] = _init_conv(nk(), out_c, in_c, 1, 1)
                bp["ds_bn"] = _init_bn(nk(), out_c)
            in_c = out_c
            blocks.append(bp)
        layer_params.append(blocks)
    p["layers"] = layer_params
    p["fc_w"] = 0.05 * jax.random.normal(nk(), (num_classes, 512), jnp.float32)
    p["fc_b"] = 0.05 * jax.random.normal(nk(), (num_classes,), jnp.float32)
    return p


if __name__ == "__main__":
    key = jax.random.PRNGKey(0)
    pkey, xkey = jax.random.split(key)
    raw_params = init_params(pkey, layers=(1, 1, 1, 1), num_classes=10)
    params = prepare_params(raw_params)          # one-time weight/BN prep
    x = jax.random.normal(xkey, (2, 3, 16, 16), jnp.float32)  # small NCHW input
    fwd = jax.jit(lambda p, xx: resnet_forward(p, xx, num_classes=10))
    out = fwd(params, x)
    jax.block_until_ready(out)
    assert out.shape == (2, 10) and out.dtype == jnp.float32
    print("KERNEL_OK")
</pallas_src>

<mosaic_0001>
module attributes {stable_mosaic.version = 11 : i64} {
  func.func @_matmul_bn_kernel(%arg0: i32, %arg1: i32, %arg2: i32, %arg3: memref<256x128xbf16, #tpu.memory_space<vmem>>, %arg4: memref<128x128xbf16, #tpu.memory_space<vmem>>, %arg5: memref<1x128xf32, #tpu.memory_space<vmem>>, %arg6: memref<1x128xf32, #tpu.memory_space<vmem>>, %arg7: memref<256x128xbf16, #tpu.memory_space<vmem>>, %arg8: memref<256x128xf32, #tpu.memory_space<vmem>>) attributes {dimension_semantics = [#tpu.dimension_semantics<parallel>, #tpu.dimension_semantics<parallel>, #tpu.dimension_semantics<arbitrary>], iteration_bounds = array<i64: 2, 1, 1>, scalar_prefetch = 0 : i64, scratch_operands = 1 : i64, tpu.core_type = #tpu.core_type<tc>, window_params = [{transform_indices = @transform_0, window_bounds = array<i64: 256, 128>}, {transform_indices = @transform_1, window_bounds = array<i64: 128, 128>}, {transform_indices = @transform_2, window_bounds = array<i64: 1, 128>}, {transform_indices = @transform_3, window_bounds = array<i64: 1, 128>}, {transform_indices = @transform_4, window_bounds = array<i64: 256, 128>}]} {
    %c0_i32 = arith.constant 0 : i32
    %0 = arith.cmpi eq, %arg2, %c0_i32 : i32
    %1 = arith.extui %0 : i1 to i32
    %c0_i32_0 = arith.constant 0 : i32
    %2 = arith.cmpi ne, %1, %c0_i32_0 : i32
    scf.if %2 {
      %cst_10 = arith.constant 0.000000e+00 : f32
      %12 = vector.broadcast %cst_10 : f32 to vector<256x128xf32>
      %c0_11 = arith.constant 0 : index
      %c0_12 = arith.constant 0 : index
      %13 = vector.load %arg8[%c0_11, %c0_12] : memref<256x128xf32, #tpu.memory_space<vmem>>, vector<256x128xf32>
      tpu.vector_store %arg8[%c0_11, %c0_12], %12 {strides = array<i32>} : memref<256x128xf32, #tpu.memory_space<vmem>>, vector<256x128xf32>,
    } else {
    }
    %c0 = arith.constant 0 : index
    %c0_1 = arith.constant 0 : index
    %3 = vector.load %arg8[%c0, %c0_1] : memref<256x128xf32, #tpu.memory_space<vmem>>, vector<256x128xf32>
    %c0_2 = arith.constant 0 : index
    %c0_3 = arith.constant 0 : index
    %4 = vector.load %arg3[%c0_2, %c0_3] : memref<256x128xbf16, #tpu.memory_space<vmem>>, vector<256x128xbf16>
    %c0_4 = arith.constant 0 : index
    %c0_5 = arith.constant 0 : index
    %5 = vector.load %arg4[%c0_4, %c0_5] : memref<128x128xbf16, #tpu.memory_space<vmem>>, vector<128x128xbf16>
    %cst = arith.constant dense<0.000000e+00> : vector<256x128xf32>
    %6 = tpu.matmul %4, %5, %cst {dimension_numbers = #tpu.dot_dimension_numbers<[1], [0], [0], [1], [0, 0, 1, 1], [], []>} : vector<256x128xbf16>, vector<128x128xbf16>, vector<256x128xf32> -> vector<256x128xf32>
    %7 = arith.addf %3, %6 : vector<256x128xf32>
    %c0_6 = arith.constant 0 : index
    %c0_7 = arith.constant 0 : index
    %8 = vector.load %arg8[%c0_6, %c0_7] : memref<256x128xf32, #tpu.memory_space<vmem>>, vector<256x128xf32>
    tpu.vector_store %arg8[%c0_6, %c0_7], %7 {strides = array<i32>} : memref<256x128xf32, #tpu.memory_space<vmem>>, vector<256x128xf32>,
    %c0_i32_8 = arith.constant 0 : i32
    %9 = arith.cmpi eq, %arg2, %c0_i32_8 : i32
    %10 = arith.extui %9 : i1 to i32
    %c0_i32_9 = arith.constant 0 : i32
    %11 = arith.cmpi ne, %10, %c0_i32_9 : i32
    scf.if %11 {
      %c0_10 = arith.constant 0 : index
      %c0_11 = arith.constant 0 : index
      %12 = vector.load %arg8[%c0_10, %c0_11] : memref<256x128xf32, #tpu.memory_space<vmem>>, vector<256x128xf32>
      %c0_12 = arith.constant 0 : index
      %c0_13 = arith.constant 0 : index
      %13 = vector.load %arg5[%c0_12, %c0_13] : memref<1x128xf32, #tpu.memory_space<vmem>>, vector<1x128xf32>
      %14 = vector.broadcast %13 : vector<1x128xf32> to vector<256x128xf32>
      %15 = arith.mulf %12, %14 : vector<256x128xf32>
      %c0_14 = arith.constant 0 : index
      %c0_15 = arith.constant 0 : index
      %16 = vector.load %arg6[%c0_14, %c0_15] : memref<1x128xf32, #tpu.memory_space<vmem>>, vector<1x128xf32>
      %17 = vector.broadcast %16 : vector<1x128xf32> to vector<256x128xf32>
      %18 = arith.addf %15, %17 : vector<256x128xf32>
      %cst_16 = arith.constant 0.000000e+00 : f32
      %19 = vector.broadcast %cst_16 : f32 to vector<256x128xf32>
      %20 = arith.maximumf %18, %19 : vector<256x128xf32>
      %21 = arith.truncf %20 : vector<256x128xf32> to vector<256x128xbf16>
      %c0_17 = arith.constant 0 : index
      %c0_18 = arith.constant 0 : index
      %22 = vector.load %arg7[%c0_17, %c0_18] : memref<256x128xbf16, #tpu.memory_space<vmem>>, vector<256x128xbf16>
      tpu.vector_store %arg7[%c0_17, %c0_18], %21 {strides = array<i32>} : memref<256x128xbf16, #tpu.memory_space<vmem>>, vector<256x128xbf16>,
    } else {
    }
    return
  }
  func.func @transform_0(%arg0: i32, %arg1: i32, %arg2: i32) -> (i32, i32) {
    %c0_i32 = arith.constant 0 : i32
    return %arg0, %arg2 : i32, i32
  }
  func.func @transform_1(%arg0: i32, %arg1: i32, %arg2: i32) -> (i32, i32) {
    %c0_i32 = arith.constant 0 : i32
    return %arg2, %arg1 : i32, i32
  }
  func.func @transform_2(%arg0: i32, %arg1: i32, %arg2: i32) -> (i32, i32) {
    %c0_i32 = arith.constant 0 : i32
    %c0_i32_0 = arith.constant 0 : i32
    return %c0_i32, %arg1 : i32, i32
  }
  func.func @transform_3(%arg0: i32, %arg1: i32, %arg2: i32) -> (i32, i32) {
    %c0_i32 = arith.constant 0 : i32
    %c0_i32_0 = arith.constant 0 : i32
    return %c0_i32, %arg1 : i32, i32
  }
  func.func @transform_4(%arg0: i32, %arg1: i32, %arg2: i32) -> (i32, i32) {
    %c0_i32 = arith.constant 0 : i32
    return %arg0, %arg1 : i32, i32
  }
}

module attributes {stable_mosaic.version = 11 : i64} {
  func.func @_matmul_bn_kernel(%arg0: i32, %arg1: i32, %arg2: i32, %arg3: memref<256x128xbf16, #tpu.memory_space<vmem>>, %arg4: memref<128x128xbf16, #tpu.memory_space<vmem>>, %arg5: memref<1x128xf32, #tpu.memory_space<vmem>>, %arg6: memref<1x128xf32, #tpu.memory_space<vmem>>, %arg7: memref<256x128xbf16, #tpu.memory_space<vmem>>, %arg8: memref<256x128xf32, #tpu.memory_space<vmem>>) attributes {dimension_semantics = [#tpu.dimension_semantics<parallel>, #tpu.dimension_semantics<parallel>, #tpu.dimension_semantics<arbitrary>], iteration_bounds = array<i64: 2, 1, 9>, scalar_prefetch = 0 : i64, scratch_operands = 1 : i64, tpu.core_type = #tpu.core_type<tc>, window_params = [{transform_indices = @transform_0, window_bounds = array<i64: 256, 128>}, {transform_indices = @transform_1, window_bounds = array<i64: 128, 128>}, {transform_indices = @transform_2, window_bounds = array<i64: 1, 128>}, {transform_indices = @transform_3, window_bounds = array<i64: 1, 128>}, {transform_indices = @transform_4, window_bounds = array<i64: 256, 128>}]} {
    %c0_i32 = arith.constant 0 : i32
    %0 = arith.cmpi eq, %arg2, %c0_i32 : i32
    %1 = arith.extui %0 : i1 to i32
    %c0_i32_0 = arith.constant 0 : i32
    %2 = arith.cmpi ne, %1, %c0_i32_0 : i32
    scf.if %2 {
      %cst_9 = arith.constant 0.000000e+00 : f32
      %12 = vector.broadcast %cst_9 : f32 to vector<256x128xf32>
      %c0_10 = arith.constant 0 : index
      %c0_11 = arith.constant 0 : index
      %13 = vector.load %arg8[%c0_10, %c0_11] : memref<256x128xf32, #tpu.memory_space<vmem>>, vector<256x128xf32>
      tpu.vector_store %arg8[%c0_10, %c0_11], %12 {strides = array<i32>} : memref<256x128xf32, #tpu.memory_space<vmem>>, vector<256x128xf32>,
    } else {
    }
    %c0 = arith.constant 0 : index
    %c0_1 = arith.constant 0 : index
    %3 = vector.load %arg8[%c0, %c0_1] : memref<256x128xf32, #tpu.memory_space<vmem>>, vector<256x128xf32>
    %c0_2 = arith.constant 0 : index
    %c0_3 = arith.constant 0 : index
    %4 = vector.load %arg3[%c0_2, %c0_3] : memref<256x128xbf16, #tpu.memory_space<vmem>>, vector<256x128xbf16>
    %c0_4 = arith.constant 0 : index
    %c0_5 = arith.constant 0 : index
    %5 = vector.load %arg4[%c0_4, %c0_5] : memref<128x128xbf16, #tpu.memory_space<vmem>>, vector<128x128xbf16>
    %cst = arith.constant dense<0.000000e+00> : vector<256x128xf32>
    %6 = tpu.matmul %4, %5, %cst {dimension_numbers = #tpu.dot_dimension_numbers<[1], [0], [0], [1], [0, 0, 1, 1], [], []>} : vector<256x128xbf16>, vector<128x128xbf16>, vector<256x128xf32> -> vector<256x128xf32>
    %7 = arith.addf %3, %6 : vector<256x128xf32>
    %c0_6 = arith.constant 0 : index
    %c0_7 = arith.constant 0 : index
    %8 = vector.load %arg8[%c0_6, %c0_7] : memref<256x128xf32, #tpu.memory_space<vmem>>, vector<256x128xf32>
    tpu.vector_store %arg8[%c0_6, %c0_7], %7 {strides = array<i32>} : memref<256x128xf32, #tpu.memory_space<vmem>>, vector<256x128xf32>,
    %c8_i32 = arith.constant 8 : i32
    %9 = arith.cmpi eq, %arg2, %c8_i32 : i32
    %10 = arith.extui %9 : i1 to i32
    %c0_i32_8 = arith.constant 0 : i32
    %11 = arith.cmpi ne, %10, %c0_i32_8 : i32
    scf.if %11 {
      %c0_9 = arith.constant 0 : index
      %c0_10 = arith.constant 0 : index
      %12 = vector.load %arg8[%c0_9, %c0_10] : memref<256x128xf32, #tpu.memory_space<vmem>>, vector<256x128xf32>
      %c0_11 = arith.constant 0 : index
      %c0_12 = arith.constant 0 : index
      %13 = vector.load %arg5[%c0_11, %c0_12] : memref<1x128xf32, #tpu.memory_space<vmem>>, vector<1x128xf32>
      %14 = vector.broadcast %13 : vector<1x128xf32> to vector<256x128xf32>
      %15 = arith.mulf %12, %14 : vector<256x128xf32>
      %c0_13 = arith.constant 0 : index
      %c0_14 = arith.constant 0 : index
      %16 = vector.load %arg6[%c0_13, %c0_14] : memref<1x128xf32, #tpu.memory_space<vmem>>, vector<1x128xf32>
      %17 = vector.broadcast %16 : vector<1x128xf32> to vector<256x128xf32>
      %18 = arith.addf %15, %17 : vector<256x128xf32>
      %cst_15 = arith.constant 0.000000e+00 : f32
      %19 = vector.broadcast %cst_15 : f32 to vector<256x128xf32>
      %20 = arith.maximumf %18, %19 : vector<256x128xf32>
      %21 = arith.truncf %20 : vector<256x128xf32> to vector<256x128xbf16>
      %c0_16 = arith.constant 0 : index
      %c0_17 = arith.constant 0 : index
      %22 = vector.load %arg7[%c0_16, %c0_17] : memref<256x128xbf16, #tpu.memory_space<vmem>>, vector<256x128xbf16>
      tpu.vector_store %arg7[%c0_16, %c0_17], %21 {strides = array<i32>} : memref<256x128xbf16, #tpu.memory_space<vmem>>, vector<256x128xbf16>,
    } else {
    }
    return
  }
  func.func @transform_0(%arg0: i32, %arg1: i32, %arg2: i32) -> (i32, i32) {
    %c0_i32 = arith.constant 0 : i32
    return %arg0, %arg2 : i32, i32
  }
  func.func @transform_1(%arg0: i32, %arg1: i32, %arg2: i32) -> (i32, i32) {
    %c0_i32 = arith.constant 0 : i32
    return %arg2, %arg1 : i32, i32
  }
  func.func @transform_2(%arg0: i32, %arg1: i32, %arg2: i32) -> (i32, i32) {
    %c0_i32 = arith.constant 0 : i32
    %c0_i32_0 = arith.constant 0 : i32
    return %c0_i32, %arg1 : i32, i32
  }
  func.func @transform_3(%arg0: i32, %arg1: i32, %arg2: i32) -> (i32, i32) {
    %c0_i32 = arith.constant 0 : i32
    %c0_i32_0 = arith.constant 0 : i32
    return %c0_i32, %arg1 : i32, i32
  }
  func.func @transform_4(%arg0: i32, %arg1: i32, %arg2: i32) -> (i32, i32) {
    %c0_i32 = arith.constant 0 : i32
    return %arg0, %arg1 : i32, i32
  }
}

module attributes {stable_mosaic.version = 11 : i64} {
  func.func @_matmul_bn_res_kernel(%arg0: i32, %arg1: i32, %arg2: i32, %arg3: memref<256x128xbf16, #tpu.memory_space<vmem>>, %arg4: memref<128x128xbf16, #tpu.memory_space<vmem>>, %arg5: memref<1x128xf32, #tpu.memory_space<vmem>>, %arg6: memref<1x128xf32, #tpu.memory_space<vmem>>, %arg7: memref<256x128xbf16, #tpu.memory_space<vmem>>, %arg8: memref<256x128xbf16, #tpu.memory_space<vmem>>, %arg9: memref<256x128xf32, #tpu.memory_space<vmem>>) attributes {dimension_semantics = [#tpu.dimension_semantics<parallel>, #tpu.dimension_semantics<parallel>, #tpu.dimension_semantics<arbitrary>], iteration_bounds = array<i64: 2, 1, 9>, scalar_prefetch = 0 : i64, scratch_operands = 1 : i64, tpu.core_type = #tpu.core_type<tc>, window_params = [{transform_indices = @transform_0, window_bounds = array<i64: 256, 128>}, {transform_indices = @transform_1, window_bounds = array<i64: 128, 128>}, {transform_indices = @transform_2, window_bounds = array<i64: 1, 128>}, {transform_indices = @transform_3, window_bounds = array<i64: 1, 128>}, {transform_indices = @transform_4, window_bounds = array<i64: 256, 128>}, {transform_indices = @transform_5, window_bounds = array<i64: 256, 128>}]} {
    %c0_i32 = arith.constant 0 : i32
    %0 = arith.cmpi eq, %arg2, %c0_i32 : i32
    %1 = arith.extui %0 : i1 to i32
    %c0_i32_0 = arith.constant 0 : i32
    %2 = arith.cmpi ne, %1, %c0_i32_0 : i32
    scf.if %2 {
      %cst_9 = arith.constant 0.000000e+00 : f32
      %12 = vector.broadcast %cst_9 : f32 to vector<256x128xf32>
      %c0_10 = arith.constant 0 : index
      %c0_11 = arith.constant 0 : index
      %13 = vector.load %arg9[%c0_10, %c0_11] : memref<256x128xf32, #tpu.memory_space<vmem>>, vector<256x128xf32>
      tpu.vector_store %arg9[%c0_10, %c0_11], %12 {strides = array<i32>} : memref<256x128xf32, #tpu.memory_space<vmem>>, vector<256x128xf32>,
    } else {
    }
    %c0 = arith.constant 0 : index
    %c0_1 = arith.constant 0 : index
    %3 = vector.load %arg9[%c0, %c0_1] : memref<256x128xf32, #tpu.memory_space<vmem>>, vector<256x128xf32>
    %c0_2 = arith.constant 0 : index
    %c0_3 = arith.constant 0 : index
    %4 = vector.load %arg3[%c0_2, %c0_3] : memref<256x128xbf16, #tpu.memory_space<vmem>>, vector<256x128xbf16>
    %c0_4 = arith.constant 0 : index
    %c0_5 = arith.constant 0 : index
    %5 = vector.load %arg4[%c0_4, %c0_5] : memref<128x128xbf16, #tpu.memory_space<vmem>>, vector<128x128xbf16>
    %cst = arith.constant dense<0.000000e+00> : vector<256x128xf32>
    %6 = tpu.matmul %4, %5, %cst {dimension_numbers = #tpu.dot_dimension_numbers<[1], [0], [0], [1], [0, 0, 1, 1], [], []>} : vector<256x128xbf16>, vector<128x128xbf16>, vector<256x128xf32> -> vector<256x128xf32>
    %7 = arith.addf %3, %6 : vector<256x128xf32>
    %c0_6 = arith.constant 0 : index
    %c0_7 = arith.constant 0 : index
    %8 = vector.load %arg9[%c0_6, %c0_7] : memref<256x128xf32, #tpu.memory_space<vmem>>, vector<256x128xf32>
    tpu.vector_store %arg9[%c0_6, %c0_7], %7 {strides = array<i32>} : memref<256x128xf32, #tpu.memory_space<vmem>>, vector<256x128xf32>,
    %c8_i32 = arith.constant 8 : i32
    %9 = arith.cmpi eq, %arg2, %c8_i32 : i32
    %10 = arith.extui %9 : i1 to i32
    %c0_i32_8 = arith.constant 0 : i32
    %11 = arith.cmpi ne, %10, %c0_i32_8 : i32
    scf.if %11 {
      %c0_9 = arith.constant 0 : index
      %c0_10 = arith.constant 0 : index
      %12 = vector.load %arg9[%c0_9, %c0_10] : memref<256x128xf32, #tpu.memory_space<vmem>>, vector<256x128xf32>
      %c0_11 = arith.constant 0 : index
      %c0_12 = arith.constant 0 : index
      %13 = vector.load %arg5[%c0_11, %c0_12] : memref<1x128xf32, #tpu.memory_space<vmem>>, vector<1x128xf32>
      %14 = vector.broadcast %13 : vector<1x128xf32> to vector<256x128xf32>
      %15 = arith.mulf %12, %14 : vector<256x128xf32>
      %c0_13 = arith.constant 0 : index
      %c0_14 = arith.constant 0 : index
      %16 = vector.load %arg6[%c0_13, %c0_14] : memref<1x128xf32, #tpu.memory_space<vmem>>, vector<1x128xf32>
      %17 = vector.broadcast %16 : vector<1x128xf32> to vector<256x128xf32>
      %18 = arith.addf %15, %17 : vector<256x128xf32>
      %c0_15 = arith.constant 0 : index
      %c0_16 = arith.constant 0 : index
      %19 = vector.load %arg7[%c0_15, %c0_16] : memref<256x128xbf16, #tpu.memory_space<vmem>>, vector<256x128xbf16>
      %20 = arith.extf %19 : vector<256x128xbf16> to vector<256x128xf32>
      %21 = arith.addf %18, %20 : vector<256x128xf32>
      %cst_17 = arith.constant 0.000000e+00 : f32
      %22 = vector.broadcast %cst_17 : f32 to vector<256x128xf32>
      %23 = arith.maximumf %21, %22 : vector<256x128xf32>
      %24 = arith.truncf %23 : vector<256x128xf32> to vector<256x128xbf16>
      %c0_18 = arith.constant 0 : index
      %c0_19 = arith.constant 0 : index
      %25 = vector.load %arg8[%c0_18, %c0_19] : memref<256x128xbf16, #tpu.memory_space<vmem>>, vector<256x128xbf16>
      tpu.vector_store %arg8[%c0_18, %c0_19], %24 {strides = array<i32>} : memref<256x128xbf16, #tpu.memory_space<vmem>>, vector<256x128xbf16>,
    } else {
    }
    return
  }
  func.func @transform_0(%arg0: i32, %arg1: i32, %arg2: i32) -> (i32, i32) {
    %c0_i32 = arith.constant 0 : i32
    return %arg0, %arg2 : i32, i32
  }
  func.func @transform_1(%arg0: i32, %arg1: i32, %arg2: i32) -> (i32, i32) {
    %c0_i32 = arith.constant 0 : i32
    return %arg2, %arg1 : i32, i32
  }
  func.func @transform_2(%arg0: i32, %arg1: i32, %arg2: i32) -> (i32, i32) {
    %c0_i32 = arith.constant 0 : i32
    %c0_i32_0 = arith.constant 0 : i32
    return %c0_i32, %arg1 : i32, i32
  }
  func.func @transform_3(%arg0: i32, %arg1: i32, %arg2: i32) -> (i32, i32) {
    %c0_i32 = arith.constant 0 : i32
    %c0_i32_0 = arith.constant 0 : i32
    return %c0_i32, %arg1 : i32, i32
  }
  func.func @transform_4(%arg0: i32, %arg1: i32, %arg2: i32) -> (i32, i32) {
    %c0_i32 = arith.constant 0 : i32
    return %arg0, %arg1 : i32, i32
  }
  func.func @transform_5(%arg0: i32, %arg1: i32, %arg2: i32) -> (i32, i32) {
    %c0_i32 = arith.constant 0 : i32
    return %arg0, %arg1 : i32, i32
  }
}

module attributes {stable_mosaic.version = 11 : i64} {
  func.func @_matmul_bn_kernel(%arg0: i32, %arg1: i32, %arg2: i32, %arg3: memref<128x128xbf16, #tpu.memory_space<vmem>>, %arg4: memref<128x128xbf16, #tpu.memory_space<vmem>>, %arg5: memref<1x128xf32, #tpu.memory_space<vmem>>, %arg6: memref<1x128xf32, #tpu.memory_space<vmem>>, %arg7: memref<128x128xbf16, #tpu.memory_space<vmem>>, %arg8: memref<128x128xf32, #tpu.memory_space<vmem>>) attributes {dimension_semantics = [#tpu.dimension_semantics<parallel>, #tpu.dimension_semantics<parallel>, #tpu.dimension_semantics<arbitrary>], iteration_bounds = array<i64: 1, 1, 1>, scalar_prefetch = 0 : i64, scratch_operands = 1 : i64, tpu.core_type = #tpu.core_type<tc>, window_params = [{transform_indices = @transform_0, window_bounds = array<i64: 128, 128>}, {transform_indices = @transform_1, window_bounds = array<i64: 128, 128>}, {transform_indices = @transform_2, window_bounds = array<i64: 1, 128>}, {transform_indices = @transform_3, window_bounds = array<i64: 1, 128>}, {transform_indices = @transform_4, window_bounds = array<i64: 128, 128>}]} {
    %c0_i32 = arith.constant 0 : i32
    %0 = arith.cmpi eq, %arg2, %c0_i32 : i32
    %1 = arith.extui %0 : i1 to i32
    %c0_i32_0 = arith.constant 0 : i32
    %2 = arith.cmpi ne, %1, %c0_i32_0 : i32
    scf.if %2 {
      %cst_10 = arith.constant 0.000000e+00 : f32
      %12 = vector.broadcast %cst_10 : f32 to vector<128x128xf32>
      %c0_11 = arith.constant 0 : index
      %c0_12 = arith.constant 0 : index
      %13 = vector.load %arg8[%c0_11, %c0_12] : memref<128x128xf32, #tpu.memory_space<vmem>>, vector<128x128xf32>
      tpu.vector_store %arg8[%c0_11, %c0_12], %12 {strides = array<i32>} : memref<128x128xf32, #tpu.memory_space<vmem>>, vector<128x128xf32>,
    } else {
    }
    %c0 = arith.constant 0 : index
    %c0_1 = arith.constant 0 : index
    %3 = vector.load %arg8[%c0, %c0_1] : memref<128x128xf32, #tpu.memory_space<vmem>>, vector<128x128xf32>
    %c0_2 = arith.constant 0 : index
    %c0_3 = arith.constant 0 : index
    %4 = vector.load %arg3[%c0_2, %c0_3] : memref<128x128xbf16, #tpu.memory_space<vmem>>, vector<128x128xbf16>
    %c0_4 = arith.constant 0 : index
    %c0_5 = arith.constant 0 : index
    %5 = vector.load %arg4[%c0_4, %c0_5] : memref<128x128xbf16, #tpu.memory_space<vmem>>, vector<128x128xbf16>
    %cst = arith.constant dense<0.000000e+00> : vector<128x128xf32>
    %6 = tpu.matmul %4, %5, %cst {dimension_numbers = #tpu.dot_dimension_numbers<[1], [0], [0], [1], [0, 0, 1, 1], [], []>} : vector<128x128xbf16>, vector<128x128xbf16>, vector<128x128xf32> -> vector<128x128xf32>
    %7 = arith.addf %3, %6 : vector<128x128xf32>
    %c0_6 = arith.constant 0 : index
    %c0_7 = arith.constant 0 : index
    %8 = vector.load %arg8[%c0_6, %c0_7] : memref<128x128xf32, #tpu.memory_space<vmem>>, vector<128x128xf32>
    tpu.vector_store %arg8[%c0_6, %c0_7], %7 {strides = array<i32>} : memref<128x128xf32, #tpu.memory_space<vmem>>, vector<128x128xf32>,
    %c0_i32_8 = arith.constant 0 : i32
    %9 = arith.cmpi eq, %arg2, %c0_i32_8 : i32
    %10 = arith.extui %9 : i1 to i32
    %c0_i32_9 = arith.constant 0 : i32
    %11 = arith.cmpi ne, %10, %c0_i32_9 : i32
    scf.if %11 {
      %c0_10 = arith.constant 0 : index
      %c0_11 = arith.constant 0 : index
      %12 = vector.load %arg8[%c0_10, %c0_11] : memref<128x128xf32, #tpu.memory_space<vmem>>, vector<128x128xf32>
      %c0_12 = arith.constant 0 : index
      %c0_13 = arith.constant 0 : index
      %13 = vector.load %arg5[%c0_12, %c0_13] : memref<1x128xf32, #tpu.memory_space<vmem>>, vector<1x128xf32>
      %14 = vector.broadcast %13 : vector<1x128xf32> to vector<128x128xf32>
      %15 = arith.mulf %12, %14 : vector<128x128xf32>
      %c0_14 = arith.constant 0 : index
      %c0_15 = arith.constant 0 : index
      %16 = vector.load %arg6[%c0_14, %c0_15] : memref<1x128xf32, #tpu.memory_space<vmem>>, vector<1x128xf32>
      %17 = vector.broadcast %16 : vector<1x128xf32> to vector<128x128xf32>
      %18 = arith.addf %15, %17 : vector<128x128xf32>
      %19 = arith.truncf %18 : vector<128x128xf32> to vector<128x128xbf16>
      %c0_16 = arith.constant 0 : index
      %c0_17 = arith.constant 0 : index
      %20 = vector.load %arg7[%c0_16, %c0_17] : memref<128x128xbf16, #tpu.memory_space<vmem>>, vector<128x128xbf16>
      tpu.vector_store %arg7[%c0_16, %c0_17], %19 {strides = array<i32>} : memref<128x128xbf16, #tpu.memory_space<vmem>>, vector<128x128xbf16>,
    } else {
    }
    return
  }
  func.func @transform_0(%arg0: i32, %arg1: i32, %arg2: i32) -> (i32, i32) {
    %c0_i32 = arith.constant 0 : i32
    return %arg0, %arg2 : i32, i32
  }
  func.func @transform_1(%arg0: i32, %arg1: i32, %arg2: i32) -> (i32, i32) {
    %c0_i32 = arith.constant 0 : i32
    return %arg2, %arg1 : i32, i32
  }
  func.func @transform_2(%arg0: i32, %arg1: i32, %arg2: i32) -> (i32, i32) {
    %c0_i32 = arith.constant 0 : i32
    %c0_i32_0 = arith.constant 0 : i32
    return %c0_i32, %arg1 : i32, i32
  }
  func.func @transform_3(%arg0: i32, %arg1: i32, %arg2: i32) -> (i32, i32) {
    %c0_i32 = arith.constant 0 : i32
    %c0_i32_0 = arith.constant 0 : i32
    return %c0_i32, %arg1 : i32, i32
  }
  func.func @transform_4(%arg0: i32, %arg1: i32, %arg2: i32) -> (i32, i32) {
    %c0_i32 = arith.constant 0 : i32
    return %arg0, %arg1 : i32, i32
  }
}

module attributes {stable_mosaic.version = 11 : i64} {
  func.func @_matmul_bn_kernel(%arg0: i32, %arg1: i32, %arg2: i32, %arg3: memref<128x128xbf16, #tpu.memory_space<vmem>>, %arg4: memref<128x128xbf16, #tpu.memory_space<vmem>>, %arg5: memref<1x128xf32, #tpu.memory_space<vmem>>, %arg6: memref<1x128xf32, #tpu.memory_space<vmem>>, %arg7: memref<128x128xbf16, #tpu.memory_space<vmem>>, %arg8: memref<128x128xf32, #tpu.memory_space<vmem>>) attributes {dimension_semantics = [#tpu.dimension_semantics<parallel>, #tpu.dimension_semantics<parallel>, #tpu.dimension_semantics<arbitrary>], iteration_bounds = array<i64: 1, 1, 9>, scalar_prefetch = 0 : i64, scratch_operands = 1 : i64, tpu.core_type = #tpu.core_type<tc>, window_params = [{transform_indices = @transform_0, window_bounds = array<i64: 128, 128>}, {transform_indices = @transform_1, window_bounds = array<i64: 128, 128>}, {transform_indices = @transform_2, window_bounds = array<i64: 1, 128>}, {transform_indices = @transform_3, window_bounds = array<i64: 1, 128>}, {transform_indices = @transform_4, window_bounds = array<i64: 128, 128>}]} {
    %c0_i32 = arith.constant 0 : i32
    %0 = arith.cmpi eq, %arg2, %c0_i32 : i32
    %1 = arith.extui %0 : i1 to i32
    %c0_i32_0 = arith.constant 0 : i32
    %2 = arith.cmpi ne, %1, %c0_i32_0 : i32
    scf.if %2 {
      %cst_9 = arith.constant 0.000000e+00 : f32
      %12 = vector.broadcast %cst_9 : f32 to vector<128x128xf32>
      %c0_10 = arith.constant 0 : index
      %c0_11 = arith.constant 0 : index
      %13 = vector.load %arg8[%c0_10, %c0_11] : memref<128x128xf32, #tpu.memory_space<vmem>>, vector<128x128xf32>
      tpu.vector_store %arg8[%c0_10, %c0_11], %12 {strides = array<i32>} : memref<128x128xf32, #tpu.memory_space<vmem>>, vector<128x128xf32>,
    } else {
    }
    %c0 = arith.constant 0 : index
    %c0_1 = arith.constant 0 : index
    %3 = vector.load %arg8[%c0, %c0_1] : memref<128x128xf32, #tpu.memory_space<vmem>>, vector<128x128xf32>
    %c0_2 = arith.constant 0 : index
    %c0_3 = arith.constant 0 : index
    %4 = vector.load %arg3[%c0_2, %c0_3] : memref<128x128xbf16, #tpu.memory_space<vmem>>, vector<128x128xbf16>
    %c0_4 = arith.constant 0 : index
    %c0_5 = arith.constant 0 : index
    %5 = vector.load %arg4[%c0_4, %c0_5] : memref<128x128xbf16, #tpu.memory_space<vmem>>, vector<128x128xbf16>
    %cst = arith.constant dense<0.000000e+00> : vector<128x128xf32>
    %6 = tpu.matmul %4, %5, %cst {dimension_numbers = #tpu.dot_dimension_numbers<[1], [0], [0], [1], [0, 0, 1, 1], [], []>} : vector<128x128xbf16>, vector<128x128xbf16>, vector<128x128xf32> -> vector<128x128xf32>
    %7 = arith.addf %3, %6 : vector<128x128xf32>
    %c0_6 = arith.constant 0 : index
    %c0_7 = arith.constant 0 : index
    %8 = vector.load %arg8[%c0_6, %c0_7] : memref<128x128xf32, #tpu.memory_space<vmem>>, vector<128x128xf32>
    tpu.vector_store %arg8[%c0_6, %c0_7], %7 {strides = array<i32>} : memref<128x128xf32, #tpu.memory_space<vmem>>, vector<128x128xf32>,
    %c8_i32 = arith.constant 8 : i32
    %9 = arith.cmpi eq, %arg2, %c8_i32 : i32
    %10 = arith.extui %9 : i1 to i32
    %c0_i32_8 = arith.constant 0 : i32
    %11 = arith.cmpi ne, %10, %c0_i32_8 : i32
    scf.if %11 {
      %c0_9 = arith.constant 0 : index
      %c0_10 = arith.constant 0 : index
      %12 = vector.load %arg8[%c0_9, %c0_10] : memref<128x128xf32, #tpu.memory_space<vmem>>, vector<128x128xf32>
      %c0_11 = arith.constant 0 : index
      %c0_12 = arith.constant 0 : index
      %13 = vector.load %arg5[%c0_11, %c0_12] : memref<1x128xf32, #tpu.memory_space<vmem>>, vector<1x128xf32>
      %14 = vector.broadcast %13 : vector<1x128xf32> to vector<128x128xf32>
      %15 = arith.mulf %12, %14 : vector<128x128xf32>
      %c0_13 = arith.constant 0 : index
      %c0_14 = arith.constant 0 : index
      %16 = vector.load %arg6[%c0_13, %c0_14] : memref<1x128xf32, #tpu.memory_space<vmem>>, vector<1x128xf32>
      %17 = vector.broadcast %16 : vector<1x128xf32> to vector<128x128xf32>
      %18 = arith.addf %15, %17 : vector<128x128xf32>
      %cst_15 = arith.constant 0.000000e+00 : f32
      %19 = vector.broadcast %cst_15 : f32 to vector<128x128xf32>
      %20 = arith.maximumf %18, %19 : vector<128x128xf32>
      %21 = arith.truncf %20 : vector<128x128xf32> to vector<128x128xbf16>
      %c0_16 = arith.constant 0 : index
      %c0_17 = arith.constant 0 : index
      %22 = vector.load %arg7[%c0_16, %c0_17] : memref<128x128xbf16, #tpu.memory_space<vmem>>, vector<128x128xbf16>
      tpu.vector_store %arg7[%c0_16, %c0_17], %21 {strides = array<i32>} : memref<128x128xbf16, #tpu.memory_space<vmem>>, vector<128x128xbf16>,
    } else {
    }
    return
  }
  func.func @transform_0(%arg0: i32, %arg1: i32, %arg2: i32) -> (i32, i32) {
    %c0_i32 = arith.constant 0 : i32
    return %arg0, %arg2 : i32, i32
  }
  func.func @transform_1(%arg0: i32, %arg1: i32, %arg2: i32) -> (i32, i32) {
    %c0_i32 = arith.constant 0 : i32
    return %arg2, %arg1 : i32, i32
  }
  func.func @transform_2(%arg0: i32, %arg1: i32, %arg2: i32) -> (i32, i32) {
    %c0_i32 = arith.constant 0 : i32
    %c0_i32_0 = arith.constant 0 : i32
    return %c0_i32, %arg1 : i32, i32
  }
  func.func @transform_3(%arg0: i32, %arg1: i32, %arg2: i32) -> (i32, i32) {
    %c0_i32 = arith.constant 0 : i32
    %c0_i32_0 = arith.constant 0 : i32
    return %c0_i32, %arg1 : i32, i32
  }
  func.func @transform_4(%arg0: i32, %arg1: i32, %arg2: i32) -> (i32, i32) {
    %c0_i32 = arith.constant 0 : i32
    return %arg0, %arg1 : i32, i32
  }
}

module attributes {stable_mosaic.version = 11 : i64} {
  func.func @_matmul_bn_res_kernel(%arg0: i32, %arg1: i32, %arg2: i32, %arg3: memref<128x128xbf16, #tpu.memory_space<vmem>>, %arg4: memref<128x128xbf16, #tpu.memory_space<vmem>>, %arg5: memref<1x128xf32, #tpu.memory_space<vmem>>, %arg6: memref<1x128xf32, #tpu.memory_space<vmem>>, %arg7: memref<128x128xbf16, #tpu.memory_space<vmem>>, %arg8: memref<128x128xbf16, #tpu.memory_space<vmem>>, %arg9: memref<128x128xf32, #tpu.memory_space<vmem>>) attributes {dimension_semantics = [#tpu.dimension_semantics<parallel>, #tpu.dimension_semantics<parallel>, #tpu.dimension_semantics<arbitrary>], iteration_bounds = array<i64: 1, 1, 9>, scalar_prefetch = 0 : i64, scratch_operands = 1 : i64, tpu.core_type = #tpu.core_type<tc>, window_params = [{transform_indices = @transform_0, window_bounds = array<i64: 128, 128>}, {transform_indices = @transform_1, window_bounds = array<i64: 128, 128>}, {transform_indices = @transform_2, window_bounds = array<i64: 1, 128>}, {transform_indices = @transform_3, window_bounds = array<i64: 1, 128>}, {transform_indices = @transform_4, window_bounds = array<i64: 128, 128>}, {transform_indices = @transform_5, window_bounds = array<i64: 128, 128>}]} {
    %c0_i32 = arith.constant 0 : i32
    %0 = arith.cmpi eq, %arg2, %c0_i32 : i32
    %1 = arith.extui %0 : i1 to i32
    %c0_i32_0 = arith.constant 0 : i32
    %2 = arith.cmpi ne, %1, %c0_i32_0 : i32
    scf.if %2 {
      %cst_9 = arith.constant 0.000000e+00 : f32
      %12 = vector.broadcast %cst_9 : f32 to vector<128x128xf32>
      %c0_10 = arith.constant 0 : index
      %c0_11 = arith.constant 0 : index
      %13 = vector.load %arg9[%c0_10, %c0_11] : memref<128x128xf32, #tpu.memory_space<vmem>>, vector<128x128xf32>
      tpu.vector_store %arg9[%c0_10, %c0_11], %12 {strides = array<i32>} : memref<128x128xf32, #tpu.memory_space<vmem>>, vector<128x128xf32>,
    } else {
    }
    %c0 = arith.constant 0 : index
    %c0_1 = arith.constant 0 : index
    %3 = vector.load %arg9[%c0, %c0_1] : memref<128x128xf32, #tpu.memory_space<vmem>>, vector<128x128xf32>
    %c0_2 = arith.constant 0 : index
    %c0_3 = arith.constant 0 : index
    %4 = vector.load %arg3[%c0_2, %c0_3] : memref<128x128xbf16, #tpu.memory_space<vmem>>, vector<128x128xbf16>
    %c0_4 = arith.constant 0 : index
    %c0_5 = arith.constant 0 : index
    %5 = vector.load %arg4[%c0_4, %c0_5] : memref<128x128xbf16, #tpu.memory_space<vmem>>, vector<128x128xbf16>
    %cst = arith.constant dense<0.000000e+00> : vector<128x128xf32>
    %6 = tpu.matmul %4, %5, %cst {dimension_numbers = #tpu.dot_dimension_numbers<[1], [0], [0], [1], [0, 0, 1, 1], [], []>} : vector<128x128xbf16>, vector<128x128xbf16>, vector<128x128xf32> -> vector<128x128xf32>
    %7 = arith.addf %3, %6 : vector<128x128xf32>
    %c0_6 = arith.constant 0 : index
    %c0_7 = arith.constant 0 : index
    %8 = vector.load %arg9[%c0_6, %c0_7] : memref<128x128xf32, #tpu.memory_space<vmem>>, vector<128x128xf32>
    tpu.vector_store %arg9[%c0_6, %c0_7], %7 {strides = array<i32>} : memref<128x128xf32, #tpu.memory_space<vmem>>, vector<128x128xf32>,
    %c8_i32 = arith.constant 8 : i32
    %9 = arith.cmpi eq, %arg2, %c8_i32 : i32
    %10 = arith.extui %9 : i1 to i32
    %c0_i32_8 = arith.constant 0 : i32
    %11 = arith.cmpi ne, %10, %c0_i32_8 : i32
    scf.if %11 {
      %c0_9 = arith.constant 0 : index
      %c0_10 = arith.constant 0 : index
      %12 = vector.load %arg9[%c0_9, %c0_10] : memref<128x128xf32, #tpu.memory_space<vmem>>, vector<128x128xf32>
      %c0_11 = arith.constant 0 : index
      %c0_12 = arith.constant 0 : index
      %13 = vector.load %arg5[%c0_11, %c0_12] : memref<1x128xf32, #tpu.memory_space<vmem>>, vector<1x128xf32>
      %14 = vector.broadcast %13 : vector<1x128xf32> to vector<128x128xf32>
      %15 = arith.mulf %12, %14 : vector<128x128xf32>
      %c0_13 = arith.constant 0 : index
      %c0_14 = arith.constant 0 : index
      %16 = vector.load %arg6[%c0_13, %c0_14] : memref<1x128xf32, #tpu.memory_space<vmem>>, vector<1x128xf32>
      %17 = vector.broadcast %16 : vector<1x128xf32> to vector<128x128xf32>
      %18 = arith.addf %15, %17 : vector<128x128xf32>
      %c0_15 = arith.constant 0 : index
      %c0_16 = arith.constant 0 : index
      %19 = vector.load %arg7[%c0_15, %c0_16] : memref<128x128xbf16, #tpu.memory_space<vmem>>, vector<128x128xbf16>
      %20 = arith.extf %19 : vector<128x128xbf16> to vector<128x128xf32>
      %21 = arith.addf %18, %20 : vector<128x128xf32>
      %cst_17 = arith.constant 0.000000e+00 : f32
      %22 = vector.broadcast %cst_17 : f32 to vector<128x128xf32>
      %23 = arith.maximumf %21, %22 : vector<128x128xf32>
      %24 = arith.truncf %23 : vector<128x128xf32> to vector<128x128xbf16>
      %c0_18 = arith.constant 0 : index
      %c0_19 = arith.constant 0 : index
      %25 = vector.load %arg8[%c0_18, %c0_19] : memref<128x128xbf16, #tpu.memory_space<vmem>>, vector<128x128xbf16>
      tpu.vector_store %arg8[%c0_18, %c0_19], %24 {strides = array<i32>} : memref<128x128xbf16, #tpu.memory_space<vmem>>, vector<128x128xbf16>,
    } else {
    }
    return
  }
  func.func @transform_0(%arg0: i32, %arg1: i32, %arg2: i32) -> (i32, i32) {
    %c0_i32 = arith.constant 0 : i32
    return %arg0, %arg2 : i32, i32
  }
  func.func @transform_1(%arg0: i32, %arg1: i32, %arg2: i32) -> (i32, i32) {
    %c0_i32 = arith.constant 0 : i32
    return %arg2, %arg1 : i32, i32
  }
  func.func @transform_2(%arg0: i32, %arg1: i32, %arg2: i32) -> (i32, i32) {
    %c0_i32 = arith.constant 0 : i32
    %c0_i32_0 = arith.constant 0 : i32
    return %c0_i32, %arg1 : i32, i32
  }
  func.func @transform_3(%arg0: i32, %arg1: i32, %arg2: i32) -> (i32, i32) {
    %c0_i32 = arith.constant 0 : i32
    %c0_i32_0 = arith.constant 0 : i32
    return %c0_i32, %arg1 : i32, i32
  }
  func.func @transform_4(%arg0: i32, %arg1: i32, %arg2: i32) -> (i32, i32) {
    %c0_i32 = arith.constant 0 : i32
    return %arg0, %arg1 : i32, i32
  }
  func.func @transform_5(%arg0: i32, %arg1: i32, %arg2: i32) -> (i32, i32) {
    %c0_i32 = arith.constant 0 : i32
    return %arg0, %arg1 : i32, i32
  }
}

module attributes {stable_mosaic.version = 11 : i64} {
  func.func @_matmul_bn_kernel(%arg0: i32, %arg1: i32, %arg2: i32, %arg3: memref<32x128xbf16, #tpu.memory_space<vmem>>, %arg4: memref<128x128xbf16, #tpu.memory_space<vmem>>, %arg5: memref<1x128xf32, #tpu.memory_space<vmem>>, %arg6: memref<1x128xf32, #tpu.memory_space<vmem>>, %arg7: memref<32x128xbf16, #tpu.memory_space<vmem>>, %arg8: memref<32x128xf32, #tpu.memory_space<vmem>>) attributes {dimension_semantics = [#tpu.dimension_semantics<parallel>, #tpu.dimension_semantics<parallel>, #tpu.dimension_semantics<arbitrary>], iteration_bounds = array<i64: 1, 2, 1>, scalar_prefetch = 0 : i64, scratch_operands = 1 : i64, tpu.core_type = #tpu.core_type<tc>, window_params = [{transform_indices = @transform_0, window_bounds = array<i64: 32, 128>}, {transform_indices = @transform_1, window_bounds = array<i64: 128, 128>}, {transform_indices = @transform_2, window_bounds = array<i64: 1, 128>}, {transform_indices = @transform_3, window_bounds = array<i64: 1, 128>}, {transform_indices = @transform_4, window_bounds = array<i64: 32, 128>}]} {
    %c0_i32 = arith.constant 0 : i32
    %0 = arith.cmpi eq, %arg2, %c0_i32 : i32
    %1 = arith.extui %0 : i1 to i32
    %c0_i32_0 = arith.constant 0 : i32
    %2 = arith.cmpi ne, %1, %c0_i32_0 : i32
    scf.if %2 {
      %cst_10 = arith.constant 0.000000e+00 : f32
      %12 = vector.broadcast %cst_10 : f32 to vector<32x128xf32>
      %c0_11 = arith.constant 0 : index
      %c0_12 = arith.constant 0 : index
      %13 = vector.load %arg8[%c0_11, %c0_12] : memref<32x128xf32, #tpu.memory_space<vmem>>, vector<32x128xf32>
      tpu.vector_store %arg8[%c0_11, %c0_12], %12 {strides = array<i32>} : memref<32x128xf32, #tpu.memory_space<vmem>>, vector<32x128xf32>,
    } else {
    }
    %c0 = arith.constant 0 : index
    %c0_1 = arith.constant 0 : index
    %3 = vector.load %arg8[%c0, %c0_1] : memref<32x128xf32, #tpu.memory_space<vmem>>, vector<32x128xf32>
    %c0_2 = arith.constant 0 : index
    %c0_3 = arith.constant 0 : index
    %4 = vector.load %arg3[%c0_2, %c0_3] : memref<32x128xbf16, #tpu.memory_space<vmem>>, vector<32x128xbf16>
    %c0_4 = arith.constant 0 : index
    %c0_5 = arith.constant 0 : index
    %5 = vector.load %arg4[%c0_4, %c0_5] : memref<128x128xbf16, #tpu.memory_space<vmem>>, vector<128x128xbf16>
    %cst = arith.constant dense<0.000000e+00> : vector<32x128xf32>
    %6 = tpu.matmul %4, %5, %cst {dimension_numbers = #tpu.dot_dimension_numbers<[1], [0], [0], [1], [0, 0, 1, 1], [], []>} : vector<32x128xbf16>, vector<128x128xbf16>, vector<32x128xf32> -> vector<32x128xf32>
    %7 = arith.addf %3, %6 : vector<32x128xf32>
    %c0_6 = arith.constant 0 : index
    %c0_7 = arith.constant 0 : index
    %8 = vector.load %arg8[%c0_6, %c0_7] : memref<32x128xf32, #tpu.memory_space<vmem>>, vector<32x128xf32>
    tpu.vector_store %arg8[%c0_6, %c0_7], %7 {strides = array<i32>} : memref<32x128xf32, #tpu.memory_space<vmem>>, vector<32x128xf32>,
    %c0_i32_8 = arith.constant 0 : i32
    %9 = arith.cmpi eq, %arg2, %c0_i32_8 : i32
    %10 = arith.extui %9 : i1 to i32
    %c0_i32_9 = arith.constant 0 : i32
    %11 = arith.cmpi ne, %10, %c0_i32_9 : i32
    scf.if %11 {
      %c0_10 = arith.constant 0 : index
      %c0_11 = arith.constant 0 : index
      %12 = vector.load %arg8[%c0_10, %c0_11] : memref<32x128xf32, #tpu.memory_space<vmem>>, vector<32x128xf32>
      %c0_12 = arith.constant 0 : index
      %c0_13 = arith.constant 0 : index
      %13 = vector.load %arg5[%c0_12, %c0_13] : memref<1x128xf32, #tpu.memory_space<vmem>>, vector<1x128xf32>
      %14 = vector.broadcast %13 : vector<1x128xf32> to vector<32x128xf32>
      %15 = arith.mulf %12, %14 : vector<32x128xf32>
      %c0_14 = arith.constant 0 : index
      %c0_15 = arith.constant 0 : index
      %16 = vector.load %arg6[%c0_14, %c0_15] : memref<1x128xf32, #tpu.memory_space<vmem>>, vector<1x128xf32>
      %17 = vector.broadcast %16 : vector<1x128xf32> to vector<32x128xf32>
      %18 = arith.addf %15, %17 : vector<32x128xf32>
      %19 = arith.truncf %18 : vector<32x128xf32> to vector<32x128xbf16>
      %c0_16 = arith.constant 0 : index
      %c0_17 = arith.constant 0 : index
      %20 = vector.load %arg7[%c0_16, %c0_17] : memref<32x128xbf16, #tpu.memory_space<vmem>>, vector<32x128xbf16>
      tpu.vector_store %arg7[%c0_16, %c0_17], %19 {strides = array<i32>} : memref<32x128xbf16, #tpu.memory_space<vmem>>, vector<32x128xbf16>,
    } else {
    }
    return
  }
  func.func @transform_0(%arg0: i32, %arg1: i32, %arg2: i32) -> (i32, i32) {
    %c0_i32 = arith.constant 0 : i32
    return %arg0, %arg2 : i32, i32
  }
  func.func @transform_1(%arg0: i32, %arg1: i32, %arg2: i32) -> (i32, i32) {
    %c0_i32 = arith.constant 0 : i32
    return %arg2, %arg1 : i32, i32
  }
  func.func @transform_2(%arg0: i32, %arg1: i32, %arg2: i32) -> (i32, i32) {
    %c0_i32 = arith.constant 0 : i32
    %c0_i32_0 = arith.constant 0 : i32
    return %c0_i32, %arg1 : i32, i32
  }
  func.func @transform_3(%arg0: i32, %arg1: i32, %arg2: i32) -> (i32, i32) {
    %c0_i32 = arith.constant 0 : i32
    %c0_i32_0 = arith.constant 0 : i32
    return %c0_i32, %arg1 : i32, i32
  }
  func.func @transform_4(%arg0: i32, %arg1: i32, %arg2: i32) -> (i32, i32) {
    %c0_i32 = arith.constant 0 : i32
    return %arg0, %arg1 : i32, i32
  }
}

module attributes {stable_mosaic.version = 11 : i64} {
  func.func @_matmul_bn_kernel(%arg0: i32, %arg1: i32, %arg2: i32, %arg3: memref<32x128xbf16, #tpu.memory_space<vmem>>, %arg4: memref<128x128xbf16, #tpu.memory_space<vmem>>, %arg5: memref<1x128xf32, #tpu.memory_space<vmem>>, %arg6: memref<1x128xf32, #tpu.memory_space<vmem>>, %arg7: memref<32x128xbf16, #tpu.memory_space<vmem>>, %arg8: memref<32x128xf32, #tpu.memory_space<vmem>>) attributes {dimension_semantics = [#tpu.dimension_semantics<parallel>, #tpu.dimension_semantics<parallel>, #tpu.dimension_semantics<arbitrary>], iteration_bounds = array<i64: 1, 2, 9>, scalar_prefetch = 0 : i64, scratch_operands = 1 : i64, tpu.core_type = #tpu.core_type<tc>, window_params = [{transform_indices = @transform_0, window_bounds = array<i64: 32, 128>}, {transform_indices = @transform_1, window_bounds = array<i64: 128, 128>}, {transform_indices = @transform_2, window_bounds = array<i64: 1, 128>}, {transform_indices = @transform_3, window_bounds = array<i64: 1, 128>}, {transform_indices = @transform_4, window_bounds = array<i64: 32, 128>}]} {
    %c0_i32 = arith.constant 0 : i32
    %0 = arith.cmpi eq, %arg2, %c0_i32 : i32
    %1 = arith.extui %0 : i1 to i32
    %c0_i32_0 = arith.constant 0 : i32
    %2 = arith.cmpi ne, %1, %c0_i32_0 : i32
    scf.if %2 {
      %cst_9 = arith.constant 0.000000e+00 : f32
      %12 = vector.broadcast %cst_9 : f32 to vector<32x128xf32>
      %c0_10 = arith.constant 0 : index
      %c0_11 = arith.constant 0 : index
      %13 = vector.load %arg8[%c0_10, %c0_11] : memref<32x128xf32, #tpu.memory_space<vmem>>, vector<32x128xf32>
      tpu.vector_store %arg8[%c0_10, %c0_11], %12 {strides = array<i32>} : memref<32x128xf32, #tpu.memory_space<vmem>>, vector<32x128xf32>,
    } else {
    }
    %c0 = arith.constant 0 : index
    %c0_1 = arith.constant 0 : index
    %3 = vector.load %arg8[%c0, %c0_1] : memref<32x128xf32, #tpu.memory_space<vmem>>, vector<32x128xf32>
    %c0_2 = arith.constant 0 : index
    %c0_3 = arith.constant 0 : index
    %4 = vector.load %arg3[%c0_2, %c0_3] : memref<32x128xbf16, #tpu.memory_space<vmem>>, vector<32x128xbf16>
    %c0_4 = arith.constant 0 : index
    %c0_5 = arith.constant 0 : index
    %5 = vector.load %arg4[%c0_4, %c0_5] : memref<128x128xbf16, #tpu.memory_space<vmem>>, vector<128x128xbf16>
    %cst = arith.constant dense<0.000000e+00> : vector<32x128xf32>
    %6 = tpu.matmul %4, %5, %cst {dimension_numbers = #tpu.dot_dimension_numbers<[1], [0], [0], [1], [0, 0, 1, 1], [], []>} : vector<32x128xbf16>, vector<128x128xbf16>, vector<32x128xf32> -> vector<32x128xf32>
    %7 = arith.addf %3, %6 : vector<32x128xf32>
    %c0_6 = arith.constant 0 : index
    %c0_7 = arith.constant 0 : index
    %8 = vector.load %arg8[%c0_6, %c0_7] : memref<32x128xf32, #tpu.memory_space<vmem>>, vector<32x128xf32>
    tpu.vector_store %arg8[%c0_6, %c0_7], %7 {strides = array<i32>} : memref<32x128xf32, #tpu.memory_space<vmem>>, vector<32x128xf32>,
    %c8_i32 = arith.constant 8 : i32
    %9 = arith.cmpi eq, %arg2, %c8_i32 : i32
    %10 = arith.extui %9 : i1 to i32
    %c0_i32_8 = arith.constant 0 : i32
    %11 = arith.cmpi ne, %10, %c0_i32_8 : i32
    scf.if %11 {
      %c0_9 = arith.constant 0 : index
      %c0_10 = arith.constant 0 : index
      %12 = vector.load %arg8[%c0_9, %c0_10] : memref<32x128xf32, #tpu.memory_space<vmem>>, vector<32x128xf32>
      %c0_11 = arith.constant 0 : index
      %c0_12 = arith.constant 0 : index
      %13 = vector.load %arg5[%c0_11, %c0_12] : memref<1x128xf32, #tpu.memory_space<vmem>>, vector<1x128xf32>
      %14 = vector.broadcast %13 : vector<1x128xf32> to vector<32x128xf32>
      %15 = arith.mulf %12, %14 : vector<32x128xf32>
      %c0_13 = arith.constant 0 : index
      %c0_14 = arith.constant 0 : index
      %16 = vector.load %arg6[%c0_13, %c0_14] : memref<1x128xf32, #tpu.memory_space<vmem>>, vector<1x128xf32>
      %17 = vector.broadcast %16 : vector<1x128xf32> to vector<32x128xf32>
      %18 = arith.addf %15, %17 : vector<32x128xf32>
      %cst_15 = arith.constant 0.000000e+00 : f32
      %19 = vector.broadcast %cst_15 : f32 to vector<32x128xf32>
      %20 = arith.maximumf %18, %19 : vector<32x128xf32>
      %21 = arith.truncf %20 : vector<32x128xf32> to vector<32x128xbf16>
      %c0_16 = arith.constant 0 : index
      %c0_17 = arith.constant 0 : index
      %22 = vector.load %arg7[%c0_16, %c0_17] : memref<32x128xbf16, #tpu.memory_space<vmem>>, vector<32x128xbf16>
      tpu.vector_store %arg7[%c0_16, %c0_17], %21 {strides = array<i32>} : memref<32x128xbf16, #tpu.memory_space<vmem>>, vector<32x128xbf16>,
    } else {
    }
    return
  }
  func.func @transform_0(%arg0: i32, %arg1: i32, %arg2: i32) -> (i32, i32) {
    %c0_i32 = arith.constant 0 : i32
    return %arg0, %arg2 : i32, i32
  }
  func.func @transform_1(%arg0: i32, %arg1: i32, %arg2: i32) -> (i32, i32) {
    %c0_i32 = arith.constant 0 : i32
    return %arg2, %arg1 : i32, i32
  }
  func.func @transform_2(%arg0: i32, %arg1: i32, %arg2: i32) -> (i32, i32) {
    %c0_i32 = arith.constant 0 : i32
    %c0_i32_0 = arith.constant 0 : i32
    return %c0_i32, %arg1 : i32, i32
  }
  func.func @transform_3(%arg0: i32, %arg1: i32, %arg2: i32) -> (i32, i32) {
    %c0_i32 = arith.constant 0 : i32
    %c0_i32_0 = arith.constant 0 : i32
    return %c0_i32, %arg1 : i32, i32
  }
  func.func @transform_4(%arg0: i32, %arg1: i32, %arg2: i32) -> (i32, i32) {
    %c0_i32 = arith.constant 0 : i32
    return %arg0, %arg1 : i32, i32
  }
}

module attributes {stable_mosaic.version = 11 : i64} {
  func.func @_matmul_bn_kernel(%arg0: i32, %arg1: i32, %arg2: i32, %arg3: memref<8x256xbf16, #tpu.memory_space<vmem>>, %arg4: memref<256x128xbf16, #tpu.memory_space<vmem>>, %arg5: memref<1x128xf32, #tpu.memory_space<vmem>>, %arg6: memref<1x128xf32, #tpu.memory_space<vmem>>, %arg7: memref<8x128xbf16, #tpu.memory_space<vmem>>, %arg8: memref<8x128xf32, #tpu.memory_space<vmem>>) attributes {dimension_semantics = [#tpu.dimension_semantics<parallel>, #tpu.dimension_semantics<parallel>, #tpu.dimension_semantics<arbitrary>], iteration_bounds = array<i64: 1, 4, 1>, scalar_prefetch = 0 : i64, scratch_operands = 1 : i64, tpu.core_type = #tpu.core_type<tc>, window_params = [{transform_indices = @transform_0, window_bounds = array<i64: 8, 256>}, {transform_indices = @transform_1, window_bounds = array<i64: 256, 128>}, {transform_indices = @transform_2, window_bounds = array<i64: 1, 128>}, {transform_indices = @transform_3, window_bounds = array<i64: 1, 128>}, {transform_indices = @transform_4, window_bounds = array<i64: 8, 128>}]} {
    %c0_i32 = arith.constant 0 : i32
    %0 = arith.cmpi eq, %arg2, %c0_i32 : i32
    %1 = arith.extui %0 : i1 to i32
    %c0_i32_0 = arith.constant 0 : i32
    %2 = arith.cmpi ne, %1, %c0_i32_0 : i32
    scf.if %2 {
      %cst_10 = arith.constant 0.000000e+00 : f32
      %12 = vector.broadcast %cst_10 : f32 to vector<8x128xf32>
      %c0_11 = arith.constant 0 : index
      %c0_12 = arith.constant 0 : index
      %13 = vector.load %arg8[%c0_11, %c0_12] : memref<8x128xf32, #tpu.memory_space<vmem>>, vector<8x128xf32>
      tpu.vector_store %arg8[%c0_11, %c0_12], %12 {strides = array<i32>} : memref<8x128xf32, #tpu.memory_space<vmem>>, vector<8x128xf32>,
    } else {
    }
    %c0 = arith.constant 0 : index
    %c0_1 = arith.constant 0 : index
    %3 = vector.load %arg8[%c0, %c0_1] : memref<8x128xf32, #tpu.memory_space<vmem>>, vector<8x128xf32>
    %c0_2 = arith.constant 0 : index
    %c0_3 = arith.constant 0 : index
    %4 = vector.load %arg3[%c0_2, %c0_3] : memref<8x256xbf16, #tpu.memory_space<vmem>>, vector<8x256xbf16>
    %c0_4 = arith.constant 0 : index
    %c0_5 = arith.constant 0 : index
    %5 = vector.load %arg4[%c0_4, %c0_5] : memref<256x128xbf16, #tpu.memory_space<vmem>>, vector<256x128xbf16>
    %cst = arith.constant dense<0.000000e+00> : vector<8x128xf32>
    %6 = tpu.matmul %4, %5, %cst {dimension_numbers = #tpu.dot_dimension_numbers<[1], [0], [0], [1], [0, 0, 1, 1], [], []>} : vector<8x256xbf16>, vector<256x128xbf16>, vector<8x128xf32> -> vector<8x128xf32>
    %7 = arith.addf %3, %6 : vector<8x128xf32>
    %c0_6 = arith.constant 0 : index
    %c0_7 = arith.constant 0 : index
    %8 = vector.load %arg8[%c0_6, %c0_7] : memref<8x128xf32, #tpu.memory_space<vmem>>, vector<8x128xf32>
    tpu.vector_store %arg8[%c0_6, %c0_7], %7 {strides = array<i32>} : memref<8x128xf32, #tpu.memory_space<vmem>>, vector<8x128xf32>,
    %c0_i32_8 = arith.constant 0 : i32
    %9 = arith.cmpi eq, %arg2, %c0_i32_8 : i32
    %10 = arith.extui %9 : i1 to i32
    %c0_i32_9 = arith.constant 0 : i32
    %11 = arith.cmpi ne, %10, %c0_i32_9 : i32
    scf.if %11 {
      %c0_10 = arith.constant 0 : index
      %c0_11 = arith.constant 0 : index
      %12 = vector.load %arg8[%c0_10, %c0_11] : memref<8x128xf32, #tpu.memory_space<vmem>>, vector<8x128xf32>
      %c0_12 = arith.constant 0 : index
      %c0_13 = arith.constant 0 : index
      %13 = vector.load %arg5[%c0_12, %c0_13] : memref<1x128xf32, #tpu.memory_space<vmem>>, vector<1x128xf32>
      %14 = vector.broadcast %13 : vector<1x128xf32> to vector<8x128xf32>
      %15 = arith.mulf %12, %14 : vector<8x128xf32>
      %c0_14 = arith.constant 0 : index
      %c0_15 = arith.constant 0 : index
      %16 = vector.load %arg6[%c0_14, %c0_15] : memref<1x128xf32, #tpu.memory_space<vmem>>, vector<1x128xf32>
      %17 = vector.broadcast %16 : vector<1x128xf32> to vector<8x128xf32>
      %18 = arith.addf %15, %17 : vector<8x128xf32>
      %19 = arith.truncf %18 : vector<8x128xf32> to vector<8x128xbf16>
      %c0_16 = arith.constant 0 : index
      %c0_17 = arith.constant 0 : index
      %20 = vector.load %arg7[%c0_16, %c0_17] : memref<8x128xbf16, #tpu.memory_space<vmem>>, vector<8x128xbf16>
      tpu.vector_store %arg7[%c0_16, %c0_17], %19 {strides = array<i32>} : memref<8x128xbf16, #tpu.memory_space<vmem>>, vector<8x128xbf16>,
    } else {
    }
    return
  }
  func.func @transform_0(%arg0: i32, %arg1: i32, %arg2: i32) -> (i32, i32) {
    %c0_i32 = arith.constant 0 : i32
    return %arg0, %arg2 : i32, i32
  }
  func.func @transform_1(%arg0: i32, %arg1: i32, %arg2: i32) -> (i32, i32) {
    %c0_i32 = arith.constant 0 : i32
    return %arg2, %arg1 : i32, i32
  }
  func.func @transform_2(%arg0: i32, %arg1: i32, %arg2: i32) -> (i32, i32) {
    %c0_i32 = arith.constant 0 : i32
    %c0_i32_0 = arith.constant 0 : i32
    return %c0_i32, %arg1 : i32, i32
  }
  func.func @transform_3(%arg0: i32, %arg1: i32, %arg2: i32) -> (i32, i32) {
    %c0_i32 = arith.constant 0 : i32
    %c0_i32_0 = arith.constant 0 : i32
    return %c0_i32, %arg1 : i32, i32
  }
  func.func @transform_4(%arg0: i32, %arg1: i32, %arg2: i32) -> (i32, i32) {
    %c0_i32 = arith.constant 0 : i32
    return %arg0, %arg1 : i32, i32
  }
}

module attributes {stable_mosaic.version = 11 : i64} {
  func.func @_matmul_bn_res_kernel(%arg0: i32, %arg1: i32, %arg2: i32, %arg3: memref<32x256xbf16, #tpu.memory_space<vmem>>, %arg4: memref<256x128xbf16, #tpu.memory_space<vmem>>, %arg5: memref<1x128xf32, #tpu.memory_space<vmem>>, %arg6: memref<1x128xf32, #tpu.memory_space<vmem>>, %arg7: memref<32x128xbf16, #tpu.memory_space<vmem>>, %arg8: memref<32x128xbf16, #tpu.memory_space<vmem>>, %arg9: memref<32x128xf32, #tpu.memory_space<vmem>>) attributes {dimension_semantics = [#tpu.dimension_semantics<parallel>, #tpu.dimension_semantics<parallel>, #tpu.dimension_semantics<arbitrary>], iteration_bounds = array<i64: 1, 2, 9>, scalar_prefetch = 0 : i64, scratch_operands = 1 : i64, tpu.core_type = #tpu.core_type<tc>, window_params = [{transform_indices = @transform_0, window_bounds = array<i64: 32, 256>}, {transform_indices = @transform_1, window_bounds = array<i64: 256, 128>}, {transform_indices = @transform_2, window_bounds = array<i64: 1, 128>}, {transform_indices = @transform_3, window_bounds = array<i64: 1, 128>}, {transform_indices = @transform_4, window_bounds = array<i64: 32, 128>}, {transform_indices = @transform_5, window_bounds = array<i64: 32, 128>}]} {
    %c0_i32 = arith.constant 0 : i32
    %0 = arith.cmpi eq, %arg2, %c0_i32 : i32
    %1 = arith.extui %0 : i1 to i32
    %c0_i32_0 = arith.constant 0 : i32
    %2 = arith.cmpi ne, %1, %c0_i32_0 : i32
    scf.if %2 {
      %cst_9 = arith.constant 0.000000e+00 : f32
      %12 = vector.broadcast %cst_9 : f32 to vector<32x128xf32>
      %c0_10 = arith.constant 0 : index
      %c0_11 = arith.constant 0 : index
      %13 = vector.load %arg9[%c0_10, %c0_11] : memref<32x128xf32, #tpu.memory_space<vmem>>, vector<32x128xf32>
      tpu.vector_store %arg9[%c0_10, %c0_11], %12 {strides = array<i32>} : memref<32x128xf32, #tpu.memory_space<vmem>>, vector<32x128xf32>,
    } else {
    }
    %c0 = arith.constant 0 : index
    %c0_1 = arith.constant 0 : index
    %3 = vector.load %arg9[%c0, %c0_1] : memref<32x128xf32, #tpu.memory_space<vmem>>, vector<32x128xf32>
    %c0_2 = arith.constant 0 : index
    %c0_3 = arith.constant 0 : index
    %4 = vector.load %arg3[%c0_2, %c0_3] : memref<32x256xbf16, #tpu.memory_space<vmem>>, vector<32x256xbf16>
    %c0_4 = arith.constant 0 : index
    %c0_5 = arith.constant 0 : index
    %5 = vector.load %arg4[%c0_4, %c0_5] : memref<256x128xbf16, #tpu.memory_space<vmem>>, vector<256x128xbf16>
    %cst = arith.constant dense<0.000000e+00> : vector<32x128xf32>
    %6 = tpu.matmul %4, %5, %cst {dimension_numbers = #tpu.dot_dimension_numbers<[1], [0], [0], [1], [0, 0, 1, 1], [], []>} : vector<32x256xbf16>, vector<256x128xbf16>, vector<32x128xf32> -> vector<32x128xf32>
    %7 = arith.addf %3, %6 : vector<32x128xf32>
    %c0_6 = arith.constant 0 : index
    %c0_7 = arith.constant 0 : index
    %8 = vector.load %arg9[%c0_6, %c0_7] : memref<32x128xf32, #tpu.memory_space<vmem>>, vector<32x128xf32>
    tpu.vector_store %arg9[%c0_6, %c0_7], %7 {strides = array<i32>} : memref<32x128xf32, #tpu.memory_space<vmem>>, vector<32x128xf32>,
    %c8_i32 = arith.constant 8 : i32
    %9 = arith.cmpi eq, %arg2, %c8_i32 : i32
    %10 = arith.extui %9 : i1 to i32
    %c0_i32_8 = arith.constant 0 : i32
    %11 = arith.cmpi ne, %10, %c0_i32_8 : i32
    scf.if %11 {
      %c0_9 = arith.constant 0 : index
      %c0_10 = arith.constant 0 : index
      %12 = vector.load %arg9[%c0_9, %c0_10] : memref<32x128xf32, #tpu.memory_space<vmem>>, vector<32x128xf32>
      %c0_11 = arith.constant 0 : index
      %c0_12 = arith.constant 0 : index
      %13 = vector.load %arg5[%c0_11, %c0_12] : memref<1x128xf32, #tpu.memory_space<vmem>>, vector<1x128xf32>
      %14 = vector.broadcast %13 : vector<1x128xf32> to vector<32x128xf32>
      %15 = arith.mulf %12, %14 : vector<32x128xf32>
      %c0_13 = arith.constant 0 : index
      %c0_14 = arith.constant 0 : index
      %16 = vector.load %arg6[%c0_13, %c0_14] : memref<1x128xf32, #tpu.memory_space<vmem>>, vector<1x128xf32>
      %17 = vector.broadcast %16 : vector<1x128xf32> to vector<32x128xf32>
      %18 = arith.addf %15, %17 : vector<32x128xf32>
      %c0_15 = arith.constant 0 : index
      %c0_16 = arith.constant 0 : index
      %19 = vector.load %arg7[%c0_15, %c0_16] : memref<32x128xbf16, #tpu.memory_space<vmem>>, vector<32x128xbf16>
      %20 = arith.extf %19 : vector<32x128xbf16> to vector<32x128xf32>
      %21 = arith.addf %18, %20 : vector<32x128xf32>
      %cst_17 = arith.constant 0.000000e+00 : f32
      %22 = vector.broadcast %cst_17 : f32 to vector<32x128xf32>
      %23 = arith.maximumf %21, %22 : vector<32x128xf32>
      %24 = arith.truncf %23 : vector<32x128xf32> to vector<32x128xbf16>
      %c0_18 = arith.constant 0 : index
      %c0_19 = arith.constant 0 : index
      %25 = vector.load %arg8[%c0_18, %c0_19] : memref<32x128xbf16, #tpu.memory_space<vmem>>, vector<32x128xbf16>
      tpu.vector_store %arg8[%c0_18, %c0_19], %24 {strides = array<i32>} : memref<32x128xbf16, #tpu.memory_space<vmem>>, vector<32x128xbf16>,
    } else {
    }
    return
  }
  func.func @transform_0(%arg0: i32, %arg1: i32, %arg2: i32) -> (i32, i32) {
    %c0_i32 = arith.constant 0 : i32
    return %arg0, %arg2 : i32, i32
  }
  func.func @transform_1(%arg0: i32, %arg1: i32, %arg2: i32) -> (i32, i32) {
    %c0_i32 = arith.constant 0 : i32
    return %arg2, %arg1 : i32, i32
  }
  func.func @transform_2(%arg0: i32, %arg1: i32, %arg2: i32) -> (i32, i32) {
    %c0_i32 = arith.constant 0 : i32
    %c0_i32_0 = arith.constant 0 : i32
    return %c0_i32, %arg1 : i32, i32
  }
  func.func @transform_3(%arg0: i32, %arg1: i32, %arg2: i32) -> (i32, i32) {
    %c0_i32 = arith.constant 0 : i32
    %c0_i32_0 = arith.constant 0 : i32
    return %c0_i32, %arg1 : i32, i32
  }
  func.func @transform_4(%arg0: i32, %arg1: i32, %arg2: i32) -> (i32, i32) {
    %c0_i32 = arith.constant 0 : i32
    return %arg0, %arg1 : i32, i32
  }
  func.func @transform_5(%arg0: i32, %arg1: i32, %arg2: i32) -> (i32, i32) {
    %c0_i32 = arith.constant 0 : i32
    return %arg0, %arg1 : i32, i32
  }
}

module attributes {stable_mosaic.version = 11 : i64} {
  func.func @_matmul_bn_kernel(%arg0: i32, %arg1: i32, %arg2: i32, %arg3: memref<8x256xbf16, #tpu.memory_space<vmem>>, %arg4: memref<256x128xbf16, #tpu.memory_space<vmem>>, %arg5: memref<1x128xf32, #tpu.memory_space<vmem>>, %arg6: memref<1x128xf32, #tpu.memory_space<vmem>>, %arg7: memref<8x128xbf16, #tpu.memory_space<vmem>>, %arg8: memref<8x128xf32, #tpu.memory_space<vmem>>) attributes {dimension_semantics = [#tpu.dimension_semantics<parallel>, #tpu.dimension_semantics<parallel>, #tpu.dimension_semantics<arbitrary>], iteration_bounds = array<i64: 1, 4, 9>, scalar_prefetch = 0 : i64, scratch_operands = 1 : i64, tpu.core_type = #tpu.core_type<tc>, window_params = [{transform_indices = @transform_0, window_bounds = array<i64: 8, 256>}, {transform_indices = @transform_1, window_bounds = array<i64: 256, 128>}, {transform_indices = @transform_2, window_bounds = array<i64: 1, 128>}, {transform_indices = @transform_3, window_bounds = array<i64: 1, 128>}, {transform_indices = @transform_4, window_bounds = array<i64: 8, 128>}]} {
    %c0_i32 = arith.constant 0 : i32
    %0 = arith.cmpi eq, %arg2, %c0_i32 : i32
    %1 = arith.extui %0 : i1 to i32
    %c0_i32_0 = arith.constant 0 : i32
    %2 = arith.cmpi ne, %1, %c0_i32_0 : i32
    scf.if %2 {
      %cst_9 = arith.constant 0.000000e+00 : f32
      %12 = vector.broadcast %cst_9 : f32 to vector<8x128xf32>
      %c0_10 = arith.constant 0 : index
      %c0_11 = arith.constant 0 : index
      %13 = vector.load %arg8[%c0_10, %c0_11] : memref<8x128xf32, #tpu.memory_space<vmem>>, vector<8x128xf32>
      tpu.vector_store %arg8[%c0_10, %c0_11], %12 {strides = array<i32>} : memref<8x128xf32, #tpu.memory_space<vmem>>, vector<8x128xf32>,
    } else {
    }
    %c0 = arith.constant 0 : index
    %c0_1 = arith.constant 0 : index
    %3 = vector.load %arg8[%c0, %c0_1] : memref<8x128xf32, #tpu.memory_space<vmem>>, vector<8x128xf32>
    %c0_2 = arith.constant 0 : index
    %c0_3 = arith.constant 0 : index
    %4 = vector.load %arg3[%c0_2, %c0_3] : memref<8x256xbf16, #tpu.memory_space<vmem>>, vector<8x256xbf16>
    %c0_4 = arith.constant 0 : index
    %c0_5 = arith.constant 0 : index
    %5 = vector.load %arg4[%c0_4, %c0_5] : memref<256x128xbf16, #tpu.memory_space<vmem>>, vector<256x128xbf16>
    %cst = arith.constant dense<0.000000e+00> : vector<8x128xf32>
    %6 = tpu.matmul %4, %5, %cst {dimension_numbers = #tpu.dot_dimension_numbers<[1], [0], [0], [1], [0, 0, 1, 1], [], []>} : vector<8x256xbf16>, vector<256x128xbf16>, vector<8x128xf32> -> vector<8x128xf32>
    %7 = arith.addf %3, %6 : vector<8x128xf32>
    %c0_6 = arith.constant 0 : index
    %c0_7 = arith.constant 0 : index
    %8 = vector.load %arg8[%c0_6, %c0_7] : memref<8x128xf32, #tpu.memory_space<vmem>>, vector<8x128xf32>
    tpu.vector_store %arg8[%c0_6, %c0_7], %7 {strides = array<i32>} : memref<8x128xf32, #tpu.memory_space<vmem>>, vector<8x128xf32>,
    %c8_i32 = arith.constant 8 : i32
    %9 = arith.cmpi eq, %arg2, %c8_i32 : i32
    %10 = arith.extui %9 : i1 to i32
    %c0_i32_8 = arith.constant 0 : i32
    %11 = arith.cmpi ne, %10, %c0_i32_8 : i32
    scf.if %11 {
      %c0_9 = arith.constant 0 : index
      %c0_10 = arith.constant 0 : index
      %12 = vector.load %arg8[%c0_9, %c0_10] : memref<8x128xf32, #tpu.memory_space<vmem>>, vector<8x128xf32>
      %c0_11 = arith.constant 0 : index
      %c0_12 = arith.constant 0 : index
      %13 = vector.load %arg5[%c0_11, %c0_12] : memref<1x128xf32, #tpu.memory_space<vmem>>, vector<1x128xf32>
      %14 = vector.broadcast %13 : vector<1x128xf32> to vector<8x128xf32>
      %15 = arith.mulf %12, %14 : vector<8x128xf32>
      %c0_13 = arith.constant 0 : index
      %c0_14 = arith.constant 0 : index
      %16 = vector.load %arg6[%c0_13, %c0_14] : memref<1x128xf32, #tpu.memory_space<vmem>>, vector<1x128xf32>
      %17 = vector.broadcast %16 : vector<1x128xf32> to vector<8x128xf32>
      %18 = arith.addf %15, %17 : vector<8x128xf32>
      %cst_15 = arith.constant 0.000000e+00 : f32
      %19 = vector.broadcast %cst_15 : f32 to vector<8x128xf32>
      %20 = arith.maximumf %18, %19 : vector<8x128xf32>
      %21 = arith.truncf %20 : vector<8x128xf32> to vector<8x128xbf16>
      %c0_16 = arith.constant 0 : index
      %c0_17 = arith.constant 0 : index
      %22 = vector.load %arg7[%c0_16, %c0_17] : memref<8x128xbf16, #tpu.memory_space<vmem>>, vector<8x128xbf16>
      tpu.vector_store %arg7[%c0_16, %c0_17], %21 {strides = array<i32>} : memref<8x128xbf16, #tpu.memory_space<vmem>>, vector<8x128xbf16>,
    } else {
    }
    return
  }
  func.func @transform_0(%arg0: i32, %arg1: i32, %arg2: i32) -> (i32, i32) {
    %c0_i32 = arith.constant 0 : i32
    return %arg0, %arg2 : i32, i32
  }
  func.func @transform_1(%arg0: i32, %arg1: i32, %arg2: i32) -> (i32, i32) {
    %c0_i32 = arith.constant 0 : i32
    return %arg2, %arg1 : i32, i32
  }
  func.func @transform_2(%arg0: i32, %arg1: i32, %arg2: i32) -> (i32, i32) {
    %c0_i32 = arith.constant 0 : i32
    %c0_i32_0 = arith.constant 0 : i32
    return %c0_i32, %arg1 : i32, i32
  }
  func.func @transform_3(%arg0: i32, %arg1: i32, %arg2: i32) -> (i32, i32) {
    %c0_i32 = arith.constant 0 : i32
    %c0_i32_0 = arith.constant 0 : i32
    return %c0_i32, %arg1 : i32, i32
  }
  func.func @transform_4(%arg0: i32, %arg1: i32, %arg2: i32) -> (i32, i32) {
    %c0_i32 = arith.constant 0 : i32
    return %arg0, %arg1 : i32, i32
  }
}

module attributes {stable_mosaic.version = 11 : i64} {
  func.func @_matmul_bn_res_kernel(%arg0: i32, %arg1: i32, %arg2: i32, %arg3: memref<8x512xbf16, #tpu.memory_space<vmem>>, %arg4: memref<512x128xbf16, #tpu.memory_space<vmem>>, %arg5: memref<1x128xf32, #tpu.memory_space<vmem>>, %arg6: memref<1x128xf32, #tpu.memory_space<vmem>>, %arg7: memref<8x128xbf16, #tpu.memory_space<vmem>>, %arg8: memref<8x128xbf16, #tpu.memory_space<vmem>>, %arg9: memref<8x128xf32, #tpu.memory_space<vmem>>) attributes {dimension_semantics = [#tpu.dimension_semantics<parallel>, #tpu.dimension_semantics<parallel>, #tpu.dimension_semantics<arbitrary>], iteration_bounds = array<i64: 1, 4, 9>, scalar_prefetch = 0 : i64, scratch_operands = 1 : i64, tpu.core_type = #tpu.core_type<tc>, window_params = [{transform_indices = @transform_0, window_bounds = array<i64: 8, 512>}, {transform_indices = @transform_1, window_bounds = array<i64: 512, 128>}, {transform_indices = @transform_2, window_bounds = array<i64: 1, 128>}, {transform_indices = @transform_3, window_bounds = array<i64: 1, 128>}, {transform_indices = @transform_4, window_bounds = array<i64: 8, 128>}, {transform_indices = @transform_5, window_bounds = array<i64: 8, 128>}]} {
    %c0_i32 = arith.constant 0 : i32
    %0 = arith.cmpi eq, %arg2, %c0_i32 : i32
    %1 = arith.extui %0 : i1 to i32
    %c0_i32_0 = arith.constant 0 : i32
    %2 = arith.cmpi ne, %1, %c0_i32_0 : i32
    scf.if %2 {
      %cst_9 = arith.constant 0.000000e+00 : f32
      %12 = vector.broadcast %cst_9 : f32 to vector<8x128xf32>
      %c0_10 = arith.constant 0 : index
      %c0_11 = arith.constant 0 : index
      %13 = vector.load %arg9[%c0_10, %c0_11] : memref<8x128xf32, #tpu.memory_space<vmem>>, vector<8x128xf32>
      tpu.vector_store %arg9[%c0_10, %c0_11], %12 {strides = array<i32>} : memref<8x128xf32, #tpu.memory_space<vmem>>, vector<8x128xf32>,
    } else {
    }
    %c0 = arith.constant 0 : index
    %c0_1 = arith.constant 0 : index
    %3 = vector.load %arg9[%c0, %c0_1] : memref<8x128xf32, #tpu.memory_space<vmem>>, vector<8x128xf32>
    %c0_2 = arith.constant 0 : index
    %c0_3 = arith.constant 0 : index
    %4 = vector.load %arg3[%c0_2, %c0_3] : memref<8x512xbf16, #tpu.memory_space<vmem>>, vector<8x512xbf16>
    %c0_4 = arith.constant 0 : index
    %c0_5 = arith.constant 0 : index
    %5 = vector.load %arg4[%c0_4, %c0_5] : memref<512x128xbf16, #tpu.memory_space<vmem>>, vector<512x128xbf16>
    %cst = arith.constant dense<0.000000e+00> : vector<8x128xf32>
    %6 = tpu.matmul %4, %5, %cst {dimension_numbers = #tpu.dot_dimension_numbers<[1], [0], [0], [1], [0, 0, 1, 1], [], []>} : vector<8x512xbf16>, vector<512x128xbf16>, vector<8x128xf32> -> vector<8x128xf32>
    %7 = arith.addf %3, %6 : vector<8x128xf32>
    %c0_6 = arith.constant 0 : index
    %c0_7 = arith.constant 0 : index
    %8 = vector.load %arg9[%c0_6, %c0_7] : memref<8x128xf32, #tpu.memory_space<vmem>>, vector<8x128xf32>
    tpu.vector_store %arg9[%c0_6, %c0_7], %7 {strides = array<i32>} : memref<8x128xf32, #tpu.memory_space<vmem>>, vector<8x128xf32>,
    %c8_i32 = arith.constant 8 : i32
    %9 = arith.cmpi eq, %arg2, %c8_i32 : i32
    %10 = arith.extui %9 : i1 to i32
    %c0_i32_8 = arith.constant 0 : i32
    %11 = arith.cmpi ne, %10, %c0_i32_8 : i32
    scf.if %11 {
      %c0_9 = arith.constant 0 : index
      %c0_10 = arith.constant 0 : index
      %12 = vector.load %arg9[%c0_9, %c0_10] : memref<8x128xf32, #tpu.memory_space<vmem>>, vector<8x128xf32>
      %c0_11 = arith.constant 0 : index
      %c0_12 = arith.constant 0 : index
      %13 = vector.load %arg5[%c0_11, %c0_12] : memref<1x128xf32, #tpu.memory_space<vmem>>, vector<1x128xf32>
      %14 = vector.broadcast %13 : vector<1x128xf32> to vector<8x128xf32>
      %15 = arith.mulf %12, %14 : vector<8x128xf32>
      %c0_13 = arith.constant 0 : index
      %c0_14 = arith.constant 0 : index
      %16 = vector.load %arg6[%c0_13, %c0_14] : memref<1x128xf32, #tpu.memory_space<vmem>>, vector<1x128xf32>
      %17 = vector.broadcast %16 : vector<1x128xf32> to vector<8x128xf32>
      %18 = arith.addf %15, %17 : vector<8x128xf32>
      %c0_15 = arith.constant 0 : index
      %c0_16 = arith.constant 0 : index
      %19 = vector.load %arg7[%c0_15, %c0_16] : memref<8x128xbf16, #tpu.memory_space<vmem>>, vector<8x128xbf16>
      %20 = arith.extf %19 : vector<8x128xbf16> to vector<8x128xf32>
      %21 = arith.addf %18, %20 : vector<8x128xf32>
      %cst_17 = arith.constant 0.000000e+00 : f32
      %22 = vector.broadcast %cst_17 : f32 to vector<8x128xf32>
      %23 = arith.maximumf %21, %22 : vector<8x128xf32>
      %24 = arith.truncf %23 : vector<8x128xf32> to vector<8x128xbf16>
      %c0_18 = arith.constant 0 : index
      %c0_19 = arith.constant 0 : index
      %25 = vector.load %arg8[%c0_18, %c0_19] : memref<8x128xbf16, #tpu.memory_space<vmem>>, vector<8x128xbf16>
      tpu.vector_store %arg8[%c0_18, %c0_19], %24 {strides = array<i32>} : memref<8x128xbf16, #tpu.memory_space<vmem>>, vector<8x128xbf16>,
    } else {
    }
    return
  }
  func.func @transform_0(%arg0: i32, %arg1: i32, %arg2: i32) -> (i32, i32) {
    %c0_i32 = arith.constant 0 : i32
    return %arg0, %arg2 : i32, i32
  }
  func.func @transform_1(%arg0: i32, %arg1: i32, %arg2: i32) -> (i32, i32) {
    %c0_i32 = arith.constant 0 : i32
    return %arg2, %arg1 : i32, i32
  }
  func.func @transform_2(%arg0: i32, %arg1: i32, %arg2: i32) -> (i32, i32) {
    %c0_i32 = arith.constant 0 : i32
    %c0_i32_0 = arith.constant 0 : i32
    return %c0_i32, %arg1 : i32, i32
  }
  func.func @transform_3(%arg0: i32, %arg1: i32, %arg2: i32) -> (i32, i32) {
    %c0_i32 = arith.constant 0 : i32
    %c0_i32_0 = arith.constant 0 : i32
    return %c0_i32, %arg1 : i32, i32
  }
  func.func @transform_4(%arg0: i32, %arg1: i32, %arg2: i32) -> (i32, i32) {
    %c0_i32 = arith.constant 0 : i32
    return %arg0, %arg1 : i32, i32
  }
  func.func @transform_5(%arg0: i32, %arg1: i32, %arg2: i32) -> (i32, i32) {
    %c0_i32 = arith.constant 0 : i32
    return %arg0, %arg1 : i32, i32
  }
}

module attributes {stable_mosaic.version = 11 : i64} {
  func.func @_pool_fc_kernel(%arg0: i32, %arg1: memref<2x4x512xbf16, #tpu.memory_space<vmem>>, %arg2: memref<512x128xf32, #tpu.memory_space<vmem>>, %arg3: memref<1x128xf32, #tpu.memory_space<vmem>>, %arg4: memref<2x128xf32, #tpu.memory_space<vmem>>, %arg5: memref<2x512xf32, #tpu.memory_space<vmem>>) attributes {dimension_semantics = [#tpu.dimension_semantics<arbitrary>], iteration_bounds = array<i64: 1>, scalar_prefetch = 0 : i64, scratch_operands = 1 : i64, tpu.core_type = #tpu.core_type<tc>, window_params = [{transform_indices = @transform_0, window_bounds = array<i64: 2, 4, 512>}, {pipeline_mode = #tpu.pipeline_mode<synchronous>, transform_indices = @transform_1, window_bounds = array<i64: 512, 128>}, {pipeline_mode = #tpu.pipeline_mode<synchronous>, transform_indices = @transform_2, window_bounds = array<i64: 1, 128>}, {pipeline_mode = #tpu.pipeline_mode<synchronous>, transform_indices = @transform_3, window_bounds = array<i64: 2, 128>}]} {
    %c0_i32 = arith.constant 0 : i32
    %0 = arith.cmpi eq, %arg0, %c0_i32 : i32
    %1 = arith.extui %0 : i1 to i32
    %c0_i32_0 = arith.constant 0 : i32
    %2 = arith.cmpi ne, %1, %c0_i32_0 : i32
    scf.if %2 {
      %cst_9 = arith.constant 0.000000e+00 : f32
      %12 = vector.broadcast %cst_9 : f32 to vector<2x512xf32>
      %c0_10 = arith.constant 0 : index
      %c0_11 = arith.constant 0 : index
      %13 = vector.load %arg5[%c0_10, %c0_11] : memref<2x512xf32, #tpu.memory_space<vmem>>, vector<2x512xf32>
      tpu.vector_store %arg5[%c0_10, %c0_11], %12 {strides = array<i32>} : memref<2x512xf32, #tpu.memory_space<vmem>>, vector<2x512xf32>,
    } else {
    }
    %c0 = arith.constant 0 : index
    %c0_1 = arith.constant 0 : index
    %3 = vector.load %arg5[%c0, %c0_1] : memref<2x512xf32, #tpu.memory_space<vmem>>, vector<2x512xf32>
    %c0_2 = arith.constant 0 : index
    %c0_3 = arith.constant 0 : index
    %c0_4 = arith.constant 0 : index
    %4 = vector.load %arg1[%c0_2, %c0_3, %c0_4] : memref<2x4x512xbf16, #tpu.memory_space<vmem>>, vector<2x4x512xbf16>
    %5 = arith.extf %4 : vector<2x4x512xbf16> to vector<2x4x512xf32>
    %cst = arith.constant dense<0.000000e+00> : vector<2x512xf32>
    %6 = vector.multi_reduction <add>, %5, %cst [1] : vector<2x4x512xf32> to vector<2x512xf32>
    %7 = arith.addf %3, %6 : vector<2x512xf32>
    %c0_5 = arith.constant 0 : index
    %c0_6 = arith.constant 0 : index
    %8 = vector.load %arg5[%c0_5, %c0_6] : memref<2x512xf32, #tpu.memory_space<vmem>>, vector<2x512xf32>
    tpu.vector_store %arg5[%c0_5, %c0_6], %7 {strides = array<i32>} : memref<2x512xf32, #tpu.memory_space<vmem>>, vector<2x512xf32>,
    %c0_i32_7 = arith.constant 0 : i32
    %9 = arith.cmpi eq, %arg0, %c0_i32_7 : i32
    %10 = arith.extui %9 : i1 to i32
    %c0_i32_8 = arith.constant 0 : i32
    %11 = arith.cmpi ne, %10, %c0_i32_8 : i32
    scf.if %11 {
      %c0_9 = arith.constant 0 : index
      %c0_10 = arith.constant 0 : index
      %12 = vector.load %arg5[%c0_9, %c0_10] : memref<2x512xf32, #tpu.memory_space<vmem>>, vector<2x512xf32>
      %cst_11 = arith.constant 2.500000e-01 : f32
      %13 = vector.broadcast %cst_11 : f32 to vector<2x512xf32>
      %14 = arith.mulf %12, %13 : vector<2x512xf32>
      %c0_12 = arith.constant 0 : index
      %c0_13 = arith.constant 0 : index
      %15 = vector.load %arg2[%c0_12, %c0_13] : memref<512x128xf32, #tpu.memory_space<vmem>>, vector<512x128xf32>
      %cst_14 = arith.constant dense<0.000000e+00> : vector<2x128xf32>
      %16 = tpu.matmul %14, %15, %cst_14 {dimension_numbers = #tpu.dot_dimension_numbers<[1], [0], [0], [1], [0, 0, 1, 1], [], []>} : vector<2x512xf32>, vector<512x128xf32>, vector<2x128xf32> -> vector<2x128xf32>
      %c0_15 = arith.constant 0 : index
      %c0_16 = arith.constant 0 : index
      %17 = vector.load %arg3[%c0_15, %c0_16] : memref<1x128xf32, #tpu.memory_space<vmem>>, vector<1x128xf32>
      %18 = vector.broadcast %17 : vector<1x128xf32> to vector<2x128xf32>
      %19 = arith.addf %16, %18 : vector<2x128xf32>
      %c0_17 = arith.constant 0 : index
      %c0_18 = arith.constant 0 : index
      %20 = vector.load %arg4[%c0_17, %c0_18] : memref<2x128xf32, #tpu.memory_space<vmem>>, vector<2x128xf32>
      tpu.vector_store %arg4[%c0_17, %c0_18], %19 {strides = array<i32>} : memref<2x128xf32, #tpu.memory_space<vmem>>, vector<2x128xf32>,
    } else {
    }
    return
  }
  func.func @transform_0(%arg0: i32) -> (i32, i32, i32) {
    %c0_i32 = arith.constant 0 : i32
    %c0_i32_0 = arith.constant 0 : i32
    %c0_i32_1 = arith.constant 0 : i32
    return %c0_i32, %arg0, %c0_i32_0 : i32, i32, i32
  }
  func.func @transform_1(%arg0: i32) -> (i32, i32) {
    %c0_i32 = arith.constant 0 : i32
    %c0_i32_0 = arith.constant 0 : i32
    %c0_i32_1 = arith.constant 0 : i32
    return %c0_i32, %c0_i32_0 : i32, i32
  }
  func.func @transform_2(%arg0: i32) -> (i32, i32) {
    %c0_i32 = arith.constant 0 : i32
    %c0_i32_0 = arith.constant 0 : i32
    %c0_i32_1 = arith.constant 0 : i32
    return %c0_i32, %c0_i32_0 : i32, i32
  }
  func.func @transform_3(%arg0: i32) -> (i32, i32) {
    %c0_i32 = arith.constant 0 : i32
    %c0_i32_0 = arith.constant 0 : i32
    %c0_i32_1 = arith.constant 0 : i32
    return %c0_i32, %c0_i32_0 : i32, i32
  }
}

</mosaic_0001>

<bundles_post_ra>
// kernel: _lambda_.13
= control target key start
LH: loop header
LB: loop body
LE: loop exit
PB: predicated region body
PF: predicated region fallthrough
CT: control target
= control target key end

     0   :  { %s1367_s15 = smov 0   ;;  %s1369_s16 = smov 0   ;;  %s1544_s0 = inlined_call_operand.vmem [shape: bf16[512,128], index: 0, kind: input, shape index: {}]   ;;  %s1545_s1 = inlined_call_operand.vmem [shape: bf16[128,128], index: 1, kind: input, shape index: {}]   ;;  %s1546_s2 = inlined_call_operand.vmem [shape: f32[1,128], index: 2, kind: input, shape index: {}]   ;;  %s1547_s3 = inlined_call_operand.vmem [shape: f32[1,128], index: 3, kind: input, shape index: {}]   ;;  %s1548_s4 = inlined_call_operand.vmem [shape: bf16[512,128], index: 4, kind: output, shape index: {}]  }
   0x1   :  { %s1371_s17 = smov 0  }
   0x2 LB: > { %s33_s18 = sadd.s32 1, %s1336_s16  ;;  %p1046_p0 = scmp.ge.s32.totalorder %s1340_s17, 1  ;;  %s1340_s17 = sphi %s1371_s17, %s14_s17   ;;  %s1336_s16 = sphi %s1369_s16, %s1550_s16   ;;  %s1332_s15 = sphi %s1367_s15, %s1549_s15  }
   0x3   : > { %p35_p1 = scmp.ge.s32.totalorder %s33_s18, 2  ;;  %p221_p2 = scmp.lt.s32.totalorder %s1340_s17, 3 }
   0x5   : > { %s1552_s18 = smov (%p35_p1, %s33_s18), 0  ;;  %p222_p3 = pnand %p1046_p0, %p221_p2 }
   0x6   : > { %s1047_s27 = sshll.u32 (!%p222_p3), %s1332_s15, 5 }
   0x7   : > { %225 = sbr.rel (%p222_p3) target bundleno = 243 (0xf3), region = 36  ;;  %p268_p4 = scmp.lt.s32.totalorder (!%p222_p3), %s1047_s27, 63 }
   0xc   : > { %v1172_v0 = vld [vmem:[%s1545_s1 + $0x38] sm:$0xff]  ;;  %v1171_v1 = vld [vmem:[%s1545_s1 + $0x30] sm:$0xff]  ;;  %v1170_v2 = vld [vmem:[%s1545_s1 + $0x28] sm:$0xff]  ;;  %s1554_s27 = smov (!%p268_p4, %s1047_s27), 63 }
   0xd   : > { %560 = vmatpush.bf16.msra.mxu0 %v1172_v0  ;;  %1268 = vmatpush.bf16.msra.mxu1 %v1172_v0  ;;  %v1169_v3 = vld [vmem:[%s1545_s1 + $0x20] sm:$0xff]  ;;  %v1168_v4 = vld [vmem:[%s1545_s1 + $0x18] sm:$0xff]  ;;  %v1167_v5 = vld [vmem:[%s1545_s1 + $0x10] sm:$0xff]  ;;  %s1048_s8 = sshll.u32 %s1554_s27, 2 }
   0xe   : > { %1269 = vmatpush.bf16.msra.mxu2 %v1172_v0  ;;  %1270 = vmatpush.bf16.msra.mxu3 %v1172_v0  ;;  %v1166_v6 = vld [vmem:[%s1545_s1 + $0x8] sm:$0xff]  ;;  %v1165_v7 = vld [vmem:[%s1545_s1] sm:$0xff]  ;;  %s1420_s13 = scalar_lea.vmem %s1544_s0, %s1048_s8  ;;  %s1463_s23 = scalar_lea.vmem %s1548_s4, %s1048_s8 }
   0xf   : > { %v1149_v8 = vld [vmem:[%s1420_s13] sm:$0xff]  ;;  %v1150_v12 = vld [vmem:[%s1420_s13 + $0x8] sm:$0xff]  ;;  %v1151_v16 = vld [vmem:[%s1420_s13 + $0x10] sm:$0xff] }
  0x10   : > { %v1153_v9 = vld [vmem:[%s1420_s13 + $0x20] sm:$0xff]  ;;  %v1154_v13 = vld [vmem:[%s1420_s13 + $0x28] sm:$0xff]  ;;  %v1155_v17 = vld [vmem:[%s1420_s13 + $0x30] sm:$0xff] }
  0x11   : > { %561 = vmatpush.bf16.msra.mxu0 %v1171_v1  ;;  %1271 = vmatpush.bf16.msra.mxu1 %v1171_v1  ;;  %v1157_v10 = vld [vmem:[%s1420_s13 + $0x40] sm:$0xff]  ;;  %v1158_v14 = vld [vmem:[%s1420_s13 + $0x48] sm:$0xff]  ;;  %v1159_v18 = vld [vmem:[%s1420_s13 + $0x50] sm:$0xff] }
  0x12   : > { %1272 = vmatpush.bf16.msra.mxu2 %v1171_v1  ;;  %1273 = vmatpush.bf16.msra.mxu3 %v1171_v1  ;;  %v1161_v11 = vld [vmem:[%s1420_s13 + $0x60] sm:$0xff]  ;;  %v1162_v15 = vld [vmem:[%s1420_s13 + $0x68] sm:$0xff]  ;;  %v1163_v19 = vld [vmem:[%s1420_s13 + $0x70] sm:$0xff] }
  0x13   : > { %v1152_v20 = vld [vmem:[%s1420_s13 + $0x18] sm:$0xff]  ;;  %v1441_v26 = vld [vmem:[%s1546_s2] ss:$0 sm:$0xff] }
  0x14   : > { %v1156_v21 = vld [vmem:[%s1420_s13 + $0x38] sm:$0xff]  ;;  %v1447_v28 = vld [vmem:[%s1547_s3] ss:$0 sm:$0xff] }
  0x15   : > { %562 = vmatpush.bf16.msra.mxu0 %v1170_v2  ;;  %1274 = vmatpush.bf16.msra.mxu1 %v1170_v2  ;;  %v1160_v22 = vld [vmem:[%s1420_s13 + $0x58] sm:$0xff] }
  0x16   : > { %1275 = vmatpush.bf16.msra.mxu2 %v1170_v2  ;;  %1276 = vmatpush.bf16.msra.mxu3 %v1170_v2  ;;  %v1164_v23 = vld [vmem:[%s1420_s13 + $0x78] sm:$0xff] }
  0x19   : > { %563 = vmatpush.bf16.msra.mxu0 %v1169_v3  ;;  %1277 = vmatpush.bf16.msra.mxu1 %v1169_v3 }
  0x1a   : > { %1278 = vmatpush.bf16.msra.mxu2 %v1169_v3  ;;  %1279 = vmatpush.bf16.msra.mxu3 %v1169_v3 }
  0x1d   : > { %564 = vmatpush.bf16.msra.mxu0 %v1168_v4  ;;  %1280 = vmatpush.bf16.msra.mxu1 %v1168_v4 }
  0x1e   : > { %1281 = vmatpush.bf16.msra.mxu2 %v1168_v4  ;;  %1282 = vmatpush.bf16.msra.mxu3 %v1168_v4 }
  0x21   : > { %565 = vmatpush.bf16.msra.mxu0 %v1167_v5  ;;  %1283 = vmatpush.bf16.msra.mxu1 %v1167_v5 }
  0x22   : > { %1284 = vmatpush.bf16.msra.mxu2 %v1167_v5  ;;  %1285 = vmatpush.bf16.msra.mxu3 %v1167_v5 }
  0x25   : > { %566 = vmatpush.bf16.msra.mxu0 %v1166_v6  ;;  %1286 = vmatpush.bf16.msra.mxu1 %v1166_v6 }
  0x26   : > { %1287 = vmatpush.bf16.msra.mxu2 %v1166_v6  ;;  %1288 = vmatpush.bf16.msra.mxu3 %v1166_v6 }
  0x29   : > { %567 = vmatpush.bf16.msra.mxu0 %v1165_v7  ;;  %1289 = vmatpush.bf16.msra.mxu1 %v1165_v7 }
  0x2a   : > { %1290 = vmatpush.bf16.msra.mxu2 %v1165_v7  ;;  %1291 = vmatpush.bf16.msra.mxu3 %v1165_v7 }
  0x2c   : > { %568 = vmatmul.bf16.vlgmr.msra.gmra.mxu0 %v1149_v8  ;;  %588 = vmatmul.bf16.vlgmr.msra.gmra.mxu1 %v1153_v9 }
  0x2d   : > { %608 = vmatmul.bf16.vlgmr.msra.gmra.mxu2 %v1157_v10  ;;  %628 = vmatmul.bf16.vlgmr.msra.gmra.mxu3 %v1161_v11 }
  0x3c   : > { %573 = vmatmul.bf16.gmra.mxu0 %v1150_v12  ;;  %593 = vmatmul.bf16.gmra.mxu1 %v1154_v13 }
  0x3d   : > { %613 = vmatmul.bf16.gmra.mxu2 %v1158_v14  ;;  %633 = vmatmul.bf16.gmra.mxu3 %v1162_v15 }
  0x4c   : > { %578 = vmatmul.bf16.gmra.mxu0 %v1151_v16  ;;  %598 = vmatmul.bf16.gmra.mxu1 %v1155_v17 }
  0x4d   : > { %618 = vmatmul.bf16.gmra.mxu2 %v1159_v18  ;;  %638 = vmatmul.bf16.gmra.mxu3 %v1163_v19 }
  0x5c   : > { %583 = vmatmul.bf16.gmra.mxu0 %v1152_v20  ;;  %603 = vmatmul.bf16.gmra.mxu1 %v1156_v21 }
  0x5d   : > { %623 = vmatmul.bf16.gmra.mxu2 %v1160_v22  ;;  %643 = vmatmul.bf16.gmra.mxu3 %v1164_v23 }
  0xa9   : > { %v569_v24 = vpop.f32.mrf.mxu0  ;;  %v589_v25 = vpop.f32.mrf.mxu1 }
  0xaa   : > { %v752_v27 = vmul.f32 %v1441_v26, %v569_v24  ;;  %v760_v29 = vmul.f32 %v1441_v26, %v589_v25 }
  0xac   : > { %v788_v34 = vadd.f32 %v1447_v28, %v752_v27  ;;  %v796_v35 = vadd.f32 %v1447_v28, %v760_v29 }
  0xae   : > { %v820_v42 = vmax.f32 %v788_v34, 0.0  ;;  %v828_v43 = vmax.f32 %v796_v35, 0.0 }
  0xb0   : > { %v609_v30 = vpop.f32.mrf.mxu2  ;;  %v629_v31 = vpop.f32.mrf.mxu3 }
  0xb1   : > { %v571_v32 = vpop.f32.mrf.mxu0  ;;  %v591_v33 = vpop.f32.mrf.mxu1  ;;  %v768_v40 = vmul.f32 %v1441_v26, %v609_v30  ;;  %v776_v41 = vmul.f32 %v1441_v26, %v629_v31 }
  0xb2   : > { %v753_v36 = vmul.f32 %v1441_v26, %v571_v32  ;;  %v761_v37 = vmul.f32 %v1441_v26, %v591_v33 }
  0xb3   : > { %v804_v50 = vadd.f32 %v1447_v28, %v768_v40  ;;  %v812_v51 = vadd.f32 %v1447_v28, %v776_v41 }
  0xb4   : > { %v789_v38 = vadd.f32 %v1447_v28, %v753_v36  ;;  %v797_v39 = vadd.f32 %v1447_v28, %v761_v37 }
  0xb5   : > { %v836_v58 = vmax.f32 %v804_v50, 0.0  ;;  %v844_v59 = vmax.f32 %v812_v51, 0.0 }
  0xb6   : > { %v821_v44 = vmax.f32 %v789_v38, 0.0  ;;  %v829_v45 = vmax.f32 %v797_v39, 0.0 }
  0xb8   : > { %v1176_v46 = vpack.c.bf16 %v821_v44, %v820_v42  ;;  %v1196_v47 = vpack.c.bf16 %v829_v45, %v828_v43  ;;  %v611_v48 = vpop.f32.mrf.mxu2  ;;  %v631_v49 = vpop.f32.mrf.mxu3 }
  0xb9   : > { %v769_v52 = vmul.f32 %v1441_v26, %v611_v48  ;;  %v777_v53 = vmul.f32 %v1441_v26, %v631_v49  ;;  %v574_v54 = vpop.f32.mrf.mxu0  ;;  %v594_v55 = vpop.f32.mrf.mxu1 }
  0xba   : > { %1177 = vst [vmem:[%s1463_s23] sm:$0xff] %v1176_v46   ;;  %v754_v62 = vmul.f32 %v1441_v26, %v574_v54  ;;  %v762_v63 = vmul.f32 %v1441_v26, %v594_v55 }
  0xbb   : > { %1256 = vst [vmem:[%s1463_s23 + $0x20] sm:$0xff] %v1196_v47   ;;  %v805_v56 = vadd.f32 %v1447_v28, %v769_v52  ;;  %v813_v57 = vadd.f32 %v1447_v28, %v777_v53 }
  0xbc   : > { %v790_v6 = vadd.f32 %v1447_v28, %v754_v62  ;;  %v798_v7 = vadd.f32 %v1447_v28, %v762_v63 }
  0xbd   : > { %v837_v60 = vmax.f32 %v805_v56, 0.0  ;;  %v845_v61 = vmax.f32 %v813_v57, 0.0 }
  0xbe   : > { %v822_v14 = vmax.f32 %v790_v6, 0.0  ;;  %v830_v15 = vmax.f32 %v798_v7, 0.0 }
  0xbf   : > { %v1216_v0 = vpack.c.bf16 %v837_v60, %v836_v58  ;;  %v1236_v1 = vpack.c.bf16 %v845_v61, %v844_v59 }
  0xc0   : > { %v614_v2 = vpop.f32.mrf.mxu2  ;;  %v634_v3 = vpop.f32.mrf.mxu3 }
  0xc1   : > { %1260 = vst [vmem:[%s1463_s23 + $0x40] sm:$0xff] %v1216_v0   ;;  %v576_v4 = vpop.f32.mrf.mxu0  ;;  %v596_v5 = vpop.f32.mrf.mxu1  ;;  %v770_v12 = vmul.f32 %v1441_v26, %v614_v2  ;;  %v778_v13 = vmul.f32 %v1441_v26, %v634_v3 }
  0xc2   : > { %1264 = vst [vmem:[%s1463_s23 + $0x60] sm:$0xff] %v1236_v1   ;;  %v755_v8 = vmul.f32 %v1441_v26, %v576_v4  ;;  %v763_v9 = vmul.f32 %v1441_v26, %v596_v5 }
  0xc3   : > { %v806_v22 = vadd.f32 %v1447_v28, %v770_v12  ;;  %v814_v23 = vadd.f32 %v1447_v28, %v778_v13 }
  0xc4   : > { %v791_v10 = vadd.f32 %v1447_v28, %v755_v8  ;;  %v799_v11 = vadd.f32 %v1447_v28, %v763_v9 }
  0xc5   : > { %v838_v32 = vmax.f32 %v806_v22, 0.0  ;;  %v846_v33 = vmax.f32 %v814_v23, 0.0 }
  0xc6   : > { %v823_v16 = vmax.f32 %v791_v10, 0.0  ;;  %v831_v17 = vmax.f32 %v799_v11, 0.0 }
  0xc8   : > { %v1181_v18 = vpack.c.bf16 %v823_v16, %v822_v14  ;;  %v1201_v19 = vpack.c.bf16 %v831_v17, %v830_v15  ;;  %v616_v20 = vpop.f32.mrf.mxu2  ;;  %v636_v21 = vpop.f32.mrf.mxu3 }
  0xc9   : > { %v771_v24 = vmul.f32 %v1441_v26, %v616_v20  ;;  %v779_v25 = vmul.f32 %v1441_v26, %v636_v21  ;;  %v579_v27 = vpop.f32.mrf.mxu0  ;;  %v599_v29 = vpop.f32.mrf.mxu1 }
  0xca   : > { %1253 = vst [vmem:[%s1463_s23 + $0x8] sm:$0xff] %v1181_v18   ;;  %v756_v36 = vmul.f32 %v1441_v26, %v579_v27  ;;  %v764_v37 = vmul.f32 %v1441_v26, %v599_v29 }
  0xcb   : > { %1257 = vst [vmem:[%s1463_s23 + $0x28] sm:$0xff] %v1201_v19   ;;  %v807_v30 = vadd.f32 %v1447_v28, %v771_v24  ;;  %v815_v31 = vadd.f32 %v1447_v28, %v779_v25 }
  0xcc   : > { %v792_v44 = vadd.f32 %v1447_v28, %v756_v36  ;;  %v800_v45 = vadd.f32 %v1447_v28, %v764_v37 }
  0xcd   : > { %v839_v34 = vmax.f32 %v807_v30, 0.0  ;;  %v847_v35 = vmax.f32 %v815_v31, 0.0 }
  0xce   : > { %v824_v52 = vmax.f32 %v792_v44, 0.0  ;;  %v832_v53 = vmax.f32 %v800_v45, 0.0 }
  0xcf   : > { %v1221_v38 = vpack.c.bf16 %v839_v34, %v838_v32  ;;  %v1241_v39 = vpack.c.bf16 %v847_v35, %v846_v33 }
  0xd0   : > { %v619_v40 = vpop.f32.mrf.mxu2  ;;  %v639_v41 = vpop.f32.mrf.mxu3 }
  0xd1   : > { %1261 = vst [vmem:[%s1463_s23 + $0x48] sm:$0xff] %v1221_v38   ;;  %v581_v42 = vpop.f32.mrf.mxu0  ;;  %v601_v43 = vpop.f32.mrf.mxu1  ;;  %v772_v50 = vmul.f32 %v1441_v26, %v619_v40  ;;  %v780_v51 = vmul.f32 %v1441_v26, %v639_v41 }
  0xd2   : > { %1265 = vst [vmem:[%s1463_s23 + $0x68] sm:$0xff] %v1241_v39   ;;  %v757_v46 = vmul.f32 %v1441_v26, %v581_v42  ;;  %v765_v47 = vmul.f32 %v1441_v26, %v601_v43 }
  0xd3   : > { %v808_v60 = vadd.f32 %v1447_v28, %v772_v50  ;;  %v816_v61 = vadd.f32 %v1447_v28, %v780_v51 }
  0xd4   : > { %v793_v48 = vadd.f32 %v1447_v28, %v757_v46  ;;  %v801_v49 = vadd.f32 %v1447_v28, %v765_v47 }
  0xd5   : > { %v840_v4 = vmax.f32 %v808_v60, 0.0  ;;  %v848_v5 = vmax.f32 %v816_v61, 0.0 }
  0xd6   : > { %v825_v54 = vmax.f32 %v793_v48, 0.0  ;;  %v833_v55 = vmax.f32 %v801_v49, 0.0 }
  0xd8   : > { %v1186_v56 = vpack.c.bf16 %v825_v54, %v824_v52  ;;  %v1206_v57 = vpack.c.bf16 %v833_v55, %v832_v53  ;;  %v621_v58 = vpop.f32.mrf.mxu2  ;;  %v641_v59 = vpop.f32.mrf.mxu3 }
  0xd9   : > { %v773_v62 = vmul.f32 %v1441_v26, %v621_v58  ;;  %v781_v63 = vmul.f32 %v1441_v26, %v641_v59  ;;  %v584_v0 = vpop.f32.mrf.mxu0  ;;  %v604_v1 = vpop.f32.mrf.mxu1 }
  0xda   : > { %1254 = vst [vmem:[%s1463_s23 + $0x10] sm:$0xff] %v1186_v56   ;;  %v758_v8 = vmul.f32 %v1441_v26, %v584_v0  ;;  %v766_v9 = vmul.f32 %v1441_v26, %v604_v1 }
  0xdb   : > { %1258 = vst [vmem:[%s1463_s23 + $0x30] sm:$0xff] %v1206_v57   ;;  %v809_v2 = vadd.f32 %v1447_v28, %v773_v62  ;;  %v817_v3 = vadd.f32 %v1447_v28, %v781_v63 }
  0xdc   : > { %v794_v16 = vadd.f32 %v1447_v28, %v758_v8  ;;  %v802_v17 = vadd.f32 %v1447_v28, %v766_v9 }
  0xdd   : > { %v841_v6 = vmax.f32 %v809_v2, 0.0  ;;  %v849_v7 = vmax.f32 %v817_v3, 0.0 }
  0xde   : > { %v826_v24 = vmax.f32 %v794_v16, 0.0  ;;  %v834_v25 = vmax.f32 %v802_v17, 0.0 }
  0xdf   : > { %v1226_v10 = vpack.c.bf16 %v841_v6, %v840_v4  ;;  %v1246_v11 = vpack.c.bf16 %v849_v7, %v848_v5 }
  0xe0   : > { %v624_v12 = vpop.f32.mrf.mxu2  ;;  %v644_v13 = vpop.f32.mrf.mxu3 }
  0xe1   : > { %1262 = vst [vmem:[%s1463_s23 + $0x50] sm:$0xff] %v1226_v10   ;;  %v586_v14 = vpop.f32.mrf.mxu0  ;;  %v606_v15 = vpop.f32.mrf.mxu1  ;;  %v774_v22 = vmul.f32 %v1441_v26, %v624_v12  ;;  %v782_v23 = vmul.f32 %v1441_v26, %v644_v13 }
  0xe2   : > { %1266 = vst [vmem:[%s1463_s23 + $0x70] sm:$0xff] %v1246_v11   ;;  %v759_v18 = vmul.f32 %v1441_v26, %v586_v14  ;;  %v767_v19 = vmul.f32 %v1441_v26, %v606_v15 }
  0xe3   : > { %v810_v34 = vadd.f32 %v1447_v28, %v774_v22  ;;  %v818_v35 = vadd.f32 %v1447_v28, %v782_v23 }
  0xe4   : > { %v795_v20 = vadd.f32 %v1447_v28, %v759_v18  ;;  %v803_v21 = vadd.f32 %v1447_v28, %v767_v19 }
  0xe5   : > { %v842_v40 = vmax.f32 %v810_v34, 0.0  ;;  %v850_v41 = vmax.f32 %v818_v35, 0.0 }
  0xe6   : > { %v827_v27 = vmax.f32 %v795_v20, 0.0  ;;  %v835_v29 = vmax.f32 %v803_v21, 0.0 }
  0xe8   : > { %v1191_v30 = vpack.c.bf16 %v827_v27, %v826_v24  ;;  %v1211_v31 = vpack.c.bf16 %v835_v29, %v834_v25  ;;  %v626_v32 = vpop.f32.mrf.mxu2  ;;  %v646_v33 = vpop.f32.mrf.mxu3 }
  0xe9   : > { %v775_v36 = vmul.f32 %v1441_v26, %v626_v32  ;;  %v783_v37 = vmul.f32 %v1441_v26, %v646_v33 }
  0xea   : > { %1255 = vst [vmem:[%s1463_s23 + $0x18] sm:$0xff] %v1191_v30  }
  0xeb   : > { %1259 = vst [vmem:[%s1463_s23 + $0x38] sm:$0xff] %v1211_v31   ;;  %v811_v38 = vadd.f32 %v1447_v28, %v775_v36  ;;  %v819_v39 = vadd.f32 %v1447_v28, %v783_v37 }
  0xed   : > { %v843_v42 = vmax.f32 %v811_v38, 0.0  ;;  %v851_v43 = vmax.f32 %v819_v39, 0.0 }
  0xef   : > { %v1231_v44 = vpack.c.bf16 %v843_v42, %v842_v40  ;;  %v1251_v45 = vpack.c.bf16 %v851_v43, %v850_v41 }
  0xf1   : > { %1263 = vst [vmem:[%s1463_s23 + $0x58] sm:$0xff] %v1231_v44  }
  0xf2   : > { %1267 = vst [vmem:[%s1463_s23 + $0x78] sm:$0xff] %v1251_v45  }
  0xf3 PF: > { %s14_s17 = sadd.s32 1, %s1340_s17   ;;  %s1549_s15 = smov %s1336_s16 }
  0xf4   : > { %p11_p5 = scmp.ge.s32.totalorder %s14_s17, 4   ;;  %s1550_s16 = smov %s1552_s18 }
  0xf6   :  { %13 = sbr.rel (!%p11_p5) target bundleno = 2 (0x2), region = 83 }

// kernel: _lambda_.14
= control target key start
LH: loop header
LB: loop body
LE: loop exit
PB: predicated region body
PF: predicated region fallthrough
CT: control target
= control target key end

     0   :  { %s1606_s15 = smov 0   ;;  %s1608_s16 = smov 0   ;;  %s1888_s0 = inlined_call_operand.vmem [shape: bf16[512,1152], index: 0, kind: input, shape index: {}]   ;;  %s1889_s1 = inlined_call_operand.vmem [shape: bf16[1152,128], index: 1, kind: input, shape index: {}]   ;;  %s1890_s2 = inlined_call_operand.vmem [shape: f32[1,128], index: 2, kind: input, shape index: {}]   ;;  %s1891_s3 = inlined_call_operand.vmem [shape: f32[1,128], index: 3, kind: input, shape index: {}]   ;;  %s1892_s4 = inlined_call_operand.vmem [shape: bf16[512,128], index: 4, kind: output, shape index: {}]  }
   0x1   :  { %s1610_s17 = smov 0   ;;  %s1612_s18 = smov 0  }
   0x2   :  { %s1614_s19 = smov 0   ;;  %s1616_s20 = smov 0  }
   0x3   :  { %s1618_s21 = smov 0  }
   0x4 LB: > { %s26_s22 = sadd.s32 1, %s1570_s19  ;;  %s33_s23 = sadd.s32 1, %s1574_s20  ;;  %s1578_s21 = sphi %s1618_s21, %s14_s21   ;;  %s1574_s20 = sphi %s1616_s20, %s1898_s20   ;;  %s1570_s19 = sphi %s1614_s19, %s1897_s19   ;;  %s1566_s18 = sphi %s1612_s18, %s1896_s18   ;;  %s1562_s17 = sphi %s1610_s17, %s1895_s17   ;;  %s1558_s16 = sphi %s1608_s16, %s1894_s16   ;;  %s1554_s15 = sphi %s1606_s15, %s1893_s15  }
   0x5   : > { %p27_p0 = scmp.ge.s32.totalorder %s26_s22, 9  ;;  %p49_p1 = scmp.ne.s32.totalorder %s1558_s16, %s1554_s15 }
   0x6   : > { %p50_p2 = scmp.eq.s32.totalorder %s1578_s21, 0  ;;  %s42_s27 = sadd.s32 1, %s1558_s16 }
   0x7   : > { %s1900_s22 = smov (%p27_p0, %s26_s22), 0  ;;  %s1902_s23 = smov (!%p27_p0, %s33_s23), %s1574_s20 }
   0x8   : > { %p51_p3 = por %p50_p2, %p49_p1  ;;  %p35_p4 = scmp.ge.s32.totalorder %s1902_s23, 2 }
   0x9   : > { %s38_s24 = ssub.s32 %s1570_s19, %s1900_s22  ;;  %p1210_p6 = scmp.ge.s32.totalorder %s1578_s21, 18 }
   0xa   : > { %s1904_s23 = smov (%p35_p4, %s1902_s23), 0 }
   0xb   : > { %s37_s25 = ssub.s32 %s1574_s20, %s1904_s23  ;;  %195 = sbr.rel (%p1210_p6) target bundleno = 55 (0x37), region = 24 }
   0xc   : > { %s39_s26 = sor.u32 %s38_s24, %s37_s25 }
   0xd   : > { %p40_p5 = scmp.eq.s32.totalorder %s39_s26, 0 }
   0xf   : > { %s1657_s28 = scalar_select %p40_p5, %s1558_s16, %s42_s27  }
  0x10   : > { %198 = sbr.rel (!%p51_p3) target bundleno = 55 (0x37), region = 28  ;;  %s200_s29 = sand.u32 (%p51_p3), 1, %s1558_s16  }
  0x11   : > { %s1464_s30 = smul.u32 (%p51_p3), 288, %s1574_s20  ;;  %s1211_s5 = sshll.u32 (%p51_p3), %s200_s29, 7 }
  0x12   : > { %s1671_s11 = scalar_lea.vmem (%p51_p3), [#allocation3], %s1211_s5 }
  0x13   : > { %s205_s6 = sadd.s32 (%p51_p3), %s1570_s19, %s1464_s30 }
  0x14   : > { %s1214_s7 = sshll.u32 (%p51_p3), %s205_s6, 2 }
  0x15   : > { %s1666_s10 = scalar_lea.vmem %s1888_s0, %s1214_s7 }
  0x16   : > { %v224_v0 = vld [vmem:[%s1666_s10] sm:$0xf]  ;;  %v226_v1 = vld [vmem:[%s1666_s10 + $0x24] sm:$0xf]  ;;  %v228_v2 = vld [vmem:[%s1666_s10 + $0x48] sm:$0xf] }
  0x17   : > { %225 = vst [vmem:[%s1671_s11] sm:$0xf] %v224_v0  ;;  %v230_v3 = vld [vmem:[%s1666_s10 + $0x6c] sm:$0xf]  ;;  %v232_v4 = vld [vmem:[%s1666_s10 + $0x90] sm:$0xf] }
  0x18   : > { %227 = vst [vmem:[%s1671_s11 + $0x4] sm:$0xf] %v226_v1  ;;  %v234_v5 = vld [vmem:[%s1666_s10 + $0xb4] sm:$0xf]  ;;  %v236_v6 = vld [vmem:[%s1666_s10 + $0xd8] sm:$0xf] }
  0x19   : > { %229 = vst [vmem:[%s1671_s11 + $0x8] sm:$0xf] %v228_v2  ;;  %v238_v7 = vld [vmem:[%s1666_s10 + $0xfc] sm:$0xf]  ;;  %v240_v8 = vld [vmem:[%s1666_s10 + $0x120] sm:$0xf] }
  0x1a   : > { %231 = vst [vmem:[%s1671_s11 + $0xc] sm:$0xf] %v230_v3  ;;  %v242_v9 = vld [vmem:[%s1666_s10 + $0x144] sm:$0xf]  ;;  %v244_v10 = vld [vmem:[%s1666_s10 + $0x168] sm:$0xf] }
  0x1b   : > { %233 = vst [vmem:[%s1671_s11 + $0x10] sm:$0xf] %v232_v4  ;;  %v246_v11 = vld [vmem:[%s1666_s10 + $0x18c] sm:$0xf]  ;;  %v248_v12 = vld [vmem:[%s1666_s10 + $0x1b0] sm:$0xf] }
  0x1c   : > { %235 = vst [vmem:[%s1671_s11 + $0x14] sm:$0xf] %v234_v5  ;;  %v250_v13 = vld [vmem:[%s1666_s10 + $0x1d4] sm:$0xf]  ;;  %v252_v14 = vld [vmem:[%s1666_s10 + $0x1f8] sm:$0xf] }
  0x1d   : > { %237 = vst [vmem:[%s1671_s11 + $0x18] sm:$0xf] %v236_v6  ;;  %v254_v15 = vld [vmem:[%s1666_s10 + $0x21c] sm:$0xf]  ;;  %v256_v16 = vld [vmem:[%s1666_s10 + $0x240] sm:$0xf] }
  0x1e   : > { %239 = vst [vmem:[%s1671_s11 + $0x1c] sm:$0xf] %v238_v7  ;;  %v258_v17 = vld [vmem:[%s1666_s10 + $0x264] sm:$0xf]  ;;  %v260_v18 = vld [vmem:[%s1666_s10 + $0x288] sm:$0xf] }
  0x1f   : > { %241 = vst [vmem:[%s1671_s11 + $0x20] sm:$0xf] %v240_v8  ;;  %v262_v19 = vld [vmem:[%s1666_s10 + $0x2ac] sm:$0xf]  ;;  %v264_v20 = vld [vmem:[%s1666_s10 + $0x2d0] sm:$0xf] }
  0x20   : > { %243 = vst [vmem:[%s1671_s11 + $0x24] sm:$0xf] %v242_v9  ;;  %v266_v21 = vld [vmem:[%s1666_s10 + $0x2f4] sm:$0xf]  ;;  %v268_v22 = vld [vmem:[%s1666_s10 + $0x318] sm:$0xf] }
  0x21   : > { %245 = vst [vmem:[%s1671_s11 + $0x28] sm:$0xf] %v244_v10  ;;  %v270_v23 = vld [vmem:[%s1666_s10 + $0x33c] sm:$0xf]  ;;  %v272_v24 = vld [vmem:[%s1666_s10 + $0x360] sm:$0xf] }
  0x22   : > { %247 = vst [vmem:[%s1671_s11 + $0x2c] sm:$0xf] %v246_v11  ;;  %v274_v25 = vld [vmem:[%s1666_s10 + $0x384] sm:$0xf]  ;;  %v276_v26 = vld [vmem:[%s1666_s10 + $0x3a8] sm:$0xf] }
  0x23   : > { %249 = vst [vmem:[%s1671_s11 + $0x30] sm:$0xf] %v248_v12  ;;  %v278_v27 = vld [vmem:[%s1666_s10 + $0x3cc] sm:$0xf]  ;;  %v280_v28 = vld [vmem:[%s1666_s10 + $0x3f0] sm:$0xf] }
  0x24   : > { %251 = vst [vmem:[%s1671_s11 + $0x34] sm:$0xf] %v250_v13  ;;  %v282_v29 = vld [vmem:[%s1666_s10 + $0x414] sm:$0xf]  ;;  %v284_v30 = vld [vmem:[%s1666_s10 + $0x438] sm:$0xf] }
  0x25   : > { %253 = vst [vmem:[%s1671_s11 + $0x38] sm:$0xf] %v252_v14  ;;  %v286_v31 = vld [vmem:[%s1666_s10 + $0x45c] sm:$0xf] }
  0x26   : > { %255 = vst [vmem:[%s1671_s11 + $0x3c] sm:$0xf] %v254_v15 }
  0x27   : > { %257 = vst [vmem:[%s1671_s11 + $0x40] sm:$0xf] %v256_v16 }
  0x28   : > { %259 = vst [vmem:[%s1671_s11 + $0x44] sm:$0xf] %v258_v17 }
  0x29   : > { %261 = vst [vmem:[%s1671_s11 + $0x48] sm:$0xf] %v260_v18 }
  0x2a   : > { %263 = vst [vmem:[%s1671_s11 + $0x4c] sm:$0xf] %v262_v19 }
  0x2b   : > { %265 = vst [vmem:[%s1671_s11 + $0x50] sm:$0xf] %v264_v20 }
  0x2c   : > { %267 = vst [vmem:[%s1671_s11 + $0x54] sm:$0xf] %v266_v21 }
  0x2d   : > { %269 = vst [vmem:[%s1671_s11 + $0x58] sm:$0xf] %v268_v22 }
  0x2e   : > { %271 = vst [vmem:[%s1671_s11 + $0x5c] sm:$0xf] %v270_v23 }
  0x2f   : > { %273 = vst [vmem:[%s1671_s11 + $0x60] sm:$0xf] %v272_v24 }
  0x30   : > { %275 = vst [vmem:[%s1671_s11 + $0x64] sm:$0xf] %v274_v25 }
  0x31   : > { %277 = vst [vmem:[%s1671_s11 + $0x68] sm:$0xf] %v276_v26 }
  0x32   : > { %279 = vst [vmem:[%s1671_s11 + $0x6c] sm:$0xf] %v278_v27 }
  0x33   : > { %281 = vst [vmem:[%s1671_s11 + $0x70] sm:$0xf] %v280_v28 }
  0x34   : > { %283 = vst [vmem:[%s1671_s11 + $0x74] sm:$0xf] %v282_v29 }
  0x35   : > { %285 = vst [vmem:[%s1671_s11 + $0x78] sm:$0xf] %v284_v30 }
  0x36   : > { %287 = vst [vmem:[%s1671_s11 + $0x7c] sm:$0xf] %v286_v31 }
  0x37 PF: > { %p1215_p7 = scmp.ge.s32.totalorder %s1578_s21, 1  ;;  %p386_p8 = scmp.lt.s32.totalorder %s1578_s21, 19 }
  0x39   : > { %p387_p9 = pnand %p1215_p7, %p386_p8 }
  0x3a   : > { %s393_s12 = sand.u32 (!%p387_p9), 1, %s1554_s15   ;;  %s1217_s13 = sshll.u32 (!%p387_p9), %s1562_s17, 4 }
  0x3b   : > { %390 = sbr.rel (%p387_p9) target bundleno = 365 (0x16d), region = 73  ;;  %s1216_s14 = sshll.u32 (!%p387_p9), %s393_s12, 7 }
  0x3c   : > { %p437_p10 = scmp.lt.s32.totalorder (!%p387_p9), %s1217_s13, 143  ;;  %s1219_s24 = sshll.u32 (!%p387_p9), %s1566_s18, 5 }
  0x3d   : > { %p452_p11 = scmp.lt.s32.totalorder (!%p387_p9), %s1219_s24, 63  ;;  %s1749_s15 = scalar_lea.vmem (!%p387_p9), [#allocation3], %s1216_s14 }
  0x3e   : > { %p1221_p12 = scmp.ne.s32.totalorder (!%p387_p9), %s1562_s17, 0 }
  0x40   : > { %s1906_s13 = smov (!%p437_p10, %s1217_s13), 143  ;;  %s1908_s24 = smov (!%p452_p11, %s1219_s24), 63 }
  0x41   : > { %s1218_s25 = sshll.u32 %s1906_s13, 2  ;;  %s1220_s30 = sshll.u32 %s1908_s24, 2 }
  0x42   : > { %s1742_s29 = scalar_lea.vmem %s1889_s1, %s1218_s25  ;;  %s1747_s7 = scalar_lea.vmem %s1892_s4, %s1220_s30 }
  0x43   : > { %463 = sbr.rel (%p1221_p12) target bundleno = 105 (0x69), region = 81 }
  0x48   : > { %v1580_v32 = vmov 0.0  }
  0x49   : > { %464 = vst [vmem:[#allocation2 + $0xb0] sm:$0xff] %v1580_v32 }
  0x4a   : > { %465 = vst [vmem:[#allocation2] sm:$0xff] %v1580_v32 }
  0x4b   : > { %466 = vst [vmem:[#allocation2 + $0xd8] sm:$0xff] %v1580_v32 }
  0x4c   : > { %467 = vst [vmem:[#allocation2 + $0x18] sm:$0xff] %v1580_v32 }
  0x4d   : > { %468 = vst [vmem:[#allocation2 + $0x50] sm:$0xff] %v1580_v32 }
  0x4e   : > { %469 = vst [vmem:[#allocation2 + $0x68] sm:$0xff] %v1580_v32 }
  0x4f   : > { %470 = vst [vmem:[#allocation2 + $0x30] sm:$0xff] %v1580_v32 }
  0x50   : > { %471 = vst [vmem:[#allocation2 + $0x48] sm:$0xff] %v1580_v32 }
  0x51   : > { %472 = vst [vmem:[#allocation2 + $0x80] sm:$0xff] %v1580_v32 }
  0x52   : > { %473 = vst [vmem:[#allocation2 + $0x88] sm:$0xff] %v1580_v32 }
  0x53   : > { %474 = vst [vmem:[#allocation2 + $0xe8] sm:$0xff] %v1580_v32 }
  0x54   : > { %475 = vst [vmem:[#allocation2 + $0xb8] sm:$0xff] %v1580_v32 }
  0x55   : > { %476 = vst [vmem:[#allocation2 + $0x60] sm:$0xff] %v1580_v32 }
  0x56   : > { %477 = vst [vmem:[#allocation2 + $0xf0] sm:$0xff] %v1580_v32 }
  0x57   : > { %478 = vst [vmem:[#allocation2 + $0x8] sm:$0xff] %v1580_v32 }
  0x58   : > { %479 = vst [vmem:[#allocation2 + $0x78] sm:$0xff] %v1580_v32 }
  0x59   : > { %480 = vst [vmem:[#allocation2 + $0x38] sm:$0xff] %v1580_v32 }
  0x5a   : > { %481 = vst [vmem:[#allocation2 + $0x58] sm:$0xff] %v1580_v32 }
  0x5b   : > { %482 = vst [vmem:[#allocation2 + $0x40] sm:$0xff] %v1580_v32 }
  0x5c   : > { %483 = vst [vmem:[#allocation2 + $0xc8] sm:$0xff] %v1580_v32 }
  0x5d   : > { %484 = vst [vmem:[#allocation2 + $0xe0] sm:$0xff] %v1580_v32 }
  0x5e   : > { %485 = vst [vmem:[#allocation2 + $0x90] sm:$0xff] %v1580_v32 }
  0x5f   : > { %486 = vst [vmem:[#allocation2 + $0x70] sm:$0xff] %v1580_v32 }
  0x60   : > { %487 = vst [vmem:[#allocation2 + $0xc0] sm:$0xff] %v1580_v32 }
  0x61   : > { %488 = vst [vmem:[#allocation2 + $0xa8] sm:$0xff] %v1580_v32 }
  0x62   : > { %489 = vst [vmem:[#allocation2 + $0xd0] sm:$0xff] %v1580_v32 }
  0x63   : > { %490 = vst [vmem:[#allocation2 + $0x10] sm:$0xff] %v1580_v32 }
  0x64   : > { %491 = vst [vmem:[#allocation2 + $0x28] sm:$0xff] %v1580_v32 }
  0x65   : > { %492 = vst [vmem:[#allocation2 + $0xa0] sm:$0xff] %v1580_v32 }
  0x66   : > { %493 = vst [vmem:[#allocation2 + $0xf8] sm:$0xff] %v1580_v32 }
  0x67   : > { %494 = vst [vmem:[#allocation2 + $0x20] sm:$0xff] %v1580_v32 }
  0x68   : > { %495 = vst [vmem:[#allocation2 + $0x98] sm:$0xff] %v1580_v32 }
  0x69 PF: > { %v1344_v33 = vld [vmem:[%s1742_s29 + $0x38] sm:$0xff]  ;;  %v1343_v34 = vld [vmem:[%s1742_s29 + $0x30] sm:$0xff]  ;;  %v1342_v35 = vld [vmem:[%s1742_s29 + $0x28] sm:$0xff]  ;;  %p1318_p13 = scmp.ne.s32.totalorder %s1562_s17, 8 }
  0x6a   : > { %720 = vmatpush.bf16.msra.mxu0 %v1344_v33  ;;  %1440 = vmatpush.bf16.msra.mxu1 %v1344_v33  ;;  %v1341_v36 = vld [vmem:[%s1742_s29 + $0x20] sm:$0xff]  ;;  %v1340_v37 = vld [vmem:[%s1742_s29 + $0x18] sm:$0xff]  ;;  %v1339_v38 = vld [vmem:[%s1742_s29 + $0x10] sm:$0xff] }
  0x6b   : > { %1441 = vmatpush.bf16.msra.mxu2 %v1344_v33  ;;  %1442 = vmatpush.bf16.msra.mxu3 %v1344_v33  ;;  %v1338_v39 = vld [vmem:[%s1742_s29 + $0x8] sm:$0xff]  ;;  %v1337_v40 = vld [vmem:[%s1742_s29] sm:$0xff]  ;;  %v1323_v49 = vld [vmem:[%s1749_s15 + $0x10] sm:$0xff] }
  0x6c   : > { %v1321_v41 = vld [vmem:[%s1749_s15] sm:$0xff]  ;;  %v1322_v45 = vld [vmem:[%s1749_s15 + $0x8] sm:$0xff]  ;;  %v1327_v50 = vld [vmem:[%s1749_s15 + $0x30] sm:$0xff] }
  0x6d   : > { %v1325_v42 = vld [vmem:[%s1749_s15 + $0x20] sm:$0xff]  ;;  %v1326_v46 = vld [vmem:[%s1749_s15 + $0x28] sm:$0xff]  ;;  %v1331_v51 = vld [vmem:[%s1749_s15 + $0x50] sm:$0xff] }
  0x6e   : > { %721 = vmatpush.bf16.msra.mxu0 %v1343_v34  ;;  %1443 = vmatpush.bf16.msra.mxu1 %v1343_v34  ;;  %v1329_v43 = vld [vmem:[%s1749_s15 + $0x40] sm:$0xff]  ;;  %v1330_v47 = vld [vmem:[%s1749_s15 + $0x48] sm:$0xff]  ;;  %v1335_v52 = vld [vmem:[%s1749_s15 + $0x70] sm:$0xff] }
  0x6f   : > { %1444 = vmatpush.bf16.msra.mxu2 %v1343_v34  ;;  %1445 = vmatpush.bf16.msra.mxu3 %v1343_v34  ;;  %v1333_v44 = vld [vmem:[%s1749_s15 + $0x60] sm:$0xff]  ;;  %v1334_v48 = vld [vmem:[%s1749_s15 + $0x68] sm:$0xff]  ;;  %v1324_v53 = vld [vmem:[%s1749_s15 + $0x18] sm:$0xff] }
  0x70   : > { %v1328_v54 = vld [vmem:[%s1749_s15 + $0x38] sm:$0xff]  ;;  %v496_v57 = vld [vmem:[#allocation2 + $0xb0] sm:$0xff]  ;;  %v504_v58 = vld [vmem:[#allocation2 + $0x80] sm:$0xff] }
  0x71   : > { %v1332_v55 = vld [vmem:[%s1749_s15 + $0x58] sm:$0xff]  ;;  %v520_v0 = vld [vmem:[#allocation2 + $0xa8] sm:$0xff]  ;;  %v497_v1 = vld [vmem:[#allocation2] sm:$0xff] }
  0x72   : > { %722 = vmatpush.bf16.msra.mxu0 %v1342_v35  ;;  %1446 = vmatpush.bf16.msra.mxu1 %v1342_v35  ;;  %v1336_v56 = vld [vmem:[%s1749_s15 + $0x78] sm:$0xff]  ;;  %v505_v2 = vld [vmem:[#allocation2 + $0x88] sm:$0xff]  ;;  %v521_v12 = vld [vmem:[#allocation2 + $0xd0] sm:$0xff] }
  0x73   : > { %1447 = vmatpush.bf16.msra.mxu2 %v1342_v35  ;;  %1448 = vmatpush.bf16.msra.mxu3 %v1342_v35  ;;  %v512_v63 = vld [vmem:[#allocation2 + $0x38] sm:$0xff]  ;;  %v506_v14 = vld [vmem:[#allocation2 + $0xe8] sm:$0xff]  ;;  %v514_v23 = vld [vmem:[#allocation2 + $0x40] sm:$0xff] }
  0x74   : > { %v513_v11 = vld [vmem:[#allocation2 + $0x58] sm:$0xff]  ;;  %v522_v24 = vld [vmem:[#allocation2 + $0x10] sm:$0xff]  ;;  %v515_v35 = vld [vmem:[#allocation2 + $0xc8] sm:$0xff] }
  0x75   : > { %v498_v13 = vld [vmem:[#allocation2 + $0xd8] sm:$0xff] }
  0x76   : > { %723 = vmatpush.bf16.msra.mxu0 %v1341_v36  ;;  %1449 = vmatpush.bf16.msra.mxu1 %v1341_v36  ;;  %v499_v25 = vld [vmem:[#allocation2 + $0x18] sm:$0xff] }
  0x77   : > { %1450 = vmatpush.bf16.msra.mxu2 %v1341_v36  ;;  %1451 = vmatpush.bf16.msra.mxu3 %v1341_v36  ;;  %v507_v26 = vld [vmem:[#allocation2 + $0xb8] sm:$0xff]  ;;  %v523_v36 = vld [vmem:[#allocation2 + $0x28] sm:$0xff] }
  0x7a   : > { %724 = vmatpush.bf16.msra.mxu0 %v1340_v37  ;;  %1452 = vmatpush.bf16.msra.mxu1 %v1340_v37 }
  0x7b   : > { %1453 = vmatpush.bf16.msra.mxu2 %v1340_v37  ;;  %1454 = vmatpush.bf16.msra.mxu3 %v1340_v37  ;;  %v500_v37 = vld [vmem:[#allocation2 + $0x50] sm:$0xff] }
  0x7e   : > { %725 = vmatpush.bf16.msra.mxu0 %v1339_v38  ;;  %1455 = vmatpush.bf16.msra.mxu1 %v1339_v38 }
  0x7f   : > { %1456 = vmatpush.bf16.msra.mxu2 %v1339_v38  ;;  %1457 = vmatpush.bf16.msra.mxu3 %v1339_v38  ;;  %v508_v38 = vld [vmem:[#allocation2 + $0x60] sm:$0xff] }
  0x82   : > { %726 = vmatpush.bf16.msra.mxu0 %v1338_v39  ;;  %1458 = vmatpush.bf16.msra.mxu1 %v1338_v39 }
  0x83   : > { %1459 = vmatpush.bf16.msra.mxu2 %v1338_v39  ;;  %1460 = vmatpush.bf16.msra.mxu3 %v1338_v39 }
  0x86   : > { %727 = vmatpush.bf16.msra.mxu0 %v1337_v40  ;;  %1461 = vmatpush.bf16.msra.mxu1 %v1337_v40 }
  0x87   : > { %1462 = vmatpush.bf16.msra.mxu2 %v1337_v40  ;;  %1463 = vmatpush.bf16.msra.mxu3 %v1337_v40 }
  0x89   : > { %728 = vmatmul.bf16.vlgmr.msra.gmra.mxu0 %v1321_v41  ;;  %748 = vmatmul.bf16.vlgmr.msra.gmra.mxu1 %v1325_v42 }
  0x8a   : > { %768 = vmatmul.bf16.vlgmr.msra.gmra.mxu2 %v1329_v43  ;;  %788 = vmatmul.bf16.vlgmr.msra.gmra.mxu3 %v1333_v44 }
  0x99   : > { %733 = vmatmul.bf16.gmra.mxu0 %v1322_v45  ;;  %753 = vmatmul.bf16.gmra.mxu1 %v1326_v46 }
  0x9a   : > { %773 = vmatmul.bf16.gmra.mxu2 %v1330_v47  ;;  %793 = vmatmul.bf16.gmra.mxu3 %v1334_v48  ;;  %v516_v47 = vld [vmem:[#allocation2 + $0xe0] sm:$0xff] }
  0x9b   : > { %v524_v48 = vld [vmem:[#allocation2 + $0xa0] sm:$0xff] }
  0xa9   : > { %738 = vmatmul.bf16.gmra.mxu0 %v1323_v49  ;;  %758 = vmatmul.bf16.gmra.mxu1 %v1327_v50  ;;  %v501_v49 = vld [vmem:[#allocation2 + $0x68] sm:$0xff]  ;;  %v509_v50 = vld [vmem:[#allocation2 + $0xf0] sm:$0xff] }
  0xaa   : > { %778 = vmatmul.bf16.gmra.mxu2 %v1331_v51  ;;  %798 = vmatmul.bf16.gmra.mxu3 %v1335_v52 }
  0xb9   : > { %743 = vmatmul.bf16.gmra.mxu0 %v1324_v53  ;;  %763 = vmatmul.bf16.gmra.mxu1 %v1328_v54 }
  0xba   : > { %783 = vmatmul.bf16.gmra.mxu2 %v1332_v55  ;;  %803 = vmatmul.bf16.gmra.mxu3 %v1336_v56 }
 0x106   : > { %v729_v59 = vpop.f32.mrf.mxu0  ;;  %v749_v60 = vpop.f32.mrf.mxu1 }
 0x107   : > { %v809_v61 = vadd.f32 %v729_v59, %v496_v57  ;;  %v817_v62 = vadd.f32 %v749_v60, %v504_v58  ;;  %v517_v59 = vld [vmem:[#allocation2 + $0x90] sm:$0xff]  ;;  %v525_v60 = vld [vmem:[#allocation2 + $0xf8] sm:$0xff] }
 0x109   : > { %841 = vst [vmem:[#allocation2 + $0xb0] sm:$0xff] %v809_v61  ;;  %v502_v61 = vld [vmem:[#allocation2 + $0x30] sm:$0xff] }
 0x10a   : > { %849 = vst [vmem:[#allocation2 + $0x80] sm:$0xff] %v817_v62  ;;  %v510_v62 = vld [vmem:[#allocation2 + $0x8] sm:$0xff] }
 0x10d   : > { %v769_v3 = vpop.f32.mrf.mxu2  ;;  %v789_v4 = vpop.f32.mrf.mxu3 }
 0x10e   : > { %v825_v5 = vadd.f32 %v769_v3, %v512_v63  ;;  %v833_v6 = vadd.f32 %v789_v4, %v520_v0  ;;  %v731_v7 = vpop.f32.mrf.mxu0  ;;  %v751_v8 = vpop.f32.mrf.mxu1 }
 0x10f   : > { %v810_v9 = vadd.f32 %v731_v7, %v497_v1  ;;  %v818_v10 = vadd.f32 %v751_v8, %v505_v2  ;;  %v518_v7 = vld [vmem:[#allocation2 + $0x70] sm:$0xff]  ;;  %v526_v8 = vld [vmem:[#allocation2 + $0x20] sm:$0xff] }
 0x110   : > { %857 = vst [vmem:[#allocation2 + $0x38] sm:$0xff] %v825_v5 }
 0x111   : > { %865 = vst [vmem:[#allocation2 + $0xa8] sm:$0xff] %v833_v6 }
 0x112   : > { %842 = vst [vmem:[#allocation2] sm:$0xff] %v810_v9  ;;  %v503_v9 = vld [vmem:[#allocation2 + $0x48] sm:$0xff] }
 0x113   : > { %850 = vst [vmem:[#allocation2 + $0x88] sm:$0xff] %v818_v10  ;;  %v511_v10 = vld [vmem:[#allocation2 + $0x78] sm:$0xff] }
 0x115   : > { %v771_v15 = vpop.f32.mrf.mxu2  ;;  %v791_v16 = vpop.f32.mrf.mxu3 }
 0x116   : > { %v826_v17 = vadd.f32 %v771_v15, %v513_v11  ;;  %v834_v18 = vadd.f32 %v791_v16, %v521_v12  ;;  %v734_v19 = vpop.f32.mrf.mxu0  ;;  %v754_v20 = vpop.f32.mrf.mxu1 }
 0x117   : > { %v811_v21 = vadd.f32 %v734_v19, %v498_v13  ;;  %v819_v22 = vadd.f32 %v754_v20, %v506_v14  ;;  %v519_v19 = vld [vmem:[#allocation2 + $0xc0] sm:$0xff]  ;;  %v527_v20 = vld [vmem:[#allocation2 + $0x98] sm:$0xff] }
 0x118   : > { %858 = vst [vmem:[#allocation2 + $0x58] sm:$0xff] %v826_v17 }
 0x119   : > { %866 = vst [vmem:[#allocation2 + $0xd0] sm:$0xff] %v834_v18 }
 0x11a   : > { %843 = vst [vmem:[#allocation2 + $0xd8] sm:$0xff] %v811_v21 }
 0x11b   : > { %851 = vst [vmem:[#allocation2 + $0xe8] sm:$0xff] %v819_v22 }
 0x11d   : > { %v774_v27 = vpop.f32.mrf.mxu2  ;;  %v794_v28 = vpop.f32.mrf.mxu3 }
 0x11e   : > { %v827_v29 = vadd.f32 %v774_v27, %v514_v23  ;;  %v835_v30 = vadd.f32 %v794_v28, %v522_v24  ;;  %v736_v31 = vpop.f32.mrf.mxu0  ;;  %v756_v32 = vpop.f32.mrf.mxu1 }
 0x11f   : > { %v812_v33 = vadd.f32 %v736_v31, %v499_v25  ;;  %v820_v34 = vadd.f32 %v756_v32, %v507_v26 }
 0x120   : > { %859 = vst [vmem:[#allocation2 + $0x40] sm:$0xff] %v827_v29 }
 0x121   : > { %867 = vst [vmem:[#allocation2 + $0x10] sm:$0xff] %v835_v30 }
 0x122   : > { %844 = vst [vmem:[#allocation2 + $0x18] sm:$0xff] %v812_v33 }
 0x123   : > { %852 = vst [vmem:[#allocation2 + $0xb8] sm:$0xff] %v820_v34 }
 0x125   : > { %v776_v39 = vpop.f32.mrf.mxu2  ;;  %v796_v40 = vpop.f32.mrf.mxu3 }
 0x126   : > { %v828_v41 = vadd.f32 %v776_v39, %v515_v35  ;;  %v836_v42 = vadd.f32 %v796_v40, %v523_v36  ;;  %v739_v43 = vpop.f32.mrf.mxu0  ;;  %v759_v44 = vpop.f32.mrf.mxu1 }
 0x127   : > { %v813_v45 = vadd.f32 %v739_v43, %v500_v37  ;;  %v821_v46 = vadd.f32 %v759_v44, %v508_v38 }
 0x128   : > { %860 = vst [vmem:[#allocation2 + $0xc8] sm:$0xff] %v828_v41 }
 0x129   : > { %868 = vst [vmem:[#allocation2 + $0x28] sm:$0xff] %v836_v42 }
 0x12a   : > { %845 = vst [vmem:[#allocation2 + $0x50] sm:$0xff] %v813_v45 }
 0x12b   : > { %853 = vst [vmem:[#allocation2 + $0x60] sm:$0xff] %v821_v46 }
 0x12d   : > { %v779_v51 = vpop.f32.mrf.mxu2  ;;  %v799_v52 = vpop.f32.mrf.mxu3 }
 0x12e   : > { %v829_v53 = vadd.f32 %v779_v51, %v516_v47  ;;  %v837_v54 = vadd.f32 %v799_v52, %v524_v48  ;;  %v741_v55 = vpop.f32.mrf.mxu0  ;;  %v761_v56 = vpop.f32.mrf.mxu1 }
 0x12f   : > { %v814_v57 = vadd.f32 %v741_v55, %v501_v49  ;;  %v822_v58 = vadd.f32 %v761_v56, %v509_v50 }
 0x130   : > { %861 = vst [vmem:[#allocation2 + $0xe0] sm:$0xff] %v829_v53 }
 0x131   : > { %869 = vst [vmem:[#allocation2 + $0xa0] sm:$0xff] %v837_v54 }
 0x132   : > { %846 = vst [vmem:[#allocation2 + $0x68] sm:$0xff] %v814_v57 }
 0x133   : > { %854 = vst [vmem:[#allocation2 + $0xf0] sm:$0xff] %v822_v58 }
 0x135   : > { %v781_v63 = vpop.f32.mrf.mxu2  ;;  %v801_v0 = vpop.f32.mrf.mxu3 }
 0x136   : > { %v830_v1 = vadd.f32 %v781_v63, %v517_v59  ;;  %v838_v2 = vadd.f32 %v801_v0, %v525_v60  ;;  %v744_v3 = vpop.f32.mrf.mxu0  ;;  %v764_v4 = vpop.f32.mrf.mxu1 }
 0x137   : > { %v815_v5 = vadd.f32 %v744_v3, %v502_v61  ;;  %v823_v6 = vadd.f32 %v764_v4, %v510_v62 }
 0x138   : > { %862 = vst [vmem:[#allocation2 + $0x90] sm:$0xff] %v830_v1 }
 0x139   : > { %870 = vst [vmem:[#allocation2 + $0xf8] sm:$0xff] %v838_v2 }
 0x13a   : > { %847 = vst [vmem:[#allocation2 + $0x30] sm:$0xff] %v815_v5 }
 0x13b   : > { %855 = vst [vmem:[#allocation2 + $0x8] sm:$0xff] %v823_v6 }
 0x13d   : > { %v784_v11 = vpop.f32.mrf.mxu2  ;;  %v804_v12 = vpop.f32.mrf.mxu3 }
 0x13e   : > { %v831_v13 = vadd.f32 %v784_v11, %v518_v7  ;;  %v839_v14 = vadd.f32 %v804_v12, %v526_v8  ;;  %v746_v15 = vpop.f32.mrf.mxu0  ;;  %v766_v16 = vpop.f32.mrf.mxu1 }
 0x13f   : > { %v816_v17 = vadd.f32 %v746_v15, %v503_v9  ;;  %v824_v18 = vadd.f32 %v766_v16, %v511_v10 }
 0x140   : > { %863 = vst [vmem:[#allocation2 + $0x70] sm:$0xff] %v831_v13 }
 0x141   : > { %871 = vst [vmem:[#allocation2 + $0x20] sm:$0xff] %v839_v14 }
 0x142   : > { %848 = vst [vmem:[#allocation2 + $0x48] sm:$0xff] %v816_v17 }
 0x143   : > { %856 = vst [vmem:[#allocation2 + $0x78] sm:$0xff] %v824_v18 }
 0x145   : > { %v786_v21 = vpop.f32.mrf.mxu2  ;;  %v806_v22 = vpop.f32.mrf.mxu3  ;;  %876 = sbr.rel (%p1318_p13) target bundleno = 365 (0x16d), region = 85 }
 0x146   : > { %v832_v23 = vadd.f32 %v786_v21, %v519_v19  ;;  %v840_v24 = vadd.f32 %v806_v22, %v527_v20 }
 0x148   : > { %864 = vst [vmem:[#allocation2 + $0xc0] sm:$0xff] %v832_v23 }
 0x149   : > { %872 = vst [vmem:[#allocation2 + $0x98] sm:$0xff] %v840_v24 }
 0x14a   : > { %v877_v25 = vld [vmem:[#allocation2 + $0xb0] sm:$0xff]  ;;  %v878_v26 = vld [vmem:[#allocation2] sm:$0xff]  ;;  %v879_v29 = vld [vmem:[#allocation2 + $0xd8] sm:$0xff] }
 0x14b   : > { %v1780_v27 = vld [vmem:[%s1890_s2] ss:$0 sm:$0xff]  ;;  %v880_v30 = vld [vmem:[#allocation2 + $0x18] sm:$0xff]  ;;  %v881_v31 = vld [vmem:[#allocation2 + $0x50] sm:$0xff] }
 0x14c   : > { %v1785_v28 = vld [vmem:[%s1891_s3] ss:$0 sm:$0xff]  ;;  %v913_v32 = vmul.f32 %v1780_v27, %v877_v25  ;;  %v914_v33 = vmul.f32 %v1780_v27, %v878_v26  ;;  %v915_v34 = vmul.f32 %v1780_v27, %v879_v29  ;;  %v916_v35 = vmul.f32 %v1780_v27, %v880_v30  ;;  %v882_v36 = vld [vmem:[#allocation2 + $0x68] sm:$0xff]  ;;  %v883_v37 = vld [vmem:[#allocation2 + $0x30] sm:$0xff] }
 0x14d   : > { %v884_v38 = vld [vmem:[#allocation2 + $0x48] sm:$0xff]  ;;  %v917_v39 = vmul.f32 %v1780_v27, %v881_v31  ;;  %v918_v40 = vmul.f32 %v1780_v27, %v882_v36  ;;  %v919_v41 = vmul.f32 %v1780_v27, %v883_v37  ;;  %v885_v51 = vld [vmem:[#allocation2 + $0x80] sm:$0xff]  ;;  %v888_v58 = vld [vmem:[#allocation2 + $0xb8] sm:$0xff] }
 0x14e   : > { %v920_v42 = vmul.f32 %v1780_v27, %v884_v38  ;;  %v949_v43 = vadd.f32 %v1785_v28, %v913_v32  ;;  %v950_v44 = vadd.f32 %v1785_v28, %v914_v33  ;;  %v951_v45 = vadd.f32 %v1785_v28, %v915_v34  ;;  %v886_v52 = vld [vmem:[#allocation2 + $0x88] sm:$0xff]  ;;  %v889_v63 = vld [vmem:[#allocation2 + $0x60] sm:$0xff]  ;;  %v890_v0 = vld [vmem:[#allocation2 + $0xf0] sm:$0xff] }
 0x14f   : > { %v952_v46 = vadd.f32 %v1785_v28, %v916_v35  ;;  %v953_v47 = vadd.f32 %v1785_v28, %v917_v39  ;;  %v954_v48 = vadd.f32 %v1785_v28, %v918_v40  ;;  %v955_v49 = vadd.f32 %v1785_v28, %v919_v41  ;;  %v887_v57 = vld [vmem:[#allocation2 + $0xe8] sm:$0xff]  ;;  %v892_v6 = vld [vmem:[#allocation2 + $0x78] sm:$0xff]  ;;  %v895_v31 = vld [vmem:[#allocation2 + $0x40] sm:$0xff] }
 0x150   : > { %v956_v50 = vadd.f32 %v1785_v28, %v920_v42  ;;  %v981_v53 = vmax.f32 %v949_v43, 0.0  ;;  %v982_v54 = vmax.f32 %v950_v44, 0.0  ;;  %v983_v55 = vmax.f32 %v951_v45, 0.0  ;;  %v891_v5 = vld [vmem:[#allocation2 + $0x8] sm:$0xff]  ;;  %v893_v19 = vld [vmem:[#allocation2 + $0x38] sm:$0xff]  ;;  %v897_v37 = vld [vmem:[#allocation2 + $0xe0] sm:$0xff] }
 0x151   : > { %v984_v56 = vmax.f32 %v952_v46, 0.0  ;;  %v985_v59 = vmax.f32 %v953_v47, 0.0  ;;  %v986_v60 = vmax.f32 %v954_v48, 0.0  ;;  %v987_v61 = vmax.f32 %v955_v49, 0.0  ;;  %v894_v24 = vld [vmem:[#allocation2 + $0x58] sm:$0xff]  ;;  %v896_v32 = vld [vmem:[#allocation2 + $0xc8] sm:$0xff] }
 0x152   : > { %v988_v62 = vmax.f32 %v956_v50, 0.0  ;;  %v1348_v1 = vpack.c.bf16 %v982_v54, %v981_v53  ;;  %v921_v3 = vmul.f32 %v1780_v27, %v885_v51  ;;  %v922_v4 = vmul.f32 %v1780_v27, %v886_v52  ;;  %v898_v38 = vld [vmem:[#allocation2 + $0x90] sm:$0xff]  ;;  %v900_v48 = vld [vmem:[#allocation2 + $0xc0] sm:$0xff]  ;;  %v901_v53 = vld [vmem:[#allocation2 + $0xa8] sm:$0xff] }
 0x153   : > { %v1353_v2 = vpack.c.bf16 %v984_v56, %v983_v55  ;;  %v1358_v7 = vpack.c.bf16 %v986_v60, %v985_v59  ;;  %v923_v9 = vmul.f32 %v1780_v27, %v887_v57  ;;  %v924_v10 = vmul.f32 %v1780_v27, %v888_v58  ;;  %v899_v43 = vld [vmem:[#allocation2 + $0x70] sm:$0xff] }
 0x154   : > { %v1363_v8 = vpack.c.bf16 %v988_v62, %v987_v61  ;;  %1349 = vst [vmem:[%s1747_s7] sm:$0xff] %v1348_v1   ;;  %v957_v11 = vadd.f32 %v1785_v28, %v921_v3  ;;  %v958_v12 = vadd.f32 %v1785_v28, %v922_v4  ;;  %v925_v13 = vmul.f32 %v1780_v27, %v889_v63  ;;  %v902_v62 = vld [vmem:[#allocation2 + $0xd0] sm:$0xff]  ;;  %v904_v4 = vld [vmem:[#allocation2 + $0x28] sm:$0xff] }
 0x155   : > { %v926_v14 = vmul.f32 %v1780_v27, %v890_v0  ;;  %1425 = vst [vmem:[%s1747_s7 + $0x8] sm:$0xff] %v1353_v2   ;;  %v959_v15 = vadd.f32 %v1785_v28, %v923_v9  ;;  %v960_v16 = vadd.f32 %v1785_v28, %v924_v10  ;;  %v927_v17 = vmul.f32 %v1780_v27, %v891_v5  ;;  %v903_v3 = vld [vmem:[#allocation2 + $0x10] sm:$0xff]  ;;  %v905_v9 = vld [vmem:[#allocation2 + $0xa0] sm:$0xff]  ;;  %v906_v10 = vld [vmem:[#allocation2 + $0xf8] sm:$0xff] }
 0x156   : > { %v928_v18 = vmul.f32 %v1780_v27, %v892_v6  ;;  %1426 = vst [vmem:[%s1747_s7 + $0x10] sm:$0xff] %v1358_v7   ;;  %v989_v20 = vmax.f32 %v957_v11, 0.0  ;;  %v990_v21 = vmax.f32 %v958_v12, 0.0  ;;  %v961_v22 = vadd.f32 %v1785_v28, %v925_v13 }
 0x157   : > { %v962_v23 = vadd.f32 %v1785_v28, %v926_v14  ;;  %1427 = vst [vmem:[%s1747_s7 + $0x18] sm:$0xff] %v1363_v8   ;;  %v991_v25 = vmax.f32 %v959_v15, 0.0  ;;  %v992_v26 = vmax.f32 %v960_v16, 0.0  ;;  %v963_v29 = vadd.f32 %v1785_v28, %v927_v17  ;;  %v907_v15 = vld [vmem:[#allocation2 + $0x20] sm:$0xff] }
 0x158   : > { %v964_v30 = vadd.f32 %v1785_v28, %v928_v18  ;;  %v1368_v33 = vpack.c.bf16 %v990_v21, %v989_v20  ;;  %v993_v34 = vmax.f32 %v961_v22, 0.0  ;;  %v929_v36 = vmul.f32 %v1780_v27, %v893_v19  ;;  %v908_v20 = vld [vmem:[#allocation2 + $0x98] sm:$0xff] }
 0x159   : > { %v994_v35 = vmax.f32 %v962_v23, 0.0  ;;  %v1373_v39 = vpack.c.bf16 %v992_v26, %v991_v25  ;;  %v995_v40 = vmax.f32 %v963_v29, 0.0  ;;  %v930_v42 = vmul.f32 %v1780_v27, %v894_v24 }
 0x15a   : > { %v996_v41 = vmax.f32 %v964_v30, 0.0  ;;  %1428 = vst [vmem:[%s1747_s7 + $0x20] sm:$0xff] %v1368_v33   ;;  %v965_v45 = vadd.f32 %v1785_v28, %v929_v36  ;;  %v931_v46 = vmul.f32 %v1780_v27, %v895_v31  ;;  %v932_v47 = vmul.f32 %v1780_v27, %v896_v32 }
 0x15b   : > { %v1378_v44 = vpack.c.bf16 %v994_v35, %v993_v34  ;;  %1429 = vst [vmem:[%s1747_s7 + $0x28] sm:$0xff] %v1373_v39   ;;  %v966_v50 = vadd.f32 %v1785_v28, %v930_v42  ;;  %v933_v51 = vmul.f32 %v1780_v27, %v897_v37  ;;  %v934_v52 = vmul.f32 %v1780_v27, %v898_v38 }
 0x15c   : > { %v1383_v49 = vpack.c.bf16 %v996_v41, %v995_v40  ;;  %v997_v54 = vmax.f32 %v965_v45, 0.0  ;;  %v967_v55 = vadd.f32 %v1785_v28, %v931_v46  ;;  %v968_v56 = vadd.f32 %v1785_v28, %v932_v47 }
 0x15d   : > { %1430 = vst [vmem:[%s1747_s7 + $0x30] sm:$0xff] %v1378_v44   ;;  %v935_v57 = vmul.f32 %v1780_v27, %v899_v43  ;;  %v998_v58 = vmax.f32 %v966_v50, 0.0  ;;  %v969_v59 = vadd.f32 %v1785_v28, %v933_v51  ;;  %v970_v60 = vadd.f32 %v1785_v28, %v934_v52 }
 0x15e   : > { %1431 = vst [vmem:[%s1747_s7 + $0x38] sm:$0xff] %v1383_v49   ;;  %v936_v61 = vmul.f32 %v1780_v27, %v900_v48  ;;  %v999_v63 = vmax.f32 %v967_v55, 0.0  ;;  %v1000_v0 = vmax.f32 %v968_v56, 0.0  ;;  %v937_v2 = vmul.f32 %v1780_v27, %v901_v53 }
 0x15f   : > { %v971_v1 = vadd.f32 %v1785_v28, %v935_v57  ;;  %v1388_v5 = vpack.c.bf16 %v998_v58, %v997_v54  ;;  %v1001_v6 = vmax.f32 %v969_v59, 0.0  ;;  %v1002_v7 = vmax.f32 %v970_v60, 0.0 }
 0x160   : > { %v972_v8 = vadd.f32 %v1785_v28, %v936_v61  ;;  %v1393_v11 = vpack.c.bf16 %v1000_v0, %v999_v63  ;;  %v938_v13 = vmul.f32 %v1780_v27, %v902_v62  ;;  %v973_v14 = vadd.f32 %v1785_v28, %v937_v2 }
 0x161   : > { %v1003_v12 = vmax.f32 %v971_v1, 0.0  ;;  %1432 = vst [vmem:[%s1747_s7 + $0x40] sm:$0xff] %v1388_v5   ;;  %v1398_v16 = vpack.c.bf16 %v1002_v7, %v1001_v6  ;;  %v939_v18 = vmul.f32 %v1780_v27, %v903_v3  ;;  %v940_v19 = vmul.f32 %v1780_v27, %v904_v4 }
 0x162   : > { %v1004_v17 = vmax.f32 %v972_v8, 0.0  ;;  %1433 = vst [vmem:[%s1747_s7 + $0x48] sm:$0xff] %v1393_v11   ;;  %v974_v21 = vadd.f32 %v1785_v28, %v938_v13  ;;  %v1005_v22 = vmax.f32 %v973_v14, 0.0  ;;  %v941_v23 = vmul.f32 %v1780_v27, %v905_v9 }
 0x163   : > { %v942_v24 = vmul.f32 %v1780_v27, %v906_v10  ;;  %1434 = vst [vmem:[%s1747_s7 + $0x50] sm:$0xff] %v1398_v16   ;;  %v975_v26 = vadd.f32 %v1785_v28, %v939_v18  ;;  %v976_v29 = vadd.f32 %v1785_v28, %v940_v19  ;;  %v943_v30 = vmul.f32 %v1780_v27, %v907_v15 }
 0x164   : > { %v1403_v25 = vpack.c.bf16 %v1004_v17, %v1003_v12  ;;  %v1006_v31 = vmax.f32 %v974_v21, 0.0  ;;  %v977_v32 = vadd.f32 %v1785_v28, %v941_v23  ;;  %v944_v34 = vmul.f32 %v1780_v27, %v908_v20 }
 0x165   : > { %v978_v33 = vadd.f32 %v1785_v28, %v942_v24  ;;  %v1007_v35 = vmax.f32 %v975_v26, 0.0  ;;  %v1008_v36 = vmax.f32 %v976_v29, 0.0  ;;  %v979_v37 = vadd.f32 %v1785_v28, %v943_v30 }
 0x166   : > { %1435 = vst [vmem:[%s1747_s7 + $0x58] sm:$0xff] %v1403_v25   ;;  %v1408_v38 = vpack.c.bf16 %v1006_v31, %v1005_v22  ;;  %v1009_v39 = vmax.f32 %v977_v32, 0.0  ;;  %v980_v41 = vadd.f32 %v1785_v28, %v944_v34 }
 0x167   : > { %v1010_v40 = vmax.f32 %v978_v33, 0.0  ;;  %v1413_v42 = vpack.c.bf16 %v1008_v36, %v1007_v35  ;;  %v1011_v43 = vmax.f32 %v979_v37, 0.0 }
 0x168   : > { %1436 = vst [vmem:[%s1747_s7 + $0x60] sm:$0xff] %v1408_v38   ;;  %v1012_v45 = vmax.f32 %v980_v41, 0.0 }
 0x169   : > { %v1418_v44 = vpack.c.bf16 %v1010_v40, %v1009_v39  ;;  %1437 = vst [vmem:[%s1747_s7 + $0x68] sm:$0xff] %v1413_v42  }
 0x16a   : > { %v1423_v46 = vpack.c.bf16 %v1012_v45, %v1011_v43 }
 0x16b   : > { %1438 = vst [vmem:[%s1747_s7 + $0x70] sm:$0xff] %v1418_v44  }
 0x16c   : > { %1439 = vst [vmem:[%s1747_s7 + $0x78] sm:$0xff] %v1423_v46  }
 0x16d PF: > { %s14_s21 = sadd.s32 1, %s1578_s21   ;;  %s1893_s15 = smov %s1558_s16 }
 0x16e   : > { %p11_p0 = scmp.ge.s32.totalorder %s14_s21, 20   ;;  %s1894_s16 = smov %s1657_s28 }
 0x16f   : > { %s1895_s17 = smov %s1570_s19  ;;  %s1896_s18 = smov %s1574_s20 }
 0x170   : > { %s1897_s19 = smov %s1900_s22  ;;  %s1898_s20 = smov %s1904_s23 }
 0x171   :  { %13 = sbr.rel (!%p11_p0) target bundleno = 4 (0x4), region = 129 }

// kernel: _lambda_.15
= control target key start
LH: loop header
LB: loop body
LE: loop exit
PB: predicated region body
PF: predicated region fallthrough
CT: control target
= control target key end

     0   :  { %s1863_s18 = smov 0   ;;  %s1865_s19 = smov 0   ;;  %s2166_s0 = inlined_call_operand.vmem [shape: bf16[512,1152], index: 0, kind: input, shape index: {}]   ;;  %s2167_s1 = inlined_call_operand.vmem [shape: bf16[1152,128], index: 1, kind: input, shape index: {}]   ;;  %s2168_s2 = inlined_call_operand.vmem [shape: f32[1,128], index: 2, kind: input, shape index: {}]   ;;  %s2169_s3 = inlined_call_operand.vmem [shape: f32[1,128], index: 3, kind: input, shape index: {}]   ;;  %s2170_s4 = inlined_call_operand.vmem [shape: bf16[512,128], index: 4, kind: input, shape index: {}]   ;;  %s2171_s5 = inlined_call_operand.vmem [shape: bf16[512,128], index: 5, kind: output, shape index: {}]  }
   0x1   :  { %s1867_s20 = smov 0   ;;  %s1869_s21 = smov 0  }
   0x2   :  { %s1871_s22 = smov 0   ;;  %s1873_s23 = smov 0  }
   0x3   :  { %s1875_s24 = smov 0  }
   0x4 LB: > { %s27_s25 = sadd.s32 1, %s1822_s22  ;;  %s34_s26 = sadd.s32 1, %s1826_s23  ;;  %s1830_s24 = sphi %s1875_s24, %s15_s24   ;;  %s1826_s23 = sphi %s1873_s23, %s2177_s23   ;;  %s1822_s22 = sphi %s1871_s22, %s2176_s22   ;;  %s1818_s21 = sphi %s1869_s21, %s2175_s21   ;;  %s1814_s20 = sphi %s1867_s20, %s2174_s20   ;;  %s1810_s19 = sphi %s1865_s19, %s2173_s19   ;;  %s1806_s18 = sphi %s1863_s18, %s2172_s18  }
   0x5   : > { %p28_p0 = scmp.ge.s32.totalorder %s27_s25, 9  ;;  %p50_p1 = scmp.ne.s32.totalorder %s1810_s19, %s1806_s18 }
   0x6   : > { %p51_p2 = scmp.eq.s32.totalorder %s1830_s24, 0  ;;  %s43_s30 = sadd.s32 1, %s1810_s19 }
   0x7   : > { %s2179_s25 = smov (%p28_p0, %s27_s25), 0  ;;  %s2181_s26 = smov (!%p28_p0, %s34_s26), %s1826_s23 }
   0x8   : > { %p52_p3 = por %p51_p2, %p50_p1  ;;  %p36_p4 = scmp.ge.s32.totalorder %s2181_s26, 2 }
   0x9   : > { %s39_s27 = ssub.s32 %s1822_s22, %s2179_s25  ;;  %p1381_p6 = scmp.ge.s32.totalorder %s1830_s24, 18 }
   0xa   : > { %s2183_s26 = smov (%p36_p4, %s2181_s26), 0 }
   0xb   : > { %s38_s28 = ssub.s32 %s1826_s23, %s2183_s26  ;;  %224 = sbr.rel (%p1381_p6) target bundleno = 55 (0x37), region = 24 }
   0xc   : > { %s40_s29 = sor.u32 %s39_s27, %s38_s28 }
   0xd   : > { %p41_p5 = scmp.eq.s32.totalorder %s40_s29, 0 }
   0xf   : > { %s1914_s6 = scalar_select %p41_p5, %s1810_s19, %s43_s30  }
  0x10   : > { %227 = sbr.rel (!%p52_p3) target bundleno = 55 (0x37), region = 28  ;;  %s229_s7 = sand.u32 (%p52_p3), 1, %s1810_s19  }
  0x11   : > { %s1716_s8 = smul.u32 (%p52_p3), 288, %s1826_s23  ;;  %s1382_s9 = sshll.u32 (%p52_p3), %s229_s7, 7 }
  0x12   : > { %s1928_s15 = scalar_lea.vmem (%p52_p3), [#allocation3], %s1382_s9 }
  0x13   : > { %s234_s10 = sadd.s32 (%p52_p3), %s1822_s22, %s1716_s8 }
  0x14   : > { %s1385_s11 = sshll.u32 (%p52_p3), %s234_s10, 2 }
  0x15   : > { %s1923_s14 = scalar_lea.vmem %s2166_s0, %s1385_s11 }
  0x16   : > { %v253_v0 = vld [vmem:[%s1923_s14] sm:$0xf]  ;;  %v255_v1 = vld [vmem:[%s1923_s14 + $0x24] sm:$0xf]  ;;  %v257_v2 = vld [vmem:[%s1923_s14 + $0x48] sm:$0xf] }
  0x17   : > { %254 = vst [vmem:[%s1928_s15] sm:$0xf] %v253_v0  ;;  %v259_v3 = vld [vmem:[%s1923_s14 + $0x6c] sm:$0xf]  ;;  %v261_v4 = vld [vmem:[%s1923_s14 + $0x90] sm:$0xf] }
  0x18   : > { %256 = vst [vmem:[%s1928_s15 + $0x4] sm:$0xf] %v255_v1  ;;  %v263_v5 = vld [vmem:[%s1923_s14 + $0xb4] sm:$0xf]  ;;  %v265_v6 = vld [vmem:[%s1923_s14 + $0xd8] sm:$0xf] }
  0x19   : > { %258 = vst [vmem:[%s1928_s15 + $0x8] sm:$0xf] %v257_v2  ;;  %v267_v7 = vld [vmem:[%s1923_s14 + $0xfc] sm:$0xf]  ;;  %v269_v8 = vld [vmem:[%s1923_s14 + $0x120] sm:$0xf] }
  0x1a   : > { %260 = vst [vmem:[%s1928_s15 + $0xc] sm:$0xf] %v259_v3  ;;  %v271_v9 = vld [vmem:[%s1923_s14 + $0x144] sm:$0xf]  ;;  %v273_v10 = vld [vmem:[%s1923_s14 + $0x168] sm:$0xf] }
  0x1b   : > { %262 = vst [vmem:[%s1928_s15 + $0x10] sm:$0xf] %v261_v4  ;;  %v275_v11 = vld [vmem:[%s1923_s14 + $0x18c] sm:$0xf]  ;;  %v277_v12 = vld [vmem:[%s1923_s14 + $0x1b0] sm:$0xf] }
  0x1c   : > { %264 = vst [vmem:[%s1928_s15 + $0x14] sm:$0xf] %v263_v5  ;;  %v279_v13 = vld [vmem:[%s1923_s14 + $0x1d4] sm:$0xf]  ;;  %v281_v14 = vld [vmem:[%s1923_s14 + $0x1f8] sm:$0xf] }
  0x1d   : > { %266 = vst [vmem:[%s1928_s15 + $0x18] sm:$0xf] %v265_v6  ;;  %v283_v15 = vld [vmem:[%s1923_s14 + $0x21c] sm:$0xf]  ;;  %v285_v16 = vld [vmem:[%s1923_s14 + $0x240] sm:$0xf] }
  0x1e   : > { %268 = vst [vmem:[%s1928_s15 + $0x1c] sm:$0xf] %v267_v7  ;;  %v287_v17 = vld [vmem:[%s1923_s14 + $0x264] sm:$0xf]  ;;  %v289_v18 = vld [vmem:[%s1923_s14 + $0x288] sm:$0xf] }
  0x1f   : > { %270 = vst [vmem:[%s1928_s15 + $0x20] sm:$0xf] %v269_v8  ;;  %v291_v19 = vld [vmem:[%s1923_s14 + $0x2ac] sm:$0xf]  ;;  %v293_v20 = vld [vmem:[%s1923_s14 + $0x2d0] sm:$0xf] }
  0x20   : > { %272 = vst [vmem:[%s1928_s15 + $0x24] sm:$0xf] %v271_v9  ;;  %v295_v21 = vld [vmem:[%s1923_s14 + $0x2f4] sm:$0xf]  ;;  %v297_v22 = vld [vmem:[%s1923_s14 + $0x318] sm:$0xf] }
  0x21   : > { %274 = vst [vmem:[%s1928_s15 + $0x28] sm:$0xf] %v273_v10  ;;  %v299_v23 = vld [vmem:[%s1923_s14 + $0x33c] sm:$0xf]  ;;  %v301_v24 = vld [vmem:[%s1923_s14 + $0x360] sm:$0xf] }
  0x22   : > { %276 = vst [vmem:[%s1928_s15 + $0x2c] sm:$0xf] %v275_v11  ;;  %v303_v25 = vld [vmem:[%s1923_s14 + $0x384] sm:$0xf]  ;;  %v305_v26 = vld [vmem:[%s1923_s14 + $0x3a8] sm:$0xf] }
  0x23   : > { %278 = vst [vmem:[%s1928_s15 + $0x30] sm:$0xf] %v277_v12  ;;  %v307_v27 = vld [vmem:[%s1923_s14 + $0x3cc] sm:$0xf]  ;;  %v309_v28 = vld [vmem:[%s1923_s14 + $0x3f0] sm:$0xf] }
  0x24   : > { %280 = vst [vmem:[%s1928_s15 + $0x34] sm:$0xf] %v279_v13  ;;  %v311_v29 = vld [vmem:[%s1923_s14 + $0x414] sm:$0xf]  ;;  %v313_v30 = vld [vmem:[%s1923_s14 + $0x438] sm:$0xf] }
  0x25   : > { %282 = vst [vmem:[%s1928_s15 + $0x38] sm:$0xf] %v281_v14  ;;  %v315_v31 = vld [vmem:[%s1923_s14 + $0x45c] sm:$0xf] }
  0x26   : > { %284 = vst [vmem:[%s1928_s15 + $0x3c] sm:$0xf] %v283_v15 }
  0x27   : > { %286 = vst [vmem:[%s1928_s15 + $0x40] sm:$0xf] %v285_v16 }
  0x28   : > { %288 = vst [vmem:[%s1928_s15 + $0x44] sm:$0xf] %v287_v17 }
  0x29   : > { %290 = vst [vmem:[%s1928_s15 + $0x48] sm:$0xf] %v289_v18 }
  0x2a   : > { %292 = vst [vmem:[%s1928_s15 + $0x4c] sm:$0xf] %v291_v19 }
  0x2b   : > { %294 = vst [vmem:[%s1928_s15 + $0x50] sm:$0xf] %v293_v20 }
  0x2c   : > { %296 = vst [vmem:[%s1928_s15 + $0x54] sm:$0xf] %v295_v21 }
  0x2d   : > { %298 = vst [vmem:[%s1928_s15 + $0x58] sm:$0xf] %v297_v22 }
  0x2e   : > { %300 = vst [vmem:[%s1928_s15 + $0x5c] sm:$0xf] %v299_v23 }
  0x2f   : > { %302 = vst [vmem:[%s1928_s15 + $0x60] sm:$0xf] %v301_v24 }
  0x30   : > { %304 = vst [vmem:[%s1928_s15 + $0x64] sm:$0xf] %v303_v25 }
  0x31   : > { %306 = vst [vmem:[%s1928_s15 + $0x68] sm:$0xf] %v305_v26 }
  0x32   : > { %308 = vst [vmem:[%s1928_s15 + $0x6c] sm:$0xf] %v307_v27 }
  0x33   : > { %310 = vst [vmem:[%s1928_s15 + $0x70] sm:$0xf] %v309_v28 }
  0x34   : > { %312 = vst [vmem:[%s1928_s15 + $0x74] sm:$0xf] %v311_v29 }
  0x35   : > { %314 = vst [vmem:[%s1928_s15 + $0x78] sm:$0xf] %v313_v30 }
  0x36   : > { %316 = vst [vmem:[%s1928_s15 + $0x7c] sm:$0xf] %v315_v31 }
  0x37 PF: > { %p1386_p7 = scmp.ge.s32.totalorder %s1830_s24, 1  ;;  %p427_p8 = scmp.lt.s32.totalorder %s1830_s24, 19 }
  0x39   : > { %p428_p9 = pnand %p1386_p7, %p427_p8 }
  0x3a   : > { %s434_s16 = sand.u32 (!%p428_p9), 1, %s1806_s18   ;;  %s1388_s17 = sshll.u32 (!%p428_p9), %s1814_s20, 4 }
  0x3b   : > { %431 = sbr.rel (%p428_p9) target bundleno = 382 (0x17e), region = 77  ;;  %s1387_s27 = sshll.u32 (!%p428_p9), %s434_s16, 7 }
  0x3c   : > { %p488_p10 = scmp.lt.s32.totalorder (!%p428_p9), %s1388_s17, 143  ;;  %s1390_s28 = sshll.u32 (!%p428_p9), %s1818_s21, 5 }
  0x3d   : > { %p503_p11 = scmp.lt.s32.totalorder (!%p428_p9), %s1390_s28, 63  ;;  %s2011_s21 = scalar_lea.vmem (!%p428_p9), [#allocation3], %s1387_s27 }
  0x3e   : > { %p1394_p12 = scmp.ne.s32.totalorder (!%p428_p9), %s1814_s20, 0 }
  0x40   : > { %s2185_s17 = smov (!%p488_p10, %s1388_s17), 143  ;;  %s2187_s28 = smov (!%p503_p11, %s1390_s28), 63 }
  0x41   : > { %s1389_s29 = sshll.u32 %s2185_s17, 2  ;;  %s1391_s9 = sshll.u32 %s2187_s28, 2 }
  0x42   : > { %s1999_s8 = scalar_lea.vmem %s2167_s1, %s1389_s29  ;;  %s2004_s12 = scalar_lea.vmem %s2170_s4, %s1391_s9 }
  0x43   : > { %s2009_s14 = scalar_lea.vmem %s2171_s5, %s1391_s9  ;;  %523 = sbr.rel (%p1394_p12) target bundleno = 105 (0x69), region = 85 }
  0x48   : > { %v1832_v32 = vmov 0.0  }
  0x49   : > { %524 = vst [vmem:[#allocation2 + $0xb0] sm:$0xff] %v1832_v32 }
  0x4a   : > { %525 = vst [vmem:[#allocation2] sm:$0xff] %v1832_v32 }
  0x4b   : > { %526 = vst [vmem:[#allocation2 + $0xd8] sm:$0xff] %v1832_v32 }
  0x4c   : > { %527 = vst [vmem:[#allocation2 + $0x18] sm:$0xff] %v1832_v32 }
  0x4d   : > { %528 = vst [vmem:[#allocation2 + $0x50] sm:$0xff] %v1832_v32 }
  0x4e   : > { %529 = vst [vmem:[#allocation2 + $0x68] sm:$0xff] %v1832_v32 }
  0x4f   : > { %530 = vst [vmem:[#allocation2 + $0x30] sm:$0xff] %v1832_v32 }
  0x50   : > { %531 = vst [vmem:[#allocation2 + $0x48] sm:$0xff] %v1832_v32 }
  0x51   : > { %532 = vst [vmem:[#allocation2 + $0x80] sm:$0xff] %v1832_v32 }
  0x52   : > { %533 = vst [vmem:[#allocation2 + $0x88] sm:$0xff] %v1832_v32 }
  0x53   : > { %534 = vst [vmem:[#allocation2 + $0xe8] sm:$0xff] %v1832_v32 }
  0x54   : > { %535 = vst [vmem:[#allocation2 + $0xb8] sm:$0xff] %v1832_v32 }
  0x55   : > { %536 = vst [vmem:[#allocation2 + $0x60] sm:$0xff] %v1832_v32 }
  0x56   : > { %537 = vst [vmem:[#allocation2 + $0xf0] sm:$0xff] %v1832_v32 }
  0x57   : > { %538 = vst [vmem:[#allocation2 + $0x8] sm:$0xff] %v1832_v32 }
  0x58   : > { %539 = vst [vmem:[#allocation2 + $0x78] sm:$0xff] %v1832_v32 }
  0x59   : > { %540 = vst [vmem:[#allocation2 + $0x38] sm:$0xff] %v1832_v32 }
  0x5a   : > { %541 = vst [vmem:[#allocation2 + $0x58] sm:$0xff] %v1832_v32 }
  0x5b   : > { %542 = vst [vmem:[#allocation2 + $0x40] sm:$0xff] %v1832_v32 }
  0x5c   : > { %543 = vst [vmem:[#allocation2 + $0xc8] sm:$0xff] %v1832_v32 }
  0x5d   : > { %544 = vst [vmem:[#allocation2 + $0xe0] sm:$0xff] %v1832_v32 }
  0x5e   : > { %545 = vst [vmem:[#allocation2 + $0x90] sm:$0xff] %v1832_v32 }
  0x5f   : > { %546 = vst [vmem:[#allocation2 + $0x70] sm:$0xff] %v1832_v32 }
  0x60   : > { %547 = vst [vmem:[#allocation2 + $0xc0] sm:$0xff] %v1832_v32 }
  0x61   : > { %548 = vst [vmem:[#allocation2 + $0xa8] sm:$0xff] %v1832_v32 }
  0x62   : > { %549 = vst [vmem:[#allocation2 + $0xd0] sm:$0xff] %v1832_v32 }
  0x63   : > { %550 = vst [vmem:[#allocation2 + $0x10] sm:$0xff] %v1832_v32 }
  0x64   : > { %551 = vst [vmem:[#allocation2 + $0x28] sm:$0xff] %v1832_v32 }
  0x65   : > { %552 = vst [vmem:[#allocation2 + $0xa0] sm:$0xff] %v1832_v32 }
  0x66   : > { %553 = vst [vmem:[#allocation2 + $0xf8] sm:$0xff] %v1832_v32 }
  0x67   : > { %554 = vst [vmem:[#allocation2 + $0x20] sm:$0xff] %v1832_v32 }
  0x68   : > { %555 = vst [vmem:[#allocation2 + $0x98] sm:$0xff] %v1832_v32 }
  0x69 PF: > { %v1517_v33 = vld [vmem:[%s1999_s8 + $0x38] sm:$0xff]  ;;  %v1516_v34 = vld [vmem:[%s1999_s8 + $0x30] sm:$0xff]  ;;  %v1515_v35 = vld [vmem:[%s1999_s8 + $0x28] sm:$0xff]  ;;  %p1491_p13 = scmp.ne.s32.totalorder %s1814_s20, 8 }
  0x6a   : > { %780 = vmatpush.bf16.msra.mxu0 %v1517_v33  ;;  %1692 = vmatpush.bf16.msra.mxu1 %v1517_v33  ;;  %v1514_v36 = vld [vmem:[%s1999_s8 + $0x20] sm:$0xff]  ;;  %v1513_v37 = vld [vmem:[%s1999_s8 + $0x18] sm:$0xff]  ;;  %v1512_v38 = vld [vmem:[%s1999_s8 + $0x10] sm:$0xff] }
  0x6b   : > { %1693 = vmatpush.bf16.msra.mxu2 %v1517_v33  ;;  %1694 = vmatpush.bf16.msra.mxu3 %v1517_v33  ;;  %v1511_v39 = vld [vmem:[%s1999_s8 + $0x8] sm:$0xff]  ;;  %v1510_v40 = vld [vmem:[%s1999_s8] sm:$0xff]  ;;  %v1496_v49 = vld [vmem:[%s2011_s21 + $0x10] sm:$0xff] }
  0x6c   : > { %v1494_v41 = vld [vmem:[%s2011_s21] sm:$0xff]  ;;  %v1495_v45 = vld [vmem:[%s2011_s21 + $0x8] sm:$0xff]  ;;  %v1500_v50 = vld [vmem:[%s2011_s21 + $0x30] sm:$0xff] }
  0x6d   : > { %v1498_v42 = vld [vmem:[%s2011_s21 + $0x20] sm:$0xff]  ;;  %v1499_v46 = vld [vmem:[%s2011_s21 + $0x28] sm:$0xff]  ;;  %v1504_v51 = vld [vmem:[%s2011_s21 + $0x50] sm:$0xff] }
  0x6e   : > { %781 = vmatpush.bf16.msra.mxu0 %v1516_v34  ;;  %1695 = vmatpush.bf16.msra.mxu1 %v1516_v34  ;;  %v1502_v43 = vld [vmem:[%s2011_s21 + $0x40] sm:$0xff]  ;;  %v1503_v47 = vld [vmem:[%s2011_s21 + $0x48] sm:$0xff]  ;;  %v1508_v52 = vld [vmem:[%s2011_s21 + $0x70] sm:$0xff] }
  0x6f   : > { %1696 = vmatpush.bf16.msra.mxu2 %v1516_v34  ;;  %1697 = vmatpush.bf16.msra.mxu3 %v1516_v34  ;;  %v1506_v44 = vld [vmem:[%s2011_s21 + $0x60] sm:$0xff]  ;;  %v1507_v48 = vld [vmem:[%s2011_s21 + $0x68] sm:$0xff]  ;;  %v1497_v53 = vld [vmem:[%s2011_s21 + $0x18] sm:$0xff] }
  0x70   : > { %v1501_v54 = vld [vmem:[%s2011_s21 + $0x38] sm:$0xff]  ;;  %v556_v57 = vld [vmem:[#allocation2 + $0xb0] sm:$0xff]  ;;  %v564_v58 = vld [vmem:[#allocation2 + $0x80] sm:$0xff] }
  0x71   : > { %v1505_v55 = vld [vmem:[%s2011_s21 + $0x58] sm:$0xff]  ;;  %v580_v0 = vld [vmem:[#allocation2 + $0xa8] sm:$0xff]  ;;  %v557_v1 = vld [vmem:[#allocation2] sm:$0xff] }
  0x72   : > { %782 = vmatpush.bf16.msra.mxu0 %v1515_v35  ;;  %1698 = vmatpush.bf16.msra.mxu1 %v1515_v35  ;;  %v1509_v56 = vld [vmem:[%s2011_s21 + $0x78] sm:$0xff]  ;;  %v565_v2 = vld [vmem:[#allocation2 + $0x88] sm:$0xff]  ;;  %v581_v12 = vld [vmem:[#allocation2 + $0xd0] sm:$0xff] }
  0x73   : > { %1699 = vmatpush.bf16.msra.mxu2 %v1515_v35  ;;  %1700 = vmatpush.bf16.msra.mxu3 %v1515_v35  ;;  %v572_v63 = vld [vmem:[#allocation2 + $0x38] sm:$0xff]  ;;  %v566_v14 = vld [vmem:[#allocation2 + $0xe8] sm:$0xff]  ;;  %v574_v23 = vld [vmem:[#allocation2 + $0x40] sm:$0xff] }
  0x74   : > { %v573_v11 = vld [vmem:[#allocation2 + $0x58] sm:$0xff]  ;;  %v582_v24 = vld [vmem:[#allocation2 + $0x10] sm:$0xff]  ;;  %v575_v35 = vld [vmem:[#allocation2 + $0xc8] sm:$0xff] }
  0x75   : > { %v558_v13 = vld [vmem:[#allocation2 + $0xd8] sm:$0xff] }
  0x76   : > { %783 = vmatpush.bf16.msra.mxu0 %v1514_v36  ;;  %1701 = vmatpush.bf16.msra.mxu1 %v1514_v36  ;;  %v559_v25 = vld [vmem:[#allocation2 + $0x18] sm:$0xff] }
  0x77   : > { %1702 = vmatpush.bf16.msra.mxu2 %v1514_v36  ;;  %1703 = vmatpush.bf16.msra.mxu3 %v1514_v36  ;;  %v567_v26 = vld [vmem:[#allocation2 + $0xb8] sm:$0xff]  ;;  %v583_v36 = vld [vmem:[#allocation2 + $0x28] sm:$0xff] }
  0x7a   : > { %784 = vmatpush.bf16.msra.mxu0 %v1513_v37  ;;  %1704 = vmatpush.bf16.msra.mxu1 %v1513_v37 }
  0x7b   : > { %1705 = vmatpush.bf16.msra.mxu2 %v1513_v37  ;;  %1706 = vmatpush.bf16.msra.mxu3 %v1513_v37  ;;  %v560_v37 = vld [vmem:[#allocation2 + $0x50] sm:$0xff] }
  0x7e   : > { %785 = vmatpush.bf16.msra.mxu0 %v1512_v38  ;;  %1707 = vmatpush.bf16.msra.mxu1 %v1512_v38 }
  0x7f   : > { %1708 = vmatpush.bf16.msra.mxu2 %v1512_v38  ;;  %1709 = vmatpush.bf16.msra.mxu3 %v1512_v38  ;;  %v568_v38 = vld [vmem:[#allocation2 + $0x60] sm:$0xff] }
  0x82   : > { %786 = vmatpush.bf16.msra.mxu0 %v1511_v39  ;;  %1710 = vmatpush.bf16.msra.mxu1 %v1511_v39 }
  0x83   : > { %1711 = vmatpush.bf16.msra.mxu2 %v1511_v39  ;;  %1712 = vmatpush.bf16.msra.mxu3 %v1511_v39 }
  0x86   : > { %787 = vmatpush.bf16.msra.mxu0 %v1510_v40  ;;  %1713 = vmatpush.bf16.msra.mxu1 %v1510_v40 }
  0x87   : > { %1714 = vmatpush.bf16.msra.mxu2 %v1510_v40  ;;  %1715 = vmatpush.bf16.msra.mxu3 %v1510_v40 }
  0x89   : > { %788 = vmatmul.bf16.vlgmr.msra.gmra.mxu0 %v1494_v41  ;;  %808 = vmatmul.bf16.vlgmr.msra.gmra.mxu1 %v1498_v42 }
  0x8a   : > { %828 = vmatmul.bf16.vlgmr.msra.gmra.mxu2 %v1502_v43  ;;  %848 = vmatmul.bf16.vlgmr.msra.gmra.mxu3 %v1506_v44 }
  0x99   : > { %793 = vmatmul.bf16.gmra.mxu0 %v1495_v45  ;;  %813 = vmatmul.bf16.gmra.mxu1 %v1499_v46 }
  0x9a   : > { %833 = vmatmul.bf16.gmra.mxu2 %v1503_v47  ;;  %853 = vmatmul.bf16.gmra.mxu3 %v1507_v48  ;;  %v576_v47 = vld [vmem:[#allocation2 + $0xe0] sm:$0xff] }
  0x9b   : > { %v584_v48 = vld [vmem:[#allocation2 + $0xa0] sm:$0xff] }
  0xa9   : > { %798 = vmatmul.bf16.gmra.mxu0 %v1496_v49  ;;  %818 = vmatmul.bf16.gmra.mxu1 %v1500_v50  ;;  %v561_v49 = vld [vmem:[#allocation2 + $0x68] sm:$0xff]  ;;  %v569_v50 = vld [vmem:[#allocation2 + $0xf0] sm:$0xff] }
  0xaa   : > { %838 = vmatmul.bf16.gmra.mxu2 %v1504_v51  ;;  %858 = vmatmul.bf16.gmra.mxu3 %v1508_v52 }
  0xb9   : > { %803 = vmatmul.bf16.gmra.mxu0 %v1497_v53  ;;  %823 = vmatmul.bf16.gmra.mxu1 %v1501_v54 }
  0xba   : > { %843 = vmatmul.bf16.gmra.mxu2 %v1505_v55  ;;  %863 = vmatmul.bf16.gmra.mxu3 %v1509_v56 }
 0x106   : > { %v789_v59 = vpop.f32.mrf.mxu0  ;;  %v809_v60 = vpop.f32.mrf.mxu1 }
 0x107   : > { %v869_v61 = vadd.f32 %v789_v59, %v556_v57  ;;  %v877_v62 = vadd.f32 %v809_v60, %v564_v58  ;;  %v577_v59 = vld [vmem:[#allocation2 + $0x90] sm:$0xff]  ;;  %v585_v60 = vld [vmem:[#allocation2 + $0xf8] sm:$0xff] }
 0x109   : > { %901 = vst [vmem:[#allocation2 + $0xb0] sm:$0xff] %v869_v61  ;;  %v562_v61 = vld [vmem:[#allocation2 + $0x30] sm:$0xff] }
 0x10a   : > { %909 = vst [vmem:[#allocation2 + $0x80] sm:$0xff] %v877_v62  ;;  %v570_v62 = vld [vmem:[#allocation2 + $0x8] sm:$0xff] }
 0x10d   : > { %v829_v3 = vpop.f32.mrf.mxu2  ;;  %v849_v4 = vpop.f32.mrf.mxu3 }
 0x10e   : > { %v885_v5 = vadd.f32 %v829_v3, %v572_v63  ;;  %v893_v6 = vadd.f32 %v849_v4, %v580_v0  ;;  %v791_v7 = vpop.f32.mrf.mxu0  ;;  %v811_v8 = vpop.f32.mrf.mxu1 }
 0x10f   : > { %v870_v9 = vadd.f32 %v791_v7, %v557_v1  ;;  %v878_v10 = vadd.f32 %v811_v8, %v565_v2  ;;  %v578_v7 = vld [vmem:[#allocation2 + $0x70] sm:$0xff]  ;;  %v586_v8 = vld [vmem:[#allocation2 + $0x20] sm:$0xff] }
 0x110   : > { %917 = vst [vmem:[#allocation2 + $0x38] sm:$0xff] %v885_v5 }
 0x111   : > { %925 = vst [vmem:[#allocation2 + $0xa8] sm:$0xff] %v893_v6 }
 0x112   : > { %902 = vst [vmem:[#allocation2] sm:$0xff] %v870_v9  ;;  %v563_v9 = vld [vmem:[#allocation2 + $0x48] sm:$0xff] }
 0x113   : > { %910 = vst [vmem:[#allocation2 + $0x88] sm:$0xff] %v878_v10  ;;  %v571_v10 = vld [vmem:[#allocation2 + $0x78] sm:$0xff] }
 0x115   : > { %v831_v15 = vpop.f32.mrf.mxu2  ;;  %v851_v16 = vpop.f32.mrf.mxu3 }
 0x116   : > { %v886_v17 = vadd.f32 %v831_v15, %v573_v11  ;;  %v894_v18 = vadd.f32 %v851_v16, %v581_v12  ;;  %v794_v19 = vpop.f32.mrf.mxu0  ;;  %v814_v20 = vpop.f32.mrf.mxu1 }
 0x117   : > { %v871_v21 = vadd.f32 %v794_v19, %v558_v13  ;;  %v879_v22 = vadd.f32 %v814_v20, %v566_v14  ;;  %v579_v19 = vld [vmem:[#allocation2 + $0xc0] sm:$0xff]  ;;  %v587_v20 = vld [vmem:[#allocation2 + $0x98] sm:$0xff] }
 0x118   : > { %918 = vst [vmem:[#allocation2 + $0x58] sm:$0xff] %v886_v17 }
 0x119   : > { %926 = vst [vmem:[#allocation2 + $0xd0] sm:$0xff] %v894_v18 }
 0x11a   : > { %903 = vst [vmem:[#allocation2 + $0xd8] sm:$0xff] %v871_v21 }
 0x11b   : > { %911 = vst [vmem:[#allocation2 + $0xe8] sm:$0xff] %v879_v22 }
 0x11d   : > { %v834_v27 = vpop.f32.mrf.mxu2  ;;  %v854_v28 = vpop.f32.mrf.mxu3 }
 0x11e   : > { %v887_v29 = vadd.f32 %v834_v27, %v574_v23  ;;  %v895_v30 = vadd.f32 %v854_v28, %v582_v24  ;;  %v796_v31 = vpop.f32.mrf.mxu0  ;;  %v816_v32 = vpop.f32.mrf.mxu1 }
 0x11f   : > { %v872_v33 = vadd.f32 %v796_v31, %v559_v25  ;;  %v880_v34 = vadd.f32 %v816_v32, %v567_v26 }
 0x120   : > { %919 = vst [vmem:[#allocation2 + $0x40] sm:$0xff] %v887_v29 }
 0x121   : > { %927 = vst [vmem:[#allocation2 + $0x10] sm:$0xff] %v895_v30 }
 0x122   : > { %904 = vst [vmem:[#allocation2 + $0x18] sm:$0xff] %v872_v33 }
 0x123   : > { %912 = vst [vmem:[#allocation2 + $0xb8] sm:$0xff] %v880_v34 }
 0x125   : > { %v836_v39 = vpop.f32.mrf.mxu2  ;;  %v856_v40 = vpop.f32.mrf.mxu3 }
 0x126   : > { %v888_v41 = vadd.f32 %v836_v39, %v575_v35  ;;  %v896_v42 = vadd.f32 %v856_v40, %v583_v36  ;;  %v799_v43 = vpop.f32.mrf.mxu0  ;;  %v819_v44 = vpop.f32.mrf.mxu1 }
 0x127   : > { %v873_v45 = vadd.f32 %v799_v43, %v560_v37  ;;  %v881_v46 = vadd.f32 %v819_v44, %v568_v38 }
 0x128   : > { %920 = vst [vmem:[#allocation2 + $0xc8] sm:$0xff] %v888_v41 }
 0x129   : > { %928 = vst [vmem:[#allocation2 + $0x28] sm:$0xff] %v896_v42 }
 0x12a   : > { %905 = vst [vmem:[#allocation2 + $0x50] sm:$0xff] %v873_v45 }
 0x12b   : > { %913 = vst [vmem:[#allocation2 + $0x60] sm:$0xff] %v881_v46 }
 0x12d   : > { %v839_v51 = vpop.f32.mrf.mxu2  ;;  %v859_v52 = vpop.f32.mrf.mxu3 }
 0x12e   : > { %v889_v53 = vadd.f32 %v839_v51, %v576_v47  ;;  %v897_v54 = vadd.f32 %v859_v52, %v584_v48  ;;  %v801_v55 = vpop.f32.mrf.mxu0  ;;  %v821_v56 = vpop.f32.mrf.mxu1 }
 0x12f   : > { %v874_v57 = vadd.f32 %v801_v55, %v561_v49  ;;  %v882_v58 = vadd.f32 %v821_v56, %v569_v50 }
 0x130   : > { %921 = vst [vmem:[#allocation2 + $0xe0] sm:$0xff] %v889_v53 }
 0x131   : > { %929 = vst [vmem:[#allocation2 + $0xa0] sm:$0xff] %v897_v54 }
 0x132   : > { %906 = vst [vmem:[#allocation2 + $0x68] sm:$0xff] %v874_v57 }
 0x133   : > { %914 = vst [vmem:[#allocation2 + $0xf0] sm:$0xff] %v882_v58 }
 0x135   : > { %v841_v63 = vpop.f32.mrf.mxu2  ;;  %v861_v0 = vpop.f32.mrf.mxu3 }
 0x136   : > { %v890_v1 = vadd.f32 %v841_v63, %v577_v59  ;;  %v898_v2 = vadd.f32 %v861_v0, %v585_v60  ;;  %v804_v3 = vpop.f32.mrf.mxu0  ;;  %v824_v4 = vpop.f32.mrf.mxu1 }
 0x137   : > { %v875_v5 = vadd.f32 %v804_v3, %v562_v61  ;;  %v883_v6 = vadd.f32 %v824_v4, %v570_v62 }
 0x138   : > { %922 = vst [vmem:[#allocation2 + $0x90] sm:$0xff] %v890_v1 }
 0x139   : > { %930 = vst [vmem:[#allocation2 + $0xf8] sm:$0xff] %v898_v2 }
 0x13a   : > { %907 = vst [vmem:[#allocation2 + $0x30] sm:$0xff] %v875_v5 }
 0x13b   : > { %915 = vst [vmem:[#allocation2 + $0x8] sm:$0xff] %v883_v6 }
 0x13d   : > { %v844_v11 = vpop.f32.mrf.mxu2  ;;  %v864_v12 = vpop.f32.mrf.mxu3 }
 0x13e   : > { %v891_v13 = vadd.f32 %v844_v11, %v578_v7  ;;  %v899_v14 = vadd.f32 %v864_v12, %v586_v8  ;;  %v806_v15 = vpop.f32.mrf.mxu0  ;;  %v826_v16 = vpop.f32.mrf.mxu1 }
 0x13f   : > { %v876_v17 = vadd.f32 %v806_v15, %v563_v9  ;;  %v884_v18 = vadd.f32 %v826_v16, %v571_v10 }
 0x140   : > { %923 = vst [vmem:[#allocation2 + $0x70] sm:$0xff] %v891_v13 }
 0x141   : > { %931 = vst [vmem:[#allocation2 + $0x20] sm:$0xff] %v899_v14 }
 0x142   : > { %908 = vst [vmem:[#allocation2 + $0x48] sm:$0xff] %v876_v17 }
 0x143   : > { %916 = vst [vmem:[#allocation2 + $0x78] sm:$0xff] %v884_v18 }
 0x145   : > { %v846_v21 = vpop.f32.mrf.mxu2  ;;  %v866_v22 = vpop.f32.mrf.mxu3  ;;  %936 = sbr.rel (%p1491_p13) target bundleno = 382 (0x17e), region = 89 }
 0x146   : > { %v892_v23 = vadd.f32 %v846_v21, %v579_v19  ;;  %v900_v24 = vadd.f32 %v866_v22, %v587_v20 }
 0x148   : > { %924 = vst [vmem:[#allocation2 + $0xc0] sm:$0xff] %v892_v23 }
 0x149   : > { %932 = vst [vmem:[#allocation2 + $0x98] sm:$0xff] %v900_v24 }
 0x14a   : > { %v937_v25 = vld [vmem:[#allocation2 + $0xb0] sm:$0xff]  ;;  %v938_v26 = vld [vmem:[#allocation2] sm:$0xff]  ;;  %v939_v30 = vld [vmem:[#allocation2 + $0xd8] sm:$0xff] }
 0x14b   : > { %v2042_v27 = vld [vmem:[%s2168_s2] ss:$0 sm:$0xff]  ;;  %v940_v31 = vld [vmem:[#allocation2 + $0x18] sm:$0xff]  ;;  %v1662_v36 = vld [vmem:[%s2004_s12 + $0x8] sm:$0xff]  }
 0x14c   : > { %v2047_v28 = vld [vmem:[%s2169_s3] ss:$0 sm:$0xff]  ;;  %v973_v32 = vmul.f32 %v2042_v27, %v937_v25  ;;  %v974_v33 = vmul.f32 %v2042_v27, %v938_v26  ;;  %v941_v37 = vld [vmem:[#allocation2 + $0x50] sm:$0xff]  ;;  %v942_v38 = vld [vmem:[#allocation2 + $0x68] sm:$0xff]  ;;  %v975_v39 = vmul.f32 %v2042_v27, %v939_v30  ;;  %v976_v40 = vmul.f32 %v2042_v27, %v940_v31 }
 0x14d   : > { %v1519_v29 = vld [vmem:[%s2004_s12] sm:$0xff]   ;;  %v1524_v41 = vunpack.c.l.bf16 %v1662_v36  ;;  %v1525_v42 = vunpack.c.h.bf16 %v1662_v36  ;;  %v1663_v43 = vld [vmem:[%s2004_s12 + $0x10] sm:$0xff]   ;;  %v977_v46 = vmul.f32 %v2042_v27, %v941_v37  ;;  %v978_v47 = vmul.f32 %v2042_v27, %v942_v38  ;;  %v944_v49 = vld [vmem:[#allocation2 + $0x48] sm:$0xff] }
 0x14e   : > { %v1520_v34 = vunpack.c.l.bf16 %v1519_v29  ;;  %v1521_v35 = vunpack.c.h.bf16 %v1519_v29  ;;  %v1009_v44 = vadd.f32 %v2047_v28, %v973_v32  ;;  %v1010_v45 = vadd.f32 %v2047_v28, %v974_v33  ;;  %v943_v48 = vld [vmem:[#allocation2 + $0x30] sm:$0xff]  ;;  %v1664_v62 = vld [vmem:[%s2004_s12 + $0x18] sm:$0xff]   ;;  %v945_v3 = vld [vmem:[#allocation2 + $0x80] sm:$0xff] }
 0x14f   : > { %v1011_v50 = vadd.f32 %v2047_v28, %v975_v39  ;;  %v1012_v51 = vadd.f32 %v2047_v28, %v976_v40  ;;  %v1528_v52 = vunpack.c.l.bf16 %v1663_v43  ;;  %v1529_v53 = vunpack.c.h.bf16 %v1663_v43  ;;  %v946_v4 = vld [vmem:[#allocation2 + $0x88] sm:$0xff]  ;;  %v1665_v9 = vld [vmem:[%s2004_s12 + $0x20] sm:$0xff]   ;;  %v948_v19 = vld [vmem:[#allocation2 + $0xb8] sm:$0xff] }
 0x150   : > { %v1105_v54 = vadd.f32 %v1520_v34, %v1009_v44  ;;  %v1106_v55 = vadd.f32 %v1521_v35, %v1010_v45  ;;  %v1013_v56 = vadd.f32 %v2047_v28, %v977_v46  ;;  %v1014_v57 = vadd.f32 %v2047_v28, %v978_v47  ;;  %v947_v14 = vld [vmem:[#allocation2 + $0xe8] sm:$0xff]  ;;  %v949_v31 = vld [vmem:[#allocation2 + $0x60] sm:$0xff]  ;;  %v950_v32 = vld [vmem:[#allocation2 + $0xf0] sm:$0xff] }
 0x151   : > { %v1107_v58 = vadd.f32 %v1524_v41, %v1011_v50  ;;  %v1108_v59 = vadd.f32 %v1525_v42, %v1012_v51  ;;  %v979_v60 = vmul.f32 %v2042_v27, %v943_v48  ;;  %v980_v61 = vmul.f32 %v2042_v27, %v944_v49  ;;  %v1666_v20 = vld [vmem:[%s2004_s12 + $0x28] sm:$0xff]   ;;  %v1667_v33 = vld [vmem:[%s2004_s12 + $0x30] sm:$0xff]   ;;  %v952_v47 = vld [vmem:[#allocation2 + $0x78] sm:$0xff] }
 0x152   : > { %v1137_v63 = vmax.f32 %v1105_v54, 0.0  ;;  %v1138_v0 = vmax.f32 %v1106_v55, 0.0  ;;  %v1109_v1 = vadd.f32 %v1528_v52, %v1013_v56  ;;  %v1110_v2 = vadd.f32 %v1529_v53, %v1014_v57  ;;  %v951_v46 = vld [vmem:[#allocation2 + $0x8] sm:$0xff]  ;;  %v1668_v52 = vld [vmem:[%s2004_s12 + $0x38] sm:$0xff]  }
 0x153   : > { %v1139_v5 = vmax.f32 %v1107_v58, 0.0  ;;  %v1140_v6 = vmax.f32 %v1108_v59, 0.0  ;;  %v1015_v7 = vadd.f32 %v2047_v28, %v979_v60  ;;  %v1016_v8 = vadd.f32 %v2047_v28, %v980_v61  ;;  %v953_v57 = vld [vmem:[#allocation2 + $0x38] sm:$0xff] }
 0x154   : > { %v1585_v10 = vpack.c.bf16 %v1138_v0, %v1137_v63  ;;  %v1141_v11 = vmax.f32 %v1109_v1, 0.0  ;;  %v1142_v12 = vmax.f32 %v1110_v2, 0.0  ;;  %v1532_v13 = vunpack.c.l.bf16 %v1664_v62 }
 0x155   : > { %v1590_v15 = vpack.c.bf16 %v1140_v6, %v1139_v5  ;;  %v1533_v16 = vunpack.c.h.bf16 %v1664_v62  ;;  %v981_v17 = vmul.f32 %v2042_v27, %v945_v3  ;;  %v982_v18 = vmul.f32 %v2042_v27, %v946_v4  ;;  %v954_v62 = vld [vmem:[#allocation2 + $0x58] sm:$0xff]  ;;  %v1669_v3 = vld [vmem:[%s2004_s12 + $0x40] sm:$0xff]  }
 0x156   : > { %1586 = vst [vmem:[%s2009_s14] sm:$0xff] %v1585_v10   ;;  %v1595_v21 = vpack.c.bf16 %v1142_v12, %v1141_v11  ;;  %v1111_v22 = vadd.f32 %v1532_v13, %v1015_v7  ;;  %v1536_v23 = vunpack.c.l.bf16 %v1665_v9  ;;  %v1537_v24 = vunpack.c.h.bf16 %v1665_v9  ;;  %v956_v13 = vld [vmem:[#allocation2 + $0xc8] sm:$0xff] }
 0x157   : > { %1677 = vst [vmem:[%s2009_s14 + $0x8] sm:$0xff] %v1590_v15   ;;  %v1112_v25 = vadd.f32 %v1533_v16, %v1016_v8  ;;  %v1017_v26 = vadd.f32 %v2047_v28, %v981_v17  ;;  %v1018_v29 = vadd.f32 %v2047_v28, %v982_v18  ;;  %v983_v30 = vmul.f32 %v2042_v27, %v947_v14  ;;  %v955_v8 = vld [vmem:[#allocation2 + $0x40] sm:$0xff]  ;;  %v1670_v18 = vld [vmem:[%s2004_s12 + $0x48] sm:$0xff]  }
 0x158   : > { %1678 = vst [vmem:[%s2009_s14 + $0x10] sm:$0xff] %v1595_v21   ;;  %v1143_v34 = vmax.f32 %v1111_v22, 0.0  ;;  %v984_v35 = vmul.f32 %v2042_v27, %v948_v19  ;;  %v1540_v36 = vunpack.c.l.bf16 %v1666_v20  ;;  %v1541_v37 = vunpack.c.h.bf16 %v1666_v20 }
 0x159   : > { %v1144_v38 = vmax.f32 %v1112_v25, 0.0  ;;  %v1113_v39 = vadd.f32 %v1536_v23, %v1017_v26  ;;  %v1114_v40 = vadd.f32 %v1537_v24, %v1018_v29  ;;  %v1019_v41 = vadd.f32 %v2047_v28, %v983_v30  ;;  %v957_v23 = vld [vmem:[#allocation2 + $0xe0] sm:$0xff]  ;;  %v958_v30 = vld [vmem:[#allocation2 + $0x90] sm:$0xff] }
 0x15a   : > { %v1020_v42 = vadd.f32 %v2047_v28, %v984_v35  ;;  %v985_v43 = vmul.f32 %v2042_v27, %v949_v31  ;;  %v986_v44 = vmul.f32 %v2042_v27, %v950_v32  ;;  %v1544_v45 = vunpack.c.l.bf16 %v1667_v33  ;;  %v1671_v31 = vld [vmem:[%s2004_s12 + $0x50] sm:$0xff]  }
 0x15b   : > { %v1600_v48 = vpack.c.bf16 %v1144_v38, %v1143_v34  ;;  %v1145_v49 = vmax.f32 %v1113_v39, 0.0  ;;  %v1146_v50 = vmax.f32 %v1114_v40, 0.0  ;;  %v1115_v51 = vadd.f32 %v1540_v36, %v1019_v41  ;;  %v959_v36 = vld [vmem:[#allocation2 + $0x70] sm:$0xff]  ;;  %v960_v41 = vld [vmem:[#allocation2 + $0xc0] sm:$0xff] }
 0x15c   : > { %v1116_v53 = vadd.f32 %v1541_v37, %v1020_v42  ;;  %v1021_v54 = vadd.f32 %v2047_v28, %v985_v43  ;;  %v1022_v55 = vadd.f32 %v2047_v28, %v986_v44  ;;  %v1545_v56 = vunpack.c.h.bf16 %v1667_v33 }
 0x15d   : > { %1679 = vst [vmem:[%s2009_s14 + $0x18] sm:$0xff] %v1600_v48   ;;  %v1605_v58 = vpack.c.bf16 %v1146_v50, %v1145_v49  ;;  %v1147_v59 = vmax.f32 %v1115_v51, 0.0  ;;  %v987_v60 = vmul.f32 %v2042_v27, %v951_v46  ;;  %v988_v61 = vmul.f32 %v2042_v27, %v952_v47  ;;  %v1672_v46 = vld [vmem:[%s2004_s12 + $0x58] sm:$0xff]   ;;  %v961_v51 = vld [vmem:[#allocation2 + $0xa8] sm:$0xff] }
 0x15e   : > { %v1148_v63 = vmax.f32 %v1116_v53, 0.0  ;;  %v1117_v0 = vadd.f32 %v1544_v45, %v1021_v54  ;;  %v1118_v1 = vadd.f32 %v1545_v56, %v1022_v55  ;;  %v1548_v2 = vunpack.c.l.bf16 %v1668_v52  ;;  %v962_v56 = vld [vmem:[#allocation2 + $0xd0] sm:$0xff] }
 0x15f   : > { %1680 = vst [vmem:[%s2009_s14 + $0x20] sm:$0xff] %v1605_v58   ;;  %v1023_v4 = vadd.f32 %v2047_v28, %v987_v60  ;;  %v1024_v5 = vadd.f32 %v2047_v28, %v988_v61  ;;  %v1549_v6 = vunpack.c.h.bf16 %v1668_v52  ;;  %v989_v7 = vmul.f32 %v2042_v27, %v953_v57  ;;  %v1673_v61 = vld [vmem:[%s2004_s12 + $0x60] sm:$0xff]  }
 0x160   : > { %v1610_v9 = vpack.c.bf16 %v1148_v63, %v1147_v59  ;;  %v1149_v10 = vmax.f32 %v1117_v0, 0.0  ;;  %v1150_v11 = vmax.f32 %v1118_v1, 0.0  ;;  %v990_v12 = vmul.f32 %v2042_v27, %v954_v62 }
 0x161   : > { %v1119_v14 = vadd.f32 %v1548_v2, %v1023_v4  ;;  %v1120_v15 = vadd.f32 %v1549_v6, %v1024_v5  ;;  %v1025_v16 = vadd.f32 %v2047_v28, %v989_v7  ;;  %v1552_v17 = vunpack.c.l.bf16 %v1669_v3  ;;  %v963_v2 = vld [vmem:[#allocation2 + $0x10] sm:$0xff]  ;;  %v964_v7 = vld [vmem:[#allocation2 + $0x28] sm:$0xff] }
 0x162   : > { %1681 = vst [vmem:[%s2009_s14 + $0x28] sm:$0xff] %v1610_v9   ;;  %v1615_v19 = vpack.c.bf16 %v1150_v11, %v1149_v10  ;;  %v1026_v20 = vadd.f32 %v2047_v28, %v990_v12  ;;  %v1553_v21 = vunpack.c.h.bf16 %v1669_v3  ;;  %v991_v22 = vmul.f32 %v2042_v27, %v955_v8  ;;  %v1674_v12 = vld [vmem:[%s2004_s12 + $0x68] sm:$0xff]  }
 0x163   : > { %v1151_v24 = vmax.f32 %v1119_v14, 0.0  ;;  %v1152_v25 = vmax.f32 %v1120_v15, 0.0  ;;  %v1121_v26 = vadd.f32 %v1552_v17, %v1025_v16  ;;  %v992_v29 = vmul.f32 %v2042_v27, %v956_v13  ;;  %v965_v17 = vld [vmem:[#allocation2 + $0xa0] sm:$0xff] }
 0x164   : > { %1682 = vst [vmem:[%s2009_s14 + $0x30] sm:$0xff] %v1615_v19   ;;  %v1122_v32 = vadd.f32 %v1553_v21, %v1026_v20  ;;  %v1027_v33 = vadd.f32 %v2047_v28, %v991_v22  ;;  %v1556_v34 = vunpack.c.l.bf16 %v1670_v18  ;;  %v1557_v35 = vunpack.c.h.bf16 %v1670_v18  ;;  %v966_v22 = vld [vmem:[#allocation2 + $0xf8] sm:$0xff] }
 0x165   : > { %v1620_v37 = vpack.c.bf16 %v1152_v25, %v1151_v24  ;;  %v1153_v38 = vmax.f32 %v1121_v26, 0.0  ;;  %v1028_v39 = vadd.f32 %v2047_v28, %v992_v29  ;;  %v993_v40 = vmul.f32 %v2042_v27, %v957_v23  ;;  %v1675_v23 = vld [vmem:[%s2004_s12 + $0x70] sm:$0xff]  }
 0x166   : > { %v1154_v42 = vmax.f32 %v1122_v32, 0.0  ;;  %v1123_v43 = vadd.f32 %v1556_v34, %v1027_v33  ;;  %v994_v44 = vmul.f32 %v2042_v27, %v958_v30  ;;  %v1560_v45 = vunpack.c.l.bf16 %v1671_v31  ;;  %v967_v30 = vld [vmem:[#allocation2 + $0x20] sm:$0xff] }
 0x167   : > { %1683 = vst [vmem:[%s2009_s14 + $0x38] sm:$0xff] %v1620_v37   ;;  %v1124_v47 = vadd.f32 %v1557_v35, %v1028_v39  ;;  %v1029_v48 = vadd.f32 %v2047_v28, %v993_v40  ;;  %v1561_v49 = vunpack.c.h.bf16 %v1671_v31  ;;  %v995_v50 = vmul.f32 %v2042_v27, %v959_v36  ;;  %v968_v35 = vld [vmem:[#allocation2 + $0x98] sm:$0xff] }
 0x168   : > { %v1625_v52 = vpack.c.bf16 %v1154_v42, %v1153_v38  ;;  %v1155_v53 = vmax.f32 %v1123_v43, 0.0  ;;  %v1030_v54 = vadd.f32 %v2047_v28, %v994_v44  ;;  %v996_v55 = vmul.f32 %v2042_v27, %v960_v41  ;;  %v1676_v40 = vld [vmem:[%s2004_s12 + $0x78] sm:$0xff]  }
 0x169   : > { %v1156_v57 = vmax.f32 %v1124_v47, 0.0  ;;  %v1125_v58 = vadd.f32 %v1560_v45, %v1029_v48  ;;  %v1031_v59 = vadd.f32 %v2047_v28, %v995_v50  ;;  %v1564_v60 = vunpack.c.l.bf16 %v1672_v46 }
 0x16a   : > { %1684 = vst [vmem:[%s2009_s14 + $0x40] sm:$0xff] %v1625_v52   ;;  %v1126_v62 = vadd.f32 %v1561_v49, %v1030_v54  ;;  %v1032_v63 = vadd.f32 %v2047_v28, %v996_v55  ;;  %v1565_v0 = vunpack.c.h.bf16 %v1672_v46  ;;  %v997_v1 = vmul.f32 %v2042_v27, %v961_v51 }
 0x16b   : > { %v1630_v3 = vpack.c.bf16 %v1156_v57, %v1155_v53  ;;  %v1157_v4 = vmax.f32 %v1125_v58, 0.0  ;;  %v1127_v5 = vadd.f32 %v1564_v60, %v1031_v59  ;;  %v998_v6 = vmul.f32 %v2042_v27, %v962_v56 }
 0x16c   : > { %v1158_v8 = vmax.f32 %v1126_v62, 0.0  ;;  %v1128_v9 = vadd.f32 %v1565_v0, %v1032_v63  ;;  %v1033_v10 = vadd.f32 %v2047_v28, %v997_v1  ;;  %v1568_v11 = vunpack.c.l.bf16 %v1673_v61 }
 0x16d   : > { %1685 = vst [vmem:[%s2009_s14 + $0x48] sm:$0xff] %v1630_v3   ;;  %v1159_v13 = vmax.f32 %v1127_v5, 0.0  ;;  %v1034_v14 = vadd.f32 %v2047_v28, %v998_v6  ;;  %v1569_v15 = vunpack.c.h.bf16 %v1673_v61  ;;  %v999_v16 = vmul.f32 %v2042_v27, %v963_v2 }
 0x16e   : > { %v1635_v18 = vpack.c.bf16 %v1158_v8, %v1157_v4  ;;  %v1160_v19 = vmax.f32 %v1128_v9, 0.0  ;;  %v1129_v20 = vadd.f32 %v1568_v11, %v1033_v10  ;;  %v1000_v21 = vmul.f32 %v2042_v27, %v964_v7 }
 0x16f   : > { %v1130_v24 = vadd.f32 %v1569_v15, %v1034_v14  ;;  %v1035_v25 = vadd.f32 %v2047_v28, %v999_v16  ;;  %v1572_v26 = vunpack.c.l.bf16 %v1674_v12  ;;  %v1573_v29 = vunpack.c.h.bf16 %v1674_v12 }
 0x170   : > { %1686 = vst [vmem:[%s2009_s14 + $0x50] sm:$0xff] %v1635_v18   ;;  %v1640_v31 = vpack.c.bf16 %v1160_v19, %v1159_v13  ;;  %v1161_v32 = vmax.f32 %v1129_v20, 0.0  ;;  %v1036_v33 = vadd.f32 %v2047_v28, %v1000_v21  ;;  %v1001_v34 = vmul.f32 %v2042_v27, %v965_v17 }
 0x171   : > { %v1162_v36 = vmax.f32 %v1130_v24, 0.0  ;;  %v1131_v37 = vadd.f32 %v1572_v26, %v1035_v25  ;;  %v1002_v38 = vmul.f32 %v2042_v27, %v966_v22  ;;  %v1576_v39 = vunpack.c.l.bf16 %v1675_v23 }
 0x172   : > { %1687 = vst [vmem:[%s2009_s14 + $0x58] sm:$0xff] %v1640_v31   ;;  %v1132_v41 = vadd.f32 %v1573_v29, %v1036_v33  ;;  %v1037_v42 = vadd.f32 %v2047_v28, %v1001_v34  ;;  %v1577_v43 = vunpack.c.h.bf16 %v1675_v23  ;;  %v1003_v44 = vmul.f32 %v2042_v27, %v967_v30 }
 0x173   : > { %v1645_v45 = vpack.c.bf16 %v1162_v36, %v1161_v32  ;;  %v1163_v46 = vmax.f32 %v1131_v37, 0.0  ;;  %v1038_v47 = vadd.f32 %v2047_v28, %v1002_v38  ;;  %v1004_v48 = vmul.f32 %v2042_v27, %v968_v35 }
 0x174   : > { %v1164_v49 = vmax.f32 %v1132_v41, 0.0  ;;  %v1133_v50 = vadd.f32 %v1576_v39, %v1037_v42  ;;  %v1039_v51 = vadd.f32 %v2047_v28, %v1003_v44  ;;  %v1580_v52 = vunpack.c.l.bf16 %v1676_v40 }
 0x175   : > { %1688 = vst [vmem:[%s2009_s14 + $0x60] sm:$0xff] %v1645_v45   ;;  %v1134_v53 = vadd.f32 %v1577_v43, %v1038_v47  ;;  %v1040_v54 = vadd.f32 %v2047_v28, %v1004_v48  ;;  %v1581_v55 = vunpack.c.h.bf16 %v1676_v40 }
 0x176   : > { %v1650_v56 = vpack.c.bf16 %v1164_v49, %v1163_v46  ;;  %v1165_v57 = vmax.f32 %v1133_v50, 0.0  ;;  %v1135_v58 = vadd.f32 %v1580_v52, %v1039_v51 }
 0x177   : > { %v1166_v59 = vmax.f32 %v1134_v53, 0.0  ;;  %v1136_v60 = vadd.f32 %v1581_v55, %v1040_v54 }
 0x178   : > { %1689 = vst [vmem:[%s2009_s14 + $0x68] sm:$0xff] %v1650_v56   ;;  %v1167_v61 = vmax.f32 %v1135_v58, 0.0 }
 0x179   : > { %v1655_v27 = vpack.c.bf16 %v1166_v59, %v1165_v57  ;;  %v1168_v62 = vmax.f32 %v1136_v60, 0.0 }
 0x17b   : > { %1690 = vst [vmem:[%s2009_s14 + $0x70] sm:$0xff] %v1655_v27   ;;  %v1660_v63 = vpack.c.bf16 %v1168_v62, %v1167_v61 }
 0x17d   : > { %1691 = vst [vmem:[%s2009_s14 + $0x78] sm:$0xff] %v1660_v63  }
 0x17e PF: > { %s15_s24 = sadd.s32 1, %s1830_s24   ;;  %s2172_s18 = smov %s1810_s19 }
 0x17f   : > { %p12_p0 = scmp.ge.s32.totalorder %s15_s24, 20   ;;  %s2173_s19 = smov %s1914_s6 }
 0x180   : > { %s2174_s20 = smov %s1822_s22  ;;  %s2175_s21 = smov %s1826_s23 }
 0x181   : > { %s2176_s22 = smov %s2179_s25  ;;  %s2177_s23 = smov %s2183_s26 }
 0x182   :  { %14 = sbr.rel (!%p12_p0) target bundleno = 4 (0x4), region = 136 }

// kernel: _lambda_.17
= control target key start
LH: loop header
LB: loop body
LE: loop exit
PB: predicated region body
PF: predicated region fallthrough
CT: control target
= control target key end

     0   :  { %s613_s1 = inlined_call_operand.vmem [shape: bf16[128,128], index: 1, kind: input, shape index: {}]   ;;  %s614_s2 = inlined_call_operand.vmem [shape: f32[1,128], index: 2, kind: input, shape index: {}]   ;;  %s615_s3 = inlined_call_operand.vmem [shape: f32[1,128], index: 3, kind: input, shape index: {}]   ;;  %s616_s0 = inlined_call_operand.vmem [shape: bf16[128,128], index: 0, kind: input, shape index: {}]   ;;  %s617_s4 = inlined_call_operand.vmem [shape: bf16[128,128], index: 4, kind: output, shape index: {}]  }
   0x1   :  { %v436_v0 = vld [vmem:[%s613_s1 + $0x38] sm:$0xff]  ;;  %v435_v1 = vld [vmem:[%s613_s1 + $0x30] sm:$0xff]  ;;  %v434_v2 = vld [vmem:[%s613_s1 + $0x28] sm:$0xff] }
   0x2   :  { %181 = vmatpush.bf16.msra.mxu0 %v436_v0  ;;  %484 = vmatpush.bf16.msra.mxu1 %v436_v0  ;;  %v433_v3 = vld [vmem:[%s613_s1 + $0x20] sm:$0xff]  ;;  %v432_v4 = vld [vmem:[%s613_s1 + $0x18] sm:$0xff]  ;;  %v431_v5 = vld [vmem:[%s613_s1 + $0x10] sm:$0xff] }
   0x3   :  { %485 = vmatpush.bf16.msra.mxu2 %v436_v0  ;;  %486 = vmatpush.bf16.msra.mxu3 %v436_v0  ;;  %v430_v6 = vld [vmem:[%s613_s1 + $0x8] sm:$0xff]  ;;  %v429_v7 = vld [vmem:[%s613_s1] sm:$0xff]  ;;  %v423_v9 = vld [vmem:[%s616_s0 + $0x10] sm:$0xff] }
   0x4   :  { %v421_v8 = vld [vmem:[%s616_s0] sm:$0xff]  ;;  %v427_v11 = vld [vmem:[%s616_s0 + $0x30] sm:$0xff]  ;;  %v422_v12 = vld [vmem:[%s616_s0 + $0x8] sm:$0xff] }
   0x5   :  { %v425_v10 = vld [vmem:[%s616_s0 + $0x20] sm:$0xff]  ;;  %v424_v13 = vld [vmem:[%s616_s0 + $0x18] sm:$0xff]  ;;  %v426_v14 = vld [vmem:[%s616_s0 + $0x28] sm:$0xff] }
   0x6   :  { %182 = vmatpush.bf16.msra.mxu0 %v435_v1  ;;  %487 = vmatpush.bf16.msra.mxu1 %v435_v1  ;;  %v428_v15 = vld [vmem:[%s616_s0 + $0x38] sm:$0xff]  ;;  %v508_v18 = vld [vmem:[%s614_s2] ss:$0 sm:$0xff] }
   0x7   :  { %488 = vmatpush.bf16.msra.mxu2 %v435_v1  ;;  %489 = vmatpush.bf16.msra.mxu3 %v435_v1  ;;  %v509_v20 = vld [vmem:[%s615_s3] ss:$0 sm:$0xff] }
   0xa   :  { %183 = vmatpush.bf16.msra.mxu0 %v434_v2  ;;  %490 = vmatpush.bf16.msra.mxu1 %v434_v2 }
   0xb   :  { %491 = vmatpush.bf16.msra.mxu2 %v434_v2  ;;  %492 = vmatpush.bf16.msra.mxu3 %v434_v2 }
   0xe   :  { %184 = vmatpush.bf16.msra.mxu0 %v433_v3  ;;  %493 = vmatpush.bf16.msra.mxu1 %v433_v3 }
   0xf   :  { %494 = vmatpush.bf16.msra.mxu2 %v433_v3  ;;  %495 = vmatpush.bf16.msra.mxu3 %v433_v3 }
  0x12   :  { %185 = vmatpush.bf16.msra.mxu0 %v432_v4  ;;  %496 = vmatpush.bf16.msra.mxu1 %v432_v4 }
  0x13   :  { %497 = vmatpush.bf16.msra.mxu2 %v432_v4  ;;  %498 = vmatpush.bf16.msra.mxu3 %v432_v4 }
  0x16   :  { %186 = vmatpush.bf16.msra.mxu0 %v431_v5  ;;  %499 = vmatpush.bf16.msra.mxu1 %v431_v5 }
  0x17   :  { %500 = vmatpush.bf16.msra.mxu2 %v431_v5  ;;  %501 = vmatpush.bf16.msra.mxu3 %v431_v5 }
  0x1a   :  { %187 = vmatpush.bf16.msra.mxu0 %v430_v6  ;;  %502 = vmatpush.bf16.msra.mxu1 %v430_v6 }
  0x1b   :  { %503 = vmatpush.bf16.msra.mxu2 %v430_v6  ;;  %504 = vmatpush.bf16.msra.mxu3 %v430_v6 }
  0x1e   :  { %188 = vmatpush.bf16.msra.mxu0 %v429_v7  ;;  %505 = vmatpush.bf16.msra.mxu1 %v429_v7 }
  0x1f   :  { %506 = vmatpush.bf16.msra.mxu2 %v429_v7  ;;  %507 = vmatpush.bf16.msra.mxu3 %v429_v7 }
  0x21   :  { %189 = vmatmul.bf16.vlgmr.msra.gmra.mxu0 %v421_v8  ;;  %199 = vmatmul.bf16.vlgmr.msra.gmra.mxu1 %v423_v9 }
  0x22   :  { %209 = vmatmul.bf16.vlgmr.msra.gmra.mxu2 %v425_v10  ;;  %219 = vmatmul.bf16.vlgmr.msra.gmra.mxu3 %v427_v11 }
  0x31   :  { %194 = vmatmul.bf16.gmra.mxu0 %v422_v12  ;;  %204 = vmatmul.bf16.gmra.mxu1 %v424_v13 }
  0x32   :  { %214 = vmatmul.bf16.gmra.mxu2 %v426_v14  ;;  %224 = vmatmul.bf16.gmra.mxu3 %v428_v15 }
  0x9e   :  { %v190_v16 = vpop.f32.mrf.mxu0  ;;  %v200_v17 = vpop.f32.mrf.mxu1 }
  0x9f   :  { %v285_v19 = vmul.f32 %v508_v18, %v190_v16  ;;  %v289_v21 = vmul.f32 %v508_v18, %v200_v17 }
  0xa1   :  { %v305_v28 = vadd.f32 %v509_v20, %v285_v19  ;;  %v309_v29 = vadd.f32 %v509_v20, %v289_v21 }
  0xa5   :  { %v210_v22 = vpop.f32.mrf.mxu2  ;;  %v220_v23 = vpop.f32.mrf.mxu3 }
  0xa6   :  { %v192_v24 = vpop.f32.mrf.mxu0  ;;  %v202_v25 = vpop.f32.mrf.mxu1  ;;  %v293_v34 = vmul.f32 %v508_v18, %v210_v22  ;;  %v297_v35 = vmul.f32 %v508_v18, %v220_v23 }
  0xa7   :  { %v286_v26 = vmul.f32 %v508_v18, %v192_v24  ;;  %v290_v27 = vmul.f32 %v508_v18, %v202_v25 }
  0xa8   :  { %v313_v42 = vadd.f32 %v509_v20, %v293_v34  ;;  %v317_v43 = vadd.f32 %v509_v20, %v297_v35 }
  0xa9   :  { %v306_v30 = vadd.f32 %v509_v20, %v286_v26  ;;  %v310_v31 = vadd.f32 %v509_v20, %v290_v27 }
  0xab   :  { %v440_v32 = vpack.c.bf16 %v306_v30, %v305_v28  ;;  %v450_v33 = vpack.c.bf16 %v310_v31, %v309_v29 }
  0xad   :  { %441 = vst [vmem:[%s617_s4] sm:$0xff] %v440_v32   ;;  %v212_v36 = vpop.f32.mrf.mxu2  ;;  %v222_v37 = vpop.f32.mrf.mxu3 }
  0xae   :  { %478 = vst [vmem:[%s617_s4 + $0x10] sm:$0xff] %v450_v33   ;;  %v294_v38 = vmul.f32 %v508_v18, %v212_v36  ;;  %v298_v39 = vmul.f32 %v508_v18, %v222_v37  ;;  %v195_v40 = vpop.f32.mrf.mxu0  ;;  %v205_v41 = vpop.f32.mrf.mxu1 }
  0xaf   :  { %v287_v48 = vmul.f32 %v508_v18, %v195_v40  ;;  %v291_v49 = vmul.f32 %v508_v18, %v205_v41 }
  0xb0   :  { %v314_v44 = vadd.f32 %v509_v20, %v294_v38  ;;  %v318_v45 = vadd.f32 %v509_v20, %v298_v39 }
  0xb1   :  { %v307_v56 = vadd.f32 %v509_v20, %v287_v48  ;;  %v311_v57 = vadd.f32 %v509_v20, %v291_v49 }
  0xb2   :  { %v460_v46 = vpack.c.bf16 %v314_v44, %v313_v42  ;;  %v470_v47 = vpack.c.bf16 %v318_v45, %v317_v43 }
  0xb4   :  { %480 = vst [vmem:[%s617_s4 + $0x20] sm:$0xff] %v460_v46  }
  0xb5   :  { %482 = vst [vmem:[%s617_s4 + $0x30] sm:$0xff] %v470_v47   ;;  %v215_v50 = vpop.f32.mrf.mxu2  ;;  %v225_v51 = vpop.f32.mrf.mxu3 }
  0xb6   :  { %v197_v52 = vpop.f32.mrf.mxu0  ;;  %v207_v53 = vpop.f32.mrf.mxu1  ;;  %v295_v62 = vmul.f32 %v508_v18, %v215_v50  ;;  %v299_v63 = vmul.f32 %v508_v18, %v225_v51 }
  0xb7   :  { %v288_v54 = vmul.f32 %v508_v18, %v197_v52  ;;  %v292_v55 = vmul.f32 %v508_v18, %v207_v53 }
  0xb8   :  { %v315_v4 = vadd.f32 %v509_v20, %v295_v62  ;;  %v319_v5 = vadd.f32 %v509_v20, %v299_v63 }
  0xb9   :  { %v308_v58 = vadd.f32 %v509_v20, %v288_v54  ;;  %v312_v59 = vadd.f32 %v509_v20, %v292_v55 }
  0xbb   :  { %v445_v60 = vpack.c.bf16 %v308_v58, %v307_v56  ;;  %v455_v61 = vpack.c.bf16 %v312_v59, %v311_v57 }
  0xbd   :  { %477 = vst [vmem:[%s617_s4 + $0x8] sm:$0xff] %v445_v60   ;;  %v217_v0 = vpop.f32.mrf.mxu2  ;;  %v227_v1 = vpop.f32.mrf.mxu3 }
  0xbe   :  { %479 = vst [vmem:[%s617_s4 + $0x18] sm:$0xff] %v455_v61   ;;  %v296_v2 = vmul.f32 %v508_v18, %v217_v0  ;;  %v300_v3 = vmul.f32 %v508_v18, %v227_v1 }
  0xc0   :  { %v316_v6 = vadd.f32 %v509_v20, %v296_v2  ;;  %v320_v7 = vadd.f32 %v509_v20, %v300_v3 }
  0xc2   :  { %v465_v8 = vpack.c.bf16 %v316_v6, %v315_v4  ;;  %v475_v9 = vpack.c.bf16 %v320_v7, %v319_v5 }
  0xc4   :  { %481 = vst [vmem:[%s617_s4 + $0x28] sm:$0xff] %v465_v8  }
  0xc5   :  { %483 = vst [vmem:[%s617_s4 + $0x38] sm:$0xff] %v475_v9  }

// kernel: _lambda_.16
= control target key start
LH: loop header
LB: loop body
LE: loop exit
PB: predicated region body
PF: predicated region fallthrough
CT: control target
= control target key end

     0   :  { %s1148_s15 = smov 0   ;;  %s1150_s16 = smov 0   ;;  %s1301_s0 = inlined_call_operand.vmem [shape: bf16[128,1152], index: 0, kind: input, shape index: {}]   ;;  %s1302_s1 = inlined_call_operand.vmem [shape: bf16[1152,128], index: 1, kind: input, shape index: {}]   ;;  %s1303_s2 = inlined_call_operand.vmem [shape: f32[1,128], index: 2, kind: input, shape index: {}]   ;;  %s1304_s3 = inlined_call_operand.vmem [shape: f32[1,128], index: 3, kind: input, shape index: {}]   ;;  %s1305_s4 = inlined_call_operand.vmem [shape: bf16[128,128], index: 4, kind: output, shape index: {}]  }
   0x1   :  { %s1152_s17 = smov 0   ;;  %s1154_s18 = smov 0  }
   0x2   :  { %s1156_s19 = smov 0  }
   0x3 LB: > { %s26_s20 = sadd.s32 1, %s1116_s18  ;;  %p49_p1 = scmp.ne.s32.totalorder %s1108_s16, %s1104_s15  ;;  %s1120_s19 = sphi %s1156_s19, %s14_s19   ;;  %s1116_s18 = sphi %s1154_s18, %s1309_s18   ;;  %s1112_s17 = sphi %s1152_s17, %s1308_s17   ;;  %s1108_s16 = sphi %s1150_s16, %s1307_s16   ;;  %s1104_s15 = sphi %s1148_s15, %s1306_s15  }
   0x4   : > { %p27_p0 = scmp.ge.s32.totalorder %s26_s20, 9  ;;  %p50_p2 = scmp.eq.s32.totalorder %s1120_s19, 0 }
   0x5   : > { %s42_s22 = sadd.s32 1, %s1108_s16  ;;  %p875_p5 = scmp.ge.s32.totalorder %s1120_s19, 9 }
   0x6   : > { %s1311_s20 = smov (%p27_p0, %s26_s20), 0  ;;  %p51_p3 = por %p50_p2, %p49_p1 }
   0x7   : > { %s38_s21 = ssub.s32 %s1116_s18, %s1311_s20  ;;  %195 = sbr.rel (%p875_p5) target bundleno = 32 (0x20), region = 24 }
   0x8   : > { %p40_p4 = scmp.eq.s32.totalorder %s38_s21, 0 }
   0xa   : > { %s1183_s23 = scalar_select %p40_p4, %s1108_s16, %s42_s22  }
   0xc   : > { %198 = sbr.rel (!%p51_p3) target bundleno = 32 (0x20), region = 28  ;;  %s200_s24 = sand.u32 (%p51_p3), 1, %s1108_s16  }
   0xd   : > { %s877_s25 = sshll.u32 (%p51_p3), %s1116_s18, 2  ;;  %s876_s26 = sshll.u32 (%p51_p3), %s200_s24, 6 }
   0xe   : > { %s1191_s29 = scalar_lea.vmem (%p51_p3), %s1301_s0, %s877_s25  ;;  %s202_s30 = scalar_lea.vmem (%p51_p3), [#allocation3], %s876_s26 }
   0xf   : > { %v224_v0 = vld [vmem:[%s1191_s29] sm:$0xf] (%p51_p3)  ;;  %v226_v1 = vld [vmem:[%s1191_s29 + $0x24] sm:$0xf] (%p51_p3)  ;;  %v228_v2 = vld [vmem:[%s1191_s29 + $0x48] sm:$0xf] (%p51_p3) }
  0x10   : > { %225 = vst [vmem:[%s202_s30] sm:$0xf] (%p51_p3), %v224_v0  ;;  %v230_v3 = vld [vmem:[%s1191_s29 + $0x6c] sm:$0xf] (%p51_p3)  ;;  %v232_v4 = vld [vmem:[%s1191_s29 + $0x90] sm:$0xf] (%p51_p3) }
  0x11   : > { %227 = vst [vmem:[%s202_s30 + $0x4] sm:$0xf] %v226_v1  ;;  %v234_v5 = vld [vmem:[%s1191_s29 + $0xb4] sm:$0xf]  ;;  %v236_v6 = vld [vmem:[%s1191_s29 + $0xd8] sm:$0xf] }
  0x12   : > { %229 = vst [vmem:[%s202_s30 + $0x8] sm:$0xf] %v228_v2  ;;  %v238_v7 = vld [vmem:[%s1191_s29 + $0xfc] sm:$0xf]  ;;  %v240_v8 = vld [vmem:[%s1191_s29 + $0x120] sm:$0xf] }
  0x13   : > { %231 = vst [vmem:[%s202_s30 + $0xc] sm:$0xf] %v230_v3  ;;  %v242_v9 = vld [vmem:[%s1191_s29 + $0x144] sm:$0xf]  ;;  %v244_v10 = vld [vmem:[%s1191_s29 + $0x168] sm:$0xf] }
  0x14   : > { %233 = vst [vmem:[%s202_s30 + $0x10] sm:$0xf] %v232_v4  ;;  %v246_v11 = vld [vmem:[%s1191_s29 + $0x18c] sm:$0xf]  ;;  %v248_v12 = vld [vmem:[%s1191_s29 + $0x1b0] sm:$0xf] }
  0x15   : > { %235 = vst [vmem:[%s202_s30 + $0x14] sm:$0xf] %v234_v5  ;;  %v250_v13 = vld [vmem:[%s1191_s29 + $0x1d4] sm:$0xf]  ;;  %v252_v14 = vld [vmem:[%s1191_s29 + $0x1f8] sm:$0xf] }
  0x16   : > { %237 = vst [vmem:[%s202_s30 + $0x18] sm:$0xf] %v236_v6  ;;  %v254_v15 = vld [vmem:[%s1191_s29 + $0x21c] sm:$0xf] }
  0x17   : > { %239 = vst [vmem:[%s202_s30 + $0x1c] sm:$0xf] %v238_v7 }
  0x18   : > { %241 = vst [vmem:[%s202_s30 + $0x20] sm:$0xf] %v240_v8 }
  0x19   : > { %243 = vst [vmem:[%s202_s30 + $0x24] sm:$0xf] %v242_v9 }
  0x1a   : > { %245 = vst [vmem:[%s202_s30 + $0x28] sm:$0xf] %v244_v10 }
  0x1b   : > { %247 = vst [vmem:[%s202_s30 + $0x2c] sm:$0xf] %v246_v11 }
  0x1c   : > { %249 = vst [vmem:[%s202_s30 + $0x30] sm:$0xf] %v248_v12 }
  0x1d   : > { %251 = vst [vmem:[%s202_s30 + $0x34] sm:$0xf] %v250_v13 }
  0x1e   : > { %253 = vst [vmem:[%s202_s30 + $0x38] sm:$0xf] %v252_v14 }
  0x1f   : > { %255 = vst [vmem:[%s202_s30 + $0x3c] sm:$0xf] %v254_v15 }
  0x20 PF: > { %p878_p6 = scmp.ge.s32.totalorder %s1120_s19, 1  ;;  %p322_p7 = scmp.lt.s32.totalorder %s1120_s19, 10 }
  0x22   : > { %p323_p8 = pnand %p878_p6, %p322_p7 }
  0x23   : > { %s329_s5 = sand.u32 (!%p323_p8), 1, %s1104_s15   ;;  %s880_s6 = sshll.u32 (!%p323_p8), %s1112_s17, 4 }
  0x24   : > { %326 = sbr.rel (%p323_p8) target bundleno = 277 (0x115), region = 73  ;;  %s879_s7 = sshll.u32 (!%p323_p8), %s329_s5, 6 }
  0x25   : > { %p373_p9 = scmp.lt.s32.totalorder (!%p323_p8), %s880_s6, 143  ;;  %s1218_s12 = scalar_lea.vmem (!%p323_p8), [#allocation3], %s879_s7 }
  0x26   : > { %p882_p10 = scmp.ne.s32.totalorder (!%p323_p8), %s1112_s17, 0 }
  0x29   : > { %s1313_s6 = smov (!%p373_p9, %s880_s6), 143  ;;  %399 = sbr.rel (%p882_p10) target bundleno = 63 (0x3f), region = 81 }
  0x2a   : > { %s881_s8 = sshll.u32 %s1313_s6, 2 }
  0x2b   : > { %s1216_s11 = scalar_lea.vmem %s1302_s1, %s881_s8 }
  0x2e   : > { %v1122_v16 = vmov 0.0  }
  0x2f   : > { %400 = vst [vmem:[#allocation2 + $0x30] sm:$0xff] %v1122_v16 }
  0x30   : > { %401 = vst [vmem:[#allocation2] sm:$0xff] %v1122_v16 }
  0x31   : > { %402 = vst [vmem:[#allocation2 + $0x58] sm:$0xff] %v1122_v16 }
  0x32   : > { %403 = vst [vmem:[#allocation2 + $0x18] sm:$0xff] %v1122_v16 }
  0x33   : > { %404 = vst [vmem:[#allocation2 + $0x50] sm:$0xff] %v1122_v16 }
  0x34   : > { %405 = vst [vmem:[#allocation2 + $0x68] sm:$0xff] %v1122_v16 }
  0x35   : > { %406 = vst [vmem:[#allocation2 + $0x8] sm:$0xff] %v1122_v16 }
  0x36   : > { %407 = vst [vmem:[#allocation2 + $0x48] sm:$0xff] %v1122_v16 }
  0x37   : > { %408 = vst [vmem:[#allocation2 + $0x40] sm:$0xff] %v1122_v16 }
  0x38   : > { %409 = vst [vmem:[#allocation2 + $0x20] sm:$0xff] %v1122_v16 }
  0x39   : > { %410 = vst [vmem:[#allocation2 + $0x10] sm:$0xff] %v1122_v16 }
  0x3a   : > { %411 = vst [vmem:[#allocation2 + $0x38] sm:$0xff] %v1122_v16 }
  0x3b   : > { %412 = vst [vmem:[#allocation2 + $0x60] sm:$0xff] %v1122_v16 }
  0x3c   : > { %413 = vst [vmem:[#allocation2 + $0x70] sm:$0xff] %v1122_v16 }
  0x3d   : > { %414 = vst [vmem:[#allocation2 + $0x78] sm:$0xff] %v1122_v16 }
  0x3e   : > { %415 = vst [vmem:[#allocation2 + $0x28] sm:$0xff] %v1122_v16 }
  0x3f PF: > { %v967_v17 = vld [vmem:[%s1216_s11 + $0x38] sm:$0xff]  ;;  %v966_v18 = vld [vmem:[%s1216_s11 + $0x30] sm:$0xff]  ;;  %v965_v19 = vld [vmem:[%s1216_s11 + $0x28] sm:$0xff]  ;;  %p947_p11 = scmp.ne.s32.totalorder %s1112_s17, 8 }
  0x40   : > { %560 = vmatpush.bf16.msra.mxu0 %v967_v17  ;;  %1015 = vmatpush.bf16.msra.mxu1 %v967_v17  ;;  %v964_v20 = vld [vmem:[%s1216_s11 + $0x20] sm:$0xff]  ;;  %v963_v21 = vld [vmem:[%s1216_s11 + $0x18] sm:$0xff]  ;;  %v962_v22 = vld [vmem:[%s1216_s11 + $0x10] sm:$0xff] }
  0x41   : > { %1016 = vmatpush.bf16.msra.mxu2 %v967_v17  ;;  %1017 = vmatpush.bf16.msra.mxu3 %v967_v17  ;;  %v961_v23 = vld [vmem:[%s1216_s11 + $0x8] sm:$0xff]  ;;  %v960_v24 = vld [vmem:[%s1216_s11] sm:$0xff]  ;;  %v954_v26 = vld [vmem:[%s1218_s12 + $0x10] sm:$0xff] }
  0x42   : > { %v952_v25 = vld [vmem:[%s1218_s12] sm:$0xff]  ;;  %v958_v28 = vld [vmem:[%s1218_s12 + $0x30] sm:$0xff]  ;;  %v953_v29 = vld [vmem:[%s1218_s12 + $0x8] sm:$0xff] }
  0x43   : > { %v956_v27 = vld [vmem:[%s1218_s12 + $0x20] sm:$0xff]  ;;  %v955_v30 = vld [vmem:[%s1218_s12 + $0x18] sm:$0xff]  ;;  %v957_v31 = vld [vmem:[%s1218_s12 + $0x28] sm:$0xff] }
  0x44   : > { %561 = vmatpush.bf16.msra.mxu0 %v966_v18  ;;  %1018 = vmatpush.bf16.msra.mxu1 %v966_v18  ;;  %v959_v32 = vld [vmem:[%s1218_s12 + $0x38] sm:$0xff]  ;;  %v416_v33 = vld [vmem:[#allocation2 + $0x30] sm:$0xff]  ;;  %v424_v39 = vld [vmem:[#allocation2 + $0x40] sm:$0xff] }
  0x45   : > { %1019 = vmatpush.bf16.msra.mxu2 %v966_v18  ;;  %1020 = vmatpush.bf16.msra.mxu3 %v966_v18  ;;  %v420_v34 = vld [vmem:[#allocation2 + $0x50] sm:$0xff]  ;;  %v428_v40 = vld [vmem:[#allocation2 + $0x60] sm:$0xff]  ;;  %v421_v42 = vld [vmem:[#allocation2 + $0x68] sm:$0xff] }
  0x46   : > { %v417_v41 = vld [vmem:[#allocation2] sm:$0xff]  ;;  %v429_v52 = vld [vmem:[#allocation2 + $0x70] sm:$0xff]  ;;  %v418_v53 = vld [vmem:[#allocation2 + $0x58] sm:$0xff] }
  0x47   : > { %v425_v51 = vld [vmem:[#allocation2 + $0x20] sm:$0xff]  ;;  %v422_v54 = vld [vmem:[#allocation2 + $0x8] sm:$0xff]  ;;  %v426_v63 = vld [vmem:[#allocation2 + $0x10] sm:$0xff] }
  0x48   : > { %562 = vmatpush.bf16.msra.mxu0 %v965_v19  ;;  %1021 = vmatpush.bf16.msra.mxu1 %v965_v19  ;;  %v430_v0 = vld [vmem:[#allocation2 + $0x78] sm:$0xff]  ;;  %v423_v2 = vld [vmem:[#allocation2 + $0x48] sm:$0xff] }
  0x49   : > { %1022 = vmatpush.bf16.msra.mxu2 %v965_v19  ;;  %1023 = vmatpush.bf16.msra.mxu3 %v965_v19  ;;  %v419_v1 = vld [vmem:[#allocation2 + $0x18] sm:$0xff]  ;;  %v431_v12 = vld [vmem:[#allocation2 + $0x28] sm:$0xff] }
  0x4a   : > { %v427_v11 = vld [vmem:[#allocation2 + $0x38] sm:$0xff] }
  0x4c   : > { %563 = vmatpush.bf16.msra.mxu0 %v964_v20  ;;  %1024 = vmatpush.bf16.msra.mxu1 %v964_v20 }
  0x4d   : > { %1025 = vmatpush.bf16.msra.mxu2 %v964_v20  ;;  %1026 = vmatpush.bf16.msra.mxu3 %v964_v20 }
  0x50   : > { %564 = vmatpush.bf16.msra.mxu0 %v963_v21  ;;  %1027 = vmatpush.bf16.msra.mxu1 %v963_v21 }
  0x51   : > { %1028 = vmatpush.bf16.msra.mxu2 %v963_v21  ;;  %1029 = vmatpush.bf16.msra.mxu3 %v963_v21 }
  0x54   : > { %565 = vmatpush.bf16.msra.mxu0 %v962_v22  ;;  %1030 = vmatpush.bf16.msra.mxu1 %v962_v22 }
  0x55   : > { %1031 = vmatpush.bf16.msra.mxu2 %v962_v22  ;;  %1032 = vmatpush.bf16.msra.mxu3 %v962_v22 }
  0x58   : > { %566 = vmatpush.bf16.msra.mxu0 %v961_v23  ;;  %1033 = vmatpush.bf16.msra.mxu1 %v961_v23 }
  0x59   : > { %1034 = vmatpush.bf16.msra.mxu2 %v961_v23  ;;  %1035 = vmatpush.bf16.msra.mxu3 %v961_v23 }
  0x5c   : > { %567 = vmatpush.bf16.msra.mxu0 %v960_v24  ;;  %1036 = vmatpush.bf16.msra.mxu1 %v960_v24 }
  0x5d   : > { %1037 = vmatpush.bf16.msra.mxu2 %v960_v24  ;;  %1038 = vmatpush.bf16.msra.mxu3 %v960_v24 }
  0x5f   : > { %568 = vmatmul.bf16.vlgmr.msra.gmra.mxu0 %v952_v25  ;;  %578 = vmatmul.bf16.vlgmr.msra.gmra.mxu1 %v954_v26 }
  0x60   : > { %588 = vmatmul.bf16.vlgmr.msra.gmra.mxu2 %v956_v27  ;;  %598 = vmatmul.bf16.vlgmr.msra.gmra.mxu3 %v958_v28 }
  0x6f   : > { %573 = vmatmul.bf16.gmra.mxu0 %v953_v29  ;;  %583 = vmatmul.bf16.gmra.mxu1 %v955_v30 }
  0x70   : > { %593 = vmatmul.bf16.gmra.mxu2 %v957_v31  ;;  %603 = vmatmul.bf16.gmra.mxu3 %v959_v32 }
  0xdc   : > { %v569_v35 = vpop.f32.mrf.mxu0  ;;  %v579_v36 = vpop.f32.mrf.mxu1 }
  0xdd   : > { %v609_v37 = vadd.f32 %v569_v35, %v416_v33  ;;  %v613_v38 = vadd.f32 %v579_v36, %v420_v34 }
  0xdf   : > { %625 = vst [vmem:[#allocation2 + $0x30] sm:$0xff] %v609_v37 }
  0xe0   : > { %629 = vst [vmem:[#allocation2 + $0x50] sm:$0xff] %v613_v38 }
  0xe3   : > { %v589_v43 = vpop.f32.mrf.mxu2  ;;  %v599_v44 = vpop.f32.mrf.mxu3 }
  0xe4   : > { %v617_v45 = vadd.f32 %v589_v43, %v424_v39  ;;  %v621_v46 = vadd.f32 %v599_v44, %v428_v40  ;;  %v571_v47 = vpop.f32.mrf.mxu0  ;;  %v581_v48 = vpop.f32.mrf.mxu1 }
  0xe5   : > { %v610_v49 = vadd.f32 %v571_v47, %v417_v41  ;;  %v614_v50 = vadd.f32 %v581_v48, %v421_v42 }
  0xe6   : > { %633 = vst [vmem:[#allocation2 + $0x40] sm:$0xff] %v617_v45 }
  0xe7   : > { %637 = vst [vmem:[#allocation2 + $0x60] sm:$0xff] %v621_v46 }
  0xe8   : > { %626 = vst [vmem:[#allocation2] sm:$0xff] %v610_v49 }
  0xe9   : > { %630 = vst [vmem:[#allocation2 + $0x68] sm:$0xff] %v614_v50 }
  0xeb   : > { %v591_v55 = vpop.f32.mrf.mxu2  ;;  %v601_v56 = vpop.f32.mrf.mxu3 }
  0xec   : > { %v618_v57 = vadd.f32 %v591_v55, %v425_v51  ;;  %v622_v58 = vadd.f32 %v601_v56, %v429_v52  ;;  %v574_v59 = vpop.f32.mrf.mxu0  ;;  %v584_v60 = vpop.f32.mrf.mxu1 }
  0xed   : > { %v611_v61 = vadd.f32 %v574_v59, %v418_v53  ;;  %v615_v62 = vadd.f32 %v584_v60, %v422_v54 }
  0xee   : > { %634 = vst [vmem:[#allocation2 + $0x20] sm:$0xff] %v618_v57 }
  0xef   : > { %638 = vst [vmem:[#allocation2 + $0x70] sm:$0xff] %v622_v58 }
  0xf0   : > { %627 = vst [vmem:[#allocation2 + $0x58] sm:$0xff] %v611_v61 }
  0xf1   : > { %631 = vst [vmem:[#allocation2 + $0x8] sm:$0xff] %v615_v62 }
  0xf3   : > { %v594_v3 = vpop.f32.mrf.mxu2  ;;  %v604_v4 = vpop.f32.mrf.mxu3 }
  0xf4   : > { %v619_v5 = vadd.f32 %v594_v3, %v426_v63  ;;  %v623_v6 = vadd.f32 %v604_v4, %v430_v0  ;;  %v576_v7 = vpop.f32.mrf.mxu0  ;;  %v586_v8 = vpop.f32.mrf.mxu1 }
  0xf5   : > { %v612_v9 = vadd.f32 %v576_v7, %v419_v1  ;;  %v616_v10 = vadd.f32 %v586_v8, %v423_v2 }
  0xf6   : > { %635 = vst [vmem:[#allocation2 + $0x10] sm:$0xff] %v619_v5 }
  0xf7   : > { %639 = vst [vmem:[#allocation2 + $0x78] sm:$0xff] %v623_v6 }
  0xf8   : > { %628 = vst [vmem:[#allocation2 + $0x18] sm:$0xff] %v612_v9 }
  0xf9   : > { %632 = vst [vmem:[#allocation2 + $0x48] sm:$0xff] %v616_v10 }
  0xfb   : > { %v596_v13 = vpop.f32.mrf.mxu2  ;;  %v606_v14 = vpop.f32.mrf.mxu3  ;;  %644 = sbr.rel (%p947_p11) target bundleno = 277 (0x115), region = 85 }
  0xfc   : > { %v620_v15 = vadd.f32 %v596_v13, %v427_v11  ;;  %v624_v16 = vadd.f32 %v606_v14, %v431_v12 }
  0xfe   : > { %636 = vst [vmem:[#allocation2 + $0x38] sm:$0xff] %v620_v15 }
  0xff   : > { %640 = vst [vmem:[#allocation2 + $0x28] sm:$0xff] %v624_v16 }
 0x100   : > { %v645_v17 = vld [vmem:[#allocation2 + $0x30] sm:$0xff]  ;;  %v646_v18 = vld [vmem:[#allocation2] sm:$0xff]  ;;  %v647_v21 = vld [vmem:[#allocation2 + $0x58] sm:$0xff] }
 0x101   : > { %v1080_v19 = vld [vmem:[%s1303_s2] ss:$0 sm:$0xff]  ;;  %v648_v22 = vld [vmem:[#allocation2 + $0x18] sm:$0xff]  ;;  %v649_v23 = vld [vmem:[#allocation2 + $0x50] sm:$0xff] }
 0x102   : > { %v1244_v20 = vld [vmem:[%s1304_s3] ss:$0 sm:$0xff]  ;;  %v665_v24 = vmul.f32 %v1080_v19, %v645_v17  ;;  %v666_v25 = vmul.f32 %v1080_v19, %v646_v18  ;;  %v667_v26 = vmul.f32 %v1080_v19, %v647_v21  ;;  %v668_v27 = vmul.f32 %v1080_v19, %v648_v22  ;;  %v650_v28 = vld [vmem:[#allocation2 + $0x68] sm:$0xff]  ;;  %v655_v49 = vld [vmem:[#allocation2 + $0x10] sm:$0xff] }
 0x103   : > { %v651_v29 = vld [vmem:[#allocation2 + $0x8] sm:$0xff]  ;;  %v669_v31 = vmul.f32 %v1080_v19, %v649_v23  ;;  %v670_v32 = vmul.f32 %v1080_v19, %v650_v28  ;;  %v653_v43 = vld [vmem:[#allocation2 + $0x40] sm:$0xff]  ;;  %v658_v56 = vld [vmem:[#allocation2 + $0x70] sm:$0xff]  ;;  %v675_v1 = vmul.f32 %v1080_v19, %v655_v49 }
 0x104   : > { %v652_v30 = vld [vmem:[#allocation2 + $0x48] sm:$0xff]  ;;  %v671_v33 = vmul.f32 %v1080_v19, %v651_v29  ;;  %v685_v35 = vadd.f32 %v1244_v20, %v665_v24  ;;  %v686_v36 = vadd.f32 %v1244_v20, %v666_v25  ;;  %v687_v37 = vadd.f32 %v1244_v20, %v667_v26  ;;  %v654_v44 = vld [vmem:[#allocation2 + $0x20] sm:$0xff]  ;;  %v659_v61 = vld [vmem:[#allocation2 + $0x78] sm:$0xff] }
 0x105   : > { %v672_v34 = vmul.f32 %v1080_v19, %v652_v30  ;;  %v688_v38 = vadd.f32 %v1244_v20, %v668_v27  ;;  %v689_v39 = vadd.f32 %v1244_v20, %v669_v31  ;;  %v690_v40 = vadd.f32 %v1244_v20, %v670_v32  ;;  %v656_v50 = vld [vmem:[#allocation2 + $0x38] sm:$0xff]  ;;  %v657_v55 = vld [vmem:[#allocation2 + $0x60] sm:$0xff] }
 0x106   : > { %v691_v41 = vadd.f32 %v1244_v20, %v671_v33  ;;  %v701_v45 = vmax.f32 %v685_v35, 0.0  ;;  %v702_v46 = vmax.f32 %v686_v36, 0.0  ;;  %v703_v47 = vmax.f32 %v687_v37, 0.0  ;;  %v660_v62 = vld [vmem:[#allocation2 + $0x28] sm:$0xff] }
 0x107   : > { %v692_v42 = vadd.f32 %v1244_v20, %v672_v34  ;;  %v704_v48 = vmax.f32 %v688_v38, 0.0  ;;  %v705_v51 = vmax.f32 %v689_v39, 0.0  ;;  %v706_v52 = vmax.f32 %v690_v40, 0.0 }
 0x108   : > { %v707_v53 = vmax.f32 %v691_v41, 0.0  ;;  %v971_v57 = vpack.c.bf16 %v702_v46, %v701_v45  ;;  %v673_v59 = vmul.f32 %v1080_v19, %v653_v43  ;;  %v674_v60 = vmul.f32 %v1080_v19, %v654_v44 }
 0x109   : > { %v708_v54 = vmax.f32 %v692_v42, 0.0  ;;  %v976_v58 = vpack.c.bf16 %v704_v48, %v703_v47  ;;  %v981_v63 = vpack.c.bf16 %v706_v52, %v705_v51  ;;  %v676_v2 = vmul.f32 %v1080_v19, %v656_v50 }
 0x10a   : > { %972 = vst [vmem:[%s1305_s4] sm:$0xff] %v971_v57   ;;  %v693_v3 = vadd.f32 %v1244_v20, %v673_v59  ;;  %v694_v4 = vadd.f32 %v1244_v20, %v674_v60  ;;  %v677_v5 = vmul.f32 %v1080_v19, %v657_v55  ;;  %v678_v6 = vmul.f32 %v1080_v19, %v658_v56 }
 0x10b   : > { %v986_v0 = vpack.c.bf16 %v708_v54, %v707_v53  ;;  %1008 = vst [vmem:[%s1305_s4 + $0x8] sm:$0xff] %v976_v58   ;;  %v695_v7 = vadd.f32 %v1244_v20, %v675_v1  ;;  %v696_v8 = vadd.f32 %v1244_v20, %v676_v2  ;;  %v679_v9 = vmul.f32 %v1080_v19, %v659_v61 }
 0x10c   : > { %v680_v10 = vmul.f32 %v1080_v19, %v660_v62  ;;  %1009 = vst [vmem:[%s1305_s4 + $0x10] sm:$0xff] %v981_v63   ;;  %v709_v11 = vmax.f32 %v693_v3, 0.0  ;;  %v710_v12 = vmax.f32 %v694_v4, 0.0  ;;  %v697_v13 = vadd.f32 %v1244_v20, %v677_v5 }
 0x10d   : > { %v698_v14 = vadd.f32 %v1244_v20, %v678_v6  ;;  %1010 = vst [vmem:[%s1305_s4 + $0x18] sm:$0xff] %v986_v0   ;;  %v711_v15 = vmax.f32 %v695_v7, 0.0  ;;  %v712_v16 = vmax.f32 %v696_v8, 0.0  ;;  %v699_v17 = vadd.f32 %v1244_v20, %v679_v9 }
 0x10e   : > { %v700_v18 = vadd.f32 %v1244_v20, %v680_v10  ;;  %v991_v19 = vpack.c.bf16 %v710_v12, %v709_v11  ;;  %v713_v21 = vmax.f32 %v697_v13, 0.0 }
 0x10f   : > { %v714_v22 = vmax.f32 %v698_v14, 0.0  ;;  %v996_v23 = vpack.c.bf16 %v712_v16, %v711_v15  ;;  %v715_v24 = vmax.f32 %v699_v17, 0.0 }
 0x110   : > { %v716_v25 = vmax.f32 %v700_v18, 0.0  ;;  %1011 = vst [vmem:[%s1305_s4 + $0x20] sm:$0xff] %v991_v19  }
 0x111   : > { %v1001_v26 = vpack.c.bf16 %v714_v22, %v713_v21  ;;  %1012 = vst [vmem:[%s1305_s4 + $0x28] sm:$0xff] %v996_v23  }
 0x112   : > { %v1006_v27 = vpack.c.bf16 %v716_v25, %v715_v24 }
 0x113   : > { %1013 = vst [vmem:[%s1305_s4 + $0x30] sm:$0xff] %v1001_v26  }
 0x114   : > { %1014 = vst [vmem:[%s1305_s4 + $0x38] sm:$0xff] %v1006_v27  }
 0x115 PF: > { %s14_s19 = sadd.s32 1, %s1120_s19   ;;  %s1306_s15 = smov %s1108_s16 }
 0x116   : > { %p11_p12 = scmp.ge.s32.totalorder %s14_s19, 11   ;;  %s1307_s16 = smov %s1183_s23 }
 0x117   : > { %s1308_s17 = smov %s1116_s18  ;;  %s1309_s18 = smov %s1311_s20 }
 0x118   :  { %13 = sbr.rel (!%p11_p12) target bundleno = 3 (0x3), region = 129 }

// kernel: _lambda_.18
= control target key start
LH: loop header
LB: loop body
LE: loop exit
PB: predicated region body
PF: predicated region fallthrough
CT: control target
= control target key end

     0   :  { %s1319_s18 = smov 0   ;;  %s1321_s19 = smov 0   ;;  %s1514_s0 = inlined_call_operand.vmem [shape: bf16[128,1152], index: 0, kind: input, shape index: {}]   ;;  %s1515_s1 = inlined_call_operand.vmem [shape: bf16[1152,128], index: 1, kind: input, shape index: {}]   ;;  %s1516_s2 = inlined_call_operand.vmem [shape: f32[1,128], index: 2, kind: input, shape index: {}]   ;;  %s1517_s3 = inlined_call_operand.vmem [shape: f32[1,128], index: 3, kind: input, shape index: {}]   ;;  %s1518_s4 = inlined_call_operand.vmem [shape: bf16[128,128], index: 4, kind: input, shape index: {}]   ;;  %s1519_s5 = inlined_call_operand.vmem [shape: bf16[128,128], index: 5, kind: output, shape index: {}]  }
   0x1   :  { %s1323_s20 = smov 0   ;;  %s1325_s21 = smov 0  }
   0x2   :  { %s1327_s22 = smov 0  }
   0x3 LB: > { %s27_s23 = sadd.s32 1, %s1282_s21  ;;  %p50_p1 = scmp.ne.s32.totalorder %s1274_s19, %s1270_s18  ;;  %s1286_s22 = sphi %s1327_s22, %s15_s22   ;;  %s1282_s21 = sphi %s1325_s21, %s1523_s21   ;;  %s1278_s20 = sphi %s1323_s20, %s1522_s20   ;;  %s1274_s19 = sphi %s1321_s19, %s1521_s19   ;;  %s1270_s18 = sphi %s1319_s18, %s1520_s18  }
   0x4   : > { %p28_p0 = scmp.ge.s32.totalorder %s27_s23, 9  ;;  %p51_p2 = scmp.eq.s32.totalorder %s1286_s22, 0 }
   0x5   : > { %s43_s25 = sadd.s32 1, %s1274_s19  ;;  %p1002_p5 = scmp.ge.s32.totalorder %s1286_s22, 9 }
   0x6   : > { %s1525_s23 = smov (%p28_p0, %s27_s23), 0  ;;  %p52_p3 = por %p51_p2, %p50_p1 }
   0x7   : > { %s39_s24 = ssub.s32 %s1282_s21, %s1525_s23  ;;  %236 = sbr.rel (%p1002_p5) target bundleno = 32 (0x20), region = 28 }
   0x8   : > { %p41_p4 = scmp.eq.s32.totalorder %s39_s24, 0 }
   0xa   : > { %s1354_s26 = scalar_select %p41_p4, %s1274_s19, %s43_s25  }
   0xc   : > { %239 = sbr.rel (!%p52_p3) target bundleno = 32 (0x20), region = 32  ;;  %s241_s27 = sand.u32 (%p52_p3), 1, %s1274_s19  }
   0xd   : > { %s1004_s28 = sshll.u32 (%p52_p3), %s1282_s21, 2  ;;  %s1003_s29 = sshll.u32 (%p52_p3), %s241_s27, 6 }
   0xe   : > { %s1362_s7 = scalar_lea.vmem (%p52_p3), %s1514_s0, %s1004_s28  ;;  %s243_s8 = scalar_lea.vmem (%p52_p3), [#allocation3], %s1003_s29 }
   0xf   : > { %v265_v0 = vld [vmem:[%s1362_s7] sm:$0xf] (%p52_p3)  ;;  %v267_v1 = vld [vmem:[%s1362_s7 + $0x24] sm:$0xf] (%p52_p3)  ;;  %v269_v2 = vld [vmem:[%s1362_s7 + $0x48] sm:$0xf] (%p52_p3) }
  0x10   : > { %266 = vst [vmem:[%s243_s8] sm:$0xf] (%p52_p3), %v265_v0  ;;  %v271_v3 = vld [vmem:[%s1362_s7 + $0x6c] sm:$0xf] (%p52_p3)  ;;  %v273_v4 = vld [vmem:[%s1362_s7 + $0x90] sm:$0xf] (%p52_p3) }
  0x11   : > { %268 = vst [vmem:[%s243_s8 + $0x4] sm:$0xf] %v267_v1  ;;  %v275_v5 = vld [vmem:[%s1362_s7 + $0xb4] sm:$0xf]  ;;  %v277_v6 = vld [vmem:[%s1362_s7 + $0xd8] sm:$0xf] }
  0x12   : > { %270 = vst [vmem:[%s243_s8 + $0x8] sm:$0xf] %v269_v2  ;;  %v279_v7 = vld [vmem:[%s1362_s7 + $0xfc] sm:$0xf]  ;;  %v281_v8 = vld [vmem:[%s1362_s7 + $0x120] sm:$0xf] }
  0x13   : > { %272 = vst [vmem:[%s243_s8 + $0xc] sm:$0xf] %v271_v3  ;;  %v283_v9 = vld [vmem:[%s1362_s7 + $0x144] sm:$0xf]  ;;  %v285_v10 = vld [vmem:[%s1362_s7 + $0x168] sm:$0xf] }
  0x14   : > { %274 = vst [vmem:[%s243_s8 + $0x10] sm:$0xf] %v273_v4  ;;  %v287_v11 = vld [vmem:[%s1362_s7 + $0x18c] sm:$0xf]  ;;  %v289_v12 = vld [vmem:[%s1362_s7 + $0x1b0] sm:$0xf] }
  0x15   : > { %276 = vst [vmem:[%s243_s8 + $0x14] sm:$0xf] %v275_v5  ;;  %v291_v13 = vld [vmem:[%s1362_s7 + $0x1d4] sm:$0xf]  ;;  %v293_v14 = vld [vmem:[%s1362_s7 + $0x1f8] sm:$0xf] }
  0x16   : > { %278 = vst [vmem:[%s243_s8 + $0x18] sm:$0xf] %v277_v6  ;;  %v295_v15 = vld [vmem:[%s1362_s7 + $0x21c] sm:$0xf] }
  0x17   : > { %280 = vst [vmem:[%s243_s8 + $0x1c] sm:$0xf] %v279_v7 }
  0x18   : > { %282 = vst [vmem:[%s243_s8 + $0x20] sm:$0xf] %v281_v8 }
  0x19   : > { %284 = vst [vmem:[%s243_s8 + $0x24] sm:$0xf] %v283_v9 }
  0x1a   : > { %286 = vst [vmem:[%s243_s8 + $0x28] sm:$0xf] %v285_v10 }
  0x1b   : > { %288 = vst [vmem:[%s243_s8 + $0x2c] sm:$0xf] %v287_v11 }
  0x1c   : > { %290 = vst [vmem:[%s243_s8 + $0x30] sm:$0xf] %v289_v12 }
  0x1d   : > { %292 = vst [vmem:[%s243_s8 + $0x34] sm:$0xf] %v291_v13 }
  0x1e   : > { %294 = vst [vmem:[%s243_s8 + $0x38] sm:$0xf] %v293_v14 }
  0x1f   : > { %296 = vst [vmem:[%s243_s8 + $0x3c] sm:$0xf] %v295_v15 }
  0x20 PF: > { %p1005_p6 = scmp.ge.s32.totalorder %s1286_s22, 1  ;;  %p363_p7 = scmp.lt.s32.totalorder %s1286_s22, 10 }
  0x22   : > { %p364_p8 = pnand %p1005_p6, %p363_p7 }
  0x23   : > { %s370_s9 = sand.u32 (!%p364_p8), 1, %s1270_s18   ;;  %s1007_s10 = sshll.u32 (!%p364_p8), %s1278_s20, 4 }
  0x24   : > { %367 = sbr.rel (%p364_p8) target bundleno = 286 (0x11e), region = 77  ;;  %s1006_s11 = sshll.u32 (!%p364_p8), %s370_s9, 6 }
  0x25   : > { %p424_p9 = scmp.lt.s32.totalorder (!%p364_p8), %s1007_s10, 143  ;;  %s1389_s16 = scalar_lea.vmem (!%p364_p8), [#allocation3], %s1006_s11 }
  0x26   : > { %p1009_p10 = scmp.ne.s32.totalorder (!%p364_p8), %s1278_s20, 0 }
  0x29   : > { %s1527_s10 = smov (!%p424_p9, %s1007_s10), 143  ;;  %459 = sbr.rel (%p1009_p10) target bundleno = 63 (0x3f), region = 85 }
  0x2a   : > { %s1008_s12 = sshll.u32 %s1527_s10, 2 }
  0x2b   : > { %s1387_s15 = scalar_lea.vmem %s1515_s1, %s1008_s12 }
  0x2e   : > { %v1288_v16 = vmov 0.0  }
  0x2f   : > { %460 = vst [vmem:[#allocation2 + $0x30] sm:$0xff] %v1288_v16 }
  0x30   : > { %461 = vst [vmem:[#allocation2] sm:$0xff] %v1288_v16 }
  0x31   : > { %462 = vst [vmem:[#allocation2 + $0x58] sm:$0xff] %v1288_v16 }
  0x32   : > { %463 = vst [vmem:[#allocation2 + $0x18] sm:$0xff] %v1288_v16 }
  0x33   : > { %464 = vst [vmem:[#allocation2 + $0x50] sm:$0xff] %v1288_v16 }
  0x34   : > { %465 = vst [vmem:[#allocation2 + $0x68] sm:$0xff] %v1288_v16 }
  0x35   : > { %466 = vst [vmem:[#allocation2 + $0x8] sm:$0xff] %v1288_v16 }
  0x36   : > { %467 = vst [vmem:[#allocation2 + $0x48] sm:$0xff] %v1288_v16 }
  0x37   : > { %468 = vst [vmem:[#allocation2 + $0x40] sm:$0xff] %v1288_v16 }
  0x38   : > { %469 = vst [vmem:[#allocation2 + $0x20] sm:$0xff] %v1288_v16 }
  0x39   : > { %470 = vst [vmem:[#allocation2 + $0x10] sm:$0xff] %v1288_v16 }
  0x3a   : > { %471 = vst [vmem:[#allocation2 + $0x38] sm:$0xff] %v1288_v16 }
  0x3b   : > { %472 = vst [vmem:[#allocation2 + $0x60] sm:$0xff] %v1288_v16 }
  0x3c   : > { %473 = vst [vmem:[#allocation2 + $0x70] sm:$0xff] %v1288_v16 }
  0x3d   : > { %474 = vst [vmem:[#allocation2 + $0x78] sm:$0xff] %v1288_v16 }
  0x3e   : > { %475 = vst [vmem:[#allocation2 + $0x28] sm:$0xff] %v1288_v16 }
  0x3f PF: > { %v1094_v17 = vld [vmem:[%s1387_s15 + $0x38] sm:$0xff]  ;;  %v1093_v18 = vld [vmem:[%s1387_s15 + $0x30] sm:$0xff]  ;;  %v1092_v19 = vld [vmem:[%s1387_s15 + $0x28] sm:$0xff]  ;;  %p1074_p11 = scmp.ne.s32.totalorder %s1278_s20, 8 }
  0x40   : > { %620 = vmatpush.bf16.msra.mxu0 %v1094_v17  ;;  %1181 = vmatpush.bf16.msra.mxu1 %v1094_v17  ;;  %v1091_v20 = vld [vmem:[%s1387_s15 + $0x20] sm:$0xff]  ;;  %v1090_v21 = vld [vmem:[%s1387_s15 + $0x18] sm:$0xff]  ;;  %v1089_v22 = vld [vmem:[%s1387_s15 + $0x10] sm:$0xff] }
  0x41   : > { %1182 = vmatpush.bf16.msra.mxu2 %v1094_v17  ;;  %1183 = vmatpush.bf16.msra.mxu3 %v1094_v17  ;;  %v1088_v23 = vld [vmem:[%s1387_s15 + $0x8] sm:$0xff]  ;;  %v1087_v24 = vld [vmem:[%s1387_s15] sm:$0xff]  ;;  %v1081_v26 = vld [vmem:[%s1389_s16 + $0x10] sm:$0xff] }
  0x42   : > { %v1079_v25 = vld [vmem:[%s1389_s16] sm:$0xff]  ;;  %v1085_v28 = vld [vmem:[%s1389_s16 + $0x30] sm:$0xff]  ;;  %v1080_v29 = vld [vmem:[%s1389_s16 + $0x8] sm:$0xff] }
  0x43   : > { %v1083_v27 = vld [vmem:[%s1389_s16 + $0x20] sm:$0xff]  ;;  %v1082_v30 = vld [vmem:[%s1389_s16 + $0x18] sm:$0xff]  ;;  %v1084_v31 = vld [vmem:[%s1389_s16 + $0x28] sm:$0xff] }
  0x44   : > { %621 = vmatpush.bf16.msra.mxu0 %v1093_v18  ;;  %1184 = vmatpush.bf16.msra.mxu1 %v1093_v18  ;;  %v1086_v32 = vld [vmem:[%s1389_s16 + $0x38] sm:$0xff]  ;;  %v476_v33 = vld [vmem:[#allocation2 + $0x30] sm:$0xff]  ;;  %v484_v39 = vld [vmem:[#allocation2 + $0x40] sm:$0xff] }
  0x45   : > { %1185 = vmatpush.bf16.msra.mxu2 %v1093_v18  ;;  %1186 = vmatpush.bf16.msra.mxu3 %v1093_v18  ;;  %v480_v34 = vld [vmem:[#allocation2 + $0x50] sm:$0xff]  ;;  %v488_v40 = vld [vmem:[#allocation2 + $0x60] sm:$0xff]  ;;  %v481_v42 = vld [vmem:[#allocation2 + $0x68] sm:$0xff] }
  0x46   : > { %v477_v41 = vld [vmem:[#allocation2] sm:$0xff]  ;;  %v489_v52 = vld [vmem:[#allocation2 + $0x70] sm:$0xff]  ;;  %v478_v53 = vld [vmem:[#allocation2 + $0x58] sm:$0xff] }
  0x47   : > { %v485_v51 = vld [vmem:[#allocation2 + $0x20] sm:$0xff]  ;;  %v482_v54 = vld [vmem:[#allocation2 + $0x8] sm:$0xff]  ;;  %v486_v63 = vld [vmem:[#allocation2 + $0x10] sm:$0xff] }
  0x48   : > { %622 = vmatpush.bf16.msra.mxu0 %v1092_v19  ;;  %1187 = vmatpush.bf16.msra.mxu1 %v1092_v19  ;;  %v490_v0 = vld [vmem:[#allocation2 + $0x78] sm:$0xff]  ;;  %v483_v2 = vld [vmem:[#allocation2 + $0x48] sm:$0xff] }
  0x49   : > { %1188 = vmatpush.bf16.msra.mxu2 %v1092_v19  ;;  %1189 = vmatpush.bf16.msra.mxu3 %v1092_v19  ;;  %v479_v1 = vld [vmem:[#allocation2 + $0x18] sm:$0xff]  ;;  %v491_v12 = vld [vmem:[#allocation2 + $0x28] sm:$0xff] }
  0x4a   : > { %v487_v11 = vld [vmem:[#allocation2 + $0x38] sm:$0xff] }
  0x4c   : > { %623 = vmatpush.bf16.msra.mxu0 %v1091_v20  ;;  %1190 = vmatpush.bf16.msra.mxu1 %v1091_v20 }
  0x4d   : > { %1191 = vmatpush.bf16.msra.mxu2 %v1091_v20  ;;  %1192 = vmatpush.bf16.msra.mxu3 %v1091_v20 }
  0x50   : > { %624 = vmatpush.bf16.msra.mxu0 %v1090_v21  ;;  %1193 = vmatpush.bf16.msra.mxu1 %v1090_v21 }
  0x51   : > { %1194 = vmatpush.bf16.msra.mxu2 %v1090_v21  ;;  %1195 = vmatpush.bf16.msra.mxu3 %v1090_v21 }
  0x54   : > { %625 = vmatpush.bf16.msra.mxu0 %v1089_v22  ;;  %1196 = vmatpush.bf16.msra.mxu1 %v1089_v22 }
  0x55   : > { %1197 = vmatpush.bf16.msra.mxu2 %v1089_v22  ;;  %1198 = vmatpush.bf16.msra.mxu3 %v1089_v22 }
  0x58   : > { %626 = vmatpush.bf16.msra.mxu0 %v1088_v23  ;;  %1199 = vmatpush.bf16.msra.mxu1 %v1088_v23 }
  0x59   : > { %1200 = vmatpush.bf16.msra.mxu2 %v1088_v23  ;;  %1201 = vmatpush.bf16.msra.mxu3 %v1088_v23 }
  0x5c   : > { %627 = vmatpush.bf16.msra.mxu0 %v1087_v24  ;;  %1202 = vmatpush.bf16.msra.mxu1 %v1087_v24 }
  0x5d   : > { %1203 = vmatpush.bf16.msra.mxu2 %v1087_v24  ;;  %1204 = vmatpush.bf16.msra.mxu3 %v1087_v24 }
  0x5f   : > { %628 = vmatmul.bf16.vlgmr.msra.gmra.mxu0 %v1079_v25  ;;  %638 = vmatmul.bf16.vlgmr.msra.gmra.mxu1 %v1081_v26 }
  0x60   : > { %648 = vmatmul.bf16.vlgmr.msra.gmra.mxu2 %v1083_v27  ;;  %658 = vmatmul.bf16.vlgmr.msra.gmra.mxu3 %v1085_v28 }
  0x6f   : > { %633 = vmatmul.bf16.gmra.mxu0 %v1080_v29  ;;  %643 = vmatmul.bf16.gmra.mxu1 %v1082_v30 }
  0x70   : > { %653 = vmatmul.bf16.gmra.mxu2 %v1084_v31  ;;  %663 = vmatmul.bf16.gmra.mxu3 %v1086_v32 }
  0xdc   : > { %v629_v35 = vpop.f32.mrf.mxu0  ;;  %v639_v36 = vpop.f32.mrf.mxu1 }
  0xdd   : > { %v669_v37 = vadd.f32 %v629_v35, %v476_v33  ;;  %v673_v38 = vadd.f32 %v639_v36, %v480_v34 }
  0xdf   : > { %685 = vst [vmem:[#allocation2 + $0x30] sm:$0xff] %v669_v37 }
  0xe0   : > { %689 = vst [vmem:[#allocation2 + $0x50] sm:$0xff] %v673_v38 }
  0xe3   : > { %v649_v43 = vpop.f32.mrf.mxu2  ;;  %v659_v44 = vpop.f32.mrf.mxu3 }
  0xe4   : > { %v677_v45 = vadd.f32 %v649_v43, %v484_v39  ;;  %v681_v46 = vadd.f32 %v659_v44, %v488_v40  ;;  %v631_v47 = vpop.f32.mrf.mxu0  ;;  %v641_v48 = vpop.f32.mrf.mxu1 }
  0xe5   : > { %v670_v49 = vadd.f32 %v631_v47, %v477_v41  ;;  %v674_v50 = vadd.f32 %v641_v48, %v481_v42 }
  0xe6   : > { %693 = vst [vmem:[#allocation2 + $0x40] sm:$0xff] %v677_v45 }
  0xe7   : > { %697 = vst [vmem:[#allocation2 + $0x60] sm:$0xff] %v681_v46 }
  0xe8   : > { %686 = vst [vmem:[#allocation2] sm:$0xff] %v670_v49 }
  0xe9   : > { %690 = vst [vmem:[#allocation2 + $0x68] sm:$0xff] %v674_v50 }
  0xeb   : > { %v651_v55 = vpop.f32.mrf.mxu2  ;;  %v661_v56 = vpop.f32.mrf.mxu3 }
  0xec   : > { %v678_v57 = vadd.f32 %v651_v55, %v485_v51  ;;  %v682_v58 = vadd.f32 %v661_v56, %v489_v52  ;;  %v634_v59 = vpop.f32.mrf.mxu0  ;;  %v644_v60 = vpop.f32.mrf.mxu1 }
  0xed   : > { %v671_v61 = vadd.f32 %v634_v59, %v478_v53  ;;  %v675_v62 = vadd.f32 %v644_v60, %v482_v54 }
  0xee   : > { %694 = vst [vmem:[#allocation2 + $0x20] sm:$0xff] %v678_v57 }
  0xef   : > { %698 = vst [vmem:[#allocation2 + $0x70] sm:$0xff] %v682_v58 }
  0xf0   : > { %687 = vst [vmem:[#allocation2 + $0x58] sm:$0xff] %v671_v61 }
  0xf1   : > { %691 = vst [vmem:[#allocation2 + $0x8] sm:$0xff] %v675_v62 }
  0xf3   : > { %v654_v3 = vpop.f32.mrf.mxu2  ;;  %v664_v4 = vpop.f32.mrf.mxu3 }
  0xf4   : > { %v679_v5 = vadd.f32 %v654_v3, %v486_v63  ;;  %v683_v6 = vadd.f32 %v664_v4, %v490_v0  ;;  %v636_v7 = vpop.f32.mrf.mxu0  ;;  %v646_v8 = vpop.f32.mrf.mxu1 }
  0xf5   : > { %v672_v9 = vadd.f32 %v636_v7, %v479_v1  ;;  %v676_v10 = vadd.f32 %v646_v8, %v483_v2 }
  0xf6   : > { %695 = vst [vmem:[#allocation2 + $0x10] sm:$0xff] %v679_v5 }
  0xf7   : > { %699 = vst [vmem:[#allocation2 + $0x78] sm:$0xff] %v683_v6 }
  0xf8   : > { %688 = vst [vmem:[#allocation2 + $0x18] sm:$0xff] %v672_v9 }
  0xf9   : > { %692 = vst [vmem:[#allocation2 + $0x48] sm:$0xff] %v676_v10 }
  0xfb   : > { %v656_v13 = vpop.f32.mrf.mxu2  ;;  %v666_v14 = vpop.f32.mrf.mxu3  ;;  %704 = sbr.rel (%p1074_p11) target bundleno = 286 (0x11e), region = 89 }
  0xfc   : > { %v680_v15 = vadd.f32 %v656_v13, %v487_v11  ;;  %v684_v16 = vadd.f32 %v666_v14, %v491_v12 }
  0xfe   : > { %696 = vst [vmem:[#allocation2 + $0x38] sm:$0xff] %v680_v15 }
  0xff   : > { %700 = vst [vmem:[#allocation2 + $0x28] sm:$0xff] %v684_v16 }
 0x100   : > { %v705_v17 = vld [vmem:[#allocation2 + $0x30] sm:$0xff]  ;;  %v706_v18 = vld [vmem:[#allocation2] sm:$0xff]  ;;  %v707_v22 = vld [vmem:[#allocation2 + $0x58] sm:$0xff] }
 0x101   : > { %v1412_v19 = vld [vmem:[%s1516_s2] ss:$0 sm:$0xff]  ;;  %v708_v23 = vld [vmem:[#allocation2 + $0x18] sm:$0xff]  ;;  %v1167_v28 = vld [vmem:[%s1518_s4 + $0x8] sm:$0xff]  }
 0x102   : > { %v1417_v20 = vld [vmem:[%s1517_s3] ss:$0 sm:$0xff]  ;;  %v725_v24 = vmul.f32 %v1412_v19, %v705_v17  ;;  %v726_v25 = vmul.f32 %v1412_v19, %v706_v18  ;;  %v709_v29 = vld [vmem:[#allocation2 + $0x50] sm:$0xff]  ;;  %v710_v30 = vld [vmem:[#allocation2 + $0x68] sm:$0xff]  ;;  %v727_v31 = vmul.f32 %v1412_v19, %v707_v22  ;;  %v728_v32 = vmul.f32 %v1412_v19, %v708_v23 }
 0x103   : > { %v1096_v21 = vld [vmem:[%s1518_s4] sm:$0xff]   ;;  %v1101_v33 = vunpack.c.l.bf16 %v1167_v28  ;;  %v1102_v34 = vunpack.c.h.bf16 %v1167_v28  ;;  %v1168_v35 = vld [vmem:[%s1518_s4 + $0x10] sm:$0xff]   ;;  %v729_v38 = vmul.f32 %v1412_v19, %v709_v29  ;;  %v730_v39 = vmul.f32 %v1412_v19, %v710_v30  ;;  %v711_v40 = vld [vmem:[#allocation2 + $0x8] sm:$0xff] }
 0x104   : > { %v1097_v26 = vunpack.c.l.bf16 %v1096_v21  ;;  %v1098_v27 = vunpack.c.h.bf16 %v1096_v21  ;;  %v745_v36 = vadd.f32 %v1417_v20, %v725_v24  ;;  %v746_v37 = vadd.f32 %v1417_v20, %v726_v25  ;;  %v712_v41 = vld [vmem:[#allocation2 + $0x48] sm:$0xff]  ;;  %v1169_v54 = vld [vmem:[%s1518_s4 + $0x18] sm:$0xff]   ;;  %v713_v59 = vld [vmem:[#allocation2 + $0x40] sm:$0xff] }
 0x105   : > { %v747_v42 = vadd.f32 %v1417_v20, %v727_v31  ;;  %v748_v43 = vadd.f32 %v1417_v20, %v728_v32  ;;  %v1105_v44 = vunpack.c.l.bf16 %v1168_v35  ;;  %v1106_v45 = vunpack.c.h.bf16 %v1168_v35  ;;  %v714_v60 = vld [vmem:[#allocation2 + $0x20] sm:$0xff]  ;;  %v715_v6 = vld [vmem:[#allocation2 + $0x10] sm:$0xff]  ;;  %v716_v11 = vld [vmem:[#allocation2 + $0x38] sm:$0xff] }
 0x106   : > { %v793_v46 = vadd.f32 %v1097_v26, %v745_v36  ;;  %v794_v47 = vadd.f32 %v1098_v27, %v746_v37  ;;  %v749_v48 = vadd.f32 %v1417_v20, %v729_v38  ;;  %v750_v49 = vadd.f32 %v1417_v20, %v730_v39  ;;  %v1170_v1 = vld [vmem:[%s1518_s4 + $0x20] sm:$0xff]   ;;  %v1171_v12 = vld [vmem:[%s1518_s4 + $0x28] sm:$0xff]   ;;  %v718_v24 = vld [vmem:[#allocation2 + $0x70] sm:$0xff] }
 0x107   : > { %v795_v50 = vadd.f32 %v1101_v33, %v747_v42  ;;  %v796_v51 = vadd.f32 %v1102_v34, %v748_v43  ;;  %v731_v52 = vmul.f32 %v1412_v19, %v711_v40  ;;  %v732_v53 = vmul.f32 %v1412_v19, %v712_v41  ;;  %v717_v23 = vld [vmem:[#allocation2 + $0x60] sm:$0xff]  ;;  %v1172_v25 = vld [vmem:[%s1518_s4 + $0x30] sm:$0xff]   ;;  %v719_v38 = vld [vmem:[#allocation2 + $0x78] sm:$0xff] }
 0x108   : > { %v809_v55 = vmax.f32 %v793_v46, 0.0  ;;  %v810_v56 = vmax.f32 %v794_v47, 0.0  ;;  %v797_v57 = vadd.f32 %v1105_v44, %v749_v48  ;;  %v798_v58 = vadd.f32 %v1106_v45, %v750_v49  ;;  %v720_v39 = vld [vmem:[#allocation2 + $0x28] sm:$0xff]  ;;  %v1173_v44 = vld [vmem:[%s1518_s4 + $0x38] sm:$0xff]  }
 0x109   : > { %v811_v61 = vmax.f32 %v795_v50, 0.0  ;;  %v812_v62 = vmax.f32 %v796_v51, 0.0  ;;  %v751_v63 = vadd.f32 %v1417_v20, %v731_v52  ;;  %v752_v0 = vadd.f32 %v1417_v20, %v732_v53 }
 0x10a   : > { %v1130_v2 = vpack.c.bf16 %v810_v56, %v809_v55  ;;  %v813_v3 = vmax.f32 %v797_v57, 0.0  ;;  %v814_v4 = vmax.f32 %v798_v58, 0.0  ;;  %v1109_v5 = vunpack.c.l.bf16 %v1169_v54 }
 0x10b   : > { %v1135_v7 = vpack.c.bf16 %v812_v62, %v811_v61  ;;  %v1110_v8 = vunpack.c.h.bf16 %v1169_v54  ;;  %v733_v9 = vmul.f32 %v1412_v19, %v713_v59  ;;  %v734_v10 = vmul.f32 %v1412_v19, %v714_v60 }
 0x10c   : > { %1131 = vst [vmem:[%s1519_s5] sm:$0xff] %v1130_v2   ;;  %v1140_v13 = vpack.c.bf16 %v814_v4, %v813_v3  ;;  %v799_v14 = vadd.f32 %v1109_v5, %v751_v63  ;;  %v1113_v15 = vunpack.c.l.bf16 %v1170_v1  ;;  %v1114_v16 = vunpack.c.h.bf16 %v1170_v1 }
 0x10d   : > { %1174 = vst [vmem:[%s1519_s5 + $0x8] sm:$0xff] %v1135_v7   ;;  %v800_v17 = vadd.f32 %v1110_v8, %v752_v0  ;;  %v753_v18 = vadd.f32 %v1417_v20, %v733_v9  ;;  %v754_v21 = vadd.f32 %v1417_v20, %v734_v10  ;;  %v735_v22 = vmul.f32 %v1412_v19, %v715_v6 }
 0x10e   : > { %1175 = vst [vmem:[%s1519_s5 + $0x10] sm:$0xff] %v1140_v13   ;;  %v815_v26 = vmax.f32 %v799_v14, 0.0  ;;  %v736_v27 = vmul.f32 %v1412_v19, %v716_v11  ;;  %v1117_v28 = vunpack.c.l.bf16 %v1171_v12  ;;  %v1118_v29 = vunpack.c.h.bf16 %v1171_v12 }
 0x10f   : > { %v816_v30 = vmax.f32 %v800_v17, 0.0  ;;  %v801_v31 = vadd.f32 %v1113_v15, %v753_v18  ;;  %v802_v32 = vadd.f32 %v1114_v16, %v754_v21  ;;  %v755_v33 = vadd.f32 %v1417_v20, %v735_v22 }
 0x110   : > { %v756_v34 = vadd.f32 %v1417_v20, %v736_v27  ;;  %v737_v35 = vmul.f32 %v1412_v19, %v717_v23  ;;  %v738_v36 = vmul.f32 %v1412_v19, %v718_v24  ;;  %v1121_v37 = vunpack.c.l.bf16 %v1172_v25 }
 0x111   : > { %v1145_v40 = vpack.c.bf16 %v816_v30, %v815_v26  ;;  %v817_v41 = vmax.f32 %v801_v31, 0.0  ;;  %v818_v42 = vmax.f32 %v802_v32, 0.0  ;;  %v803_v43 = vadd.f32 %v1117_v28, %v755_v33 }
 0x112   : > { %v804_v45 = vadd.f32 %v1118_v29, %v756_v34  ;;  %v757_v46 = vadd.f32 %v1417_v20, %v737_v35  ;;  %v758_v47 = vadd.f32 %v1417_v20, %v738_v36  ;;  %v1122_v48 = vunpack.c.h.bf16 %v1172_v25 }
 0x113   : > { %1176 = vst [vmem:[%s1519_s5 + $0x18] sm:$0xff] %v1145_v40   ;;  %v1150_v49 = vpack.c.bf16 %v818_v42, %v817_v41  ;;  %v819_v50 = vmax.f32 %v803_v43, 0.0  ;;  %v739_v51 = vmul.f32 %v1412_v19, %v719_v38  ;;  %v740_v52 = vmul.f32 %v1412_v19, %v720_v39 }
 0x114   : > { %v820_v53 = vmax.f32 %v804_v45, 0.0  ;;  %v805_v54 = vadd.f32 %v1121_v37, %v757_v46  ;;  %v806_v55 = vadd.f32 %v1122_v48, %v758_v47  ;;  %v1125_v56 = vunpack.c.l.bf16 %v1173_v44 }
 0x115   : > { %1177 = vst [vmem:[%s1519_s5 + $0x20] sm:$0xff] %v1150_v49   ;;  %v759_v57 = vadd.f32 %v1417_v20, %v739_v51  ;;  %v760_v58 = vadd.f32 %v1417_v20, %v740_v52  ;;  %v1126_v59 = vunpack.c.h.bf16 %v1173_v44 }
 0x116   : > { %v1155_v60 = vpack.c.bf16 %v820_v53, %v819_v50  ;;  %v821_v61 = vmax.f32 %v805_v54, 0.0  ;;  %v822_v62 = vmax.f32 %v806_v55, 0.0 }
 0x117   : > { %v807_v63 = vadd.f32 %v1125_v56, %v759_v57  ;;  %v808_v0 = vadd.f32 %v1126_v59, %v760_v58 }
 0x118   : > { %1178 = vst [vmem:[%s1519_s5 + $0x28] sm:$0xff] %v1155_v60   ;;  %v1160_v19 = vpack.c.bf16 %v822_v62, %v821_v61 }
 0x119   : > { %v823_v1 = vmax.f32 %v807_v63, 0.0  ;;  %v824_v2 = vmax.f32 %v808_v0, 0.0 }
 0x11a   : > { %1179 = vst [vmem:[%s1519_s5 + $0x30] sm:$0xff] %v1160_v19  }
 0x11b   : > { %v1165_v3 = vpack.c.bf16 %v824_v2, %v823_v1 }
 0x11d   : > { %1180 = vst [vmem:[%s1519_s5 + $0x38] sm:$0xff] %v1165_v3  }
 0x11e PF: > { %s15_s22 = sadd.s32 1, %s1286_s22   ;;  %s1520_s18 = smov %s1274_s19 }
 0x11f   : > { %p12_p12 = scmp.ge.s32.totalorder %s15_s22, 11   ;;  %s1521_s19 = smov %s1354_s26 }
 0x120   : > { %s1522_s20 = smov %s1282_s21  ;;  %s1523_s21 = smov %s1525_s23 }
 0x121   :  { %14 = sbr.rel (!%p12_p12) target bundleno = 3 (0x3), region = 136 }

// kernel: _lambda_.20
= control target key start
LH: loop header
LB: loop body
LE: loop exit
PB: predicated region body
PF: predicated region fallthrough
CT: control target
= control target key end

     0   :  { %s897_s15 = smov 0   ;;  %s899_s16 = smov 0   ;;  %s1009_s0 = inlined_call_operand.vmem [shape: bf16[32,128], index: 0, kind: input, shape index: {}]   ;;  %s1010_s1 = inlined_call_operand.vmem [shape: bf16[128,256], index: 1, kind: input, shape index: {}]   ;;  %s1011_s2 = inlined_call_operand.vmem [shape: f32[1,256], index: 2, kind: input, shape index: {}]   ;;  %s1012_s3 = inlined_call_operand.vmem [shape: f32[1,256], index: 3, kind: input, shape index: {}]   ;;  %s1013_s4 = inlined_call_operand.vmem [shape: bf16[32,256], index: 4, kind: output, shape index: {}]  }
   0x1   :  { %s901_s17 = smov 0   ;;  %s903_s18 = smov 0  }
   0x2   :  { %s905_s19 = smov 0  }
   0x3 LB: > { %s29_s20 = sadd.s32 1, %s866_s18  ;;  %s707_s21 = sadd.s32 4294967295, %s870_s19   ;;  %s870_s19 = sphi %s905_s19, %s14_s19   ;;  %s866_s18 = sphi %s903_s18, %s1018_s18   ;;  %s862_s17 = sphi %s901_s17, %s1017_s17   ;;  %s858_s16 = sphi %s899_s16, %s1016_s16   ;;  %s854_s15 = sphi %s897_s15, %s1015_s15  }
   0x4   : > { %p31_p0 = scmp.ge.s32.totalorder %s29_s20, 2  ;;  %p77_p1 = scmp.ne.s32.totalorder %s858_s16, %s854_s15 }
   0x5   : > { %p78_p2 = scmp.eq.s32.totalorder %s870_s19, 0  ;;  %p161_p4 = scmp.eq.s32.totalorder %s707_s21, 1 }
   0x6   : > { %s1020_s20 = smov (%p31_p0, %s29_s20), 0  ;;  %s70_s23 = sadd.s32 1, %s858_s16 }
   0x7   : > { %p79_p3 = por %p78_p2, %p77_p1  ;;  %s66_s22 = ssub.s32 %s866_s18, %s1020_s20 }
   0x8   : > { %p68_p5 = scmp.eq.s32.totalorder %s66_s22, 0  ;;  %p932_p6 = por %p161_p4, %p77_p1 }
   0x9   : > { %p711_p7 = scmp.ge.s32.totalorder %s870_s19, 2 }
   0xa   : > { %s937_s25 = scalar_select %p68_p5, %s858_s16, %s70_s23  }
   0xb   : > { %195 = sbr.rel (%p711_p7) target bundleno = 36 (0x24), region = 20 }
  0x10   : > { %198 = sbr.rel (!%p79_p3) target bundleno = 36 (0x24), region = 24  ;;  %s200_s26 = sand.u32 (%p79_p3), 1, %s858_s16  }
  0x11   : > { %s713_s27 = sshll.u32 (%p79_p3), %s866_s18, 2  ;;  %s712_s28 = sshll.u32 (%p79_p3), %s200_s26, 6 }
  0x12   : > { %s945_s5 = scalar_lea.vmem (%p79_p3), %s1010_s1, %s713_s27  ;;  %s202_s6 = scalar_lea.vmem (%p79_p3), [#allocation3], %s712_s28 }
  0x13   : > { %v224_v0 = vld [vmem:[%s945_s5] sm:$0xf] (%p79_p3)  ;;  %v226_v1 = vld [vmem:[%s945_s5 + $0x8] sm:$0xf] (%p79_p3)  ;;  %v228_v2 = vld [vmem:[%s945_s5 + $0x10] sm:$0xf] (%p79_p3) }
  0x14   : > { %225 = vst [vmem:[%s202_s6] sm:$0xf] (%p79_p3), %v224_v0  ;;  %v230_v3 = vld [vmem:[%s945_s5 + $0x18] sm:$0xf] (%p79_p3)  ;;  %v232_v4 = vld [vmem:[%s945_s5 + $0x20] sm:$0xf] (%p79_p3) }
  0x15   : > { %227 = vst [vmem:[%s202_s6 + $0x4] sm:$0xf] %v226_v1  ;;  %v234_v5 = vld [vmem:[%s945_s5 + $0x28] sm:$0xf]  ;;  %v236_v6 = vld [vmem:[%s945_s5 + $0x30] sm:$0xf] }
  0x16   : > { %229 = vst [vmem:[%s202_s6 + $0x8] sm:$0xf] %v228_v2  ;;  %v238_v7 = vld [vmem:[%s945_s5 + $0x38] sm:$0xf]  ;;  %v240_v8 = vld [vmem:[%s945_s5 + $0x40] sm:$0xf] }
  0x17   : > { %231 = vst [vmem:[%s202_s6 + $0xc] sm:$0xf] %v230_v3  ;;  %v242_v9 = vld [vmem:[%s945_s5 + $0x48] sm:$0xf]  ;;  %v244_v10 = vld [vmem:[%s945_s5 + $0x50] sm:$0xf] }
  0x18   : > { %233 = vst [vmem:[%s202_s6 + $0x10] sm:$0xf] %v232_v4  ;;  %v246_v11 = vld [vmem:[%s945_s5 + $0x58] sm:$0xf]  ;;  %v248_v12 = vld [vmem:[%s945_s5 + $0x60] sm:$0xf] }
  0x19   : > { %235 = vst [vmem:[%s202_s6 + $0x14] sm:$0xf] %v234_v5  ;;  %v250_v13 = vld [vmem:[%s945_s5 + $0x68] sm:$0xf]  ;;  %v252_v14 = vld [vmem:[%s945_s5 + $0x70] sm:$0xf] }
  0x1a   : > { %237 = vst [vmem:[%s202_s6 + $0x18] sm:$0xf] %v236_v6  ;;  %v254_v15 = vld [vmem:[%s945_s5 + $0x78] sm:$0xf] }
  0x1b   : > { %239 = vst [vmem:[%s202_s6 + $0x1c] sm:$0xf] %v238_v7 }
  0x1c   : > { %241 = vst [vmem:[%s202_s6 + $0x20] sm:$0xf] %v240_v8 }
  0x1d   : > { %243 = vst [vmem:[%s202_s6 + $0x24] sm:$0xf] %v242_v9 }
  0x1e   : > { %245 = vst [vmem:[%s202_s6 + $0x28] sm:$0xf] %v244_v10 }
  0x1f   : > { %247 = vst [vmem:[%s202_s6 + $0x2c] sm:$0xf] %v246_v11 }
  0x20   : > { %249 = vst [vmem:[%s202_s6 + $0x30] sm:$0xf] %v248_v12 }
  0x21   : > { %251 = vst [vmem:[%s202_s6 + $0x34] sm:$0xf] %v250_v13 }
  0x22   : > { %253 = vst [vmem:[%s202_s6 + $0x38] sm:$0xf] %v252_v14 }
  0x23   : > { %255 = vst [vmem:[%s202_s6 + $0x3c] sm:$0xf] %v254_v15 }
  0x24 PF: > { %p714_p8 = scmp.ge.s32.totalorder %s870_s19, 1  ;;  %p322_p9 = scmp.lt.s32.totalorder %s870_s19, 3 }
  0x26   : > { %p323_p10 = pnand %p714_p8, %p322_p9 }
  0x27   : > { %s329_s7 = sand.u32 (!%p323_p10), 1, %s854_s15   ;;  %p377_p11 = scmp.lt.s32.totalorder (!%p323_p10), %s862_s17, 1 }
  0x28   : > { %326 = sbr.rel (%p323_p10) target bundleno = 229 (0xe5), region = 73  ;;  %s715_s8 = sshll.u32 (!%p323_p10), %s329_s7, 6 }
  0x29   : > { %s331_s9 = scalar_lea.vmem (!%p323_p10), [#allocation3], %s715_s8  ;;  %s716_s29 = sshll.u32 (!%p323_p10), %s329_s7, 4 }
  0x2a   : > { %s366_s30 = scalar_lea.vmem (!%p323_p10), [#allocation4], %s716_s29 }
  0x2d   : > { %v770_v16 = vld [vmem:[%s331_s9 + $0x38] sm:$0xff]  ;;  %s970_s10 = scalar_select %p377_p11, %s862_s17, 1  ;;  %v769_v17 = vld [vmem:[%s331_s9 + $0x30] sm:$0xff]  ;;  %v768_v18 = vld [vmem:[%s331_s9 + $0x28] sm:$0xff] }
  0x2e   : > { %476 = vmatpush.bf16.msra.mxu0 %v770_v16  ;;  %782 = vmatpush.bf16.msra.mxu1 %v770_v16  ;;  %v767_v19 = vld [vmem:[%s331_s9 + $0x20] sm:$0xff]  ;;  %v766_v20 = vld [vmem:[%s331_s9 + $0x18] sm:$0xff]  ;;  %v765_v21 = vld [vmem:[%s331_s9 + $0x10] sm:$0xff]  ;;  %s758_s5 = sshll.u32 (%p932_p6), %s862_s17, 2 }
  0x2f   : > { %s379_s13 = scalar_lea.vmem %s1011_s2, %s970_s10  ;;  %s382_s22 = scalar_lea.vmem %s1012_s3, %s970_s10  ;;  %v764_v22 = vld [vmem:[%s331_s9 + $0x8] sm:$0xff]  ;;  %v763_v23 = vld [vmem:[%s331_s9] sm:$0xff] }
  0x30   : > { %v761_v24 = vld [vmem:[%s1009_s0] sm:$0xff]  ;;  %v762_v25 = vld [vmem:[%s1009_s0 + $0x8] sm:$0xff]  ;;  %s545_s7 = scalar_lea.vmem (%p932_p6), %s1013_s4, %s758_s5 }
  0x31   : > { %v830_v28 = vld [vmem:[%s379_s13] ss:$0 sm:$0xff] }
  0x32   : > { %477 = vmatpush.bf16.msra.mxu0 %v769_v17  ;;  %783 = vmatpush.bf16.msra.mxu1 %v769_v17  ;;  %v831_v30 = vld [vmem:[%s382_s22] ss:$0 sm:$0xff] }
  0x36   : > { %478 = vmatpush.bf16.msra.mxu0 %v768_v18  ;;  %784 = vmatpush.bf16.msra.mxu1 %v768_v18 }
  0x3a   : > { %479 = vmatpush.bf16.msra.mxu0 %v767_v19  ;;  %785 = vmatpush.bf16.msra.mxu1 %v767_v19 }
  0x3e   : > { %480 = vmatpush.bf16.msra.mxu0 %v766_v20  ;;  %786 = vmatpush.bf16.msra.mxu1 %v766_v20 }
  0x42   : > { %481 = vmatpush.bf16.msra.mxu0 %v765_v21  ;;  %787 = vmatpush.bf16.msra.mxu1 %v765_v21 }
  0x46   : > { %482 = vmatpush.bf16.msra.mxu0 %v764_v22  ;;  %788 = vmatpush.bf16.msra.mxu1 %v764_v22 }
  0x4a   : > { %483 = vmatpush.bf16.msra.mxu0 %v763_v23  ;;  %789 = vmatpush.bf16.msra.mxu1 %v763_v23 }
  0x4d   : > { %484 = vmatmul.bf16.vlgmr.msra.gmra.mxu0 %v761_v24  ;;  %489 = vmatmul.bf16.vlgmr.msra.gmra.mxu1 %v762_v25 }
  0xca   : > { %v485_v26 = vpop.f32.mrf.mxu0  ;;  %v490_v27 = vpop.f32.mrf.mxu1 }
  0xcb   : > { %v514_v29 = vmul.f32 %v830_v28, %v485_v26  ;;  %v516_v31 = vmul.f32 %v830_v28, %v490_v27 }
  0xcd   : > { %v522_v36 = vadd.f32 %v831_v30, %v514_v29  ;;  %v524_v37 = vadd.f32 %v831_v30, %v516_v31 }
  0xd2   : > { %v487_v32 = vpop.f32.mrf.mxu0  ;;  %v492_v33 = vpop.f32.mrf.mxu1 }
  0xd3   : > { %v515_v34 = vmul.f32 %v830_v28, %v487_v32  ;;  %v517_v35 = vmul.f32 %v830_v28, %v492_v33 }
  0xd5   : > { %v523_v38 = vadd.f32 %v831_v30, %v515_v34  ;;  %v525_v39 = vadd.f32 %v831_v30, %v517_v35 }
  0xd6   : > { %540 = sbr.rel (!%p932_p6) target bundleno = 229 (0xe5), region = 89 }
  0xd7   : > { %v774_v40 = vpack.c.bf16 %v523_v38, %v522_v36  ;;  %v779_v41 = vpack.c.bf16 %v525_v39, %v524_v37 }
  0xd9   : > { %775 = vst [vmem:[%s366_s30] sm:$0xff] %v774_v40  }
  0xda   : > { %781 = vst [vmem:[%s366_s30 + $0x8] sm:$0xff] %v779_v41  }
  0xe0   : > { %v562_v42 = vld [vmem:[%s366_s30] sm:$0xf]  ;;  %v564_v43 = vld [vmem:[%s366_s30 + $0x4] sm:$0xf] }
  0xe1   : > { %v566_v44 = vld [vmem:[%s366_s30 + $0x8] sm:$0xf]  ;;  %563 = vst [vmem:[%s545_s7] sm:$0xf] %v562_v42  ;;  %v568_v45 = vld [vmem:[%s366_s30 + $0xc] sm:$0xf] }
  0xe2   : > { %565 = vst [vmem:[%s545_s7 + $0x8] sm:$0xf] %v564_v43 }
  0xe3   : > { %567 = vst [vmem:[%s545_s7 + $0x10] sm:$0xf] %v566_v44 }
  0xe4   : > { %569 = vst [vmem:[%s545_s7 + $0x18] sm:$0xf] %v568_v45 }
  0xe5 PF: > { %s14_s19 = sadd.s32 1, %s870_s19   ;;  %s1015_s15 = smov %s858_s16 }
  0xe6   : > { %p11_p12 = scmp.ge.s32.totalorder %s14_s19, 4   ;;  %s1016_s16 = smov %s937_s25 }
  0xe7   : > { %s1017_s17 = smov %s866_s18  ;;  %s1018_s18 = smov %s1020_s20 }
  0xe8   :  { %13 = sbr.rel (!%p11_p12) target bundleno = 3 (0x3), region = 170 }

// kernel: _lambda_.19
= control target key start
LH: loop header
LB: loop body
LE: loop exit
PB: predicated region body
PF: predicated region fallthrough
CT: control target
= control target key end

     0   :  { %s1285_s0 = inlined_call_operand.vmem [shape: bf16[32,1152], index: 0, kind: input, shape index: {}]   ;;  %s1286_s1 = inlined_call_operand.vmem [shape: bf16[1152,256], index: 1, kind: input, shape index: {}]   ;;  %s1287_s2 = inlined_call_operand.vmem [shape: f32[1,256], index: 2, kind: input, shape index: {}]   ;;  %s1288_s3 = inlined_call_operand.vmem [shape: f32[1,256], index: 3, kind: input, shape index: {}]   ;;  %s1289_s4 = inlined_call_operand.vmem [shape: bf16[32,256], index: 4, kind: output, shape index: {}]  }
   0x1   :  { %1292 = sst [smem:[#allocation8_spill]] %s1285_s0 }
   0x2   :  { %1293 = sst [smem:[#allocation9_spill]] %s1286_s1 }
   0x3   :  { %s1060_s15 = smov 0   ;;  %s1062_s16 = smov 0  }
   0x4   :  { %s1064_s17 = smov 0   ;;  %s1066_s18 = smov 0  }
   0x5   :  { %s1068_s19 = smov 0   ;;  %s1070_s20 = smov 0  }
   0x6   :  { %s1072_s21 = smov 0   ;;  %s1074_s22 = smov 0  }
   0x7   :  { %s1076_s23 = smov 0   ;;  %s1078_s24 = smov 0  }
   0x8   :  { %s1080_s25 = smov 0  }
   0x9 LB: > { %s765_s26 = sadd.s32 4294967295, %s1032_s25   ;;  %s26_s27 = sadd.s32 1, %s1024_s23  ;;  %s1032_s25 = sphi %s1080_s25, %s14_s25   ;;  %s1028_s24 = sphi %s1078_s24, %s1312_s24   ;;  %s1024_s23 = sphi %s1076_s23, %s1311_s23   ;;  %s1020_s22 = sphi %s1074_s22, %s1310_s22   ;;  %s1016_s21 = sphi %s1072_s21, %s1309_s21   ;;  %s1012_s20 = sphi %s1070_s20, %s1308_s20   ;;  %s1008_s19 = sphi %s1068_s19, %s1307_s19   ;;  %s1004_s18 = sphi %s1066_s18, %s1306_s18   ;;  %s1000_s17 = sphi %s1064_s17, %s1305_s17   ;;  %s996_s16 = sphi %s1062_s16, %s1304_s16   ;;  %s992_s15 = sphi %s1060_s15, %s1303_s15  }
   0xa   : > { %p27_p0 = scmp.ge.s32.totalorder %s26_s27, 9  ;;  %s29_s28 = sadd.s32 1, %s1028_s24 }
   0xb   : > { %s42_s29 = sadd.s32 1, %s1012_s20  ;;  %p49_p1 = scmp.ne.s32.totalorder %s1012_s20, %s1008_s19 }
   0xc   : > { %s1314_s27 = smov (%p27_p0, %s26_s27), 0  ;;  %s1316_s28 = smov (!%p27_p0, %s29_s28), %s1028_s24 }
   0xd   : > { %1294 = sst [smem:[#allocation6_spill]] %s1314_s27  ;;  %s38_s30 = ssub.s32 %s1024_s23, %s1314_s27 }
   0xe   : > { %p50_p2 = scmp.eq.s32.totalorder %s1032_s25, 0  ;;  %p31_p3 = scmp.ge.s32.totalorder %s1316_s28, 2 }
   0xf   : > { %p40_p4 = scmp.eq.s32.totalorder %s38_s30, 0  ;;  %s70_s6 = sadd.s32 1, %s1004_s18 }
  0x10   : > { %p1127_p5 = por %p50_p2, %p49_p1  ;;  %s1318_s28 = smov (%p31_p3, %s1316_s28), 0 }
  0x11   : > { %1296 = sst [smem:[#allocation7_spill]] %s1318_s28  ;;  %s66_s8 = ssub.s32 %s1028_s24, %s1318_s28 }
  0x12   : > { %s1135_s7 = scalar_select %p40_p4, %s1012_s20, %s42_s29  }
  0x13   : > { %p77_p6 = scmp.ne.s32.totalorder %s1004_s18, %s1000_s17  ;;  %s67_s9 = sor.u32 %s66_s8, %s38_s30 }
  0x14   : > { %p148_p7 = scmp.eq.s32.totalorder %s66_s8, 0  ;;  %p68_p8 = scmp.eq.s32.totalorder %s67_s9, 0 }
  0x15   : > { %p1141_p9 = por %p77_p6, %p50_p2  ;;  %s150_s11 = sadd.s32 1, %s996_s16 }
  0x16   : > { %p160_p10 = scmp.ne.s32.totalorder %s996_s16, %s992_s15  ;;  %p161_p11 = scmp.eq.s32.totalorder %s765_s26, 17 }
  0x17   : > { %s1149_s12 = scalar_select %p68_p8, %s1004_s18, %s70_s6  }
  0x18   : > { %s1152_s13 = scalar_select %p148_p7, %s996_s16, %s150_s11  }
  0x19   : > { %p1154_p12 = por %p161_p11, %p160_p10  ;;  %p768_p13 = scmp.ge.s32.totalorder %s1032_s25, 18 }
  0x1b   : > { %183 = sbr.rel (%p768_p13) target bundleno = 72 (0x48), region = 16 }
  0x20   : > { %186 = sbr.rel (!%p1127_p5) target bundleno = 46 (0x2e), region = 20  ;;  %s188_s29 = sand.u32 (%p1127_p5), 1, %s1012_s20  }
  0x21   : > { %s770_s30 = sshll.u32 (%p1127_p5), %s1024_s23, 2  ;;  %s769_s8 = sshll.u32 (%p1127_p5), %s188_s29, 4 }
  0x22   : > { %s1299_s0 = sld [smem:[#allocation8_spill]] (%p1127_p5)  ;;  %s190_s26 = scalar_lea.vmem (%p1127_p5), [#allocation3], %s769_s8 }
  0x28   : > { %s195_s11 = scalar_lea.vmem %s1299_s0, %s770_s30 }
  0x29   : > { %v212_v0 = vld [vmem:[%s195_s11] sm:$0xf]  ;;  %v214_v1 = vld [vmem:[%s195_s11 + $0x24] sm:$0xf]  ;;  %v216_v2 = vld [vmem:[%s195_s11 + $0x48] sm:$0xf] }
  0x2a   : > { %213 = vst [vmem:[%s190_s26] sm:$0xf] %v212_v0  ;;  %v218_v3 = vld [vmem:[%s195_s11 + $0x6c] sm:$0xf] }
  0x2b   : > { %215 = vst [vmem:[%s190_s26 + $0x4] sm:$0xf] %v214_v1 }
  0x2c   : > { %217 = vst [vmem:[%s190_s26 + $0x8] sm:$0xf] %v216_v2 }
  0x2d   : > { %219 = vst [vmem:[%s190_s26 + $0xc] sm:$0xf] %v218_v3 }
  0x2e PF: > { %251 = sbr.rel (!%p1141_p9) target bundleno = 72 (0x48), region = 61  ;;  %s253_s5 = sand.u32 (%p1141_p9), 1, %s1004_s18  }
  0x2f   : > { %s825_s29 = sshll.u32 (%p1141_p9), %s1024_s23, 5  ;;  %s771_s6 = sshll.u32 (%p1141_p9), %s253_s5, 6 }
  0x30   : > { %s258_s30 = sadd.s32 (%p1141_p9), %s1028_s24, %s825_s29  ;;  %s1300_s1 = sld [smem:[#allocation9_spill]] (%p1141_p9) }
  0x31   : > { %s774_s9 = sshll.u32 (%p1141_p9), %s258_s30, 2  ;;  %s255_s10 = scalar_lea.vmem (%p1141_p9), [#allocation4], %s771_s6 }
  0x36   : > { %s1174_s28 = scalar_lea.vmem %s1300_s1, %s774_s9 }
  0x37   : > { %v277_v4 = vld [vmem:[%s1174_s28] sm:$0xf]  ;;  %v279_v5 = vld [vmem:[%s1174_s28 + $0x8] sm:$0xf]  ;;  %v281_v6 = vld [vmem:[%s1174_s28 + $0x10] sm:$0xf] }
  0x38   : > { %278 = vst [vmem:[%s255_s10] sm:$0xf] %v277_v4  ;;  %v283_v7 = vld [vmem:[%s1174_s28 + $0x18] sm:$0xf]  ;;  %v285_v8 = vld [vmem:[%s1174_s28 + $0x20] sm:$0xf] }
  0x39   : > { %280 = vst [vmem:[%s255_s10 + $0x4] sm:$0xf] %v279_v5  ;;  %v287_v9 = vld [vmem:[%s1174_s28 + $0x28] sm:$0xf]  ;;  %v289_v10 = vld [vmem:[%s1174_s28 + $0x30] sm:$0xf] }
  0x3a   : > { %282 = vst [vmem:[%s255_s10 + $0x8] sm:$0xf] %v281_v6  ;;  %v291_v11 = vld [vmem:[%s1174_s28 + $0x38] sm:$0xf]  ;;  %v293_v12 = vld [vmem:[%s1174_s28 + $0x40] sm:$0xf] }
  0x3b   : > { %284 = vst [vmem:[%s255_s10 + $0xc] sm:$0xf] %v283_v7  ;;  %v295_v13 = vld [vmem:[%s1174_s28 + $0x48] sm:$0xf]  ;;  %v297_v14 = vld [vmem:[%s1174_s28 + $0x50] sm:$0xf] }
  0x3c   : > { %286 = vst [vmem:[%s255_s10 + $0x10] sm:$0xf] %v285_v8  ;;  %v299_v15 = vld [vmem:[%s1174_s28 + $0x58] sm:$0xf]  ;;  %v301_v16 = vld [vmem:[%s1174_s28 + $0x60] sm:$0xf] }
  0x3d   : > { %288 = vst [vmem:[%s255_s10 + $0x14] sm:$0xf] %v287_v9  ;;  %v303_v17 = vld [vmem:[%s1174_s28 + $0x68] sm:$0xf]  ;;  %v305_v18 = vld [vmem:[%s1174_s28 + $0x70] sm:$0xf] }
  0x3e   : > { %290 = vst [vmem:[%s255_s10 + $0x18] sm:$0xf] %v289_v10  ;;  %v307_v19 = vld [vmem:[%s1174_s28 + $0x78] sm:$0xf] }
  0x3f   : > { %292 = vst [vmem:[%s255_s10 + $0x1c] sm:$0xf] %v291_v11 }
  0x40   : > { %294 = vst [vmem:[%s255_s10 + $0x20] sm:$0xf] %v293_v12 }
  0x41   : > { %296 = vst [vmem:[%s255_s10 + $0x24] sm:$0xf] %v295_v13 }
  0x42   : > { %298 = vst [vmem:[%s255_s10 + $0x28] sm:$0xf] %v297_v14 }
  0x43   : > { %300 = vst [vmem:[%s255_s10 + $0x2c] sm:$0xf] %v299_v15 }
  0x44   : > { %302 = vst [vmem:[%s255_s10 + $0x30] sm:$0xf] %v301_v16 }
  0x45   : > { %304 = vst [vmem:[%s255_s10 + $0x34] sm:$0xf] %v303_v17 }
  0x46   : > { %306 = vst [vmem:[%s255_s10 + $0x38] sm:$0xf] %v305_v18 }
  0x47   : > { %308 = vst [vmem:[%s255_s10 + $0x3c] sm:$0xf] %v307_v19 }
  0x48 PF: > { %p775_p0 = scmp.ge.s32.totalorder %s1032_s25, 1  ;;  %p375_p1 = scmp.lt.s32.totalorder %s1032_s25, 19 }
  0x4a   : > { %p376_p2 = pnand %p775_p0, %p375_p1 }
  0x4b   : > { %s382_s0 = sand.u32 (!%p376_p2), 1, %s1008_s19   ;;  %s389_s11 = sand.u32 (!%p376_p2), 1, %s1000_s17  }
  0x4c   : > { %379 = sbr.rel (%p376_p2) target bundleno = 288 (0x120), region = 110  ;;  %s1196_s26 = sshll.u32 (!%p376_p2), %s382_s0, 4 }
  0x4d   : > { %s777_s28 = sshll.u32 (!%p376_p2), %s389_s11, 6  ;;  %s420_s5 = sand.u32 (!%p376_p2), 1, %s992_s15  }
  0x4e   : > { %p425_p3 = scmp.lt.s32.totalorder (!%p376_p2), %s1020_s22, 1  ;;  %s778_s29 = sshll.u32 (!%p376_p2), %s420_s5, 4 }
  0x4f   : > { %s384_s17 = scalar_lea.vmem (!%p376_p2), [#allocation3], %s1196_s26  ;;  %s1212_s0 = scalar_lea.vmem (!%p376_p2), [#allocation4], %s777_s28 }
  0x50   : > { %s1214_s27 = scalar_lea.vmem (!%p376_p2), [#allocation5], %s778_s29  ;;  %p779_p4 = scmp.ne.s32.totalorder (!%p376_p2), %s1016_s21, 0 }
  0x51   : > { %s1201_s6 = scalar_select %p425_p3, %s1020_s22, 1 }
  0x52   : > { %435 = sbr.rel (%p779_p4) target bundleno = 92 (0x5c), region = 122 }
  0x53   : > { %s427_s8 = scalar_lea.vmem %s1287_s2, %s1201_s6  ;;  %s430_s19 = scalar_lea.vmem %s1288_s3, %s1201_s6 }
  0x57   : > { %v1034_v20 = vmov 0.0  }
  0x58   : > { %436 = vst [vmem:[#allocation2 + $0x10] sm:$0xff] %v1034_v20 }
  0x59   : > { %437 = vst [vmem:[#allocation2] sm:$0xff] %v1034_v20 }
  0x5a   : > { %438 = vst [vmem:[#allocation2 + $0x18] sm:$0xff] %v1034_v20 }
  0x5b   : > { %439 = vst [vmem:[#allocation2 + $0x8] sm:$0xff] %v1034_v20 }
  0x5c PF: > { %v835_v21 = vld [vmem:[%s1212_s0 + $0x38] sm:$0xff]  ;;  %v834_v22 = vld [vmem:[%s1212_s0 + $0x30] sm:$0xff]  ;;  %v833_v23 = vld [vmem:[%s1212_s0 + $0x28] sm:$0xff]  ;;  %p820_p5 = scmp.ne.s32.totalorder %s1016_s21, 8 }
  0x5d   : > { %524 = vmatpush.bf16.msra.mxu0 %v835_v21  ;;  %847 = vmatpush.bf16.msra.mxu1 %v835_v21  ;;  %v832_v24 = vld [vmem:[%s1212_s0 + $0x20] sm:$0xff]  ;;  %v831_v25 = vld [vmem:[%s1212_s0 + $0x18] sm:$0xff]  ;;  %v830_v26 = vld [vmem:[%s1212_s0 + $0x10] sm:$0xff] }
  0x5e   : > { %v829_v27 = vld [vmem:[%s1212_s0 + $0x8] sm:$0xff]  ;;  %v828_v28 = vld [vmem:[%s1212_s0] sm:$0xff] }
  0x5f   : > { %v826_v29 = vld [vmem:[%s384_s17] sm:$0xff]  ;;  %v827_v30 = vld [vmem:[%s384_s17 + $0x8] sm:$0xff] }
  0x60   : > { %v440_v31 = vld [vmem:[#allocation2 + $0x10] sm:$0xff]  ;;  %v441_v37 = vld [vmem:[#allocation2] sm:$0xff] }
  0x61   : > { %525 = vmatpush.bf16.msra.mxu0 %v834_v22  ;;  %848 = vmatpush.bf16.msra.mxu1 %v834_v22  ;;  %v442_v32 = vld [vmem:[#allocation2 + $0x18] sm:$0xff] }
  0x62   : > { %v443_v38 = vld [vmem:[#allocation2 + $0x8] sm:$0xff] }
  0x65   : > { %526 = vmatpush.bf16.msra.mxu0 %v833_v23  ;;  %849 = vmatpush.bf16.msra.mxu1 %v833_v23 }
  0x69   : > { %527 = vmatpush.bf16.msra.mxu0 %v832_v24  ;;  %850 = vmatpush.bf16.msra.mxu1 %v832_v24 }
  0x6d   : > { %528 = vmatpush.bf16.msra.mxu0 %v831_v25  ;;  %851 = vmatpush.bf16.msra.mxu1 %v831_v25 }
  0x71   : > { %529 = vmatpush.bf16.msra.mxu0 %v830_v26  ;;  %852 = vmatpush.bf16.msra.mxu1 %v830_v26 }
  0x75   : > { %530 = vmatpush.bf16.msra.mxu0 %v829_v27  ;;  %853 = vmatpush.bf16.msra.mxu1 %v829_v27 }
  0x79   : > { %531 = vmatpush.bf16.msra.mxu0 %v828_v28  ;;  %854 = vmatpush.bf16.msra.mxu1 %v828_v28 }
  0x7c   : > { %532 = vmatmul.bf16.vlgmr.msra.gmra.mxu0 %v826_v29  ;;  %537 = vmatmul.bf16.vlgmr.msra.gmra.mxu1 %v827_v30 }
  0xf9   : > { %v533_v33 = vpop.f32.mrf.mxu0  ;;  %v538_v34 = vpop.f32.mrf.mxu1 }
  0xfa   : > { %v543_v35 = vadd.f32 %v533_v33, %v440_v31  ;;  %v545_v36 = vadd.f32 %v538_v34, %v442_v32 }
  0xfc   : > { %547 = vst [vmem:[#allocation2 + $0x10] sm:$0xff] %v543_v35 }
  0xfd   : > { %549 = vst [vmem:[#allocation2 + $0x18] sm:$0xff] %v545_v36 }
 0x101   : > { %v535_v39 = vpop.f32.mrf.mxu0  ;;  %v540_v40 = vpop.f32.mrf.mxu1  ;;  %554 = sbr.rel (%p820_p5) target bundleno = 278 (0x116), region = 126 }
 0x102   : > { %v544_v41 = vadd.f32 %v535_v39, %v441_v37  ;;  %v546_v42 = vadd.f32 %v540_v40, %v443_v38 }
 0x104   : > { %548 = vst [vmem:[#allocation2] sm:$0xff] %v544_v41 }
 0x105   : > { %550 = vst [vmem:[#allocation2 + $0x8] sm:$0xff] %v546_v42 }
 0x106   : > { %v555_v43 = vld [vmem:[#allocation2 + $0x10] sm:$0xff]  ;;  %v944_v45 = vld [vmem:[%s427_s8] ss:$0 sm:$0xff]  ;;  %v557_v47 = vld [vmem:[#allocation2 + $0x18] sm:$0xff] }
 0x107   : > { %v945_v46 = vld [vmem:[%s430_s19] ss:$0 sm:$0xff]  ;;  %v563_v49 = vmul.f32 %v944_v45, %v555_v43  ;;  %v565_v51 = vmul.f32 %v944_v45, %v557_v47 }
 0x109   : > { %v571_v53 = vadd.f32 %v945_v46, %v563_v49  ;;  %v573_v55 = vadd.f32 %v945_v46, %v565_v51 }
 0x10b   : > { %v556_v44 = vld [vmem:[#allocation2] sm:$0xff]  ;;  %v575_v57 = vmax.f32 %v571_v53, 0.0  ;;  %v577_v59 = vmax.f32 %v573_v55, 0.0 }
 0x10c   : > { %v558_v48 = vld [vmem:[#allocation2 + $0x8] sm:$0xff]  ;;  %v564_v50 = vmul.f32 %v944_v45, %v556_v44 }
 0x10d   : > { %v566_v52 = vmul.f32 %v944_v45, %v558_v48 }
 0x10e   : > { %v572_v54 = vadd.f32 %v945_v46, %v564_v50 }
 0x10f   : > { %v574_v56 = vadd.f32 %v945_v46, %v566_v52 }
 0x110   : > { %v576_v58 = vmax.f32 %v572_v54, 0.0 }
 0x111   : > { %v578_v60 = vmax.f32 %v574_v56, 0.0 }
 0x112   : > { %v839_v61 = vpack.c.bf16 %v576_v58, %v575_v57 }
 0x113   : > { %v844_v62 = vpack.c.bf16 %v578_v60, %v577_v59 }
 0x114   : > { %840 = vst [vmem:[%s1214_s27] sm:$0xff] %v839_v61  }
 0x115   : > { %846 = vst [vmem:[%s1214_s27 + $0x8] sm:$0xff] %v844_v62  }
 0x116 PF: > { %593 = sbr.rel (!%p1154_p12) target bundleno = 288 (0x120), region = 130  ;;  %s822_s21 = sshll.u32 (%p1154_p12), %s1020_s22, 2 }
 0x117   : > { %s598_s29 = scalar_lea.vmem (%p1154_p12), %s1289_s4, %s822_s21 }
 0x11b   : > { %v615_v63 = vld [vmem:[%s1214_s27] sm:$0xf]  ;;  %v617_v0 = vld [vmem:[%s1214_s27 + $0x4] sm:$0xf] }
 0x11c   : > { %v619_v1 = vld [vmem:[%s1214_s27 + $0x8] sm:$0xf]  ;;  %616 = vst [vmem:[%s598_s29] sm:$0xf] %v615_v63  ;;  %v621_v2 = vld [vmem:[%s1214_s27 + $0xc] sm:$0xf] }
 0x11d   : > { %618 = vst [vmem:[%s598_s29 + $0x8] sm:$0xf] %v617_v0 }
 0x11e   : > { %620 = vst [vmem:[%s598_s29 + $0x10] sm:$0xf] %v619_v1 }
 0x11f   : > { %622 = vst [vmem:[%s598_s29 + $0x18] sm:$0xf] %v621_v2 }
 0x120 PF: > { %s14_s25 = sadd.s32 1, %s1032_s25   ;;  %s1301_s14 = sld [smem:[#allocation6_spill]] }
 0x121   : > { %p11_p6 = scmp.ge.s32.totalorder %s14_s25, 20   ;;  %s1302_s6 = sld [smem:[#allocation7_spill]] }
 0x122   : > { %s1303_s15 = smov %s996_s16  ;;  %s1304_s16 = smov %s1152_s13 }
 0x123   : > { %s1305_s17 = smov %s1004_s18  ;;  %s1306_s18 = smov %s1149_s12 }
 0x124   : > { %s1307_s19 = smov %s1012_s20  ;;  %s1308_s20 = smov %s1135_s7 }
 0x125   : > { %s1309_s21 = smov %s1024_s23  ;;  %s1310_s22 = smov %s1028_s24 }
 0x126   : > { %s1311_s23 = smov %s1301_s14  ;;  %13 = sbr.rel (!%p11_p6) target bundleno = 9 (0x9), region = 216 }
 0x127   : > { %s1312_s24 = smov %s1302_s6 }

// kernel: _lambda_.21
= control target key start
LH: loop header
LB: loop body
LE: loop exit
PB: predicated region body
PF: predicated region fallthrough
CT: control target
= control target key end

     0   :  { %s1738_s0 = inlined_call_operand.vmem [shape: bf16[32,2304], index: 0, kind: input, shape index: {}]   ;;  %s1739_s1 = inlined_call_operand.vmem [shape: bf16[2304,256], index: 1, kind: input, shape index: {}]   ;;  %s1740_s2 = inlined_call_operand.vmem [shape: f32[1,256], index: 2, kind: input, shape index: {}]   ;;  %s1741_s3 = inlined_call_operand.vmem [shape: f32[1,256], index: 3, kind: input, shape index: {}]   ;;  %s1742_s4 = inlined_call_operand.vmem [shape: bf16[32,256], index: 4, kind: input, shape index: {}]   ;;  %s1743_s5 = inlined_call_operand.vmem [shape: bf16[32,256], index: 5, kind: output, shape index: {}]  }
   0x1   :  { %1746 = sst [smem:[#allocation10_spill]] %s1738_s0 }
   0x2   :  { %s1427_s18 = smov 0   ;;  %s1429_s19 = smov 0  }
   0x3   :  { %s1431_s20 = smov 0   ;;  %s1433_s21 = smov 0  }
   0x4   :  { %s1435_s22 = smov 0   ;;  %s1437_s23 = smov 0  }
   0x5   :  { %s1439_s24 = smov 0   ;;  %s1441_s25 = smov 0  }
   0x6   :  { %s1443_s26 = smov 0   ;;  %s1445_s27 = smov 0  }
   0x7   :  { %s1447_s28 = smov 0  }
   0x8 LB: > { %s1055_s29 = sadd.s32 4294967295, %s1394_s28   ;;  %s27_s30 = sadd.s32 1, %s1386_s26  ;;  %s1394_s28 = sphi %s1447_s28, %s15_s28   ;;  %s1390_s27 = sphi %s1445_s27, %s1767_s27   ;;  %s1386_s26 = sphi %s1443_s26, %s1766_s26   ;;  %s1382_s25 = sphi %s1441_s25, %s1765_s25   ;;  %s1378_s24 = sphi %s1439_s24, %s1764_s24   ;;  %s1374_s23 = sphi %s1437_s23, %s1763_s23   ;;  %s1370_s22 = sphi %s1435_s22, %s1762_s22   ;;  %s1366_s21 = sphi %s1433_s21, %s1761_s21   ;;  %s1362_s20 = sphi %s1431_s20, %s1760_s20   ;;  %s1358_s19 = sphi %s1429_s19, %s1759_s19   ;;  %s1354_s18 = sphi %s1427_s18, %s1758_s18  }
   0x9   : > { %p28_p0 = scmp.ge.s32.totalorder %s27_s30, 9  ;;  %s30_s6 = sadd.s32 1, %s1390_s27 }
   0xa   : > { %s43_s7 = sadd.s32 1, %s1374_s23  ;;  %p50_p1 = scmp.ne.s32.totalorder %s1374_s23, %s1370_s22 }
   0xb   : > { %s1769_s30 = smov (%p28_p0, %s27_s30), 0  ;;  %s1771_s6 = smov (!%p28_p0, %s30_s6), %s1390_s27 }
   0xc   : > { %1747 = sst [smem:[#allocation7_spill]] %s1769_s30  ;;  %s39_s8 = ssub.s32 %s1386_s26, %s1769_s30 }
   0xd   : > { %p51_p2 = scmp.eq.s32.totalorder %s1394_s28, 0  ;;  %p32_p3 = scmp.ge.s32.totalorder %s1771_s6, 2 }
   0xe   : > { %p41_p4 = scmp.eq.s32.totalorder %s39_s8, 0  ;;  %s71_s10 = sadd.s32 1, %s1366_s21 }
   0xf   : > { %p1496_p5 = por %p51_p2, %p50_p1  ;;  %s1773_s6 = smov (%p32_p3, %s1771_s6), 0 }
  0x10   : > { %1749 = sst [smem:[#allocation8_spill]] %s1773_s6  ;;  %s67_s12 = ssub.s32 %s1390_s27, %s1773_s6 }
  0x11   : > { %s1504_s11 = scalar_select %p41_p4, %s1374_s23, %s43_s7  }
  0x12   : > { %p78_p6 = scmp.ne.s32.totalorder %s1366_s21, %s1362_s20  ;;  %s68_s13 = sor.u32 %s67_s12, %s39_s8 }
  0x13   : > { %1750 = sst [smem:[#allocation9_spill]] %s1504_s11  ;;  %p149_p7 = scmp.eq.s32.totalorder %s67_s12, 0 }
  0x14   : > { %p69_p8 = scmp.eq.s32.totalorder %s68_s13, 0  ;;  %p1512_p9 = por %p78_p6, %p51_p2 }
  0x15   : > { %s151_s15 = sadd.s32 1, %s1358_s19  ;;  %p158_p10 = scmp.ne.s32.totalorder %s1358_s19, %s1354_s18 }
  0x16   : > { %s1520_s16 = scalar_select %p69_p8, %s1366_s21, %s71_s10  }
  0x17   : > { %s1523_s17 = scalar_select %p149_p7, %s1358_s19, %s151_s15  }
  0x18   : > { %p1527_p11 = por %p158_p10, %p51_p2  ;;  %p190_p12 = scmp.eq.s32.totalorder %s1055_s29, 17 }
  0x19   : > { %p1058_p0 = scmp.ge.s32.totalorder %s1394_s28, 18 }
  0x1a   : > { %p1531_p13 = por %p190_p12, %p158_p10 }
  0x1b   : > { %212 = sbr.rel (%p1058_p0) target bundleno = 92 (0x5c), region = 16 }
  0x20   : > { %215 = sbr.rel (!%p1496_p5) target bundleno = 46 (0x2e), region = 20  ;;  %s217_s10 = sand.u32 (%p1496_p5), 1, %s1374_s23  }
  0x21   : > { %s1159_s12 = sshll.u32 (%p1496_p5), %s1386_s26, 3  ;;  %s1059_s13 = sshll.u32 (%p1496_p5), %s217_s10, 5 }
  0x22   : > { %s1754_s0 = sld [smem:[#allocation10_spill]] (%p1496_p5)  ;;  %s219_s29 = scalar_lea.vmem (%p1496_p5), [#allocation3], %s1059_s13 }
  0x28   : > { %s225_s30 = scalar_lea.vmem %s1754_s0, %s1159_s12 }
  0x29   : > { %v260_v0 = vld [vmem:[%s225_s30] sm:$0xff]  ;;  %v262_v1 = vld [vmem:[%s225_s30 + $0x48] sm:$0xff]  ;;  %v264_v2 = vld [vmem:[%s225_s30 + $0x90] sm:$0xff] }
  0x2a   : > { %261 = vst [vmem:[%s219_s29] sm:$0xff] %v260_v0  ;;  %v266_v3 = vld [vmem:[%s225_s30 + $0xd8] sm:$0xff] }
  0x2b   : > { %263 = vst [vmem:[%s219_s29 + $0x8] sm:$0xff] %v262_v1 }
  0x2c   : > { %265 = vst [vmem:[%s219_s29 + $0x10] sm:$0xff] %v264_v2 }
  0x2d   : > { %267 = vst [vmem:[%s219_s29 + $0x18] sm:$0xff] %v266_v3 }
  0x2e PF: > { %273 = sbr.rel (!%p1512_p9) target bundleno = 84 (0x54), region = 58  ;;  %s275_s9 = sand.u32 (%p1512_p9), 1, %s1366_s21  }
  0x2f   : > { %s1160_s10 = sshll.u32 (%p1512_p9), %s1386_s26, 6  ;;  %s1062_s6 = sshll.u32 (%p1512_p9), %s275_s9, 7 }
  0x30   : > { %s280_s12 = sadd.s32 (%p1512_p9), %s1390_s27, %s1160_s10  ;;  %s1556_s30 = scalar_lea.vmem (%p1512_p9), [#allocation4], %s1062_s6 }
  0x31   : > { %s1065_s15 = sshll.u32 (%p1512_p9), %s280_s12, 2 }
  0x32   : > { %s1551_s13 = scalar_lea.vmem (%p1512_p9), %s1739_s1, %s1065_s15 }
  0x33   : > { %v299_v4 = vld [vmem:[%s1551_s13] sm:$0xf]  ;;  %v301_v5 = vld [vmem:[%s1551_s13 + $0x8] sm:$0xf]  ;;  %v303_v6 = vld [vmem:[%s1551_s13 + $0x10] sm:$0xf] }
  0x34   : > { %300 = vst [vmem:[%s1556_s30] sm:$0xf] %v299_v4  ;;  %v305_v7 = vld [vmem:[%s1551_s13 + $0x18] sm:$0xf]  ;;  %v307_v8 = vld [vmem:[%s1551_s13 + $0x20] sm:$0xf] }
  0x35   : > { %302 = vst [vmem:[%s1556_s30 + $0x4] sm:$0xf] %v301_v5  ;;  %v309_v9 = vld [vmem:[%s1551_s13 + $0x28] sm:$0xf]  ;;  %v311_v10 = vld [vmem:[%s1551_s13 + $0x30] sm:$0xf] }
  0x36   : > { %304 = vst [vmem:[%s1556_s30 + $0x8] sm:$0xf] %v303_v6  ;;  %v313_v11 = vld [vmem:[%s1551_s13 + $0x38] sm:$0xf]  ;;  %v315_v12 = vld [vmem:[%s1551_s13 + $0x40] sm:$0xf] }
  0x37   : > { %306 = vst [vmem:[%s1556_s30 + $0xc] sm:$0xf] %v305_v7  ;;  %v317_v13 = vld [vmem:[%s1551_s13 + $0x48] sm:$0xf]  ;;  %v319_v14 = vld [vmem:[%s1551_s13 + $0x50] sm:$0xf] }
  0x38   : > { %308 = vst [vmem:[%s1556_s30 + $0x10] sm:$0xf] %v307_v8  ;;  %v321_v15 = vld [vmem:[%s1551_s13 + $0x58] sm:$0xf]  ;;  %v323_v16 = vld [vmem:[%s1551_s13 + $0x60] sm:$0xf] }
  0x39   : > { %310 = vst [vmem:[%s1556_s30 + $0x14] sm:$0xf] %v309_v9  ;;  %v325_v17 = vld [vmem:[%s1551_s13 + $0x68] sm:$0xf]  ;;  %v327_v18 = vld [vmem:[%s1551_s13 + $0x70] sm:$0xf] }
  0x3a   : > { %312 = vst [vmem:[%s1556_s30 + $0x18] sm:$0xf] %v311_v10  ;;  %v329_v19 = vld [vmem:[%s1551_s13 + $0x78] sm:$0xf]  ;;  %v331_v20 = vld [vmem:[%s1551_s13 + $0x80] sm:$0xf] }
  0x3b   : > { %314 = vst [vmem:[%s1556_s30 + $0x1c] sm:$0xf] %v313_v11  ;;  %v333_v21 = vld [vmem:[%s1551_s13 + $0x88] sm:$0xf]  ;;  %v335_v22 = vld [vmem:[%s1551_s13 + $0x90] sm:$0xf] }
  0x3c   : > { %316 = vst [vmem:[%s1556_s30 + $0x20] sm:$0xf] %v315_v12  ;;  %v337_v23 = vld [vmem:[%s1551_s13 + $0x98] sm:$0xf]  ;;  %v339_v24 = vld [vmem:[%s1551_s13 + $0xa0] sm:$0xf] }
  0x3d   : > { %318 = vst [vmem:[%s1556_s30 + $0x24] sm:$0xf] %v317_v13  ;;  %v341_v25 = vld [vmem:[%s1551_s13 + $0xa8] sm:$0xf]  ;;  %v343_v26 = vld [vmem:[%s1551_s13 + $0xb0] sm:$0xf] }
  0x3e   : > { %320 = vst [vmem:[%s1556_s30 + $0x28] sm:$0xf] %v319_v14  ;;  %v345_v27 = vld [vmem:[%s1551_s13 + $0xb8] sm:$0xf]  ;;  %v347_v28 = vld [vmem:[%s1551_s13 + $0xc0] sm:$0xf] }
  0x3f   : > { %322 = vst [vmem:[%s1556_s30 + $0x2c] sm:$0xf] %v321_v15  ;;  %v349_v29 = vld [vmem:[%s1551_s13 + $0xc8] sm:$0xf]  ;;  %v351_v30 = vld [vmem:[%s1551_s13 + $0xd0] sm:$0xf] }
  0x40   : > { %324 = vst [vmem:[%s1556_s30 + $0x30] sm:$0xf] %v323_v16  ;;  %v353_v31 = vld [vmem:[%s1551_s13 + $0xd8] sm:$0xf]  ;;  %v355_v32 = vld [vmem:[%s1551_s13 + $0xe0] sm:$0xf] }
  0x41   : > { %326 = vst [vmem:[%s1556_s30 + $0x34] sm:$0xf] %v325_v17  ;;  %v357_v33 = vld [vmem:[%s1551_s13 + $0xe8] sm:$0xf]  ;;  %v359_v34 = vld [vmem:[%s1551_s13 + $0xf0] sm:$0xf] }
  0x42   : > { %328 = vst [vmem:[%s1556_s30 + $0x38] sm:$0xf] %v327_v18  ;;  %v361_v35 = vld [vmem:[%s1551_s13 + $0xf8] sm:$0xf] }
  0x43   : > { %330 = vst [vmem:[%s1556_s30 + $0x3c] sm:$0xf] %v329_v19 }
  0x44   : > { %332 = vst [vmem:[%s1556_s30 + $0x40] sm:$0xf] %v331_v20 }
  0x45   : > { %334 = vst [vmem:[%s1556_s30 + $0x44] sm:$0xf] %v333_v21 }
  0x46   : > { %336 = vst [vmem:[%s1556_s30 + $0x48] sm:$0xf] %v335_v22 }
  0x47   : > { %338 = vst [vmem:[%s1556_s30 + $0x4c] sm:$0xf] %v337_v23 }
  0x48   : > { %340 = vst [vmem:[%s1556_s30 + $0x50] sm:$0xf] %v339_v24 }
  0x49   : > { %342 = vst [vmem:[%s1556_s30 + $0x54] sm:$0xf] %v341_v25 }
  0x4a   : > { %344 = vst [vmem:[%s1556_s30 + $0x58] sm:$0xf] %v343_v26 }
  0x4b   : > { %346 = vst [vmem:[%s1556_s30 + $0x5c] sm:$0xf] %v345_v27 }
  0x4c   : > { %348 = vst [vmem:[%s1556_s30 + $0x60] sm:$0xf] %v347_v28 }
  0x4d   : > { %350 = vst [vmem:[%s1556_s30 + $0x64] sm:$0xf] %v349_v29 }
  0x4e   : > { %352 = vst [vmem:[%s1556_s30 + $0x68] sm:$0xf] %v351_v30 }
  0x4f   : > { %354 = vst [vmem:[%s1556_s30 + $0x6c] sm:$0xf] %v353_v31 }
  0x50   : > { %356 = vst [vmem:[%s1556_s30 + $0x70] sm:$0xf] %v355_v32 }
  0x51   : > { %358 = vst [vmem:[%s1556_s30 + $0x74] sm:$0xf] %v357_v33 }
  0x52   : > { %360 = vst [vmem:[%s1556_s30 + $0x78] sm:$0xf] %v359_v34 }
  0x53   : > { %362 = vst [vmem:[%s1556_s30 + $0x7c] sm:$0xf] %v361_v35 }
  0x54 PF: > { %462 = sbr.rel (!%p1527_p11) target bundleno = 92 (0x5c), region = 107  ;;  %s464_s0 = sand.u32 (%p1527_p11), 1, %s1358_s19  }
  0x55   : > { %s1067_s11 = sshll.u32 (%p1527_p11), %s1390_s27, 2  ;;  %s1066_s14 = sshll.u32 (%p1527_p11), %s464_s0, 4 }
  0x56   : > { %s471_s10 = scalar_lea.vmem (%p1527_p11), %s1742_s4, %s1067_s11  ;;  %s466_s6 = scalar_lea.vmem (%p1527_p11), [#allocation5], %s1066_s14 }
  0x57   : > { %v488_v36 = vld [vmem:[%s471_s10] sm:$0xf] (%p1527_p11)  ;;  %v490_v37 = vld [vmem:[%s471_s10 + $0x8] sm:$0xf] (%p1527_p11)  ;;  %v492_v38 = vld [vmem:[%s471_s10 + $0x10] sm:$0xf] (%p1527_p11) }
  0x58   : > { %489 = vst [vmem:[%s466_s6] sm:$0xf] (%p1527_p11), %v488_v36  ;;  %v494_v39 = vld [vmem:[%s471_s10 + $0x18] sm:$0xf] (%p1527_p11) }
  0x59   : > { %491 = vst [vmem:[%s466_s6 + $0x4] sm:$0xf] %v490_v37 }
  0x5a   : > { %493 = vst [vmem:[%s466_s6 + $0x8] sm:$0xf] %v492_v38 }
  0x5b   : > { %495 = vst [vmem:[%s466_s6 + $0xc] sm:$0xf] %v494_v39 }
  0x5c PF: > { %p1068_p1 = scmp.ge.s32.totalorder %s1394_s28, 1  ;;  %p526_p2 = scmp.lt.s32.totalorder %s1394_s28, 19 }
  0x5e   : > { %p527_p3 = pnand %p1068_p1, %p526_p2 }
  0x5f   : > { %s533_s7 = sand.u32 (!%p527_p3), 1, %s1370_s22   ;;  %s540_s12 = sand.u32 (!%p527_p3), 1, %s1362_s20  }
  0x60   : > { %530 = sbr.rel (%p527_p3) target bundleno = 319 (0x13f), region = 148  ;;  %s1069_s15 = sshll.u32 (!%p527_p3), %s533_s7, 5 }
  0x61   : > { %s1070_s13 = sshll.u32 (!%p527_p3), %s540_s12, 7  ;;  %s547_s30 = sand.u32 (!%p527_p3), 1, %s1354_s18  }
  0x62   : > { %p590_p4 = scmp.lt.s32.totalorder (!%p527_p3), %s1382_s25, 1  ;;  %s1632_s0 = sshll.u32 (!%p527_p3), %s547_s30, 4 }
  0x63   : > { %s1645_s22 = scalar_lea.vmem (!%p527_p3), [#allocation3], %s1069_s15  ;;  %s1647_s18 = scalar_lea.vmem (!%p527_p3), [#allocation4], %s1070_s13 }
  0x64   : > { %s549_s7 = scalar_lea.vmem (!%p527_p3), [#allocation5], %s1632_s0  ;;  %s1651_s12 = scalar_lea.vmem (!%p527_p3), [#allocation6], %s1632_s0 }
  0x65   : > { %s1635_s11 = scalar_select %p590_p4, %s1382_s25, 1 }
  0x66   : > { %p1073_p5 = scmp.ne.s32.totalorder %s1378_s24, 0 }
  0x67   : > { %s592_s9 = scalar_lea.vmem %s1740_s2, %s1635_s11  ;;  %s595_s20 = scalar_lea.vmem %s1741_s3, %s1635_s11 }
  0x68   : > { %601 = sbr.rel (%p1073_p5) target bundleno = 114 (0x72), region = 164 }
  0x6d   : > { %v1396_v40 = vmov 0.0  }
  0x6e   : > { %602 = vst [vmem:[#allocation2 + $0x10] sm:$0xff] %v1396_v40 }
  0x6f   : > { %603 = vst [vmem:[#allocation2] sm:$0xff] %v1396_v40 }
  0x70   : > { %604 = vst [vmem:[#allocation2 + $0x18] sm:$0xff] %v1396_v40 }
  0x71   : > { %605 = vst [vmem:[#allocation2 + $0x8] sm:$0xff] %v1396_v40 }
  0x72 PF: > { %v1172_v41 = vld [vmem:[%s1647_s18 + $0x38] sm:$0xff]  ;;  %v1171_v43 = vld [vmem:[%s1647_s18 + $0x30] sm:$0xff]  ;;  %v1170_v45 = vld [vmem:[%s1647_s18 + $0x28] sm:$0xff]  ;;  %p1154_p6 = scmp.ne.s32.totalorder %s1378_s24, 8 }
  0x73   : > { %v1180_v42 = vld [vmem:[%s1647_s18 + $0x78] sm:$0xff]  ;;  %762 = vmatpush.bf16.msra.mxu0 %v1172_v41  ;;  %1201 = vmatpush.bf16.msra.mxu2 %v1172_v41  ;;  %v1179_v44 = vld [vmem:[%s1647_s18 + $0x70] sm:$0xff]  ;;  %v1178_v46 = vld [vmem:[%s1647_s18 + $0x68] sm:$0xff] }
  0x74   : > { %781 = vmatpush.bf16.msra.mxu1 %v1180_v42  ;;  %1209 = vmatpush.bf16.msra.mxu3 %v1180_v42  ;;  %v1169_v47 = vld [vmem:[%s1647_s18 + $0x20] sm:$0xff]  ;;  %v1168_v49 = vld [vmem:[%s1647_s18 + $0x18] sm:$0xff]  ;;  %v1167_v51 = vld [vmem:[%s1647_s18 + $0x10] sm:$0xff] }
  0x75   : > { %v1177_v48 = vld [vmem:[%s1647_s18 + $0x60] sm:$0xff]  ;;  %v1176_v50 = vld [vmem:[%s1647_s18 + $0x58] sm:$0xff]  ;;  %v1175_v52 = vld [vmem:[%s1647_s18 + $0x50] sm:$0xff] }
  0x76   : > { %v1166_v53 = vld [vmem:[%s1647_s18 + $0x8] sm:$0xff]  ;;  %v1165_v55 = vld [vmem:[%s1647_s18] sm:$0xff]  ;;  %v1084_v59 = vld [vmem:[%s1645_s22 + $0x10] sm:$0xf] }
  0x77   : > { %763 = vmatpush.bf16.msra.mxu0 %v1171_v43  ;;  %1202 = vmatpush.bf16.msra.mxu2 %v1171_v43  ;;  %v1174_v54 = vld [vmem:[%s1647_s18 + $0x48] sm:$0xff]  ;;  %v1173_v56 = vld [vmem:[%s1647_s18 + $0x40] sm:$0xff]  ;;  %v1164_v60 = vld [vmem:[%s1645_s22 + $0x14] sm:$0xf0] }
  0x78   : > { %782 = vmatpush.bf16.msra.mxu1 %v1179_v44  ;;  %1210 = vmatpush.bf16.msra.mxu3 %v1179_v44  ;;  %v1076_v57 = vld [vmem:[%s1645_s22] sm:$0xf]  ;;  %v1162_v58 = vld [vmem:[%s1645_s22 + $0x4] sm:$0xf0]  ;;  %v1161_v61 = vld [vmem:[%s1645_s22 + $0x4] sm:$0xf]  ;;  %v1085_v2 = vor.u32 %v1164_v60, %v1084_v59 }
  0x79   : > { %v1078_v62 = vld [vmem:[%s1645_s22 + $0x8] sm:$0xf0]  ;;  %v1163_v63 = vld [vmem:[%s1645_s22 + $0x14] sm:$0xf]  ;;  %v1086_v0 = vld [vmem:[%s1645_s22 + $0x18] sm:$0xf0]  ;;  %v1077_v1 = vor.u32 %v1162_v58, %v1076_v57 }
  0x7a   : > { %v1081_v3 = vor.u32 %v1161_v61, %v1078_v62  ;;  %v1089_v4 = vor.u32 %v1163_v63, %v1086_v0  ;;  %v606_v6 = vld [vmem:[#allocation2 + $0x10] sm:$0xff]  ;;  %v608_v11 = vld [vmem:[#allocation2 + $0x18] sm:$0xff]  ;;  %v607_v15 = vld [vmem:[#allocation2] sm:$0xff] }
  0x7b   : > { %764 = vmatpush.bf16.msra.mxu0 %v1170_v45  ;;  %1203 = vmatpush.bf16.msra.mxu2 %v1170_v45  ;;  %v609_v21 = vld [vmem:[#allocation2 + $0x8] sm:$0xff] }
  0x7c   : > { %783 = vmatpush.bf16.msra.mxu1 %v1178_v46  ;;  %1211 = vmatpush.bf16.msra.mxu3 %v1178_v46 }
  0x7f   : > { %765 = vmatpush.bf16.msra.mxu0 %v1169_v47  ;;  %1204 = vmatpush.bf16.msra.mxu2 %v1169_v47 }
  0x80   : > { %784 = vmatpush.bf16.msra.mxu1 %v1177_v48  ;;  %1212 = vmatpush.bf16.msra.mxu3 %v1177_v48 }
  0x83   : > { %766 = vmatpush.bf16.msra.mxu0 %v1168_v49  ;;  %1205 = vmatpush.bf16.msra.mxu2 %v1168_v49 }
  0x84   : > { %785 = vmatpush.bf16.msra.mxu1 %v1176_v50  ;;  %1213 = vmatpush.bf16.msra.mxu3 %v1176_v50 }
  0x87   : > { %767 = vmatpush.bf16.msra.mxu0 %v1167_v51  ;;  %1206 = vmatpush.bf16.msra.mxu2 %v1167_v51 }
  0x88   : > { %786 = vmatpush.bf16.msra.mxu1 %v1175_v52  ;;  %1214 = vmatpush.bf16.msra.mxu3 %v1175_v52 }
  0x8b   : > { %768 = vmatpush.bf16.msra.mxu0 %v1166_v53  ;;  %1207 = vmatpush.bf16.msra.mxu2 %v1166_v53 }
  0x8c   : > { %787 = vmatpush.bf16.msra.mxu1 %v1174_v54  ;;  %1215 = vmatpush.bf16.msra.mxu3 %v1174_v54 }
  0x8f   : > { %769 = vmatpush.bf16.msra.mxu0 %v1165_v55  ;;  %1208 = vmatpush.bf16.msra.mxu2 %v1165_v55 }
  0x90   : > { %788 = vmatpush.bf16.msra.mxu1 %v1173_v56  ;;  %1216 = vmatpush.bf16.msra.mxu3 %v1173_v56 }
  0x92   : > { %770 = vmatmul.bf16.vlgmr.msra.gmra.mxu0 %v1077_v1  ;;  %775 = vmatmul.bf16.vlgmr.msra.gmra.mxu2 %v1085_v2 }
  0x93   : > { %789 = vmatmul.bf16.vlgmr.msra.gmra.mxu1 %v1081_v3  ;;  %794 = vmatmul.bf16.vlgmr.msra.gmra.mxu3 %v1089_v4 }
 0x10f   : > { %v771_v5 = vpop.f32.mrf.mxu0 }
 0x110   : > { %v790_v7 = vpop.f32.mrf.mxu1 }
 0x111   : > { %v791_v8 = vadd.f32 %v790_v7, %v771_v5 }
 0x113   : > { %v800_v9 = vadd.f32 %v791_v8, %v606_v6 }
 0x115   : > { %804 = vst [vmem:[#allocation2 + $0x10] sm:$0xff] %v800_v9  ;;  %v776_v10 = vpop.f32.mrf.mxu2 }
 0x116   : > { %v795_v12 = vpop.f32.mrf.mxu3 }
 0x117   : > { %v796_v13 = vadd.f32 %v795_v12, %v776_v10  ;;  %v773_v14 = vpop.f32.mrf.mxu0 }
 0x118   : > { %v792_v16 = vpop.f32.mrf.mxu1 }
 0x119   : > { %v802_v17 = vadd.f32 %v796_v13, %v608_v11  ;;  %v793_v18 = vadd.f32 %v792_v16, %v773_v14 }
 0x11b   : > { %806 = vst [vmem:[#allocation2 + $0x18] sm:$0xff] %v802_v17  ;;  %v801_v19 = vadd.f32 %v793_v18, %v607_v15 }
 0x11d   : > { %805 = vst [vmem:[#allocation2] sm:$0xff] %v801_v19  ;;  %v778_v20 = vpop.f32.mrf.mxu2 }
 0x11e   : > { %v797_v22 = vpop.f32.mrf.mxu3 }
 0x11f   : > { %v798_v23 = vadd.f32 %v797_v22, %v778_v20  ;;  %811 = sbr.rel (%p1154_p6) target bundleno = 310 (0x136), region = 168 }
 0x121   : > { %v803_v24 = vadd.f32 %v798_v23, %v609_v21 }
 0x123   : > { %807 = vst [vmem:[#allocation2 + $0x8] sm:$0xff] %v803_v24 }
 0x124   : > { %v812_v25 = vld [vmem:[#allocation2 + $0x10] sm:$0xff]  ;;  %v813_v26 = vld [vmem:[#allocation2] sm:$0xff]  ;;  %v814_v30 = vld [vmem:[#allocation2 + $0x18] sm:$0xff] }
 0x125   : > { %v1306_v27 = vld [vmem:[%s592_s9] ss:$0 sm:$0xff]  ;;  %v1199_v36 = vld [vmem:[%s549_s7 + $0x8] sm:$0xff]  }
 0x126   : > { %v1307_v28 = vld [vmem:[%s595_s20] ss:$0 sm:$0xff]  ;;  %v820_v32 = vmul.f32 %v1306_v27, %v812_v25  ;;  %v821_v33 = vmul.f32 %v1306_v27, %v813_v26  ;;  %v822_v37 = vmul.f32 %v1306_v27, %v814_v30  ;;  %v1187_v39 = vunpack.c.l.bf16 %v1199_v36 }
 0x127   : > { %v1182_v29 = vld [vmem:[%s549_s7] sm:$0xff]   ;;  %v1188_v40 = vunpack.c.h.bf16 %v1199_v36 }
 0x128   : > { %v1183_v34 = vunpack.c.l.bf16 %v1182_v29  ;;  %v1184_v35 = vunpack.c.h.bf16 %v1182_v29  ;;  %v828_v41 = vadd.f32 %v1307_v28, %v820_v32  ;;  %v829_v42 = vadd.f32 %v1307_v28, %v821_v33 }
 0x129   : > { %v830_v43 = vadd.f32 %v1307_v28, %v822_v37 }
 0x12a   : > { %v815_v31 = vld [vmem:[#allocation2 + $0x8] sm:$0xff]  ;;  %v840_v45 = vadd.f32 %v1183_v34, %v828_v41  ;;  %v841_v46 = vadd.f32 %v1184_v35, %v829_v42 }
 0x12b   : > { %v823_v38 = vmul.f32 %v1306_v27, %v815_v31  ;;  %v842_v47 = vadd.f32 %v1187_v39, %v830_v43 }
 0x12c   : > { %v844_v49 = vmax.f32 %v840_v45, 0.0  ;;  %v845_v50 = vmax.f32 %v841_v46, 0.0 }
 0x12d   : > { %v831_v44 = vadd.f32 %v1307_v28, %v823_v38  ;;  %v846_v51 = vmax.f32 %v842_v47, 0.0 }
 0x12e   : > { %v1192_v53 = vpack.c.bf16 %v845_v50, %v844_v49 }
 0x12f   : > { %v843_v48 = vadd.f32 %v1188_v40, %v831_v44 }
 0x130   : > { %1193 = vst [vmem:[%s1651_s12] sm:$0xff] %v1192_v53  }
 0x131   : > { %v847_v52 = vmax.f32 %v843_v48, 0.0 }
 0x133   : > { %v1197_v54 = vpack.c.bf16 %v847_v52, %v846_v51 }
 0x135   : > { %1200 = vst [vmem:[%s1651_s12 + $0x8] sm:$0xff] %v1197_v54  }
 0x136 PF: > { %862 = sbr.rel (!%p1531_p13) target bundleno = 319 (0x13f), region = 172  ;;  %s1156_s24 = sshll.u32 (%p1531_p13), %s1382_s25, 2 }
 0x137   : > { %v884_v55 = vld [vmem:[%s1651_s12] sm:$0xf] (%p1531_p13)  ;;  %v886_v56 = vld [vmem:[%s1651_s12 + $0x4] sm:$0xf] (%p1531_p13)  ;;  %s867_s29 = scalar_lea.vmem (%p1531_p13), %s1743_s5, %s1156_s24 }
 0x138   : > { %885 = vst [vmem:[%s867_s29] sm:$0xf] (%p1531_p13), %v884_v55 }
 0x139   : > { %887 = vst [vmem:[%s867_s29 + $0x8] sm:$0xf] (%p1531_p13), %v886_v56 }
 0x13c   : > { %v888_v57 = vld [vmem:[%s1651_s12 + $0x8] sm:$0xf]  ;;  %v890_v58 = vld [vmem:[%s1651_s12 + $0xc] sm:$0xf] }
 0x13d   : > { %889 = vst [vmem:[%s867_s29 + $0x10] sm:$0xf] %v888_v57 }
 0x13e   : > { %891 = vst [vmem:[%s867_s29 + $0x18] sm:$0xf] %v890_v58 }
 0x13f PF: > { %s15_s28 = sadd.s32 1, %s1394_s28   ;;  %s1755_s25 = sld [smem:[#allocation9_spill]] }
 0x140   : > { %p12_p7 = scmp.ge.s32.totalorder %s15_s28, 20   ;;  %s1756_s8 = sld [smem:[#allocation7_spill]] }
 0x141   : > { %s1757_s9 = sld [smem:[#allocation8_spill]]  ;;  %s1758_s18 = smov %s1358_s19 }
 0x142   : > { %s1759_s19 = smov %s1523_s17  ;;  %s1760_s20 = smov %s1366_s21 }
 0x143   : > { %s1761_s21 = smov %s1520_s16  ;;  %s1762_s22 = smov %s1374_s23 }
 0x144   : > { %s1764_s24 = smov %s1386_s26  ;;  %14 = sbr.rel (!%p12_p7) target bundleno = 8 (0x8), region = 266 }
 0x145   : > { %s1763_s23 = smov %s1755_s25  ;;  %s1765_s25 = smov %s1390_s27 }
 0x146   : > { %s1766_s26 = smov %s1756_s8 }
 0x147   : > { %s1767_s27 = smov %s1757_s9 }

// kernel: _lambda_.23
= control target key start
LH: loop header
LB: loop body
LE: loop exit
PB: predicated region body
PF: predicated region fallthrough
CT: control target
= control target key end

     0   :  { %s975_s15 = smov 0   ;;  %s977_s16 = smov 0   ;;  %s1136_s0 = inlined_call_operand.vmem [shape: bf16[8,256], index: 0, kind: input, shape index: {}]   ;;  %s1137_s1 = inlined_call_operand.vmem [shape: bf16[256,512], index: 1, kind: input, shape index: {}]   ;;  %s1138_s2 = inlined_call_operand.vmem [shape: f32[1,512], index: 2, kind: input, shape index: {}]   ;;  %s1139_s3 = inlined_call_operand.vmem [shape: f32[1,512], index: 3, kind: input, shape index: {}]   ;;  %s1140_s4 = inlined_call_operand.vmem [shape: bf16[8,512], index: 4, kind: output, shape index: {}]  }
   0x1   :  { %s979_s17 = smov 0   ;;  %s981_s18 = smov 0  }
   0x2   :  { %s983_s19 = smov 0  }
   0x3 LB: > { %s29_s20 = sadd.s32 1, %s944_s18  ;;  %p77_p1 = scmp.ne.s32.totalorder %s936_s16, %s932_s15  ;;  %s948_s19 = sphi %s983_s19, %s14_s19   ;;  %s944_s18 = sphi %s981_s18, %s1144_s18   ;;  %s940_s17 = sphi %s979_s17, %s1143_s17   ;;  %s936_s16 = sphi %s977_s16, %s1142_s16   ;;  %s932_s15 = sphi %s975_s15, %s1141_s15  }
   0x4   : > { %p31_p0 = scmp.ge.s32.totalorder %s29_s20, 4  ;;  %p78_p2 = scmp.eq.s32.totalorder %s948_s19, 0 }
   0x5   : > { %s70_s22 = sadd.s32 1, %s936_s16  ;;  %p780_p5 = scmp.ge.s32.totalorder %s948_s19, 4 }
   0x6   : > { %s1146_s20 = smov (%p31_p0, %s29_s20), 0  ;;  %p79_p3 = por %p78_p2, %p77_p1 }
   0x7   : > { %s66_s21 = ssub.s32 %s944_s18, %s1146_s20  ;;  %196 = sbr.rel (%p780_p5) target bundleno = 48 (0x30), region = 20 }
   0x8   : > { %p68_p4 = scmp.eq.s32.totalorder %s66_s21, 0 }
   0xa   : > { %s1010_s23 = scalar_select %p68_p4, %s936_s16, %s70_s22  }
   0xc   : > { %199 = sbr.rel (!%p79_p3) target bundleno = 48 (0x30), region = 24  ;;  %s201_s24 = sand.u32 (%p79_p3), 1, %s936_s16  }
   0xd   : > { %s782_s25 = sshll.u32 (%p79_p3), %s944_s18, 2  ;;  %s781_s26 = sshll.u32 (%p79_p3), %s201_s24, 7 }
   0xe   : > { %s1018_s29 = scalar_lea.vmem (%p79_p3), %s1137_s1, %s782_s25  ;;  %s1022_s30 = scalar_lea.vmem (%p79_p3), [#allocation3], %s781_s26 }
   0xf   : > { %v225_v0 = vld [vmem:[%s1018_s29] sm:$0xf] (%p79_p3)  ;;  %v227_v1 = vld [vmem:[%s1018_s29 + $0x10] sm:$0xf] (%p79_p3) }
  0x10   : > { %226 = vst [vmem:[%s1022_s30] sm:$0xf] (%p79_p3), %v225_v0  ;;  %v229_v2 = vld [vmem:[%s1018_s29 + $0x20] sm:$0xf] (%p79_p3)  ;;  %v231_v3 = vld [vmem:[%s1018_s29 + $0x30] sm:$0xf] (%p79_p3) }
  0x11   : > { %228 = vst [vmem:[%s1022_s30 + $0x4] sm:$0xf] %v227_v1  ;;  %v233_v4 = vld [vmem:[%s1018_s29 + $0x40] sm:$0xf]  ;;  %v235_v5 = vld [vmem:[%s1018_s29 + $0x50] sm:$0xf] }
  0x12   : > { %230 = vst [vmem:[%s1022_s30 + $0x8] sm:$0xf] %v229_v2  ;;  %v237_v6 = vld [vmem:[%s1018_s29 + $0x60] sm:$0xf]  ;;  %v239_v7 = vld [vmem:[%s1018_s29 + $0x70] sm:$0xf] }
  0x13   : > { %232 = vst [vmem:[%s1022_s30 + $0xc] sm:$0xf] %v231_v3  ;;  %v241_v8 = vld [vmem:[%s1018_s29 + $0x80] sm:$0xf]  ;;  %v243_v9 = vld [vmem:[%s1018_s29 + $0x90] sm:$0xf] }
  0x14   : > { %234 = vst [vmem:[%s1022_s30 + $0x10] sm:$0xf] %v233_v4  ;;  %v245_v10 = vld [vmem:[%s1018_s29 + $0xa0] sm:$0xf]  ;;  %v247_v11 = vld [vmem:[%s1018_s29 + $0xb0] sm:$0xf] }
  0x15   : > { %236 = vst [vmem:[%s1022_s30 + $0x14] sm:$0xf] %v235_v5  ;;  %v249_v12 = vld [vmem:[%s1018_s29 + $0xc0] sm:$0xf]  ;;  %v251_v13 = vld [vmem:[%s1018_s29 + $0xd0] sm:$0xf] }
  0x16   : > { %238 = vst [vmem:[%s1022_s30 + $0x18] sm:$0xf] %v237_v6  ;;  %v253_v14 = vld [vmem:[%s1018_s29 + $0xe0] sm:$0xf]  ;;  %v255_v15 = vld [vmem:[%s1018_s29 + $0xf0] sm:$0xf] }
  0x17   : > { %240 = vst [vmem:[%s1022_s30 + $0x1c] sm:$0xf] %v239_v7  ;;  %v257_v16 = vld [vmem:[%s1018_s29 + $0x100] sm:$0xf]  ;;  %v259_v17 = vld [vmem:[%s1018_s29 + $0x110] sm:$0xf] }
  0x18   : > { %242 = vst [vmem:[%s1022_s30 + $0x20] sm:$0xf] %v241_v8  ;;  %v261_v18 = vld [vmem:[%s1018_s29 + $0x120] sm:$0xf]  ;;  %v263_v19 = vld [vmem:[%s1018_s29 + $0x130] sm:$0xf] }
  0x19   : > { %244 = vst [vmem:[%s1022_s30 + $0x24] sm:$0xf] %v243_v9  ;;  %v265_v20 = vld [vmem:[%s1018_s29 + $0x140] sm:$0xf]  ;;  %v267_v21 = vld [vmem:[%s1018_s29 + $0x150] sm:$0xf] }
  0x1a   : > { %246 = vst [vmem:[%s1022_s30 + $0x28] sm:$0xf] %v245_v10  ;;  %v269_v22 = vld [vmem:[%s1018_s29 + $0x160] sm:$0xf]  ;;  %v271_v23 = vld [vmem:[%s1018_s29 + $0x170] sm:$0xf] }
  0x1b   : > { %248 = vst [vmem:[%s1022_s30 + $0x2c] sm:$0xf] %v247_v11  ;;  %v273_v24 = vld [vmem:[%s1018_s29 + $0x180] sm:$0xf]  ;;  %v275_v25 = vld [vmem:[%s1018_s29 + $0x190] sm:$0xf] }
  0x1c   : > { %250 = vst [vmem:[%s1022_s30 + $0x30] sm:$0xf] %v249_v12  ;;  %v277_v26 = vld [vmem:[%s1018_s29 + $0x1a0] sm:$0xf]  ;;  %v279_v27 = vld [vmem:[%s1018_s29 + $0x1b0] sm:$0xf] }
  0x1d   : > { %252 = vst [vmem:[%s1022_s30 + $0x34] sm:$0xf] %v251_v13  ;;  %v281_v28 = vld [vmem:[%s1018_s29 + $0x1c0] sm:$0xf]  ;;  %v283_v29 = vld [vmem:[%s1018_s29 + $0x1d0] sm:$0xf] }
  0x1e   : > { %254 = vst [vmem:[%s1022_s30 + $0x38] sm:$0xf] %v253_v14  ;;  %v285_v30 = vld [vmem:[%s1018_s29 + $0x1e0] sm:$0xf]  ;;  %v287_v31 = vld [vmem:[%s1018_s29 + $0x1f0] sm:$0xf] }
  0x1f   : > { %256 = vst [vmem:[%s1022_s30 + $0x3c] sm:$0xf] %v255_v15 }
  0x20   : > { %258 = vst [vmem:[%s1022_s30 + $0x40] sm:$0xf] %v257_v16 }
  0x21   : > { %260 = vst [vmem:[%s1022_s30 + $0x44] sm:$0xf] %v259_v17 }
  0x22   : > { %262 = vst [vmem:[%s1022_s30 + $0x48] sm:$0xf] %v261_v18 }
  0x23   : > { %264 = vst [vmem:[%s1022_s30 + $0x4c] sm:$0xf] %v263_v19 }
  0x24   : > { %266 = vst [vmem:[%s1022_s30 + $0x50] sm:$0xf] %v265_v20 }
  0x25   : > { %268 = vst [vmem:[%s1022_s30 + $0x54] sm:$0xf] %v267_v21 }
  0x26   : > { %270 = vst [vmem:[%s1022_s30 + $0x58] sm:$0xf] %v269_v22 }
  0x27   : > { %272 = vst [vmem:[%s1022_s30 + $0x5c] sm:$0xf] %v271_v23 }
  0x28   : > { %274 = vst [vmem:[%s1022_s30 + $0x60] sm:$0xf] %v273_v24 }
  0x29   : > { %276 = vst [vmem:[%s1022_s30 + $0x64] sm:$0xf] %v275_v25 }
  0x2a   : > { %278 = vst [vmem:[%s1022_s30 + $0x68] sm:$0xf] %v277_v26 }
  0x2b   : > { %280 = vst [vmem:[%s1022_s30 + $0x6c] sm:$0xf] %v279_v27 }
  0x2c   : > { %282 = vst [vmem:[%s1022_s30 + $0x70] sm:$0xf] %v281_v28 }
  0x2d   : > { %284 = vst [vmem:[%s1022_s30 + $0x74] sm:$0xf] %v283_v29 }
  0x2e   : > { %286 = vst [vmem:[%s1022_s30 + $0x78] sm:$0xf] %v285_v30 }
  0x2f   : > { %288 = vst [vmem:[%s1022_s30 + $0x7c] sm:$0xf] %v287_v31 }
  0x30 PF: > { %p783_p6 = scmp.ge.s32.totalorder %s948_s19, 1  ;;  %p387_p7 = scmp.lt.s32.totalorder %s948_s19, 5 }
  0x32   : > { %p388_p8 = pnand %p783_p6, %p387_p7 }
  0x33   : > { %s394_s5 = sand.u32 (!%p388_p8), 1, %s932_s15   ;;  %p448_p9 = scmp.lt.s32.totalorder (!%p388_p8), %s940_s17, 3 }
  0x34   : > { %391 = sbr.rel (%p388_p8) target bundleno = 225 (0xe1), region = 73  ;;  %s784_s6 = sshll.u32 (!%p388_p8), %s394_s5, 7 }
  0x35   : > { %s1089_s7 = scalar_lea.vmem (!%p388_p8), [#allocation3], %s784_s6 }
  0x39   : > { %v859_v32 = vld [vmem:[%s1089_s7 + $0x38] sm:$0xff]  ;;  %v858_v34 = vld [vmem:[%s1089_s7 + $0x30] sm:$0xff]  ;;  %v857_v36 = vld [vmem:[%s1089_s7 + $0x28] sm:$0xff]  ;;  %s1148_s17 = smov (!%p448_p9, %s940_s17), 3 }
  0x3a   : > { %v867_v33 = vld [vmem:[%s1089_s7 + $0x78] sm:$0xff]  ;;  %604 = vmatpush.bf16.msra.mxu0 %v859_v32  ;;  %v866_v35 = vld [vmem:[%s1089_s7 + $0x70] sm:$0xff]  ;;  %v865_v37 = vld [vmem:[%s1089_s7 + $0x68] sm:$0xff]  ;;  %s450_s12 = scalar_lea.vmem %s1138_s2, %s1148_s17  ;;  %s453_s15 = scalar_lea.vmem %s1139_s3, %s1148_s17 }
  0x3b   : > { %617 = vmatpush.bf16.msra.mxu1 %v867_v33  ;;  %v856_v38 = vld [vmem:[%s1089_s7 + $0x20] sm:$0xff]  ;;  %v855_v40 = vld [vmem:[%s1089_s7 + $0x18] sm:$0xff]  ;;  %v854_v42 = vld [vmem:[%s1089_s7 + $0x10] sm:$0xff]  ;;  %s785_s21 = sshll.u32 %s1148_s17, 2 }
  0x3c   : > { %v864_v39 = vld [vmem:[%s1089_s7 + $0x60] sm:$0xff]  ;;  %v863_v41 = vld [vmem:[%s1089_s7 + $0x58] sm:$0xff]  ;;  %v862_v43 = vld [vmem:[%s1089_s7 + $0x50] sm:$0xff]  ;;  %s461_s25 = scalar_lea.vmem %s1140_s4, %s785_s21 }
  0x3d   : > { %v853_v44 = vld [vmem:[%s1089_s7 + $0x8] sm:$0xff]  ;;  %v468_v46 = vld [vmem:[%s1136_s0] sm:$0xff] }
  0x3e   : > { %605 = vmatpush.bf16.msra.mxu0 %v858_v34  ;;  %v861_v45 = vld [vmem:[%s1089_s7 + $0x48] sm:$0xff]  ;;  %v502_v47 = vunpack.c.l.b16 %v468_v46  ;;  %v503_v48 = vunpack.c.h.b16 %v468_v46  ;;  %v852_v49 = vld [vmem:[%s1089_s7] sm:$0xff] }
  0x3f   : > { %618 = vmatpush.bf16.msra.mxu1 %v866_v35  ;;  %v860_v50 = vld [vmem:[%s1089_s7 + $0x40] sm:$0xff] }
  0x40   : > { %v504_v51 = vpack.c.b16 %v502_v47, %v502_v47  ;;  %v505_v52 = vpack.c.b16 %v503_v48, %v503_v48  ;;  %v908_v53 = vld [vmem:[%s450_s12] ss:$0 sm:$0xff] }
  0x41   : > { %v909_v57 = vld [vmem:[%s453_s15] ss:$0 sm:$0xff] }
  0x42   : > { %606 = vmatpush.bf16.msra.mxu0 %v857_v36 }
  0x43   : > { %619 = vmatpush.bf16.msra.mxu1 %v865_v37 }
  0x46   : > { %607 = vmatpush.bf16.msra.mxu0 %v856_v38 }
  0x47   : > { %620 = vmatpush.bf16.msra.mxu1 %v864_v39 }
  0x4a   : > { %608 = vmatpush.bf16.msra.mxu0 %v855_v40 }
  0x4b   : > { %621 = vmatpush.bf16.msra.mxu1 %v863_v41 }
  0x4e   : > { %609 = vmatpush.bf16.msra.mxu0 %v854_v42 }
  0x4f   : > { %622 = vmatpush.bf16.msra.mxu1 %v862_v43 }
  0x52   : > { %610 = vmatpush.bf16.msra.mxu0 %v853_v44 }
  0x53   : > { %623 = vmatpush.bf16.msra.mxu1 %v861_v45 }
  0x56   : > { %611 = vmatpush.bf16.msra.mxu0 %v852_v49 }
  0x57   : > { %624 = vmatpush.bf16.msra.mxu1 %v860_v50 }
  0x59   : > { %612 = vmatmul.bf16.vlgmr.msra.gmra.mxu0 %v504_v51 }
  0x5a   : > { %625 = vmatmul.bf16.vlgmr.msra.gmra.mxu1 %v505_v52 }
  0xd6   : > { %v613_v54 = vpop.f32.mrf.mxu0 }
  0xd7   : > { %v626_v55 = vpop.f32.mrf.mxu1 }
  0xd8   : > { %v627_v56 = vadd.f32 %v626_v55, %v613_v54 }
  0xda   : > { %v640_v58 = vmul.f32 %v908_v53, %v627_v56 }
  0xdc   : > { %v645_v59 = vadd.f32 %v909_v57, %v640_v58 }
  0xde   : > { %v646_v60 = vpack.c.bf16 %v645_v59, %v645_v59  ;;  %v615_v61 = vpop.f32.mrf.mxu0 }
  0xdf   : > { %v628_v62 = vpop.f32.mrf.mxu1 }
  0xe0   : > { %647 = vst [vmem:[%s461_s25] sm:$0xf] %v646_v60 }
  0xe1 PF: > { %s14_s19 = sadd.s32 1, %s948_s19   ;;  %s1141_s15 = smov %s936_s16 }
  0xe2   : > { %p11_p10 = scmp.ge.s32.totalorder %s14_s19, 6   ;;  %s1142_s16 = smov %s1010_s23 }
  0xe3   : > { %s1143_s17 = smov %s944_s18  ;;  %s1144_s18 = smov %s1146_s20 }
  0xe4   :  { %13 = sbr.rel (!%p11_p10) target bundleno = 3 (0x3), region = 129 }

// kernel: _lambda_.22
= control target key start
LH: loop header
LB: loop body
LE: loop exit
PB: predicated region body
PF: predicated region fallthrough
CT: control target
= control target key end

     0   :  { %s1016_s15 = smov 0   ;;  %s1018_s16 = smov 0   ;;  %s1224_s0 = inlined_call_operand.vmem [shape: bf16[8,2304], index: 0, kind: input, shape index: {}]   ;;  %s1225_s1 = inlined_call_operand.vmem [shape: bf16[2304,512], index: 1, kind: input, shape index: {}]   ;;  %s1226_s2 = inlined_call_operand.vmem [shape: f32[1,512], index: 2, kind: input, shape index: {}]   ;;  %s1227_s3 = inlined_call_operand.vmem [shape: f32[1,512], index: 3, kind: input, shape index: {}]   ;;  %s1228_s4 = inlined_call_operand.vmem [shape: bf16[8,512], index: 4, kind: output, shape index: {}]  }
   0x1   :  { %s1020_s17 = smov 0   ;;  %s1022_s18 = smov 0  }
   0x2   :  { %s1024_s19 = smov 0   ;;  %s1026_s20 = smov 0  }
   0x3   :  { %s1028_s21 = smov 0  }
   0x4 LB: > { %s26_s22 = sadd.s32 1, %s980_s19  ;;  %s29_s23 = sadd.s32 1, %s984_s20  ;;  %s988_s21 = sphi %s1028_s21, %s14_s21   ;;  %s984_s20 = sphi %s1026_s20, %s1234_s20   ;;  %s980_s19 = sphi %s1024_s19, %s1233_s19   ;;  %s976_s18 = sphi %s1022_s18, %s1232_s18   ;;  %s972_s17 = sphi %s1020_s17, %s1231_s17   ;;  %s968_s16 = sphi %s1018_s16, %s1230_s16   ;;  %s964_s15 = sphi %s1016_s15, %s1229_s15  }
   0x5   : > { %p27_p0 = scmp.ge.s32.totalorder %s26_s22, 9  ;;  %p77_p1 = scmp.ne.s32.totalorder %s968_s16, %s964_s15 }
   0x6   : > { %p78_p2 = scmp.eq.s32.totalorder %s988_s21, 0  ;;  %s70_s27 = sadd.s32 1, %s968_s16 }
   0x7   : > { %s1236_s22 = smov (%p27_p0, %s26_s22), 0  ;;  %s1238_s23 = smov (!%p27_p0, %s29_s23), %s984_s20 }
   0x8   : > { %p79_p3 = por %p78_p2, %p77_p1  ;;  %p31_p4 = scmp.ge.s32.totalorder %s1238_s23, 4 }
   0x9   : > { %s65_s24 = ssub.s32 %s980_s19, %s1236_s22  ;;  %p780_p6 = scmp.ge.s32.totalorder %s988_s21, 36 }
   0xa   : > { %s1240_s23 = smov (%p31_p4, %s1238_s23), 0 }
   0xb   : > { %s66_s25 = ssub.s32 %s984_s20, %s1240_s23  ;;  %183 = sbr.rel (%p780_p6) target bundleno = 54 (0x36), region = 16 }
   0xc   : > { %s67_s26 = sor.u32 %s66_s25, %s65_s24 }
   0xd   : > { %p68_p5 = scmp.eq.s32.totalorder %s67_s26, 0 }
   0xf   : > { %s1067_s28 = scalar_select %p68_p5, %s968_s16, %s70_s27  }
  0x10   : > { %199 = sbr.rel (!%p79_p3) target bundleno = 54 (0x36), region = 24  ;;  %s201_s29 = sand.u32 (%p79_p3), 1, %s968_s16  }
  0x11   : > { %s858_s30 = sshll.u32 (%p79_p3), %s980_s19, 7  ;;  %s781_s5 = sshll.u32 (%p79_p3), %s201_s29, 7 }
  0x12   : > { %s206_s6 = sadd.s32 (%p79_p3), %s984_s20, %s858_s30  ;;  %s1081_s11 = scalar_lea.vmem (%p79_p3), [#allocation3], %s781_s5 }
  0x13   : > { %s784_s7 = sshll.u32 (%p79_p3), %s206_s6, 2 }
  0x14   : > { %s1076_s10 = scalar_lea.vmem (%p79_p3), %s1225_s1, %s784_s7 }
  0x15   : > { %v225_v0 = vld [vmem:[%s1076_s10] sm:$0xf]  ;;  %v227_v1 = vld [vmem:[%s1076_s10 + $0x10] sm:$0xf] }
  0x16   : > { %v229_v2 = vld [vmem:[%s1076_s10 + $0x20] sm:$0xf]  ;;  %226 = vst [vmem:[%s1081_s11] sm:$0xf] %v225_v0  ;;  %v231_v3 = vld [vmem:[%s1076_s10 + $0x30] sm:$0xf] }
  0x17   : > { %228 = vst [vmem:[%s1081_s11 + $0x4] sm:$0xf] %v227_v1  ;;  %v233_v4 = vld [vmem:[%s1076_s10 + $0x40] sm:$0xf]  ;;  %v235_v5 = vld [vmem:[%s1076_s10 + $0x50] sm:$0xf] }
  0x18   : > { %230 = vst [vmem:[%s1081_s11 + $0x8] sm:$0xf] %v229_v2  ;;  %v237_v6 = vld [vmem:[%s1076_s10 + $0x60] sm:$0xf]  ;;  %v239_v7 = vld [vmem:[%s1076_s10 + $0x70] sm:$0xf] }
  0x19   : > { %232 = vst [vmem:[%s1081_s11 + $0xc] sm:$0xf] %v231_v3  ;;  %v241_v8 = vld [vmem:[%s1076_s10 + $0x80] sm:$0xf]  ;;  %v243_v9 = vld [vmem:[%s1076_s10 + $0x90] sm:$0xf] }
  0x1a   : > { %234 = vst [vmem:[%s1081_s11 + $0x10] sm:$0xf] %v233_v4  ;;  %v245_v10 = vld [vmem:[%s1076_s10 + $0xa0] sm:$0xf]  ;;  %v247_v11 = vld [vmem:[%s1076_s10 + $0xb0] sm:$0xf] }
  0x1b   : > { %236 = vst [vmem:[%s1081_s11 + $0x14] sm:$0xf] %v235_v5  ;;  %v249_v12 = vld [vmem:[%s1076_s10 + $0xc0] sm:$0xf]  ;;  %v251_v13 = vld [vmem:[%s1076_s10 + $0xd0] sm:$0xf] }
  0x1c   : > { %238 = vst [vmem:[%s1081_s11 + $0x18] sm:$0xf] %v237_v6  ;;  %v253_v14 = vld [vmem:[%s1076_s10 + $0xe0] sm:$0xf]  ;;  %v255_v15 = vld [vmem:[%s1076_s10 + $0xf0] sm:$0xf] }
  0x1d   : > { %240 = vst [vmem:[%s1081_s11 + $0x1c] sm:$0xf] %v239_v7  ;;  %v257_v16 = vld [vmem:[%s1076_s10 + $0x100] sm:$0xf]  ;;  %v259_v17 = vld [vmem:[%s1076_s10 + $0x110] sm:$0xf] }
  0x1e   : > { %242 = vst [vmem:[%s1081_s11 + $0x20] sm:$0xf] %v241_v8  ;;  %v261_v18 = vld [vmem:[%s1076_s10 + $0x120] sm:$0xf]  ;;  %v263_v19 = vld [vmem:[%s1076_s10 + $0x130] sm:$0xf] }
  0x1f   : > { %244 = vst [vmem:[%s1081_s11 + $0x24] sm:$0xf] %v243_v9  ;;  %v265_v20 = vld [vmem:[%s1076_s10 + $0x140] sm:$0xf]  ;;  %v267_v21 = vld [vmem:[%s1076_s10 + $0x150] sm:$0xf] }
  0x20   : > { %246 = vst [vmem:[%s1081_s11 + $0x28] sm:$0xf] %v245_v10  ;;  %v269_v22 = vld [vmem:[%s1076_s10 + $0x160] sm:$0xf]  ;;  %v271_v23 = vld [vmem:[%s1076_s10 + $0x170] sm:$0xf] }
  0x21   : > { %248 = vst [vmem:[%s1081_s11 + $0x2c] sm:$0xf] %v247_v11  ;;  %v273_v24 = vld [vmem:[%s1076_s10 + $0x180] sm:$0xf]  ;;  %v275_v25 = vld [vmem:[%s1076_s10 + $0x190] sm:$0xf] }
  0x22   : > { %250 = vst [vmem:[%s1081_s11 + $0x30] sm:$0xf] %v249_v12  ;;  %v277_v26 = vld [vmem:[%s1076_s10 + $0x1a0] sm:$0xf]  ;;  %v279_v27 = vld [vmem:[%s1076_s10 + $0x1b0] sm:$0xf] }
  0x23   : > { %252 = vst [vmem:[%s1081_s11 + $0x34] sm:$0xf] %v251_v13  ;;  %v281_v28 = vld [vmem:[%s1076_s10 + $0x1c0] sm:$0xf]  ;;  %v283_v29 = vld [vmem:[%s1076_s10 + $0x1d0] sm:$0xf] }
  0x24   : > { %254 = vst [vmem:[%s1081_s11 + $0x38] sm:$0xf] %v253_v14  ;;  %v285_v30 = vld [vmem:[%s1076_s10 + $0x1e0] sm:$0xf]  ;;  %v287_v31 = vld [vmem:[%s1076_s10 + $0x1f0] sm:$0xf] }
  0x25   : > { %256 = vst [vmem:[%s1081_s11 + $0x3c] sm:$0xf] %v255_v15 }
  0x26   : > { %258 = vst [vmem:[%s1081_s11 + $0x40] sm:$0xf] %v257_v16 }
  0x27   : > { %260 = vst [vmem:[%s1081_s11 + $0x44] sm:$0xf] %v259_v17 }
  0x28   : > { %262 = vst [vmem:[%s1081_s11 + $0x48] sm:$0xf] %v261_v18 }
  0x29   : > { %264 = vst [vmem:[%s1081_s11 + $0x4c] sm:$0xf] %v263_v19 }
  0x2a   : > { %266 = vst [vmem:[%s1081_s11 + $0x50] sm:$0xf] %v265_v20 }
  0x2b   : > { %268 = vst [vmem:[%s1081_s11 + $0x54] sm:$0xf] %v267_v21 }
  0x2c   : > { %270 = vst [vmem:[%s1081_s11 + $0x58] sm:$0xf] %v269_v22 }
  0x2d   : > { %272 = vst [vmem:[%s1081_s11 + $0x5c] sm:$0xf] %v271_v23 }
  0x2e   : > { %274 = vst [vmem:[%s1081_s11 + $0x60] sm:$0xf] %v273_v24 }
  0x2f   : > { %276 = vst [vmem:[%s1081_s11 + $0x64] sm:$0xf] %v275_v25 }
  0x30   : > { %278 = vst [vmem:[%s1081_s11 + $0x68] sm:$0xf] %v277_v26 }
  0x31   : > { %280 = vst [vmem:[%s1081_s11 + $0x6c] sm:$0xf] %v279_v27 }
  0x32   : > { %282 = vst [vmem:[%s1081_s11 + $0x70] sm:$0xf] %v281_v28 }
  0x33   : > { %284 = vst [vmem:[%s1081_s11 + $0x74] sm:$0xf] %v283_v29 }
  0x34   : > { %286 = vst [vmem:[%s1081_s11 + $0x78] sm:$0xf] %v285_v30 }
  0x35   : > { %288 = vst [vmem:[%s1081_s11 + $0x7c] sm:$0xf] %v287_v31 }
  0x36 PF: > { %p785_p7 = scmp.ge.s32.totalorder %s988_s21, 1  ;;  %p387_p8 = scmp.lt.s32.totalorder %s988_s21, 37 }
  0x38   : > { %p388_p9 = pnand %p785_p7, %p387_p8 }
  0x39   : > { %s394_s12 = sand.u32 (!%p388_p9), 1, %s964_s15   ;;  %s787_s13 = sshll.u32 (!%p388_p9), %s972_s17, 1 }
  0x3a   : > { %391 = sbr.rel (%p388_p9) target bundleno = 253 (0xfd), region = 73  ;;  %s786_s14 = sshll.u32 (!%p388_p9), %s394_s12, 7 }
  0x3b   : > { %p440_p10 = scmp.lt.s32.totalorder (!%p388_p9), %s787_s13, 17  ;;  %p448_p11 = scmp.lt.s32.totalorder (!%p388_p9), %s976_s18, 3 }
  0x3c   : > { %s1171_s12 = scalar_lea.vmem (!%p388_p9), [#allocation3], %s786_s14  ;;  %p790_p12 = scmp.ne.s32.totalorder (!%p388_p9), %s972_s17, 0 }
  0x3f   : > { %s1242_s13 = smov (!%p440_p10, %s787_s13), 17  ;;  %s1244_s18 = smov (!%p448_p11, %s976_s18), 3 }
  0x40   : > { %s788_s24 = sshll.u32 %s1242_s13, 2  ;;  %s450_s15 = scalar_lea.vmem %s1226_s2, %s1244_s18 }
  0x41   : > { %s1155_s27 = scalar_lea.vmem %s1224_s0, %s788_s24  ;;  %s453_s7 = scalar_lea.vmem %s1227_s3, %s1244_s18 }
  0x42   : > { %s789_s8 = sshll.u32 %s1244_s18, 2  ;;  %465 = sbr.rel (%p790_p12) target bundleno = 73 (0x49), region = 81 }
  0x43   : > { %s1169_s11 = scalar_lea.vmem %s1228_s4, %s789_s8 }
  0x47   : > { %v990_v32 = vmov 0.0  }
  0x48   : > { %466 = vst [vmem:[#allocation2] sm:$0xff] %v990_v32 }
  0x49 PF: > { %v866_v33 = vld [vmem:[%s1171_s12 + $0x38] sm:$0xff]  ;;  %v865_v35 = vld [vmem:[%s1171_s12 + $0x30] sm:$0xff]  ;;  %v864_v37 = vld [vmem:[%s1171_s12 + $0x28] sm:$0xff]  ;;  %p855_p13 = scmp.ne.s32.totalorder %s972_s17, 8 }
  0x4a   : > { %v874_v34 = vld [vmem:[%s1171_s12 + $0x78] sm:$0xff]  ;;  %604 = vmatpush.bf16.msra.mxu0 %v866_v33  ;;  %v873_v36 = vld [vmem:[%s1171_s12 + $0x70] sm:$0xff]  ;;  %v872_v38 = vld [vmem:[%s1171_s12 + $0x68] sm:$0xff] }
  0x4b   : > { %617 = vmatpush.bf16.msra.mxu1 %v874_v34  ;;  %v863_v39 = vld [vmem:[%s1171_s12 + $0x20] sm:$0xff]  ;;  %v862_v41 = vld [vmem:[%s1171_s12 + $0x18] sm:$0xff]  ;;  %v861_v43 = vld [vmem:[%s1171_s12 + $0x10] sm:$0xff] }
  0x4c   : > { %v871_v40 = vld [vmem:[%s1171_s12 + $0x60] sm:$0xff]  ;;  %v870_v42 = vld [vmem:[%s1171_s12 + $0x58] sm:$0xff]  ;;  %v869_v44 = vld [vmem:[%s1171_s12 + $0x50] sm:$0xff] }
  0x4d   : > { %v860_v45 = vld [vmem:[%s1171_s12 + $0x8] sm:$0xff]  ;;  %v468_v47 = vld [vmem:[%s1155_s27] sm:$0xff]  ;;  %v859_v50 = vld [vmem:[%s1171_s12] sm:$0xff] }
  0x4e   : > { %605 = vmatpush.bf16.msra.mxu0 %v865_v35  ;;  %v868_v46 = vld [vmem:[%s1171_s12 + $0x48] sm:$0xff]  ;;  %v502_v48 = vunpack.c.l.b16 %v468_v47  ;;  %v503_v49 = vunpack.c.h.b16 %v468_v47  ;;  %v867_v51 = vld [vmem:[%s1171_s12 + $0x40] sm:$0xff] }
  0x4f   : > { %618 = vmatpush.bf16.msra.mxu1 %v873_v36  ;;  %v467_v55 = vld [vmem:[#allocation2] sm:$0xff] }
  0x50   : > { %v504_v52 = vpack.c.b16 %v502_v48, %v502_v48  ;;  %v505_v53 = vpack.c.b16 %v503_v49, %v503_v49 }
  0x52   : > { %606 = vmatpush.bf16.msra.mxu0 %v864_v37 }
  0x53   : > { %619 = vmatpush.bf16.msra.mxu1 %v872_v38 }
  0x56   : > { %607 = vmatpush.bf16.msra.mxu0 %v863_v39 }
  0x57   : > { %620 = vmatpush.bf16.msra.mxu1 %v871_v40 }
  0x5a   : > { %608 = vmatpush.bf16.msra.mxu0 %v862_v41 }
  0x5b   : > { %621 = vmatpush.bf16.msra.mxu1 %v870_v42 }
  0x5e   : > { %609 = vmatpush.bf16.msra.mxu0 %v861_v43 }
  0x5f   : > { %622 = vmatpush.bf16.msra.mxu1 %v869_v44 }
  0x62   : > { %610 = vmatpush.bf16.msra.mxu0 %v860_v45 }
  0x63   : > { %623 = vmatpush.bf16.msra.mxu1 %v868_v46 }
  0x66   : > { %611 = vmatpush.bf16.msra.mxu0 %v859_v50 }
  0x67   : > { %624 = vmatpush.bf16.msra.mxu1 %v867_v51 }
  0x69   : > { %612 = vmatmul.bf16.vlgmr.msra.gmra.mxu0 %v504_v52 }
  0x6a   : > { %625 = vmatmul.bf16.vlgmr.msra.gmra.mxu1 %v505_v53 }
  0xe6   : > { %v613_v54 = vpop.f32.mrf.mxu0 }
  0xe7   : > { %v626_v56 = vpop.f32.mrf.mxu1 }
  0xe8   : > { %v627_v57 = vadd.f32 %v626_v56, %v613_v54 }
  0xea   : > { %v630_v58 = vadd.f32 %v627_v57, %v467_v55 }
  0xeb   : > { %635 = sbr.rel (%p855_p13) target bundleno = 253 (0xfd), region = 85 }
  0xec   : > { %631 = vst [vmem:[#allocation2] sm:$0xff] %v630_v58 }
  0xee   : > { %v615_v59 = vpop.f32.mrf.mxu0 }
  0xef   : > { %v628_v60 = vpop.f32.mrf.mxu1 }
  0xf0   : > { %v932_v62 = vld [vmem:[%s450_s15] ss:$0 sm:$0xff] }
  0xf1   : > { %v933_v63 = vld [vmem:[%s453_s7] ss:$0 sm:$0xff] }
  0xf3   : > { %v636_v61 = vld [vmem:[#allocation2] sm:$0xff] }
  0xf4   : > { %v641_v0 = vmul.f32 %v932_v62, %v636_v61 }
  0xf6   : > { %v646_v1 = vadd.f32 %v933_v63, %v641_v0 }
  0xf8   : > { %v647_v2 = vmax.f32 %v646_v1, 0.0 }
  0xfa   : > { %v648_v3 = vpack.c.bf16 %v647_v2, %v647_v2 }
  0xfc   : > { %649 = vst [vmem:[%s1169_s11] sm:$0xf] %v648_v3 }
  0xfd PF: > { %s14_s21 = sadd.s32 1, %s988_s21   ;;  %s1229_s15 = smov %s968_s16 }
  0xfe   : > { %p11_p0 = scmp.ge.s32.totalorder %s14_s21, 38   ;;  %s1230_s16 = smov %s1067_s28 }
  0xff   : > { %s1231_s17 = smov %s980_s19  ;;  %s1232_s18 = smov %s984_s20 }
 0x100   : > { %s1233_s19 = smov %s1236_s22  ;;  %s1234_s20 = smov %s1240_s23 }
 0x101   :  { %13 = sbr.rel (!%p11_p0) target bundleno = 4 (0x4), region = 129 }

// kernel: _lambda_.24
= control target key start
LH: loop header
LB: loop body
LE: loop exit
PB: predicated region body
PF: predicated region fallthrough
CT: control target
= control target key end

     0   :  { %s1766_s0 = inlined_call_operand.vmem [shape: bf16[8,4608], index: 0, kind: input, shape index: {}]   ;;  %s1767_s1 = inlined_call_operand.vmem [shape: bf16[4608,512], index: 1, kind: input, shape index: {}]   ;;  %s1768_s2 = inlined_call_operand.vmem [shape: f32[1,512], index: 2, kind: input, shape index: {}]   ;;  %s1769_s3 = inlined_call_operand.vmem [shape: f32[1,512], index: 3, kind: input, shape index: {}]   ;;  %s1770_s4 = inlined_call_operand.vmem [shape: bf16[8,512], index: 4, kind: input, shape index: {}]   ;;  %s1771_s5 = inlined_call_operand.vmem [shape: bf16[8,512], index: 5, kind: output, shape index: {}]  }
   0x1   :  { %1772 = sst [smem:[#allocation4_spill]] %s1767_s1 }
   0x2   :  { %s1471_s18 = smov 0   ;;  %s1473_s19 = smov 0  }
   0x3   :  { %s1475_s20 = smov 0   ;;  %s1477_s21 = smov 0  }
   0x4   :  { %s1479_s22 = smov 0   ;;  %s1481_s23 = smov 0  }
   0x5   :  { %s1483_s24 = smov 0  }
   0x6 LB: > { %s27_s25 = sadd.s32 1, %s1430_s22  ;;  %s30_s26 = sadd.s32 1, %s1434_s23  ;;  %s1438_s24 = sphi %s1483_s24, %s15_s24   ;;  %s1434_s23 = sphi %s1481_s23, %s1779_s23   ;;  %s1430_s22 = sphi %s1479_s22, %s1778_s22   ;;  %s1426_s21 = sphi %s1477_s21, %s1777_s21   ;;  %s1422_s20 = sphi %s1475_s20, %s1776_s20   ;;  %s1418_s19 = sphi %s1473_s19, %s1775_s19   ;;  %s1414_s18 = sphi %s1471_s18, %s1774_s18  }
   0x7   : > { %p28_p0 = scmp.ge.s32.totalorder %s27_s25, 9  ;;  %p78_p1 = scmp.ne.s32.totalorder %s1418_s19, %s1414_s18 }
   0x8   : > { %p79_p2 = scmp.eq.s32.totalorder %s1438_s24, 0  ;;  %s71_s30 = sadd.s32 1, %s1418_s19 }
   0x9   : > { %s1781_s25 = smov (%p28_p0, %s27_s25), 0  ;;  %s1783_s26 = smov (!%p28_p0, %s30_s26), %s1434_s23 }
   0xa   : > { %p80_p3 = por %p79_p2, %p78_p1  ;;  %p32_p4 = scmp.ge.s32.totalorder %s1783_s26, 4 }
   0xb   : > { %s66_s27 = ssub.s32 %s1430_s22, %s1781_s25  ;;  %p1149_p6 = scmp.ge.s32.totalorder %s1438_s24, 36 }
   0xc   : > { %s1785_s26 = smov (%p32_p4, %s1783_s26), 0 }
   0xd   : > { %s67_s28 = ssub.s32 %s1434_s23, %s1785_s26  ;;  %212 = sbr.rel (%p1149_p6) target bundleno = 92 (0x5c), region = 16 }
   0xe   : > { %s68_s29 = sor.u32 %s67_s28, %s66_s27 }
   0xf   : > { %p69_p5 = scmp.eq.s32.totalorder %s68_s29, 0 }
  0x11   : > { %s1522_s6 = scalar_select %p69_p5, %s1418_s19, %s71_s30  }
  0x12   : > { %228 = sbr.rel (!%p80_p3) target bundleno = 92 (0x5c), region = 24  ;;  %s230_s7 = sand.u32 (%p80_p3), 1, %s1418_s19  }
  0x13   : > { %s1292_s8 = sshll.u32 (%p80_p3), %s1430_s22, 8  ;;  %s1150_s9 = sshll.u32 (%p80_p3), %s230_s7, 8 }
  0x14   : > { %s235_s10 = sadd.s32 (%p80_p3), %s1434_s23, %s1292_s8  ;;  %s1773_s1 = sld [smem:[#allocation4_spill]] (%p80_p3) }
  0x15   : > { %s1153_s11 = sshll.u32 (%p80_p3), %s235_s10, 2  ;;  %s1536_s15 = scalar_lea.vmem (%p80_p3), [#allocation3], %s1150_s9 }
  0x1a   : > { %s1531_s14 = scalar_lea.vmem %s1773_s1, %s1153_s11 }
  0x1b   : > { %v254_v0 = vld [vmem:[%s1531_s14] sm:$0xf]  ;;  %v256_v1 = vld [vmem:[%s1531_s14 + $0x10] sm:$0xf] }
  0x1c   : > { %v258_v2 = vld [vmem:[%s1531_s14 + $0x20] sm:$0xf]  ;;  %255 = vst [vmem:[%s1536_s15] sm:$0xf] %v254_v0  ;;  %v260_v3 = vld [vmem:[%s1531_s14 + $0x30] sm:$0xf] }
  0x1d   : > { %257 = vst [vmem:[%s1536_s15 + $0x4] sm:$0xf] %v256_v1  ;;  %v262_v4 = vld [vmem:[%s1531_s14 + $0x40] sm:$0xf]  ;;  %v264_v5 = vld [vmem:[%s1531_s14 + $0x50] sm:$0xf] }
  0x1e   : > { %259 = vst [vmem:[%s1536_s15 + $0x8] sm:$0xf] %v258_v2  ;;  %v266_v6 = vld [vmem:[%s1531_s14 + $0x60] sm:$0xf]  ;;  %v268_v7 = vld [vmem:[%s1531_s14 + $0x70] sm:$0xf] }
  0x1f   : > { %261 = vst [vmem:[%s1536_s15 + $0xc] sm:$0xf] %v260_v3  ;;  %v270_v8 = vld [vmem:[%s1531_s14 + $0x80] sm:$0xf]  ;;  %v272_v9 = vld [vmem:[%s1531_s14 + $0x90] sm:$0xf] }
  0x20   : > { %263 = vst [vmem:[%s1536_s15 + $0x10] sm:$0xf] %v262_v4  ;;  %v274_v10 = vld [vmem:[%s1531_s14 + $0xa0] sm:$0xf]  ;;  %v276_v11 = vld [vmem:[%s1531_s14 + $0xb0] sm:$0xf] }
  0x21   : > { %265 = vst [vmem:[%s1536_s15 + $0x14] sm:$0xf] %v264_v5  ;;  %v278_v12 = vld [vmem:[%s1531_s14 + $0xc0] sm:$0xf]  ;;  %v280_v13 = vld [vmem:[%s1531_s14 + $0xd0] sm:$0xf] }
  0x22   : > { %267 = vst [vmem:[%s1536_s15 + $0x18] sm:$0xf] %v266_v6  ;;  %v282_v14 = vld [vmem:[%s1531_s14 + $0xe0] sm:$0xf]  ;;  %v284_v15 = vld [vmem:[%s1531_s14 + $0xf0] sm:$0xf] }
  0x23   : > { %269 = vst [vmem:[%s1536_s15 + $0x1c] sm:$0xf] %v268_v7  ;;  %v286_v16 = vld [vmem:[%s1531_s14 + $0x100] sm:$0xf]  ;;  %v288_v17 = vld [vmem:[%s1531_s14 + $0x110] sm:$0xf] }
  0x24   : > { %271 = vst [vmem:[%s1536_s15 + $0x20] sm:$0xf] %v270_v8  ;;  %v290_v18 = vld [vmem:[%s1531_s14 + $0x120] sm:$0xf]  ;;  %v292_v19 = vld [vmem:[%s1531_s14 + $0x130] sm:$0xf] }
  0x25   : > { %273 = vst [vmem:[%s1536_s15 + $0x24] sm:$0xf] %v272_v9  ;;  %v294_v20 = vld [vmem:[%s1531_s14 + $0x140] sm:$0xf]  ;;  %v296_v21 = vld [vmem:[%s1531_s14 + $0x150] sm:$0xf] }
  0x26   : > { %275 = vst [vmem:[%s1536_s15 + $0x28] sm:$0xf] %v274_v10  ;;  %v298_v22 = vld [vmem:[%s1531_s14 + $0x160] sm:$0xf]  ;;  %v300_v23 = vld [vmem:[%s1531_s14 + $0x170] sm:$0xf] }
  0x27   : > { %277 = vst [vmem:[%s1536_s15 + $0x2c] sm:$0xf] %v276_v11  ;;  %v302_v24 = vld [vmem:[%s1531_s14 + $0x180] sm:$0xf]  ;;  %v304_v25 = vld [vmem:[%s1531_s14 + $0x190] sm:$0xf] }
  0x28   : > { %279 = vst [vmem:[%s1536_s15 + $0x30] sm:$0xf] %v278_v12  ;;  %v306_v26 = vld [vmem:[%s1531_s14 + $0x1a0] sm:$0xf]  ;;  %v308_v27 = vld [vmem:[%s1531_s14 + $0x1b0] sm:$0xf] }
  0x29   : > { %281 = vst [vmem:[%s1536_s15 + $0x34] sm:$0xf] %v280_v13  ;;  %v310_v28 = vld [vmem:[%s1531_s14 + $0x1c0] sm:$0xf]  ;;  %v312_v29 = vld [vmem:[%s1531_s14 + $0x1d0] sm:$0xf] }
  0x2a   : > { %283 = vst [vmem:[%s1536_s15 + $0x38] sm:$0xf] %v282_v14  ;;  %v314_v30 = vld [vmem:[%s1531_s14 + $0x1e0] sm:$0xf]  ;;  %v316_v31 = vld [vmem:[%s1531_s14 + $0x1f0] sm:$0xf] }
  0x2b   : > { %285 = vst [vmem:[%s1536_s15 + $0x3c] sm:$0xf] %v284_v15  ;;  %v318_v32 = vld [vmem:[%s1531_s14 + $0x200] sm:$0xf]  ;;  %v320_v33 = vld [vmem:[%s1531_s14 + $0x210] sm:$0xf] }
  0x2c   : > { %287 = vst [vmem:[%s1536_s15 + $0x40] sm:$0xf] %v286_v16  ;;  %v322_v34 = vld [vmem:[%s1531_s14 + $0x220] sm:$0xf]  ;;  %v324_v35 = vld [vmem:[%s1531_s14 + $0x230] sm:$0xf] }
  0x2d   : > { %289 = vst [vmem:[%s1536_s15 + $0x44] sm:$0xf] %v288_v17  ;;  %v326_v36 = vld [vmem:[%s1531_s14 + $0x240] sm:$0xf]  ;;  %v328_v37 = vld [vmem:[%s1531_s14 + $0x250] sm:$0xf] }
  0x2e   : > { %291 = vst [vmem:[%s1536_s15 + $0x48] sm:$0xf] %v290_v18  ;;  %v330_v38 = vld [vmem:[%s1531_s14 + $0x260] sm:$0xf]  ;;  %v332_v39 = vld [vmem:[%s1531_s14 + $0x270] sm:$0xf] }
  0x2f   : > { %293 = vst [vmem:[%s1536_s15 + $0x4c] sm:$0xf] %v292_v19  ;;  %v334_v40 = vld [vmem:[%s1531_s14 + $0x280] sm:$0xf]  ;;  %v336_v41 = vld [vmem:[%s1531_s14 + $0x290] sm:$0xf] }
  0x30   : > { %295 = vst [vmem:[%s1536_s15 + $0x50] sm:$0xf] %v294_v20  ;;  %v338_v42 = vld [vmem:[%s1531_s14 + $0x2a0] sm:$0xf]  ;;  %v340_v43 = vld [vmem:[%s1531_s14 + $0x2b0] sm:$0xf] }
  0x31   : > { %297 = vst [vmem:[%s1536_s15 + $0x54] sm:$0xf] %v296_v21  ;;  %v342_v44 = vld [vmem:[%s1531_s14 + $0x2c0] sm:$0xf]  ;;  %v344_v45 = vld [vmem:[%s1531_s14 + $0x2d0] sm:$0xf] }
  0x32   : > { %299 = vst [vmem:[%s1536_s15 + $0x58] sm:$0xf] %v298_v22  ;;  %v346_v46 = vld [vmem:[%s1531_s14 + $0x2e0] sm:$0xf]  ;;  %v348_v47 = vld [vmem:[%s1531_s14 + $0x2f0] sm:$0xf] }
  0x33   : > { %301 = vst [vmem:[%s1536_s15 + $0x5c] sm:$0xf] %v300_v23  ;;  %v350_v48 = vld [vmem:[%s1531_s14 + $0x300] sm:$0xf]  ;;  %v352_v49 = vld [vmem:[%s1531_s14 + $0x310] sm:$0xf] }
  0x34   : > { %303 = vst [vmem:[%s1536_s15 + $0x60] sm:$0xf] %v302_v24  ;;  %v354_v50 = vld [vmem:[%s1531_s14 + $0x320] sm:$0xf]  ;;  %v356_v51 = vld [vmem:[%s1531_s14 + $0x330] sm:$0xf] }
  0x35   : > { %305 = vst [vmem:[%s1536_s15 + $0x64] sm:$0xf] %v304_v25  ;;  %v358_v52 = vld [vmem:[%s1531_s14 + $0x340] sm:$0xf]  ;;  %v360_v53 = vld [vmem:[%s1531_s14 + $0x350] sm:$0xf] }
  0x36   : > { %307 = vst [vmem:[%s1536_s15 + $0x68] sm:$0xf] %v306_v26  ;;  %v362_v54 = vld [vmem:[%s1531_s14 + $0x360] sm:$0xf]  ;;  %v364_v55 = vld [vmem:[%s1531_s14 + $0x370] sm:$0xf] }
  0x37   : > { %309 = vst [vmem:[%s1536_s15 + $0x6c] sm:$0xf] %v308_v27  ;;  %v366_v56 = vld [vmem:[%s1531_s14 + $0x380] sm:$0xf]  ;;  %v368_v57 = vld [vmem:[%s1531_s14 + $0x390] sm:$0xf] }
  0x38   : > { %311 = vst [vmem:[%s1536_s15 + $0x70] sm:$0xf] %v310_v28  ;;  %v370_v58 = vld [vmem:[%s1531_s14 + $0x3a0] sm:$0xf]  ;;  %v372_v59 = vld [vmem:[%s1531_s14 + $0x3b0] sm:$0xf] }
  0x39   : > { %313 = vst [vmem:[%s1536_s15 + $0x74] sm:$0xf] %v312_v29  ;;  %v374_v60 = vld [vmem:[%s1531_s14 + $0x3c0] sm:$0xf]  ;;  %v376_v61 = vld [vmem:[%s1531_s14 + $0x3d0] sm:$0xf] }
  0x3a   : > { %315 = vst [vmem:[%s1536_s15 + $0x78] sm:$0xf] %v314_v30  ;;  %v378_v62 = vld [vmem:[%s1531_s14 + $0x3e0] sm:$0xf]  ;;  %v380_v63 = vld [vmem:[%s1531_s14 + $0x3f0] sm:$0xf] }
  0x3b   : > { %317 = vst [vmem:[%s1536_s15 + $0x7c] sm:$0xf] %v316_v31 }
  0x3c   : > { %319 = vst [vmem:[%s1536_s15 + $0x80] sm:$0xf] %v318_v32 }
  0x3d   : > { %321 = vst [vmem:[%s1536_s15 + $0x84] sm:$0xf] %v320_v33 }
  0x3e   : > { %323 = vst [vmem:[%s1536_s15 + $0x88] sm:$0xf] %v322_v34 }
  0x3f   : > { %325 = vst [vmem:[%s1536_s15 + $0x8c] sm:$0xf] %v324_v35 }
  0x40   : > { %327 = vst [vmem:[%s1536_s15 + $0x90] sm:$0xf] %v326_v36 }
  0x41   : > { %329 = vst [vmem:[%s1536_s15 + $0x94] sm:$0xf] %v328_v37 }
  0x42   : > { %331 = vst [vmem:[%s1536_s15 + $0x98] sm:$0xf] %v330_v38 }
  0x43   : > { %333 = vst [vmem:[%s1536_s15 + $0x9c] sm:$0xf] %v332_v39 }
  0x44   : > { %335 = vst [vmem:[%s1536_s15 + $0xa0] sm:$0xf] %v334_v40 }
  0x45   : > { %337 = vst [vmem:[%s1536_s15 + $0xa4] sm:$0xf] %v336_v41 }
  0x46   : > { %339 = vst [vmem:[%s1536_s15 + $0xa8] sm:$0xf] %v338_v42 }
  0x47   : > { %341 = vst [vmem:[%s1536_s15 + $0xac] sm:$0xf] %v340_v43 }
  0x48   : > { %343 = vst [vmem:[%s1536_s15 + $0xb0] sm:$0xf] %v342_v44 }
  0x49   : > { %345 = vst [vmem:[%s1536_s15 + $0xb4] sm:$0xf] %v344_v45 }
  0x4a   : > { %347 = vst [vmem:[%s1536_s15 + $0xb8] sm:$0xf] %v346_v46 }
  0x4b   : > { %349 = vst [vmem:[%s1536_s15 + $0xbc] sm:$0xf] %v348_v47 }
  0x4c   : > { %351 = vst [vmem:[%s1536_s15 + $0xc0] sm:$0xf] %v350_v48 }
  0x4d   : > { %353 = vst [vmem:[%s1536_s15 + $0xc4] sm:$0xf] %v352_v49 }
  0x4e   : > { %355 = vst [vmem:[%s1536_s15 + $0xc8] sm:$0xf] %v354_v50 }
  0x4f   : > { %357 = vst [vmem:[%s1536_s15 + $0xcc] sm:$0xf] %v356_v51 }
  0x50   : > { %359 = vst [vmem:[%s1536_s15 + $0xd0] sm:$0xf] %v358_v52 }
  0x51   : > { %361 = vst [vmem:[%s1536_s15 + $0xd4] sm:$0xf] %v360_v53 }
  0x52   : > { %363 = vst [vmem:[%s1536_s15 + $0xd8] sm:$0xf] %v362_v54 }
  0x53   : > { %365 = vst [vmem:[%s1536_s15 + $0xdc] sm:$0xf] %v364_v55 }
  0x54   : > { %367 = vst [vmem:[%s1536_s15 + $0xe0] sm:$0xf] %v366_v56 }
  0x55   : > { %369 = vst [vmem:[%s1536_s15 + $0xe4] sm:$0xf] %v368_v57 }
  0x56   : > { %371 = vst [vmem:[%s1536_s15 + $0xe8] sm:$0xf] %v370_v58 }
  0x57   : > { %373 = vst [vmem:[%s1536_s15 + $0xec] sm:$0xf] %v372_v59 }
  0x58   : > { %375 = vst [vmem:[%s1536_s15 + $0xf0] sm:$0xf] %v374_v60 }
  0x59   : > { %377 = vst [vmem:[%s1536_s15 + $0xf4] sm:$0xf] %v376_v61 }
  0x5a   : > { %379 = vst [vmem:[%s1536_s15 + $0xf8] sm:$0xf] %v378_v62 }
  0x5b   : > { %381 = vst [vmem:[%s1536_s15 + $0xfc] sm:$0xf] %v380_v63 }
  0x5c PF: > { %p1154_p7 = scmp.ge.s32.totalorder %s1438_s24, 1  ;;  %p555_p8 = scmp.lt.s32.totalorder %s1438_s24, 37 }
  0x5e   : > { %p556_p9 = pnand %p1154_p7, %p555_p8 }
  0x5f   : > { %s562_s16 = sand.u32 (!%p556_p9), 1, %s1414_s18   ;;  %s1156_s17 = sshll.u32 (!%p556_p9), %s1422_s20, 2 }
  0x60   : > { %559 = sbr.rel (%p556_p9) target bundleno = 304 (0x130), region = 77  ;;  %s1155_s27 = sshll.u32 (!%p556_p9), %s562_s16, 8 }
  0x61   : > { %p618_p10 = scmp.lt.s32.totalorder (!%p556_p9), %s1156_s17, 35  ;;  %p626_p11 = scmp.lt.s32.totalorder (!%p556_p9), %s1426_s21, 3 }
  0x62   : > { %p1160_p12 = scmp.ne.s32.totalorder (!%p556_p9), %s1422_s20, 0 }
  0x65   : > { %s1787_s17 = smov (!%p618_p10, %s1156_s17), 35  ;;  %s1789_s21 = smov (!%p626_p11, %s1426_s21), 3 }
  0x66   : > { %s1157_s28 = sshll.u32 %s1787_s17, 2  ;;  %s628_s18 = scalar_lea.vmem %s1768_s2, %s1789_s21 }
  0x67   : > { %s1674_s7 = scalar_lea.vmem %s1766_s0, %s1157_s28  ;;  %s631_s12 = scalar_lea.vmem %s1769_s3, %s1789_s21 }
  0x68   : > { %s1158_s13 = sshll.u32 %s1789_s21, 2  ;;  %s1695_s28 = scalar_lea.vmem [#allocation3], %s1155_s27 }
  0x69   : > { %s1688_s16 = scalar_lea.vmem %s1770_s4, %s1158_s13  ;;  %s1693_s29 = scalar_lea.vmem %s1771_s5, %s1158_s13 }
  0x6a   : > { %651 = sbr.rel (%p1160_p12) target bundleno = 113 (0x71), region = 85 }
  0x6f   : > { %v1440_v0 = vmov 0.0  }
  0x70   : > { %652 = vst [vmem:[#allocation2] sm:$0xff] %v1440_v0 }
  0x71 PF: > { %v1300_v1 = vld [vmem:[%s1695_s28 + $0x38] sm:$0xff]  ;;  %v1299_v5 = vld [vmem:[%s1695_s28 + $0x30] sm:$0xff]  ;;  %v1298_v9 = vld [vmem:[%s1695_s28 + $0x28] sm:$0xff]  ;;  %p1289_p13 = scmp.ne.s32.totalorder %s1422_s20, 8 }
  0x72   : > { %v1308_v2 = vld [vmem:[%s1695_s28 + $0x78] sm:$0xff]  ;;  %926 = vmatpush.bf16.msra.mxu0 %v1300_v1  ;;  %v1307_v6 = vld [vmem:[%s1695_s28 + $0x70] sm:$0xff]  ;;  %v1306_v10 = vld [vmem:[%s1695_s28 + $0x68] sm:$0xff] }
  0x73   : > { %v1316_v3 = vld [vmem:[%s1695_s28 + $0xb8] sm:$0xff]  ;;  %939 = vmatpush.bf16.msra.mxu1 %v1308_v2  ;;  %v1315_v7 = vld [vmem:[%s1695_s28 + $0xb0] sm:$0xff]  ;;  %v1314_v11 = vld [vmem:[%s1695_s28 + $0xa8] sm:$0xff] }
  0x74   : > { %v1324_v4 = vld [vmem:[%s1695_s28 + $0xf8] sm:$0xff]  ;;  %952 = vmatpush.bf16.msra.mxu2 %v1316_v3  ;;  %v1323_v8 = vld [vmem:[%s1695_s28 + $0xf0] sm:$0xff]  ;;  %v1322_v12 = vld [vmem:[%s1695_s28 + $0xe8] sm:$0xff] }
  0x75   : > { %965 = vmatpush.bf16.msra.mxu3 %v1324_v4  ;;  %v1297_v13 = vld [vmem:[%s1695_s28 + $0x20] sm:$0xff]  ;;  %v1296_v17 = vld [vmem:[%s1695_s28 + $0x18] sm:$0xff]  ;;  %v1295_v21 = vld [vmem:[%s1695_s28 + $0x10] sm:$0xff] }
  0x76   : > { %927 = vmatpush.bf16.msra.mxu0 %v1299_v5  ;;  %v1305_v14 = vld [vmem:[%s1695_s28 + $0x60] sm:$0xff]  ;;  %v1304_v18 = vld [vmem:[%s1695_s28 + $0x58] sm:$0xff]  ;;  %v1303_v22 = vld [vmem:[%s1695_s28 + $0x50] sm:$0xff] }
  0x77   : > { %940 = vmatpush.bf16.msra.mxu1 %v1307_v6  ;;  %v1313_v15 = vld [vmem:[%s1695_s28 + $0xa0] sm:$0xff]  ;;  %v1312_v19 = vld [vmem:[%s1695_s28 + $0x98] sm:$0xff]  ;;  %v1311_v23 = vld [vmem:[%s1695_s28 + $0x90] sm:$0xff] }
  0x78   : > { %953 = vmatpush.bf16.msra.mxu2 %v1315_v7  ;;  %v1321_v16 = vld [vmem:[%s1695_s28 + $0xe0] sm:$0xff]  ;;  %v1320_v20 = vld [vmem:[%s1695_s28 + $0xd8] sm:$0xff]  ;;  %v1319_v24 = vld [vmem:[%s1695_s28 + $0xd0] sm:$0xff] }
  0x79   : > { %966 = vmatpush.bf16.msra.mxu3 %v1323_v8  ;;  %v1294_v25 = vld [vmem:[%s1695_s28 + $0x8] sm:$0xff]  ;;  %v654_v27 = vld [vmem:[%s1674_s7] sm:$0xff]  ;;  %v655_v30 = vld [vmem:[%s1674_s7 + $0x8] sm:$0xff] }
  0x7a   : > { %928 = vmatpush.bf16.msra.mxu0 %v1298_v9  ;;  %v1302_v26 = vld [vmem:[%s1695_s28 + $0x48] sm:$0xff]  ;;  %v722_v31 = vunpack.c.l.b16 %v654_v27  ;;  %v723_v32 = vunpack.c.h.b16 %v654_v27  ;;  %v1293_v33 = vld [vmem:[%s1695_s28] sm:$0xff]  ;;  %v724_v35 = vunpack.c.l.b16 %v655_v30  ;;  %v725_v36 = vunpack.c.h.b16 %v655_v30  ;;  %v653_v51 = vld [vmem:[#allocation2] sm:$0xff] }
  0x7b   : > { %941 = vmatpush.bf16.msra.mxu1 %v1306_v10  ;;  %v1310_v28 = vld [vmem:[%s1695_s28 + $0x88] sm:$0xff]  ;;  %v1301_v34 = vld [vmem:[%s1695_s28 + $0x40] sm:$0xff] }
  0x7c   : > { %954 = vmatpush.bf16.msra.mxu2 %v1314_v11  ;;  %v1318_v29 = vld [vmem:[%s1695_s28 + $0xc8] sm:$0xff]  ;;  %v1309_v37 = vld [vmem:[%s1695_s28 + $0x80] sm:$0xff]  ;;  %v726_v39 = vpack.c.b16 %v722_v31, %v722_v31  ;;  %v727_v40 = vpack.c.b16 %v723_v32, %v723_v32  ;;  %v728_v41 = vpack.c.b16 %v724_v35, %v724_v35  ;;  %v729_v42 = vpack.c.b16 %v725_v36, %v725_v36 }
  0x7d   : > { %967 = vmatpush.bf16.msra.mxu3 %v1322_v12  ;;  %v1317_v38 = vld [vmem:[%s1695_s28 + $0xc0] sm:$0xff] }
  0x7e   : > { %929 = vmatpush.bf16.msra.mxu0 %v1297_v13 }
  0x7f   : > { %942 = vmatpush.bf16.msra.mxu1 %v1305_v14 }
  0x80   : > { %955 = vmatpush.bf16.msra.mxu2 %v1313_v15 }
  0x81   : > { %968 = vmatpush.bf16.msra.mxu3 %v1321_v16 }
  0x82   : > { %930 = vmatpush.bf16.msra.mxu0 %v1296_v17 }
  0x83   : > { %943 = vmatpush.bf16.msra.mxu1 %v1304_v18 }
  0x84   : > { %956 = vmatpush.bf16.msra.mxu2 %v1312_v19 }
  0x85   : > { %969 = vmatpush.bf16.msra.mxu3 %v1320_v20 }
  0x86   : > { %931 = vmatpush.bf16.msra.mxu0 %v1295_v21 }
  0x87   : > { %944 = vmatpush.bf16.msra.mxu1 %v1303_v22 }
  0x88   : > { %957 = vmatpush.bf16.msra.mxu2 %v1311_v23 }
  0x89   : > { %970 = vmatpush.bf16.msra.mxu3 %v1319_v24 }
  0x8a   : > { %932 = vmatpush.bf16.msra.mxu0 %v1294_v25 }
  0x8b   : > { %945 = vmatpush.bf16.msra.mxu1 %v1302_v26 }
  0x8c   : > { %958 = vmatpush.bf16.msra.mxu2 %v1310_v28 }
  0x8d   : > { %971 = vmatpush.bf16.msra.mxu3 %v1318_v29 }
  0x8e   : > { %933 = vmatpush.bf16.msra.mxu0 %v1293_v33 }
  0x8f   : > { %946 = vmatpush.bf16.msra.mxu1 %v1301_v34 }
  0x90   : > { %959 = vmatpush.bf16.msra.mxu2 %v1309_v37 }
  0x91   : > { %972 = vmatpush.bf16.msra.mxu3 %v1317_v38  ;;  %934 = vmatmul.bf16.vlgmr.msra.gmra.mxu0 %v726_v39 }
  0x92   : > { %947 = vmatmul.bf16.vlgmr.msra.gmra.mxu1 %v727_v40 }
  0x93   : > { %960 = vmatmul.bf16.vlgmr.msra.gmra.mxu2 %v728_v41 }
  0x94   : > { %973 = vmatmul.bf16.vlgmr.msra.gmra.mxu3 %v729_v42 }
 0x10e   : > { %v935_v43 = vpop.f32.mrf.mxu0 }
 0x10f   : > { %v948_v44 = vpop.f32.mrf.mxu1 }
 0x110   : > { %v949_v45 = vadd.f32 %v948_v44, %v935_v43 }
 0x116   : > { %v961_v46 = vpop.f32.mrf.mxu2  ;;  %v937_v49 = vpop.f32.mrf.mxu0 }
 0x117   : > { %v974_v47 = vpop.f32.mrf.mxu3  ;;  %v962_v48 = vadd.f32 %v961_v46, %v949_v45  ;;  %v950_v50 = vpop.f32.mrf.mxu1 }
 0x119   : > { %v975_v52 = vadd.f32 %v974_v47, %v962_v48 }
 0x11b   : > { %v978_v53 = vadd.f32 %v975_v52, %v653_v51  ;;  %983 = sbr.rel (%p1289_p13) target bundleno = 304 (0x130), region = 89 }
 0x11d   : > { %979 = vst [vmem:[#allocation2] sm:$0xff] %v978_v53 }
 0x11e   : > { %v963_v54 = vpop.f32.mrf.mxu2 }
 0x11f   : > { %v976_v55 = vpop.f32.mrf.mxu3 }
 0x120   : > { %v1382_v57 = vld [vmem:[%s628_s18] ss:$0 sm:$0xff] }
 0x121   : > { %v1383_v58 = vld [vmem:[%s631_s12] ss:$0 sm:$0xff] }
 0x122   : > { %v995_v59 = vld [vmem:[%s1688_s16] sm:$0xf] }
 0x123   : > { %v996_v61 = vunpack.c.l.bf16 %v995_v59 }
 0x124   : > { %v984_v56 = vld [vmem:[#allocation2] sm:$0xff] }
 0x125   : > { %v989_v60 = vmul.f32 %v1382_v57, %v984_v56 }
 0x127   : > { %v994_v62 = vadd.f32 %v1383_v58, %v989_v60 }
 0x129   : > { %v997_v63 = vadd.f32 %v996_v61, %v994_v62 }
 0x12b   : > { %v998_v0 = vmax.f32 %v997_v63, 0.0 }
 0x12d   : > { %v999_v1 = vpack.c.bf16 %v998_v0, %v998_v0 }
 0x12f   : > { %1000 = vst [vmem:[%s1693_s29] sm:$0xf] %v999_v1 }
 0x130 PF: > { %s15_s24 = sadd.s32 1, %s1438_s24   ;;  %s1774_s18 = smov %s1418_s19 }
 0x131   : > { %p12_p0 = scmp.ge.s32.totalorder %s15_s24, 38   ;;  %s1775_s19 = smov %s1522_s6 }
 0x132   : > { %s1776_s20 = smov %s1430_s22  ;;  %s1777_s21 = smov %s1434_s23 }
 0x133   : > { %s1778_s22 = smov %s1781_s25  ;;  %s1779_s23 = smov %s1785_s26 }
 0x134   :  { %14 = sbr.rel (!%p12_p0) target bundleno = 6 (0x6), region = 136 }

// kernel: _lambda_.25
= control target key start
LH: loop header
LB: loop body
LE: loop exit
PB: predicated region body
PF: predicated region fallthrough
CT: control target
= control target key end

     0   :  { %s592_s0 = inlined_call_operand.vmem [shape: bf16[2,4,512], index: 0, kind: input, shape index: {}]   ;;  %s593_s1 = inlined_call_operand.vmem [shape: f32[512,128], index: 1, kind: input, shape index: {}]   ;;  %s594_s2 = inlined_call_operand.vmem [shape: f32[1,128], index: 2, kind: input, shape index: {}]   ;;  %s595_s3 = inlined_call_operand.hbm [shape: f32[2,128], index: 3, kind: output, shape index: {}]  }
   0x1   :  { %v201_v0 = vld [vmem:[%s593_s1 + $0x178] sm:$0xff]  ;;  %v200_v2 = vld [vmem:[%s593_s1 + $0x170] sm:$0xff]  ;;  %v199_v6 = vld [vmem:[%s593_s1 + $0x168] sm:$0xff] }
   0x2   :  { %v169_v1 = vld [vmem:[%s593_s1 + $0x78] sm:$0xff]  ;;  %272 = vmatpush.msra.mxu2 %v201_v0  ;;  %v168_v4 = vld [vmem:[%s593_s1 + $0x70] sm:$0xff]  ;;  %v167_v8 = vld [vmem:[%s593_s1 + $0x68] sm:$0xff] }
   0x3   :  { %232 = vmatpush.msra.mxu0 %v169_v1  ;;  %v217_v3 = vld [vmem:[%s593_s1 + $0x1f8] sm:$0xff]  ;;  %v216_v7 = vld [vmem:[%s593_s1 + $0x1f0] sm:$0xff]  ;;  %v215_v10 = vld [vmem:[%s593_s1 + $0x1e8] sm:$0xff] }
   0x4   :  { %v185_v5 = vld [vmem:[%s593_s1 + $0xf8] sm:$0xff]  ;;  %292 = vmatpush.msra.mxu3 %v217_v3  ;;  %273 = vmatpush.msra.mxu2 %v200_v2  ;;  %v184_v9 = vld [vmem:[%s593_s1 + $0xf0] sm:$0xff]  ;;  %v198_v11 = vld [vmem:[%s593_s1 + $0x160] sm:$0xff] }
   0x5   :  { %252 = vmatpush.msra.mxu1 %v185_v5  ;;  %233 = vmatpush.msra.mxu0 %v168_v4  ;;  %v166_v12 = vld [vmem:[%s593_s1 + $0x60] sm:$0xff]  ;;  %v183_v13 = vld [vmem:[%s593_s1 + $0xe8] sm:$0xff]  ;;  %v197_v16 = vld [vmem:[%s593_s1 + $0x158] sm:$0xff] }
   0x6   :  { %293 = vmatpush.msra.mxu3 %v216_v7  ;;  %274 = vmatpush.msra.mxu2 %v199_v6  ;;  %v214_v14 = vld [vmem:[%s593_s1 + $0x1e0] sm:$0xff]  ;;  %v165_v17 = vld [vmem:[%s593_s1 + $0x58] sm:$0xff]  ;;  %v196_v20 = vld [vmem:[%s593_s1 + $0x150] sm:$0xff] }
   0x7   :  { %253 = vmatpush.msra.mxu1 %v184_v9  ;;  %234 = vmatpush.msra.mxu0 %v167_v8  ;;  %v182_v15 = vld [vmem:[%s593_s1 + $0xe0] sm:$0xff]  ;;  %v213_v18 = vld [vmem:[%s593_s1 + $0x1d8] sm:$0xff]  ;;  %v164_v21 = vld [vmem:[%s593_s1 + $0x50] sm:$0xff] }
   0x8   :  { %294 = vmatpush.msra.mxu3 %v215_v10  ;;  %275 = vmatpush.msra.mxu2 %v198_v11  ;;  %v181_v19 = vld [vmem:[%s593_s1 + $0xd8] sm:$0xff]  ;;  %v212_v22 = vld [vmem:[%s593_s1 + $0x1d0] sm:$0xff]  ;;  %v195_v24 = vld [vmem:[%s593_s1 + $0x148] sm:$0xff] }
   0x9   :  { %254 = vmatpush.msra.mxu1 %v183_v13  ;;  %235 = vmatpush.msra.mxu0 %v166_v12  ;;  %v180_v23 = vld [vmem:[%s593_s1 + $0xd0] sm:$0xff]  ;;  %v163_v25 = vld [vmem:[%s593_s1 + $0x48] sm:$0xff]  ;;  %v194_v28 = vld [vmem:[%s593_s1 + $0x140] sm:$0xff] }
   0xa   :  { %295 = vmatpush.msra.mxu3 %v214_v14  ;;  %276 = vmatpush.msra.mxu2 %v197_v16  ;;  %v211_v26 = vld [vmem:[%s593_s1 + $0x1c8] sm:$0xff]  ;;  %v162_v29 = vld [vmem:[%s593_s1 + $0x40] sm:$0xff]  ;;  %v193_v32 = vld [vmem:[%s593_s1 + $0x138] sm:$0xff] }
   0xb   :  { %255 = vmatpush.msra.mxu1 %v182_v15  ;;  %236 = vmatpush.msra.mxu0 %v165_v17  ;;  %v179_v27 = vld [vmem:[%s593_s1 + $0xc8] sm:$0xff]  ;;  %v210_v30 = vld [vmem:[%s593_s1 + $0x1c0] sm:$0xff]  ;;  %v161_v33 = vld [vmem:[%s593_s1 + $0x38] sm:$0xff] }
   0xc   :  { %296 = vmatpush.msra.mxu3 %v213_v18  ;;  %277 = vmatpush.msra.mxu2 %v196_v20  ;;  %v178_v31 = vld [vmem:[%s593_s1 + $0xc0] sm:$0xff]  ;;  %v209_v34 = vld [vmem:[%s593_s1 + $0x1b8] sm:$0xff]  ;;  %v192_v36 = vld [vmem:[%s593_s1 + $0x130] sm:$0xff] }
   0xd   :  { %256 = vmatpush.msra.mxu1 %v181_v19  ;;  %237 = vmatpush.msra.mxu0 %v164_v21  ;;  %v177_v35 = vld [vmem:[%s593_s1 + $0xb8] sm:$0xff]  ;;  %v160_v37 = vld [vmem:[%s593_s1 + $0x30] sm:$0xff]  ;;  %v191_v40 = vld [vmem:[%s593_s1 + $0x128] sm:$0xff] }
   0xe   :  { %297 = vmatpush.msra.mxu3 %v212_v22  ;;  %278 = vmatpush.msra.mxu2 %v195_v24  ;;  %v208_v38 = vld [vmem:[%s593_s1 + $0x1b0] sm:$0xff]  ;;  %v159_v41 = vld [vmem:[%s593_s1 + $0x28] sm:$0xff]  ;;  %v190_v42 = vld [vmem:[%s593_s1 + $0x120] sm:$0xff] }
   0xf   :  { %257 = vmatpush.msra.mxu1 %v180_v23  ;;  %238 = vmatpush.msra.mxu0 %v163_v25  ;;  %v176_v39 = vld [vmem:[%s593_s1 + $0xb0] sm:$0xff]  ;;  %v207_v43 = vld [vmem:[%s593_s1 + $0x1a8] sm:$0xff]  ;;  %v158_v44 = vld [vmem:[%s593_s1 + $0x20] sm:$0xff] }
  0x10   :  { %298 = vmatpush.msra.mxu3 %v211_v26  ;;  %279 = vmatpush.msra.mxu2 %v194_v28  ;;  %v175_v45 = vld [vmem:[%s593_s1 + $0xa8] sm:$0xff]  ;;  %v21_v46 = vld [vmem:[%s592_s0] sm:$0xff] }
  0x11   :  { %258 = vmatpush.msra.mxu1 %v179_v27  ;;  %239 = vmatpush.msra.mxu0 %v162_v29  ;;  %v22_v47 = vld [vmem:[%s592_s0 + $0x8] sm:$0xff]  ;;  %v206_v48 = vld [vmem:[%s593_s1 + $0x1a0] sm:$0xff]  ;;  %v23_v50 = vunpack.c.l.bf16 %v21_v46  ;;  %v24_v51 = vunpack.c.h.bf16 %v21_v46 }
  0x12   :  { %299 = vmatpush.msra.mxu3 %v210_v30  ;;  %280 = vmatpush.msra.mxu2 %v193_v32  ;;  %v174_v49 = vld [vmem:[%s593_s1 + $0xa0] sm:$0xff]  ;;  %v25_v52 = vunpack.c.l.bf16 %v22_v47 }
  0x13   :  { %259 = vmatpush.msra.mxu1 %v178_v31  ;;  %240 = vmatpush.msra.mxu0 %v161_v33 }
  0x14   :  { %300 = vmatpush.msra.mxu3 %v209_v34  ;;  %281 = vmatpush.msra.mxu2 %v192_v36 }
  0x15   :  { %260 = vmatpush.msra.mxu1 %v177_v35  ;;  %241 = vmatpush.msra.mxu0 %v160_v37 }
  0x16   :  { %301 = vmatpush.msra.mxu3 %v208_v38  ;;  %282 = vmatpush.msra.mxu2 %v191_v40 }
  0x17   :  { %261 = vmatpush.msra.mxu1 %v176_v39  ;;  %242 = vmatpush.msra.mxu0 %v159_v41 }
  0x18   :  { %8 = vsyncpa [#allocation4], 0  ;;  %302 = vmatpush.msra.mxu3 %v207_v43  ;;  %v189_v53 = vld [vmem:[%s593_s1 + $0x118] sm:$0xff]  ;;  %v26_v55 = vunpack.c.h.bf16 %v22_v47  ;;  %283 = vmatpush.msra.mxu2 %v190_v42  ;;  %31 = vst [vmem:[#allocation1] ss:$2 sm:$0xff] %v23_v50  ;;  %v188_v58 = vld [vmem:[%s593_s1 + $0x110] sm:$0xff] }
  0x19   :  { %262 = vmatpush.msra.mxu1 %v175_v45  ;;  %v157_v54 = vld [vmem:[%s593_s1 + $0x18] sm:$0xff]  ;;  %243 = vmatpush.msra.mxu0 %v158_v44  ;;  %v156_v59 = vld [vmem:[%s593_s1 + $0x10] sm:$0xff]  ;;  %33 = vst [vmem:[#allocation1 + $0x10] ss:$2 sm:$0xff] %v24_v51  ;;  %v187_v62 = vld [vmem:[%s593_s1 + $0x108] sm:$0xff]  ;;  %vm54_vm0 = vcmask 1043456  }
  0x1a   :  { %v205_v56 = vld [vmem:[%s593_s1 + $0x198] sm:$0xff]  ;;  %303 = vmatpush.msra.mxu3 %v206_v48  ;;  %284 = vmatpush.msra.mxu2 %v189_v53  ;;  %v204_v60 = vld [vmem:[%s593_s1 + $0x190] sm:$0xff]  ;;  %39 = vst [vmem:[#allocation1 + $0x20] ss:$2 sm:$0xff] %v25_v52  ;;  %v155_v63 = vld [vmem:[%s593_s1 + $0x8] sm:$0xff]  ;;  %vm125_vm1 = vcmask 1041408  }
  0x1b   :  { %v173_v57 = vld [vmem:[%s593_s1 + $0x98] sm:$0xff]  ;;  %263 = vmatpush.msra.mxu1 %v174_v49  ;;  %244 = vmatpush.msra.mxu0 %v157_v54  ;;  %v172_v61 = vld [vmem:[%s593_s1 + $0x90] sm:$0xff]  ;;  %41 = vst [vmem:[#allocation1 + $0x30] ss:$2 sm:$0xff] %v26_v55  ;;  %v203_v0 = vld [vmem:[%s593_s1 + $0x188] sm:$0xff]  ;;  %vm127_vm2 = vcmask 1045508  }
  0x1c   :  { %304 = vmatpush.msra.mxu3 %v205_v56  ;;  %285 = vmatpush.msra.mxu2 %v188_v58  ;;  %v186_v1 = vld [vmem:[%s593_s1 + $0x100] sm:$0xff]  ;;  %v171_v31 = vld [vmem:[%s593_s1 + $0x88] sm:$0xff]  ;;  %vm138_vm3 = vcmask 1041409   ;;  %vm140_vm4 = vcmask 1043459   ;;  %vm142_vm5 = vcmask 1045509   ;;  %vm144_vm6 = vcmask 1047559  }
  0x1d   :  { %264 = vmatpush.msra.mxu1 %v173_v57  ;;  %245 = vmatpush.msra.mxu0 %v156_v59  ;;  %v154_v30 = vld [vmem:[%s593_s1] sm:$0xff]  ;;  %s357_s8 = smov [#allocation3]   ;;  %s320_s12 = sshll.u32 %s595_s3, 4  ;;  %s321_s12 = int_to_ptr.hbm [resolvable:$true] %s320_s12 }
  0x1e   :  { %305 = vmatpush.msra.mxu3 %v204_v60  ;;  %286 = vmatpush.msra.mxu2 %v187_v62  ;;  %v202_v36 = vld [vmem:[%s593_s1 + $0x180] sm:$0xff]  ;;  %s318_s9 = sshll.u32 %s357_s8, 4  ;;  %s319_s9 = int_to_ptr.vmem [resolvable:$true] %s318_s9 }
  0x1f   :  { %265 = vmatpush.msra.mxu1 %v172_v61  ;;  %246 = vmatpush.msra.mxu0 %v155_v63  ;;  %v34_v2 = vld.sshfl [vmem:[#allocation1] sm:$0xff pattern:$0x75316420]  ;;  %v35_v3 = vld.sshfl [vmem:[#allocation1 + $0x8] sm:$0xff pattern:$0x75316420] }
  0x20   :  { %306 = vmatpush.msra.mxu3 %v203_v0  ;;  %287 = vmatpush.msra.mxu2 %v186_v1  ;;  %v36_v4 = vld.sshfl [vmem:[#allocation1 + $0x10] sm:$0xff pattern:$0x75316420]  ;;  %v37_v5 = vld.sshfl [vmem:[#allocation1 + $0x18] sm:$0xff pattern:$0x75316420] }
  0x21   :  { %v42_v6 = vld.sshfl [vmem:[#allocation1 + $0x20] sm:$0xff pattern:$0x75316420]  ;;  %v43_v7 = vld.sshfl [vmem:[#allocation1 + $0x28] sm:$0xff pattern:$0x75316420]  ;;  %247 = vmatpush.msra.mxu0 %v154_v30  ;;  %266 = vmatpush.msra.mxu1 %v171_v31 }
  0x22   :  { %v44_v8 = vld.sshfl [vmem:[#allocation1 + $0x30] sm:$0xff pattern:$0x75316420]  ;;  %v45_v9 = vld.sshfl [vmem:[#allocation1 + $0x38] sm:$0xff pattern:$0x75316420]  ;;  %307 = vmatpush.msra.mxu3 %v202_v36 }
  0x23   :  { %v55_v10 = vsel %vm54_vm0, %v34_v2, 0.0  ;;  %v62_v11 = vsel %vm54_vm0, %v35_v3, 0.0  ;;  %v69_v12 = vsel %vm54_vm0, %v36_v4, 0.0  ;;  %v76_v13 = vsel %vm54_vm0, %v37_v5, 0.0  ;;  %v170_v37 = vld [vmem:[%s593_s1 + $0x80] sm:$0xff] }
  0x24   :  { %v56_v14 = vrot.slane %v55_v10, 4  ;;  %v63_v15 = vrot.slane %v62_v11, 4  ;;  %v70_v16 = vrot.slane %v69_v12, 4  ;;  %v77_v17 = vrot.slane %v76_v13, 4  ;;  %267 = vmatpush.msra.mxu1 %v170_v37 }
  0x25   :  { %v83_v18 = vsel %vm54_vm0, %v42_v6, 0.0  ;;  %v90_v19 = vsel %vm54_vm0, %v43_v7, 0.0  ;;  %v97_v20 = vsel %vm54_vm0, %v44_v8, 0.0  ;;  %v104_v21 = vsel %vm54_vm0, %v45_v9, 0.0 }
  0x26   :  { %v57_v22 = vadd.f32 %v56_v14, %v55_v10  ;;  %v64_v23 = vadd.f32 %v63_v15, %v62_v11  ;;  %v71_v24 = vadd.f32 %v70_v16, %v69_v12  ;;  %v78_v25 = vadd.f32 %v77_v17, %v76_v13 }
  0x27   :  { %v84_v26 = vrot.slane %v83_v18, 4  ;;  %v91_v27 = vrot.slane %v90_v19, 4  ;;  %v98_v28 = vrot.slane %v97_v20, 4  ;;  %v105_v29 = vrot.slane %v104_v21, 4 }
  0x28   :  { %v58_v32 = vrot.slane %v57_v22, 2  ;;  %v65_v33 = vrot.slane %v64_v23, 2  ;;  %v72_v34 = vrot.slane %v71_v24, 2  ;;  %v79_v35 = vrot.slane %v78_v25, 2 }
  0x29   :  { %v85_v38 = vadd.f32 %v84_v26, %v83_v18  ;;  %v92_v39 = vadd.f32 %v91_v27, %v90_v19  ;;  %v99_v40 = vadd.f32 %v98_v28, %v97_v20  ;;  %v106_v41 = vadd.f32 %v105_v29, %v104_v21  ;;  %v330_v28 = vld [vmem:[%s594_s2] ss:$0 sm:$0xff] }
  0x2a   :  { %v59_v42 = vadd.f32 %v58_v32, %v57_v22  ;;  %v66_v43 = vadd.f32 %v65_v33, %v64_v23  ;;  %v73_v44 = vadd.f32 %v72_v34, %v71_v24  ;;  %v80_v45 = vadd.f32 %v79_v35, %v78_v25 }
  0x2b   :  { %v86_v46 = vrot.slane %v85_v38, 2  ;;  %v93_v47 = vrot.slane %v92_v39, 2  ;;  %v100_v48 = vrot.slane %v99_v40, 2  ;;  %v107_v49 = vrot.slane %v106_v41, 2 }
  0x2c   :  { %v60_v50 = vrot.slane %v59_v42, 1  ;;  %v67_v51 = vrot.slane %v66_v43, 1  ;;  %v74_v52 = vrot.slane %v73_v44, 1  ;;  %v81_v53 = vrot.slane %v80_v45, 1 }
  0x2d   :  { %v87_v54 = vadd.f32 %v86_v46, %v85_v38  ;;  %v94_v55 = vadd.f32 %v93_v47, %v92_v39  ;;  %v101_v56 = vadd.f32 %v100_v48, %v99_v40  ;;  %v108_v57 = vadd.f32 %v107_v49, %v106_v41 }
  0x2e   :  { %v61_v58 = vadd.f32 %v60_v50, %v59_v42  ;;  %v68_v59 = vadd.f32 %v67_v51, %v66_v43  ;;  %v75_v60 = vadd.f32 %v74_v52, %v73_v44  ;;  %v82_v61 = vadd.f32 %v81_v53, %v80_v45 }
  0x2f   :  { %v88_v62 = vrot.slane %v87_v54, 1  ;;  %v95_v63 = vrot.slane %v94_v55, 1  ;;  %v102_v0 = vrot.slane %v101_v56, 1  ;;  %v109_v1 = vrot.slane %v108_v57, 1 }
  0x30   :  { %v119_v2 = vrot.slane %v68_v59, 6  ;;  %v120_v3 = vrot.slane %v75_v60, 4  ;;  %v121_v4 = vrot.slane %v82_v61, 2 }
  0x31   :  { %v89_v5 = vadd.f32 %v88_v62, %v87_v54  ;;  %v96_v6 = vadd.f32 %v95_v63, %v94_v55  ;;  %v103_v7 = vadd.f32 %v102_v0, %v101_v56  ;;  %v110_v8 = vadd.f32 %v109_v1, %v108_v57 }
  0x32   :  { %v126_v9 = vsel %vm125_vm1, %v61_v58, %v119_v2  ;;  %v128_v13 = vsel %vm127_vm2, %v120_v3, %v121_v4 }
  0x33   :  { %v122_v10 = vrot.slane %v96_v6, 6  ;;  %v123_v11 = vrot.slane %v103_v7, 4  ;;  %v124_v12 = vrot.slane %v110_v8, 2  ;;  %v129_v16 = vsel %vm54_vm0, %v126_v9, %v128_v13 }
  0x35   :  { %v130_v14 = vsel %vm125_vm1, %v89_v5, %v122_v10  ;;  %v131_v15 = vsel %vm127_vm2, %v123_v11, %v124_v12 }
  0x36   :  { %v132_v17 = vsel %vm54_vm0, %v130_v14, %v131_v15 }
  0x37   :  { %v137_v18 = vrot.slane %v132_v17, 7 }
  0x39   :  { %v139_v19 = vsel %vm138_vm3, %v137_v18, %v129_v16 }
  0x3a   :  { %v141_v20 = vsel %vm140_vm4, %v137_v18, %v139_v19 }
  0x3b   :  { %v143_v21 = vsel %vm142_vm5, %v137_v18, %v141_v20 }
  0x3c   :  { %v145_v22 = vsel %vm144_vm6, %v137_v18, %v143_v21 }
  0x3d   :  { %v153_v23 = vmul.f32 0.25, %v145_v22 }
  0x3f   :  { %223 = vst [vmem:[#allocation1] ss:$4 sm:$0xff] %v153_v23 }
  0x46   :  { %v226_v24 = vld.sshfl [vmem:[#allocation1 + $0x10] sm:$0xff pattern:$0x73625140]  ;;  %v224_v25 = vld.sshfl [vmem:[#allocation1] sm:$0xff pattern:$0x73625140] }
  0x47   :  { %288 = vmatmul.f32.vlgmr.msra.gmra.mxu2 %v226_v24  ;;  %248 = vmatmul.f32.vlgmr.msra.gmra.mxu0 %v224_v25  ;;  %v227_v26 = vld.sshfl [vmem:[#allocation1 + $0x18] sm:$0xff pattern:$0x73625140]  ;;  %v225_v27 = vld.sshfl [vmem:[#allocation1 + $0x8] sm:$0xff pattern:$0x73625140] }
  0x48   :  { %308 = vmatmul.f32.vlgmr.msra.gmra.mxu3 %v227_v26  ;;  %268 = vmatmul.f32.vlgmr.msra.gmra.mxu1 %v225_v27 }
  0xc4   :  { %v249_v29 = vpop.f32.mrf.mxu0 }
  0xc5   :  { %v250_v30 = vadd.f32 %v330_v28, %v249_v29  ;;  %v269_v31 = vpop.f32.mrf.mxu1 }
  0xc7   :  { %v270_v32 = vadd.f32 %v269_v31, %v250_v30 }
  0xca   :  { %v289_v33 = vpop.f32.mrf.mxu2 }
  0xcb   :  { %v290_v34 = vadd.f32 %v289_v33, %v270_v32  ;;  %v309_v35 = vpop.f32.mrf.mxu3 }
  0xcd   :  { %v310_v36 = vadd.f32 %v309_v35, %v290_v34 }
  0xcf   :  { %312 = vst [vmem:[#allocation3] sm:$0x3] %v310_v36 }
  0xd0   :  { %323 = dma.vmem_to_hbm [thread:$0]  %s319_s9, 32, %s321_s12, [#allocation4]  }
  0xd1   :  { %355 = dma.done.wait [#allocation4], 32  }
  0xd2   :  { %356 = vsyncadd [#allocation4], 4294967264 }
  0xd3   :  { %328 = vsyncpa [#allocation4], 1 }

</bundles_post_ra>
